<compile_context>
chip_gen: v5e
topology: v5e:2x2
jax: 0.10.0
libtpu: 0.0.40
codegen_flags: <defaults>
</compile_context>

<pallas_src>
import math
from functools import partial

import jax
import jax.numpy as jnp
import numpy as np
from jax.experimental import pallas as pl
from jax.experimental.pallas import tpu as pltpu

# ---------------- small config consistent with the module ----------------
BATCH = 2
INPUT_DIM = 16          # module default 64, scaled down
EMBED_DIM = 32
RANK = 8
NHEAD = 4
HEAD_DIM = EMBED_DIM // NHEAD
NUM_LAYERS = 2          # num_encoder_layers
DIM_FF = 64
MAX_ITERS = 4
ITERATIONS = 2
LN_EPS = 1e-5
D2 = 2 * INPUT_DIM                       # flattened complex row width (32)
UVW = 2 * D2                             # packed [U | V] output width (64)
FUSED = 2 * D2 + RANK                    # fused embed in-dim / fused dec out-dim (72)
SEQ = INPUT_DIM + 2 * RANK + 1           # h tokens + u tokens + v tokens + s token (33)
SCALE = 1.0 / math.sqrt(HEAD_DIM)


# ---------------- in-kernel helpers (operate on VMEM values) ----------------
def _layernorm(x, g, b):
    mu = jnp.mean(x, axis=-1, keepdims=True)
    xc = x - mu
    var = jnp.mean(xc * xc, axis=-1, keepdims=True)
    return xc * jax.lax.rsqrt(var + LN_EPS) * g + b


# ---------------- the fused kernel (whole forward, all iterations) ----------------
def _make_kernel(iterations):
    f32, bf16 = jnp.float32, jnp.bfloat16
    D, R, E, F, L, HD = INPUT_DIM, RANK, EMBED_DIM, DIM_FF, NUM_LAYERS, HEAD_DIM

    def kernel(
        x_ref,                 # (D, D2)   f32  per-batch input row-block
        hw_ref,                # (D2, E)   bf16 h_encoder weight
        wemb_ref,              # (MI, FUSED, E) bf16 fused [u_embed; v_embed; s_embed]
        tokb_ref,              # (MI, SEQ, E)   f32  per-token bias + PE row
        u0_ref, v0_ref,        # (R, D2)   f32  initial U/V packed [real | imag]
        s0_ref,                # (1, R)    f32
        aiw_ref,               # (MI, L, E, 3E) bf16
        aib_ref,               # (MI, L, 1, 3E) f32
        aow_ref,               # (MI, L, E, E)  bf16
        lbe_ref,               # (MI, L, 6, E)  f32  [aob, l1g, l1b, f2b, l2g, l2b]
        f1w_ref,               # (MI, L, E, F)  bf16
        f1b_ref,               # (MI, L, 1, F)  f32
        f2w_ref,               # (MI, L, F, E)  bf16
        wdec_ref,              # (MI, E, FUSED) bf16 fused [u_dec | v_dec | s_dec]
        dbias_ref,             # (MI, 2R+1, FUSED) f32 placed decoder biases
        out_ref,               # (R+1, UVW) f32 per-batch output block
    ):
        # h encoding is iteration-independent: compute once (bias folded into tokb).
        enc_h = jnp.dot(x_ref[...].astype(bf16), hw_ref[...],
                        preferred_element_type=f32)                       # (D, E)

        U = u0_ref[...]                          # (R, D2) packed [real | imag]
        V = v0_ref[...]
        S = s0_ref[...]                          # (1, R)

        for i in range(iterations):
            # ---- fused u/v/s embedding: one block-diagonal matmul ----
            top = jnp.concatenate([U, jnp.zeros((R, D2 + R), f32)], axis=1)
            mid = jnp.concatenate([jnp.zeros((R, D2), f32), V,
                                   jnp.zeros((R, R), f32)], axis=1)
            bot = jnp.concatenate([jnp.zeros((1, 2 * D2), f32), S], axis=1)
            emb_in = jnp.concatenate([top, mid, bot], axis=0)             # (2R+1, FUSED)
            uvs_tok = jnp.dot(emb_in.astype(bf16), wemb_ref[i, :, :],
                              preferred_element_type=f32)                 # (2R+1, E)

            # tokens = [encoded_h | u_tokens | v_tokens | s_token] + biases + PE[i]
            x = jnp.concatenate([enc_h, uvs_tok], axis=0) + tokb_ref[i, :, :]   # (SEQ, E)

            # ---- transformer encoder layers (post-norm, ReLU, dropout == identity) ----
            for l in range(L):
                lb = lbe_ref[i, l, :, :]                                   # (6, E)
                qkv = jnp.dot(x.astype(bf16), aiw_ref[i, l, :, :],
                              preferred_element_type=f32) + aib_ref[i, l, :, :]  # (SEQ, 3E)
                heads = []
                for h in range(NHEAD):
                    q = qkv[:, h * HD:(h + 1) * HD].astype(bf16)
                    k = qkv[:, E + h * HD:E + (h + 1) * HD].astype(bf16)
                    v = qkv[:, 2 * E + h * HD:2 * E + (h + 1) * HD].astype(bf16)
                    s = jax.lax.dot_general(q, k, (((1,), (1,)), ((), ())),
                                            preferred_element_type=f32) * SCALE
                    s = s - jnp.max(s, axis=-1, keepdims=True)
                    p = jnp.exp(s)
                    p = p / jnp.sum(p, axis=-1, keepdims=True)             # exact softmax
                    heads.append(jnp.dot(p.astype(bf16), v,
                                         preferred_element_type=f32))      # (SEQ, HD)
                attn = jnp.concatenate(heads, axis=-1)                     # (SEQ, E)
                a = jnp.dot(attn.astype(bf16), aow_ref[i, l, :, :],
                            preferred_element_type=f32) + lb[0:1, :]
                x = _layernorm(x + a, lb[1:2, :], lb[2:3, :])
                ff = jnp.maximum(
                    jnp.dot(x.astype(bf16), f1w_ref[i, l, :, :],
                            preferred_element_type=f32) + f1b_ref[i, l, :, :], 0.0)
                ff = jnp.dot(ff.astype(bf16), f2w_ref[i, l, :, :],
                             preferred_element_type=f32) + lb[3:4, :]
                x = _layernorm(x + ff, lb[4:5, :], lb[5:6, :])

            # ---- fused u/v/s decoders + residual + complex modulus normalization ----
            dres = jnp.dot(x[D:SEQ, :].astype(bf16), wdec_ref[i, :, :],
                           preferred_element_type=f32) + dbias_ref[i, :, :]   # (2R+1, FUSED)
            new_u = U + dres[0:R, 0:D2]
            new_v = V + dres[R:2 * R, D2:2 * D2]
            S = S + dres[2 * R:2 * R + 1, 2 * D2:2 * D2 + R]

            ur, ui = new_u[:, :D], new_u[:, D:]
            vr, vi = new_v[:, :D], new_v[:, D:]
            inv_u = jax.lax.rsqrt(ur * ur + ui * ui + 1e-8)
            inv_v = jax.lax.rsqrt(vr * vr + vi * vi + 1e-8)
            U = jnp.concatenate([ur * inv_u, ui * inv_u], axis=1)
            V = jnp.concatenate([vr * inv_v, vi * inv_v], axis=1)

        # ---- single lane-dense writeback: rows 0..R-1 = [U | V], row R = [S | 0] ----
        s_row = jnp.concatenate([S, jnp.zeros((1, UVW - R), f32)], axis=1)   # (1, UVW)
        out_ref[...] = jnp.concatenate(
            [jnp.concatenate([U, V], axis=1), s_row], axis=0)               # (R+1, UVW)

    return kernel


# ---------------- host-side parameter packing (done once) ----------------
def _deint_rows(w):   # (2D, E) interleaved [r,i,r,i,...] input rows -> [real rows | imag rows]
    return jnp.concatenate([w[0::2, :], w[1::2, :]], axis=0)


def _deint_cols(w):   # (E, 2D) interleaved output cols -> [real cols | imag cols]
    return jnp.concatenate([w[:, 0::2], w[:, 1::2]], axis=1)


def _deint_vec(b):    # (2D,) interleaved -> [real | imag]
    return jnp.concatenate([b[0::2], b[1::2]], axis=0)


def _pack_complex(u):  # (1, R, D, 2) -> (R, 2D) packed [real block | imag block]
    return jnp.concatenate([u[0, ..., 0], u[0, ..., 1]], axis=-1).astype(jnp.float32)


def pack_params(params):
    f32, bf16 = jnp.float32, jnp.bfloat16
    E, F, D, R, L = EMBED_DIM, DIM_FF, INPUT_DIM, RANK, NUM_LAYERS
    stages = params["stages"]
    pe = params["pe"].astype(f32)                       # (MAX_ITERS, E)
    hb = params["h_encoder"]["b"].astype(f32)           # (E,)

    # fused per-stage embed weight: rows [u_embed(deint) ; v_embed(deint) ; s_embed]
    wemb = jnp.stack([
        jnp.concatenate([_deint_rows(s["u_embed"]["w"]),
                         _deint_rows(s["v_embed"]["w"]),
                         s["s_embed"]["w"]], axis=0)
        for s in stages]).astype(bf16)                  # (MI, FUSED, E)

    # per-token bias + PE row, per stage (h/u/v/s biases broadcast to their rows)
    tokb = jnp.stack([
        jnp.concatenate([
            jnp.broadcast_to(hb[None, :], (D, E)),
            jnp.broadcast_to(s["u_embed"]["b"][None, :], (R, E)),
            jnp.broadcast_to(s["v_embed"]["b"][None, :], (R, E)),
            s["s_embed"]["b"][None, :],
        ], axis=0) + pe[i][None, :]
        for i, s in enumerate(stages)]).astype(f32)     # (MI, SEQ, E)

    # fused per-stage decoder weight: cols [u_dec(deint) | v_dec(deint) | s_dec]
    wdec = jnp.stack([
        jnp.concatenate([_deint_cols(s["u_dec"]["w"]),
                         _deint_cols(s["v_dec"]["w"]),
                         s["s_dec"]["w"]], axis=1)
        for s in stages]).astype(bf16)                  # (MI, E, FUSED)

    # placed decoder biases (u rows get udb, v rows vdb, s row sdb; rest zeros)
    dbias_list = []
    for s in stages:
        udb = _deint_vec(s["u_dec"]["b"]).astype(f32)
        vdb = _deint_vec(s["v_dec"]["b"]).astype(f32)
        sdb = s["s_dec"]["b"].astype(f32)
        m = jnp.zeros((2 * R + 1, FUSED), f32)
        m = m.at[0:R, 0:D2].set(jnp.broadcast_to(udb[None, :], (R, D2)))
        m = m.at[R:2 * R, D2:2 * D2].set(jnp.broadcast_to(vdb[None, :], (R, D2)))
        m = m.at[2 * R, 2 * D2:2 * D2 + R].set(sdb)
        dbias_list.append(m)
    dbias = jnp.stack(dbias_list)                       # (MI, 2R+1, FUSED)

    def lstack(fn, dtype):
        return jnp.stack(
            [jnp.stack([fn(l) for l in s["layers"]]) for s in stages]).astype(dtype)

    # per-layer coalesced E-wide slab: [attn_out_b, ln1_g, ln1_b, ff2_b, ln2_g, ln2_b]
    lbe = lstack(lambda l: jnp.stack(
        [l["attn"]["out_b"], l["ln1_g"], l["ln1_b"],
         l["ff2_b"], l["ln2_g"], l["ln2_b"]], axis=0), f32)     # (MI, L, 6, E)

    return {
        "hw": params["h_encoder"]["w"].astype(bf16),            # (D2, E)
        "wemb": wemb, "tokb": tokb,
        "u0": _pack_complex(params["initial_U"]),               # (R, D2)
        "v0": _pack_complex(params["initial_V"]),
        "s0": params["initial_S"].reshape(1, R).astype(f32),
        "aiw": lstack(lambda l: l["attn"]["in_w"], bf16),       # (MI, L, E, 3E)
        "aib": lstack(lambda l: l["attn"]["in_b"].reshape(1, 3 * E), f32),
        "aow": lstack(lambda l: l["attn"]["out_w"], bf16),      # (MI, L, E, E)
        "lbe": lbe,
        "f1w": lstack(lambda l: l["ff1_w"], bf16),              # (MI, L, E, F)
        "f1b": lstack(lambda l: l["ff1_b"].reshape(1, F), f32),
        "f2w": lstack(lambda l: l["ff2_w"], bf16),              # (MI, L, F, E)
        "wdec": wdec, "dbias": dbias,
    }


# ---------------- forward: one fused pallas_call, iterations unrolled in-kernel ----------------
def svd_transformer_forward(x, pk, iterations=ITERATIONS):
    B = x.shape[0]
    D, R, E, F, L = INPUT_DIM, RANK, EMBED_DIM, DIM_FF, NUM_LAYERS

    x3 = x.reshape(B, D, D2).astype(jnp.float32)        # == torch .view(B, D, 2D)

    def bspec(shape):        # per-batch block (leading batch dim squeezed)
        return pl.BlockSpec((None,) + shape, lambda b: (b,) + (0,) * len(shape))

    def cspec(shape):        # whole-array constant block (fetched once for the grid)
        return pl.BlockSpec(shape, lambda b: (0,) * len(shape))

    in_specs = [
        bspec((D, D2)),                            # x3
        cspec((D2, E)),                            # hw
        cspec((MAX_ITERS, FUSED, E)),              # wemb
        cspec((MAX_ITERS, SEQ, E)),                # tokb (+PE)
        cspec((R, D2)), cspec((R, D2)),            # u0, v0
        cspec((1, R)),                             # s0
        cspec((MAX_ITERS, L, E, 3 * E)),           # aiw
        cspec((MAX_ITERS, L, 1, 3 * E)),           # aib
        cspec((MAX_ITERS, L, E, E)),               # aow
        cspec((MAX_ITERS, L, 6, E)),               # lbe
        cspec((MAX_ITERS, L, E, F)),               # f1w
        cspec((MAX_ITERS, L, 1, F)),               # f1b
        cspec((MAX_ITERS, L, F, E)),               # f2w
        cspec((MAX_ITERS, E, FUSED)),              # wdec
        cspec((MAX_ITERS, 2 * R + 1, FUSED)),      # dbias
    ]
    out_specs = bspec((R + 1, UVW))
    out_shape = jax.ShapeDtypeStruct((B, R + 1, UVW), jnp.float32)

    # NOTE: on single-TC chips (v5e/v6e) the batch axis is a 2-step serial loop
    # (~0.7 us overhead); on v7x the two TensorCores each take one batch element.
    out = pl.pallas_call(
        _make_kernel(iterations),
        out_shape=out_shape,
        grid_spec=pltpu.PrefetchScalarGridSpec(
            num_scalar_prefetch=0,
            grid=(B,),
            in_specs=in_specs,
            out_specs=out_specs),
        compiler_params=pltpu.CompilerParams(
            dimension_semantics=("parallel",)),
    )(
        x3, pk["hw"], pk["wemb"], pk["tokb"], pk["u0"], pk["v0"], pk["s0"],
        pk["aiw"], pk["aib"], pk["aow"], pk["lbe"],
        pk["f1w"], pk["f1b"], pk["f2w"], pk["wdec"], pk["dbias"],
    )

    # unpack the lane-dense output: rows 0..R-1 = [U | V] packed, row R = [S | 0]
    u_pk = out[:, :R, :D2]
    v_pk = out[:, :R, D2:]
    pred_U = jnp.stack([u_pk[..., :D], u_pk[..., D:]], axis=-1)
    pred_V = jnp.stack([v_pk[..., :D], v_pk[..., D:]], axis=-1)
    pred_S = out[:, R, :R]
    return pred_U, pred_S, pred_V


# ---------------- parameters ----------------
def build_pe(max_len, d_model):
    pe = np.zeros((max_len, d_model), dtype=np.float32)
    position = np.arange(0, max_len, dtype=np.float32)[:, None]
    div_term = np.exp(np.arange(0, d_model, 2, dtype=np.float32)
                      * (-math.log(10000.0) / d_model))
    pe[:, 0::2] = np.sin(position * div_term)
    pe[:, 1::2] = np.cos(position * div_term)
    return jnp.asarray(pe)                             # (max_len, d_model)


def init_params(key):
    keys = iter(jax.random.split(key, 1024))

    def w(shape, scale=0.05):
        return scale * jax.random.normal(next(keys), shape, dtype=jnp.float32)

    def lin(k_in, k_out):
        # stored transposed relative to torch: (in, out) so that y = x @ w + b
        return {"w": w((k_in, k_out)), "b": w((k_out,), 0.01)}

    def layer_params():
        return {
            "attn": {"in_w": w((EMBED_DIM, 3 * EMBED_DIM)),
                     "in_b": w((3 * EMBED_DIM,), 0.01),
                     "out_w": w((EMBED_DIM, EMBED_DIM)),
                     "out_b": w((EMBED_DIM,), 0.01)},
            "ln1_g": jnp.ones((EMBED_DIM,), jnp.float32),
            "ln1_b": jnp.zeros((EMBED_DIM,), jnp.float32),
            "ff1_w": w((EMBED_DIM, DIM_FF)), "ff1_b": w((DIM_FF,), 0.01),
            "ff2_w": w((DIM_FF, EMBED_DIM)), "ff2_b": w((EMBED_DIM,), 0.01),
            "ln2_g": jnp.ones((EMBED_DIM,), jnp.float32),
            "ln2_b": jnp.zeros((EMBED_DIM,), jnp.float32),
        }

    def stage_params():
        return {
            "u_embed": lin(2 * INPUT_DIM, EMBED_DIM),
            "v_embed": lin(2 * INPUT_DIM, EMBED_DIM),
            "s_embed": lin(RANK, EMBED_DIM),
            "layers": [layer_params() for _ in range(NUM_LAYERS)],
            "u_dec": lin(EMBED_DIM, 2 * INPUT_DIM),
            "v_dec": lin(EMBED_DIM, 2 * INPUT_DIM),
            "s_dec": lin(EMBED_DIM, RANK),
        }

    return {
        "h_encoder": lin(2 * INPUT_DIM, EMBED_DIM),
        "pe": build_pe(MAX_ITERS, EMBED_DIM),
        "initial_U": w((1, RANK, INPUT_DIM, 2), 1.0),
        "initial_V": w((1, RANK, INPUT_DIM, 2), 1.0),
        "initial_S": w((1, RANK), 1.0),
        "stages": [stage_params() for _ in range(MAX_ITERS)],
    }


if __name__ == "__main__":
    key = jax.random.PRNGKey(0)
    pkey, xkey = jax.random.split(key)
    params = init_params(pkey)
    packed = pack_params(params)          # host-side, once
    x = jax.random.normal(xkey, (BATCH, INPUT_DIM, INPUT_DIM, 2), dtype=jnp.float32)

    fwd = jax.jit(partial(svd_transformer_forward, iterations=ITERATIONS))
    pred_U, pred_S, pred_V = fwd(x, packed)
    jax.block_until_ready((pred_U, pred_S, pred_V))

    assert pred_U.shape == (BATCH, RANK, INPUT_DIM, 2)
    assert pred_S.shape == (BATCH, RANK)
    assert pred_V.shape == (BATCH, RANK, INPUT_DIM, 2)
    assert bool(jnp.all(jnp.isfinite(pred_U)))
    assert bool(jnp.all(jnp.isfinite(pred_S)))
    assert bool(jnp.all(jnp.isfinite(pred_V)))
    print("KERNEL_OK")
</pallas_src>

<mosaic_0001>
module attributes {stable_mosaic.version = 11 : i64} {
  func.func @kernel(%arg0: i32, %arg1: memref<1x16x32xf32, #tpu.memory_space<vmem>>, %arg2: memref<32x32xbf16, #tpu.memory_space<vmem>>, %arg3: memref<4x72x32xbf16, #tpu.memory_space<vmem>>, %arg4: memref<4x33x32xf32, #tpu.memory_space<vmem>>, %arg5: memref<8x32xf32, #tpu.memory_space<vmem>>, %arg6: memref<8x32xf32, #tpu.memory_space<vmem>>, %arg7: memref<1x8xf32, #tpu.memory_space<vmem>>, %arg8: memref<4x2x32x96xbf16, #tpu.memory_space<vmem>>, %arg9: memref<4x2x1x96xf32, #tpu.memory_space<vmem>>, %arg10: memref<4x2x32x32xbf16, #tpu.memory_space<vmem>>, %arg11: memref<4x2x6x32xf32, #tpu.memory_space<vmem>>, %arg12: memref<4x2x32x64xbf16, #tpu.memory_space<vmem>>, %arg13: memref<4x2x1x64xf32, #tpu.memory_space<vmem>>, %arg14: memref<4x2x64x32xbf16, #tpu.memory_space<vmem>>, %arg15: memref<4x32x72xbf16, #tpu.memory_space<vmem>>, %arg16: memref<4x17x72xf32, #tpu.memory_space<vmem>>, %arg17: memref<1x9x64xf32, #tpu.memory_space<vmem>>) attributes {dimension_semantics = [#tpu.dimension_semantics<parallel>], iteration_bounds = array<i64: 2>, scalar_prefetch = 0 : i64, scratch_operands = 0 : i64, tpu.core_type = #tpu.core_type<tc>, window_params = [{transform_indices = @transform_0, window_bounds = array<i64: 1, 16, 32>}, {pipeline_mode = #tpu.pipeline_mode<synchronous>, transform_indices = @transform_1, window_bounds = array<i64: 32, 32>}, {pipeline_mode = #tpu.pipeline_mode<synchronous>, transform_indices = @transform_2, window_bounds = array<i64: 4, 72, 32>}, {pipeline_mode = #tpu.pipeline_mode<synchronous>, transform_indices = @transform_3, window_bounds = array<i64: 4, 33, 32>}, {pipeline_mode = #tpu.pipeline_mode<synchronous>, transform_indices = @transform_4, window_bounds = array<i64: 8, 32>}, {pipeline_mode = #tpu.pipeline_mode<synchronous>, transform_indices = @transform_5, window_bounds = array<i64: 8, 32>}, {pipeline_mode = #tpu.pipeline_mode<synchronous>, transform_indices = @transform_6, window_bounds = array<i64: 1, 8>}, {pipeline_mode = #tpu.pipeline_mode<synchronous>, transform_indices = @transform_7, window_bounds = array<i64: 4, 2, 32, 96>}, {pipeline_mode = #tpu.pipeline_mode<synchronous>, transform_indices = @transform_8, window_bounds = array<i64: 4, 2, 1, 96>}, {pipeline_mode = #tpu.pipeline_mode<synchronous>, transform_indices = @transform_9, window_bounds = array<i64: 4, 2, 32, 32>}, {pipeline_mode = #tpu.pipeline_mode<synchronous>, transform_indices = @transform_10, window_bounds = array<i64: 4, 2, 6, 32>}, {pipeline_mode = #tpu.pipeline_mode<synchronous>, transform_indices = @transform_11, window_bounds = array<i64: 4, 2, 32, 64>}, {pipeline_mode = #tpu.pipeline_mode<synchronous>, transform_indices = @transform_12, window_bounds = array<i64: 4, 2, 1, 64>}, {pipeline_mode = #tpu.pipeline_mode<synchronous>, transform_indices = @transform_13, window_bounds = array<i64: 4, 2, 64, 32>}, {pipeline_mode = #tpu.pipeline_mode<synchronous>, transform_indices = @transform_14, window_bounds = array<i64: 4, 32, 72>}, {pipeline_mode = #tpu.pipeline_mode<synchronous>, transform_indices = @transform_15, window_bounds = array<i64: 4, 17, 72>}, {transform_indices = @transform_16, window_bounds = array<i64: 1, 9, 64>}]} {
    %c0 = arith.constant 0 : index
    %c0_0 = arith.constant 0 : index
    %c0_1 = arith.constant 0 : index
    %0 = vector.load %arg1[%c0, %c0_0, %c0_1] : memref<1x16x32xf32, #tpu.memory_space<vmem>>, vector<1x16x32xf32>
    %1 = vector.shape_cast %0 : vector<1x16x32xf32> to vector<16x32xf32>
    %2 = arith.truncf %1 : vector<16x32xf32> to vector<16x32xbf16>
    %c0_2 = arith.constant 0 : index
    %c0_3 = arith.constant 0 : index
    %3 = vector.load %arg2[%c0_2, %c0_3] : memref<32x32xbf16, #tpu.memory_space<vmem>>, vector<32x32xbf16>
    %cst = arith.constant dense<0.000000e+00> : vector<16x32xf32>
    %4 = tpu.matmul %2, %3, %cst {dimension_numbers = #tpu.dot_dimension_numbers<[1], [0], [0], [1], [0, 0, 1, 1], [], []>} : vector<16x32xbf16>, vector<32x32xbf16>, vector<16x32xf32> -> vector<16x32xf32>
    %c0_4 = arith.constant 0 : index
    %c0_5 = arith.constant 0 : index
    %5 = vector.load %arg5[%c0_4, %c0_5] : memref<8x32xf32, #tpu.memory_space<vmem>>, vector<8x32xf32>
    %c0_6 = arith.constant 0 : index
    %c0_7 = arith.constant 0 : index
    %6 = vector.load %arg6[%c0_6, %c0_7] : memref<8x32xf32, #tpu.memory_space<vmem>>, vector<8x32xf32>
    %c0_8 = arith.constant 0 : index
    %c0_9 = arith.constant 0 : index
    %7 = vector.load %arg7[%c0_8, %c0_9] : memref<1x8xf32, #tpu.memory_space<vmem>>, vector<1x8xf32>
    %cst_10 = arith.constant 0.000000e+00 : f32
    %8 = vector.broadcast %cst_10 : f32 to vector<8x40xf32>
    %9 = tpu.concatenate %5, %8 in 1 : vector<8x32xf32>, vector<8x40xf32> -> vector<8x72xf32>
    %cst_11 = arith.constant 0.000000e+00 : f32
    %10 = vector.broadcast %cst_11 : f32 to vector<8x32xf32>
    %cst_12 = arith.constant 0.000000e+00 : f32
    %11 = vector.broadcast %cst_12 : f32 to vector<8x8xf32>
    %12 = tpu.concatenate %10, %6, %11 in 1 : vector<8x32xf32>, vector<8x32xf32>, vector<8x8xf32> -> vector<8x72xf32>
    %cst_13 = arith.constant 0.000000e+00 : f32
    %13 = vector.broadcast %cst_13 : f32 to vector<1x64xf32>
    %14 = tpu.concatenate %13, %7 in 1 : vector<1x64xf32>, vector<1x8xf32> -> vector<1x72xf32>
    %15 = tpu.concatenate %9, %12, %14 in 0 : vector<8x72xf32>, vector<8x72xf32>, vector<1x72xf32> -> vector<17x72xf32>
    %16 = arith.truncf %15 : vector<17x72xf32> to vector<17x72xbf16>
    %c0_14 = arith.constant 0 : index
    %c0_15 = arith.constant 0 : index
    %c0_16 = arith.constant 0 : index
    %17 = vector.load %arg3[%c0_14, %c0_15, %c0_16] : memref<4x72x32xbf16, #tpu.memory_space<vmem>>, vector<1x72x32xbf16>
    %18 = vector.shape_cast %17 : vector<1x72x32xbf16> to vector<72x32xbf16>
    %cst_17 = arith.constant dense<0.000000e+00> : vector<17x32xf32>
    %19 = tpu.matmul %16, %18, %cst_17 {dimension_numbers = #tpu.dot_dimension_numbers<[1], [0], [0], [1], [0, 0, 1, 1], [], []>} : vector<17x72xbf16>, vector<72x32xbf16>, vector<17x32xf32> -> vector<17x32xf32>
    %20 = tpu.concatenate %4, %19 in 0 : vector<16x32xf32>, vector<17x32xf32> -> vector<33x32xf32>
    %c0_18 = arith.constant 0 : index
    %c0_19 = arith.constant 0 : index
    %c0_20 = arith.constant 0 : index
    %21 = vector.load %arg4[%c0_18, %c0_19, %c0_20] : memref<4x33x32xf32, #tpu.memory_space<vmem>>, vector<1x33x32xf32>
    %22 = vector.shape_cast %21 : vector<1x33x32xf32> to vector<33x32xf32>
    %23 = arith.addf %20, %22 : vector<33x32xf32>
    %c0_21 = arith.constant 0 : index
    %c0_22 = arith.constant 0 : index
    %c0_23 = arith.constant 0 : index
    %c0_24 = arith.constant 0 : index
    %24 = vector.load %arg11[%c0_21, %c0_22, %c0_23, %c0_24] : memref<4x2x6x32xf32, #tpu.memory_space<vmem>>, vector<1x1x6x32xf32>
    %25 = vector.shape_cast %24 : vector<1x1x6x32xf32> to vector<6x32xf32>
    %26 = arith.truncf %23 : vector<33x32xf32> to vector<33x32xbf16>
    %c0_25 = arith.constant 0 : index
    %c0_26 = arith.constant 0 : index
    %c0_27 = arith.constant 0 : index
    %c0_28 = arith.constant 0 : index
    %27 = vector.load %arg8[%c0_25, %c0_26, %c0_27, %c0_28] : memref<4x2x32x96xbf16, #tpu.memory_space<vmem>>, vector<1x1x32x96xbf16>
    %28 = vector.shape_cast %27 : vector<1x1x32x96xbf16> to vector<32x96xbf16>
    %cst_29 = arith.constant dense<0.000000e+00> : vector<33x96xf32>
    %29 = tpu.matmul %26, %28, %cst_29 {dimension_numbers = #tpu.dot_dimension_numbers<[1], [0], [0], [1], [0, 0, 1, 1], [], []>} : vector<33x32xbf16>, vector<32x96xbf16>, vector<33x96xf32> -> vector<33x96xf32>
    %c0_30 = arith.constant 0 : index
    %c0_31 = arith.constant 0 : index
    %c0_32 = arith.constant 0 : index
    %c0_33 = arith.constant 0 : index
    %30 = vector.load %arg9[%c0_30, %c0_31, %c0_32, %c0_33] : memref<4x2x1x96xf32, #tpu.memory_space<vmem>>, vector<1x1x1x96xf32>
    %31 = vector.shape_cast %30 : vector<1x1x1x96xf32> to vector<1x96xf32>
    %32 = vector.broadcast %31 : vector<1x96xf32> to vector<33x96xf32>
    %33 = arith.addf %29, %32 : vector<33x96xf32>
    %34 = vector.extract_strided_slice %33 {offsets = [0, 0], sizes = [33, 8], strides = [1, 1]} : vector<33x96xf32> to vector<33x8xf32>
    %35 = arith.truncf %34 : vector<33x8xf32> to vector<33x8xbf16>
    %36 = vector.extract_strided_slice %33 {offsets = [0, 32], sizes = [33, 8], strides = [1, 1]} : vector<33x96xf32> to vector<33x8xf32>
    %37 = arith.truncf %36 : vector<33x8xf32> to vector<33x8xbf16>
    %38 = vector.extract_strided_slice %33 {offsets = [0, 64], sizes = [33, 8], strides = [1, 1]} : vector<33x96xf32> to vector<33x8xf32>
    %39 = arith.truncf %38 : vector<33x8xf32> to vector<33x8xbf16>
    %cst_34 = arith.constant dense<0.000000e+00> : vector<33x33xf32>
    %40 = tpu.matmul %35, %37, %cst_34 {dimension_numbers = #tpu.dot_dimension_numbers<[1], [1], [0], [0], [0, 0, 1, 0], [], []>} : vector<33x8xbf16>, vector<33x8xbf16>, vector<33x33xf32> -> vector<33x33xf32>
    %cst_35 = arith.constant 0.353553385 : f32
    %41 = vector.broadcast %cst_35 : f32 to vector<33x33xf32>
    %42 = arith.mulf %40, %41 : vector<33x33xf32>
    %cst_36 = arith.constant dense<0xFF800000> : vector<33xf32>
    %43 = vector.multi_reduction <maximumf>, %42, %cst_36 [1] : vector<33x33xf32> to vector<33xf32>
    %44 = vector.shape_cast %43 : vector<33xf32> to vector<33x1xf32>
    %45 = vector.broadcast %44 : vector<33x1xf32> to vector<33x33xf32>
    %46 = arith.subf %42, %45 : vector<33x33xf32>
    %47 = math.exp %46 : vector<33x33xf32>
    %cst_37 = arith.constant dense<0.000000e+00> : vector<33xf32>
    %48 = vector.multi_reduction <add>, %47, %cst_37 [1] : vector<33x33xf32> to vector<33xf32>
    %49 = vector.shape_cast %48 : vector<33xf32> to vector<33x1xf32>
    %50 = vector.broadcast %49 : vector<33x1xf32> to vector<33x33xf32>
    %51 = arith.divf %47, %50 : vector<33x33xf32>
    %52 = arith.truncf %51 : vector<33x33xf32> to vector<33x33xbf16>
    %cst_38 = arith.constant dense<0.000000e+00> : vector<33x8xf32>
    %53 = tpu.matmul %52, %39, %cst_38 {dimension_numbers = #tpu.dot_dimension_numbers<[1], [0], [0], [1], [0, 0, 1, 1], [], []>} : vector<33x33xbf16>, vector<33x8xbf16>, vector<33x8xf32> -> vector<33x8xf32>
    %54 = vector.extract_strided_slice %33 {offsets = [0, 8], sizes = [33, 8], strides = [1, 1]} : vector<33x96xf32> to vector<33x8xf32>
    %55 = arith.truncf %54 : vector<33x8xf32> to vector<33x8xbf16>
    %56 = vector.extract_strided_slice %33 {offsets = [0, 40], sizes = [33, 8], strides = [1, 1]} : vector<33x96xf32> to vector<33x8xf32>
    %57 = arith.truncf %56 : vector<33x8xf32> to vector<33x8xbf16>
    %58 = vector.extract_strided_slice %33 {offsets = [0, 72], sizes = [33, 8], strides = [1, 1]} : vector<33x96xf32> to vector<33x8xf32>
    %59 = arith.truncf %58 : vector<33x8xf32> to vector<33x8xbf16>
    %cst_39 = arith.constant dense<0.000000e+00> : vector<33x33xf32>
    %60 = tpu.matmul %55, %57, %cst_39 {dimension_numbers = #tpu.dot_dimension_numbers<[1], [1], [0], [0], [0, 0, 1, 0], [], []>} : vector<33x8xbf16>, vector<33x8xbf16>, vector<33x33xf32> -> vector<33x33xf32>
    %cst_40 = arith.constant 0.353553385 : f32
    %61 = vector.broadcast %cst_40 : f32 to vector<33x33xf32>
    %62 = arith.mulf %60, %61 : vector<33x33xf32>
    %cst_41 = arith.constant dense<0xFF800000> : vector<33xf32>
    %63 = vector.multi_reduction <maximumf>, %62, %cst_41 [1] : vector<33x33xf32> to vector<33xf32>
    %64 = vector.shape_cast %63 : vector<33xf32> to vector<33x1xf32>
    %65 = vector.broadcast %64 : vector<33x1xf32> to vector<33x33xf32>
    %66 = arith.subf %62, %65 : vector<33x33xf32>
    %67 = math.exp %66 : vector<33x33xf32>
    %cst_42 = arith.constant dense<0.000000e+00> : vector<33xf32>
    %68 = vector.multi_reduction <add>, %67, %cst_42 [1] : vector<33x33xf32> to vector<33xf32>
    %69 = vector.shape_cast %68 : vector<33xf32> to vector<33x1xf32>
    %70 = vector.broadcast %69 : vector<33x1xf32> to vector<33x33xf32>
    %71 = arith.divf %67, %70 : vector<33x33xf32>
    %72 = arith.truncf %71 : vector<33x33xf32> to vector<33x33xbf16>
    %cst_43 = arith.constant dense<0.000000e+00> : vector<33x8xf32>
    %73 = tpu.matmul %72, %59, %cst_43 {dimension_numbers = #tpu.dot_dimension_numbers<[1], [0], [0], [1], [0, 0, 1, 1], [], []>} : vector<33x33xbf16>, vector<33x8xbf16>, vector<33x8xf32> -> vector<33x8xf32>
    %74 = vector.extract_strided_slice %33 {offsets = [0, 16], sizes = [33, 8], strides = [1, 1]} : vector<33x96xf32> to vector<33x8xf32>
    %75 = arith.truncf %74 : vector<33x8xf32> to vector<33x8xbf16>
    %76 = vector.extract_strided_slice %33 {offsets = [0, 48], sizes = [33, 8], strides = [1, 1]} : vector<33x96xf32> to vector<33x8xf32>
    %77 = arith.truncf %76 : vector<33x8xf32> to vector<33x8xbf16>
    %78 = vector.extract_strided_slice %33 {offsets = [0, 80], sizes = [33, 8], strides = [1, 1]} : vector<33x96xf32> to vector<33x8xf32>
    %79 = arith.truncf %78 : vector<33x8xf32> to vector<33x8xbf16>
    %cst_44 = arith.constant dense<0.000000e+00> : vector<33x33xf32>
    %80 = tpu.matmul %75, %77, %cst_44 {dimension_numbers = #tpu.dot_dimension_numbers<[1], [1], [0], [0], [0, 0, 1, 0], [], []>} : vector<33x8xbf16>, vector<33x8xbf16>, vector<33x33xf32> -> vector<33x33xf32>
    %cst_45 = arith.constant 0.353553385 : f32
    %81 = vector.broadcast %cst_45 : f32 to vector<33x33xf32>
    %82 = arith.mulf %80, %81 : vector<33x33xf32>
    %cst_46 = arith.constant dense<0xFF800000> : vector<33xf32>
    %83 = vector.multi_reduction <maximumf>, %82, %cst_46 [1] : vector<33x33xf32> to vector<33xf32>
    %84 = vector.shape_cast %83 : vector<33xf32> to vector<33x1xf32>
    %85 = vector.broadcast %84 : vector<33x1xf32> to vector<33x33xf32>
    %86 = arith.subf %82, %85 : vector<33x33xf32>
    %87 = math.exp %86 : vector<33x33xf32>
    %cst_47 = arith.constant dense<0.000000e+00> : vector<33xf32>
    %88 = vector.multi_reduction <add>, %87, %cst_47 [1] : vector<33x33xf32> to vector<33xf32>
    %89 = vector.shape_cast %88 : vector<33xf32> to vector<33x1xf32>
    %90 = vector.broadcast %89 : vector<33x1xf32> to vector<33x33xf32>
    %91 = arith.divf %87, %90 : vector<33x33xf32>
    %92 = arith.truncf %91 : vector<33x33xf32> to vector<33x33xbf16>
    %cst_48 = arith.constant dense<0.000000e+00> : vector<33x8xf32>
    %93 = tpu.matmul %92, %79, %cst_48 {dimension_numbers = #tpu.dot_dimension_numbers<[1], [0], [0], [1], [0, 0, 1, 1], [], []>} : vector<33x33xbf16>, vector<33x8xbf16>, vector<33x8xf32> -> vector<33x8xf32>
    %94 = vector.extract_strided_slice %33 {offsets = [0, 24], sizes = [33, 8], strides = [1, 1]} : vector<33x96xf32> to vector<33x8xf32>
    %95 = arith.truncf %94 : vector<33x8xf32> to vector<33x8xbf16>
    %96 = vector.extract_strided_slice %33 {offsets = [0, 56], sizes = [33, 8], strides = [1, 1]} : vector<33x96xf32> to vector<33x8xf32>
    %97 = arith.truncf %96 : vector<33x8xf32> to vector<33x8xbf16>
    %98 = vector.extract_strided_slice %33 {offsets = [0, 88], sizes = [33, 8], strides = [1, 1]} : vector<33x96xf32> to vector<33x8xf32>
    %99 = arith.truncf %98 : vector<33x8xf32> to vector<33x8xbf16>
    %cst_49 = arith.constant dense<0.000000e+00> : vector<33x33xf32>
    %100 = tpu.matmul %95, %97, %cst_49 {dimension_numbers = #tpu.dot_dimension_numbers<[1], [1], [0], [0], [0, 0, 1, 0], [], []>} : vector<33x8xbf16>, vector<33x8xbf16>, vector<33x33xf32> -> vector<33x33xf32>
    %cst_50 = arith.constant 0.353553385 : f32
    %101 = vector.broadcast %cst_50 : f32 to vector<33x33xf32>
    %102 = arith.mulf %100, %101 : vector<33x33xf32>
    %cst_51 = arith.constant dense<0xFF800000> : vector<33xf32>
    %103 = vector.multi_reduction <maximumf>, %102, %cst_51 [1] : vector<33x33xf32> to vector<33xf32>
    %104 = vector.shape_cast %103 : vector<33xf32> to vector<33x1xf32>
    %105 = vector.broadcast %104 : vector<33x1xf32> to vector<33x33xf32>
    %106 = arith.subf %102, %105 : vector<33x33xf32>
    %107 = math.exp %106 : vector<33x33xf32>
    %cst_52 = arith.constant dense<0.000000e+00> : vector<33xf32>
    %108 = vector.multi_reduction <add>, %107, %cst_52 [1] : vector<33x33xf32> to vector<33xf32>
    %109 = vector.shape_cast %108 : vector<33xf32> to vector<33x1xf32>
    %110 = vector.broadcast %109 : vector<33x1xf32> to vector<33x33xf32>
    %111 = arith.divf %107, %110 : vector<33x33xf32>
    %112 = arith.truncf %111 : vector<33x33xf32> to vector<33x33xbf16>
    %cst_53 = arith.constant dense<0.000000e+00> : vector<33x8xf32>
    %113 = tpu.matmul %112, %99, %cst_53 {dimension_numbers = #tpu.dot_dimension_numbers<[1], [0], [0], [1], [0, 0, 1, 1], [], []>} : vector<33x33xbf16>, vector<33x8xbf16>, vector<33x8xf32> -> vector<33x8xf32>
    %114 = tpu.concatenate %53, %73, %93, %113 in 1 : vector<33x8xf32>, vector<33x8xf32>, vector<33x8xf32>, vector<33x8xf32> -> vector<33x32xf32>
    %115 = arith.truncf %114 : vector<33x32xf32> to vector<33x32xbf16>
    %c0_54 = arith.constant 0 : index
    %c0_55 = arith.constant 0 : index
    %c0_56 = arith.constant 0 : index
    %c0_57 = arith.constant 0 : index
    %116 = vector.load %arg10[%c0_54, %c0_55, %c0_56, %c0_57] : memref<4x2x32x32xbf16, #tpu.memory_space<vmem>>, vector<1x1x32x32xbf16>
    %117 = vector.shape_cast %116 : vector<1x1x32x32xbf16> to vector<32x32xbf16>
    %cst_58 = arith.constant dense<0.000000e+00> : vector<33x32xf32>
    %118 = tpu.matmul %115, %117, %cst_58 {dimension_numbers = #tpu.dot_dimension_numbers<[1], [0], [0], [1], [0, 0, 1, 1], [], []>} : vector<33x32xbf16>, vector<32x32xbf16>, vector<33x32xf32> -> vector<33x32xf32>
    %119 = vector.extract_strided_slice %25 {offsets = [0, 0], sizes = [1, 32], strides = [1, 1]} : vector<6x32xf32> to vector<1x32xf32>
    %120 = vector.broadcast %119 : vector<1x32xf32> to vector<33x32xf32>
    %121 = arith.addf %118, %120 : vector<33x32xf32>
    %122 = arith.addf %23, %121 : vector<33x32xf32>
    %123 = vector.extract_strided_slice %25 {offsets = [1, 0], sizes = [1, 32], strides = [1, 1]} : vector<6x32xf32> to vector<1x32xf32>
    %124 = vector.extract_strided_slice %25 {offsets = [2, 0], sizes = [1, 32], strides = [1, 1]} : vector<6x32xf32> to vector<1x32xf32>
    %cst_59 = arith.constant dense<0.000000e+00> : vector<33xf32>
    %125 = vector.multi_reduction <add>, %122, %cst_59 [1] : vector<33x32xf32> to vector<33xf32>
    %126 = vector.shape_cast %125 : vector<33xf32> to vector<33x1xf32>
    %cst_60 = arith.constant 3.200000e+01 : f32
    %127 = vector.broadcast %cst_60 : f32 to vector<33x1xf32>
    %128 = arith.divf %126, %127 : vector<33x1xf32>
    %129 = vector.broadcast %128 : vector<33x1xf32> to vector<33x32xf32>
    %130 = arith.subf %122, %129 : vector<33x32xf32>
    %131 = arith.mulf %130, %130 : vector<33x32xf32>
    %cst_61 = arith.constant dense<0.000000e+00> : vector<33xf32>
    %132 = vector.multi_reduction <add>, %131, %cst_61 [1] : vector<33x32xf32> to vector<33xf32>
    %133 = vector.shape_cast %132 : vector<33xf32> to vector<33x1xf32>
    %cst_62 = arith.constant 3.200000e+01 : f32
    %134 = vector.broadcast %cst_62 : f32 to vector<33x1xf32>
    %135 = arith.divf %133, %134 : vector<33x1xf32>
    %cst_63 = arith.constant 9.99999974E-6 : f32
    %136 = vector.broadcast %cst_63 : f32 to vector<33x1xf32>
    %137 = arith.addf %135, %136 : vector<33x1xf32>
    %138 = math.rsqrt %137 : vector<33x1xf32>
    %139 = vector.broadcast %138 : vector<33x1xf32> to vector<33x32xf32>
    %140 = arith.mulf %130, %139 : vector<33x32xf32>
    %141 = vector.broadcast %123 : vector<1x32xf32> to vector<33x32xf32>
    %142 = arith.mulf %140, %141 : vector<33x32xf32>
    %143 = vector.broadcast %124 : vector<1x32xf32> to vector<33x32xf32>
    %144 = arith.addf %142, %143 : vector<33x32xf32>
    %145 = arith.truncf %144 : vector<33x32xf32> to vector<33x32xbf16>
    %c0_64 = arith.constant 0 : index
    %c0_65 = arith.constant 0 : index
    %c0_66 = arith.constant 0 : index
    %c0_67 = arith.constant 0 : index
    %146 = vector.load %arg12[%c0_64, %c0_65, %c0_66, %c0_67] : memref<4x2x32x64xbf16, #tpu.memory_space<vmem>>, vector<1x1x32x64xbf16>
    %147 = vector.shape_cast %146 : vector<1x1x32x64xbf16> to vector<32x64xbf16>
    %cst_68 = arith.constant dense<0.000000e+00> : vector<33x64xf32>
    %148 = tpu.matmul %145, %147, %cst_68 {dimension_numbers = #tpu.dot_dimension_numbers<[1], [0], [0], [1], [0, 0, 1, 1], [], []>} : vector<33x32xbf16>, vector<32x64xbf16>, vector<33x64xf32> -> vector<33x64xf32>
    %c0_69 = arith.constant 0 : index
    %c0_70 = arith.constant 0 : index
    %c0_71 = arith.constant 0 : index
    %c0_72 = arith.constant 0 : index
    %149 = vector.load %arg13[%c0_69, %c0_70, %c0_71, %c0_72] : memref<4x2x1x64xf32, #tpu.memory_space<vmem>>, vector<1x1x1x64xf32>
    %150 = vector.shape_cast %149 : vector<1x1x1x64xf32> to vector<1x64xf32>
    %151 = vector.broadcast %150 : vector<1x64xf32> to vector<33x64xf32>
    %152 = arith.addf %148, %151 : vector<33x64xf32>
    %cst_73 = arith.constant 0.000000e+00 : f32
    %153 = vector.broadcast %cst_73 : f32 to vector<33x64xf32>
    %154 = arith.maximumf %152, %153 : vector<33x64xf32>
    %155 = arith.truncf %154 : vector<33x64xf32> to vector<33x64xbf16>
    %c0_74 = arith.constant 0 : index
    %c0_75 = arith.constant 0 : index
    %c0_76 = arith.constant 0 : index
    %c0_77 = arith.constant 0 : index
    %156 = vector.load %arg14[%c0_74, %c0_75, %c0_76, %c0_77] : memref<4x2x64x32xbf16, #tpu.memory_space<vmem>>, vector<1x1x64x32xbf16>
    %157 = vector.shape_cast %156 : vector<1x1x64x32xbf16> to vector<64x32xbf16>
    %cst_78 = arith.constant dense<0.000000e+00> : vector<33x32xf32>
    %158 = tpu.matmul %155, %157, %cst_78 {dimension_numbers = #tpu.dot_dimension_numbers<[1], [0], [0], [1], [0, 0, 1, 1], [], []>} : vector<33x64xbf16>, vector<64x32xbf16>, vector<33x32xf32> -> vector<33x32xf32>
    %159 = vector.extract_strided_slice %25 {offsets = [3, 0], sizes = [1, 32], strides = [1, 1]} : vector<6x32xf32> to vector<1x32xf32>
    %160 = vector.broadcast %159 : vector<1x32xf32> to vector<33x32xf32>
    %161 = arith.addf %158, %160 : vector<33x32xf32>
    %162 = arith.addf %144, %161 : vector<33x32xf32>
    %163 = vector.extract_strided_slice %25 {offsets = [4, 0], sizes = [1, 32], strides = [1, 1]} : vector<6x32xf32> to vector<1x32xf32>
    %164 = vector.extract_strided_slice %25 {offsets = [5, 0], sizes = [1, 32], strides = [1, 1]} : vector<6x32xf32> to vector<1x32xf32>
    %cst_79 = arith.constant dense<0.000000e+00> : vector<33xf32>
    %165 = vector.multi_reduction <add>, %162, %cst_79 [1] : vector<33x32xf32> to vector<33xf32>
    %166 = vector.shape_cast %165 : vector<33xf32> to vector<33x1xf32>
    %cst_80 = arith.constant 3.200000e+01 : f32
    %167 = vector.broadcast %cst_80 : f32 to vector<33x1xf32>
    %168 = arith.divf %166, %167 : vector<33x1xf32>
    %169 = vector.broadcast %168 : vector<33x1xf32> to vector<33x32xf32>
    %170 = arith.subf %162, %169 : vector<33x32xf32>
    %171 = arith.mulf %170, %170 : vector<33x32xf32>
    %cst_81 = arith.constant dense<0.000000e+00> : vector<33xf32>
    %172 = vector.multi_reduction <add>, %171, %cst_81 [1] : vector<33x32xf32> to vector<33xf32>
    %173 = vector.shape_cast %172 : vector<33xf32> to vector<33x1xf32>
    %cst_82 = arith.constant 3.200000e+01 : f32
    %174 = vector.broadcast %cst_82 : f32 to vector<33x1xf32>
    %175 = arith.divf %173, %174 : vector<33x1xf32>
    %cst_83 = arith.constant 9.99999974E-6 : f32
    %176 = vector.broadcast %cst_83 : f32 to vector<33x1xf32>
    %177 = arith.addf %175, %176 : vector<33x1xf32>
    %178 = math.rsqrt %177 : vector<33x1xf32>
    %179 = vector.broadcast %178 : vector<33x1xf32> to vector<33x32xf32>
    %180 = arith.mulf %170, %179 : vector<33x32xf32>
    %181 = vector.broadcast %163 : vector<1x32xf32> to vector<33x32xf32>
    %182 = arith.mulf %180, %181 : vector<33x32xf32>
    %183 = vector.broadcast %164 : vector<1x32xf32> to vector<33x32xf32>
    %184 = arith.addf %182, %183 : vector<33x32xf32>
    %c0_84 = arith.constant 0 : index
    %c1 = arith.constant 1 : index
    %c0_85 = arith.constant 0 : index
    %c0_86 = arith.constant 0 : index
    %185 = vector.load %arg11[%c0_84, %c1, %c0_85, %c0_86] : memref<4x2x6x32xf32, #tpu.memory_space<vmem>>, vector<1x1x6x32xf32>
    %186 = vector.shape_cast %185 : vector<1x1x6x32xf32> to vector<6x32xf32>
    %187 = arith.truncf %184 : vector<33x32xf32> to vector<33x32xbf16>
    %c0_87 = arith.constant 0 : index
    %c1_88 = arith.constant 1 : index
    %c0_89 = arith.constant 0 : index
    %c0_90 = arith.constant 0 : index
    %188 = vector.load %arg8[%c0_87, %c1_88, %c0_89, %c0_90] : memref<4x2x32x96xbf16, #tpu.memory_space<vmem>>, vector<1x1x32x96xbf16>
    %189 = vector.shape_cast %188 : vector<1x1x32x96xbf16> to vector<32x96xbf16>
    %cst_91 = arith.constant dense<0.000000e+00> : vector<33x96xf32>
    %190 = tpu.matmul %187, %189, %cst_91 {dimension_numbers = #tpu.dot_dimension_numbers<[1], [0], [0], [1], [0, 0, 1, 1], [], []>} : vector<33x32xbf16>, vector<32x96xbf16>, vector<33x96xf32> -> vector<33x96xf32>
    %c0_92 = arith.constant 0 : index
    %c1_93 = arith.constant 1 : index
    %c0_94 = arith.constant 0 : index
    %c0_95 = arith.constant 0 : index
    %191 = vector.load %arg9[%c0_92, %c1_93, %c0_94, %c0_95] : memref<4x2x1x96xf32, #tpu.memory_space<vmem>>, vector<1x1x1x96xf32>
    %192 = vector.shape_cast %191 : vector<1x1x1x96xf32> to vector<1x96xf32>
    %193 = vector.broadcast %192 : vector<1x96xf32> to vector<33x96xf32>
    %194 = arith.addf %190, %193 : vector<33x96xf32>
    %195 = vector.extract_strided_slice %194 {offsets = [0, 0], sizes = [33, 8], strides = [1, 1]} : vector<33x96xf32> to vector<33x8xf32>
    %196 = arith.truncf %195 : vector<33x8xf32> to vector<33x8xbf16>
    %197 = vector.extract_strided_slice %194 {offsets = [0, 32], sizes = [33, 8], strides = [1, 1]} : vector<33x96xf32> to vector<33x8xf32>
    %198 = arith.truncf %197 : vector<33x8xf32> to vector<33x8xbf16>
    %199 = vector.extract_strided_slice %194 {offsets = [0, 64], sizes = [33, 8], strides = [1, 1]} : vector<33x96xf32> to vector<33x8xf32>
    %200 = arith.truncf %199 : vector<33x8xf32> to vector<33x8xbf16>
    %cst_96 = arith.constant dense<0.000000e+00> : vector<33x33xf32>
    %201 = tpu.matmul %196, %198, %cst_96 {dimension_numbers = #tpu.dot_dimension_numbers<[1], [1], [0], [0], [0, 0, 1, 0], [], []>} : vector<33x8xbf16>, vector<33x8xbf16>, vector<33x33xf32> -> vector<33x33xf32>
    %cst_97 = arith.constant 0.353553385 : f32
    %202 = vector.broadcast %cst_97 : f32 to vector<33x33xf32>
    %203 = arith.mulf %201, %202 : vector<33x33xf32>
    %cst_98 = arith.constant dense<0xFF800000> : vector<33xf32>
    %204 = vector.multi_reduction <maximumf>, %203, %cst_98 [1] : vector<33x33xf32> to vector<33xf32>
    %205 = vector.shape_cast %204 : vector<33xf32> to vector<33x1xf32>
    %206 = vector.broadcast %205 : vector<33x1xf32> to vector<33x33xf32>
    %207 = arith.subf %203, %206 : vector<33x33xf32>
    %208 = math.exp %207 : vector<33x33xf32>
    %cst_99 = arith.constant dense<0.000000e+00> : vector<33xf32>
    %209 = vector.multi_reduction <add>, %208, %cst_99 [1] : vector<33x33xf32> to vector<33xf32>
    %210 = vector.shape_cast %209 : vector<33xf32> to vector<33x1xf32>
    %211 = vector.broadcast %210 : vector<33x1xf32> to vector<33x33xf32>
    %212 = arith.divf %208, %211 : vector<33x33xf32>
    %213 = arith.truncf %212 : vector<33x33xf32> to vector<33x33xbf16>
    %cst_100 = arith.constant dense<0.000000e+00> : vector<33x8xf32>
    %214 = tpu.matmul %213, %200, %cst_100 {dimension_numbers = #tpu.dot_dimension_numbers<[1], [0], [0], [1], [0, 0, 1, 1], [], []>} : vector<33x33xbf16>, vector<33x8xbf16>, vector<33x8xf32> -> vector<33x8xf32>
    %215 = vector.extract_strided_slice %194 {offsets = [0, 8], sizes = [33, 8], strides = [1, 1]} : vector<33x96xf32> to vector<33x8xf32>
    %216 = arith.truncf %215 : vector<33x8xf32> to vector<33x8xbf16>
    %217 = vector.extract_strided_slice %194 {offsets = [0, 40], sizes = [33, 8], strides = [1, 1]} : vector<33x96xf32> to vector<33x8xf32>
    %218 = arith.truncf %217 : vector<33x8xf32> to vector<33x8xbf16>
    %219 = vector.extract_strided_slice %194 {offsets = [0, 72], sizes = [33, 8], strides = [1, 1]} : vector<33x96xf32> to vector<33x8xf32>
    %220 = arith.truncf %219 : vector<33x8xf32> to vector<33x8xbf16>
    %cst_101 = arith.constant dense<0.000000e+00> : vector<33x33xf32>
    %221 = tpu.matmul %216, %218, %cst_101 {dimension_numbers = #tpu.dot_dimension_numbers<[1], [1], [0], [0], [0, 0, 1, 0], [], []>} : vector<33x8xbf16>, vector<33x8xbf16>, vector<33x33xf32> -> vector<33x33xf32>
    %cst_102 = arith.constant 0.353553385 : f32
    %222 = vector.broadcast %cst_102 : f32 to vector<33x33xf32>
    %223 = arith.mulf %221, %222 : vector<33x33xf32>
    %cst_103 = arith.constant dense<0xFF800000> : vector<33xf32>
    %224 = vector.multi_reduction <maximumf>, %223, %cst_103 [1] : vector<33x33xf32> to vector<33xf32>
    %225 = vector.shape_cast %224 : vector<33xf32> to vector<33x1xf32>
    %226 = vector.broadcast %225 : vector<33x1xf32> to vector<33x33xf32>
    %227 = arith.subf %223, %226 : vector<33x33xf32>
    %228 = math.exp %227 : vector<33x33xf32>
    %cst_104 = arith.constant dense<0.000000e+00> : vector<33xf32>
    %229 = vector.multi_reduction <add>, %228, %cst_104 [1] : vector<33x33xf32> to vector<33xf32>
    %230 = vector.shape_cast %229 : vector<33xf32> to vector<33x1xf32>
    %231 = vector.broadcast %230 : vector<33x1xf32> to vector<33x33xf32>
    %232 = arith.divf %228, %231 : vector<33x33xf32>
    %233 = arith.truncf %232 : vector<33x33xf32> to vector<33x33xbf16>
    %cst_105 = arith.constant dense<0.000000e+00> : vector<33x8xf32>
    %234 = tpu.matmul %233, %220, %cst_105 {dimension_numbers = #tpu.dot_dimension_numbers<[1], [0], [0], [1], [0, 0, 1, 1], [], []>} : vector<33x33xbf16>, vector<33x8xbf16>, vector<33x8xf32> -> vector<33x8xf32>
    %235 = vector.extract_strided_slice %194 {offsets = [0, 16], sizes = [33, 8], strides = [1, 1]} : vector<33x96xf32> to vector<33x8xf32>
    %236 = arith.truncf %235 : vector<33x8xf32> to vector<33x8xbf16>
    %237 = vector.extract_strided_slice %194 {offsets = [0, 48], sizes = [33, 8], strides = [1, 1]} : vector<33x96xf32> to vector<33x8xf32>
    %238 = arith.truncf %237 : vector<33x8xf32> to vector<33x8xbf16>
    %239 = vector.extract_strided_slice %194 {offsets = [0, 80], sizes = [33, 8], strides = [1, 1]} : vector<33x96xf32> to vector<33x8xf32>
    %240 = arith.truncf %239 : vector<33x8xf32> to vector<33x8xbf16>
    %cst_106 = arith.constant dense<0.000000e+00> : vector<33x33xf32>
    %241 = tpu.matmul %236, %238, %cst_106 {dimension_numbers = #tpu.dot_dimension_numbers<[1], [1], [0], [0], [0, 0, 1, 0], [], []>} : vector<33x8xbf16>, vector<33x8xbf16>, vector<33x33xf32> -> vector<33x33xf32>
    %cst_107 = arith.constant 0.353553385 : f32
    %242 = vector.broadcast %cst_107 : f32 to vector<33x33xf32>
    %243 = arith.mulf %241, %242 : vector<33x33xf32>
    %cst_108 = arith.constant dense<0xFF800000> : vector<33xf32>
    %244 = vector.multi_reduction <maximumf>, %243, %cst_108 [1] : vector<33x33xf32> to vector<33xf32>
    %245 = vector.shape_cast %244 : vector<33xf32> to vector<33x1xf32>
    %246 = vector.broadcast %245 : vector<33x1xf32> to vector<33x33xf32>
    %247 = arith.subf %243, %246 : vector<33x33xf32>
    %248 = math.exp %247 : vector<33x33xf32>
    %cst_109 = arith.constant dense<0.000000e+00> : vector<33xf32>
    %249 = vector.multi_reduction <add>, %248, %cst_109 [1] : vector<33x33xf32> to vector<33xf32>
    %250 = vector.shape_cast %249 : vector<33xf32> to vector<33x1xf32>
    %251 = vector.broadcast %250 : vector<33x1xf32> to vector<33x33xf32>
    %252 = arith.divf %248, %251 : vector<33x33xf32>
    %253 = arith.truncf %252 : vector<33x33xf32> to vector<33x33xbf16>
    %cst_110 = arith.constant dense<0.000000e+00> : vector<33x8xf32>
    %254 = tpu.matmul %253, %240, %cst_110 {dimension_numbers = #tpu.dot_dimension_numbers<[1], [0], [0], [1], [0, 0, 1, 1], [], []>} : vector<33x33xbf16>, vector<33x8xbf16>, vector<33x8xf32> -> vector<33x8xf32>
    %255 = vector.extract_strided_slice %194 {offsets = [0, 24], sizes = [33, 8], strides = [1, 1]} : vector<33x96xf32> to vector<33x8xf32>
    %256 = arith.truncf %255 : vector<33x8xf32> to vector<33x8xbf16>
    %257 = vector.extract_strided_slice %194 {offsets = [0, 56], sizes = [33, 8], strides = [1, 1]} : vector<33x96xf32> to vector<33x8xf32>
    %258 = arith.truncf %257 : vector<33x8xf32> to vector<33x8xbf16>
    %259 = vector.extract_strided_slice %194 {offsets = [0, 88], sizes = [33, 8], strides = [1, 1]} : vector<33x96xf32> to vector<33x8xf32>
    %260 = arith.truncf %259 : vector<33x8xf32> to vector<33x8xbf16>
    %cst_111 = arith.constant dense<0.000000e+00> : vector<33x33xf32>
    %261 = tpu.matmul %256, %258, %cst_111 {dimension_numbers = #tpu.dot_dimension_numbers<[1], [1], [0], [0], [0, 0, 1, 0], [], []>} : vector<33x8xbf16>, vector<33x8xbf16>, vector<33x33xf32> -> vector<33x33xf32>
    %cst_112 = arith.constant 0.353553385 : f32
    %262 = vector.broadcast %cst_112 : f32 to vector<33x33xf32>
    %263 = arith.mulf %261, %262 : vector<33x33xf32>
    %cst_113 = arith.constant dense<0xFF800000> : vector<33xf32>
    %264 = vector.multi_reduction <maximumf>, %263, %cst_113 [1] : vector<33x33xf32> to vector<33xf32>
    %265 = vector.shape_cast %264 : vector<33xf32> to vector<33x1xf32>
    %266 = vector.broadcast %265 : vector<33x1xf32> to vector<33x33xf32>
    %267 = arith.subf %263, %266 : vector<33x33xf32>
    %268 = math.exp %267 : vector<33x33xf32>
    %cst_114 = arith.constant dense<0.000000e+00> : vector<33xf32>
    %269 = vector.multi_reduction <add>, %268, %cst_114 [1] : vector<33x33xf32> to vector<33xf32>
    %270 = vector.shape_cast %269 : vector<33xf32> to vector<33x1xf32>
    %271 = vector.broadcast %270 : vector<33x1xf32> to vector<33x33xf32>
    %272 = arith.divf %268, %271 : vector<33x33xf32>
    %273 = arith.truncf %272 : vector<33x33xf32> to vector<33x33xbf16>
    %cst_115 = arith.constant dense<0.000000e+00> : vector<33x8xf32>
    %274 = tpu.matmul %273, %260, %cst_115 {dimension_numbers = #tpu.dot_dimension_numbers<[1], [0], [0], [1], [0, 0, 1, 1], [], []>} : vector<33x33xbf16>, vector<33x8xbf16>, vector<33x8xf32> -> vector<33x8xf32>
    %275 = tpu.concatenate %214, %234, %254, %274 in 1 : vector<33x8xf32>, vector<33x8xf32>, vector<33x8xf32>, vector<33x8xf32> -> vector<33x32xf32>
    %276 = arith.truncf %275 : vector<33x32xf32> to vector<33x32xbf16>
    %c0_116 = arith.constant 0 : index
    %c1_117 = arith.constant 1 : index
    %c0_118 = arith.constant 0 : index
    %c0_119 = arith.constant 0 : index
    %277 = vector.load %arg10[%c0_116, %c1_117, %c0_118, %c0_119] : memref<4x2x32x32xbf16, #tpu.memory_space<vmem>>, vector<1x1x32x32xbf16>
    %278 = vector.shape_cast %277 : vector<1x1x32x32xbf16> to vector<32x32xbf16>
    %cst_120 = arith.constant dense<0.000000e+00> : vector<33x32xf32>
    %279 = tpu.matmul %276, %278, %cst_120 {dimension_numbers = #tpu.dot_dimension_numbers<[1], [0], [0], [1], [0, 0, 1, 1], [], []>} : vector<33x32xbf16>, vector<32x32xbf16>, vector<33x32xf32> -> vector<33x32xf32>
    %280 = vector.extract_strided_slice %186 {offsets = [0, 0], sizes = [1, 32], strides = [1, 1]} : vector<6x32xf32> to vector<1x32xf32>
    %281 = vector.broadcast %280 : vector<1x32xf32> to vector<33x32xf32>
    %282 = arith.addf %279, %281 : vector<33x32xf32>
    %283 = arith.addf %184, %282 : vector<33x32xf32>
    %284 = vector.extract_strided_slice %186 {offsets = [1, 0], sizes = [1, 32], strides = [1, 1]} : vector<6x32xf32> to vector<1x32xf32>
    %285 = vector.extract_strided_slice %186 {offsets = [2, 0], sizes = [1, 32], strides = [1, 1]} : vector<6x32xf32> to vector<1x32xf32>
    %cst_121 = arith.constant dense<0.000000e+00> : vector<33xf32>
    %286 = vector.multi_reduction <add>, %283, %cst_121 [1] : vector<33x32xf32> to vector<33xf32>
    %287 = vector.shape_cast %286 : vector<33xf32> to vector<33x1xf32>
    %cst_122 = arith.constant 3.200000e+01 : f32
    %288 = vector.broadcast %cst_122 : f32 to vector<33x1xf32>
    %289 = arith.divf %287, %288 : vector<33x1xf32>
    %290 = vector.broadcast %289 : vector<33x1xf32> to vector<33x32xf32>
    %291 = arith.subf %283, %290 : vector<33x32xf32>
    %292 = arith.mulf %291, %291 : vector<33x32xf32>
    %cst_123 = arith.constant dense<0.000000e+00> : vector<33xf32>
    %293 = vector.multi_reduction <add>, %292, %cst_123 [1] : vector<33x32xf32> to vector<33xf32>
    %294 = vector.shape_cast %293 : vector<33xf32> to vector<33x1xf32>
    %cst_124 = arith.constant 3.200000e+01 : f32
    %295 = vector.broadcast %cst_124 : f32 to vector<33x1xf32>
    %296 = arith.divf %294, %295 : vector<33x1xf32>
    %cst_125 = arith.constant 9.99999974E-6 : f32
    %297 = vector.broadcast %cst_125 : f32 to vector<33x1xf32>
    %298 = arith.addf %296, %297 : vector<33x1xf32>
    %299 = math.rsqrt %298 : vector<33x1xf32>
    %300 = vector.broadcast %299 : vector<33x1xf32> to vector<33x32xf32>
    %301 = arith.mulf %291, %300 : vector<33x32xf32>
    %302 = vector.broadcast %284 : vector<1x32xf32> to vector<33x32xf32>
    %303 = arith.mulf %301, %302 : vector<33x32xf32>
    %304 = vector.broadcast %285 : vector<1x32xf32> to vector<33x32xf32>
    %305 = arith.addf %303, %304 : vector<33x32xf32>
    %306 = arith.truncf %305 : vector<33x32xf32> to vector<33x32xbf16>
    %c0_126 = arith.constant 0 : index
    %c1_127 = arith.constant 1 : index
    %c0_128 = arith.constant 0 : index
    %c0_129 = arith.constant 0 : index
    %307 = vector.load %arg12[%c0_126, %c1_127, %c0_128, %c0_129] : memref<4x2x32x64xbf16, #tpu.memory_space<vmem>>, vector<1x1x32x64xbf16>
    %308 = vector.shape_cast %307 : vector<1x1x32x64xbf16> to vector<32x64xbf16>
    %cst_130 = arith.constant dense<0.000000e+00> : vector<33x64xf32>
    %309 = tpu.matmul %306, %308, %cst_130 {dimension_numbers = #tpu.dot_dimension_numbers<[1], [0], [0], [1], [0, 0, 1, 1], [], []>} : vector<33x32xbf16>, vector<32x64xbf16>, vector<33x64xf32> -> vector<33x64xf32>
    %c0_131 = arith.constant 0 : index
    %c1_132 = arith.constant 1 : index
    %c0_133 = arith.constant 0 : index
    %c0_134 = arith.constant 0 : index
    %310 = vector.load %arg13[%c0_131, %c1_132, %c0_133, %c0_134] : memref<4x2x1x64xf32, #tpu.memory_space<vmem>>, vector<1x1x1x64xf32>
    %311 = vector.shape_cast %310 : vector<1x1x1x64xf32> to vector<1x64xf32>
    %312 = vector.broadcast %311 : vector<1x64xf32> to vector<33x64xf32>
    %313 = arith.addf %309, %312 : vector<33x64xf32>
    %cst_135 = arith.constant 0.000000e+00 : f32
    %314 = vector.broadcast %cst_135 : f32 to vector<33x64xf32>
    %315 = arith.maximumf %313, %314 : vector<33x64xf32>
    %316 = arith.truncf %315 : vector<33x64xf32> to vector<33x64xbf16>
    %c0_136 = arith.constant 0 : index
    %c1_137 = arith.constant 1 : index
    %c0_138 = arith.constant 0 : index
    %c0_139 = arith.constant 0 : index
    %317 = vector.load %arg14[%c0_136, %c1_137, %c0_138, %c0_139] : memref<4x2x64x32xbf16, #tpu.memory_space<vmem>>, vector<1x1x64x32xbf16>
    %318 = vector.shape_cast %317 : vector<1x1x64x32xbf16> to vector<64x32xbf16>
    %cst_140 = arith.constant dense<0.000000e+00> : vector<33x32xf32>
    %319 = tpu.matmul %316, %318, %cst_140 {dimension_numbers = #tpu.dot_dimension_numbers<[1], [0], [0], [1], [0, 0, 1, 1], [], []>} : vector<33x64xbf16>, vector<64x32xbf16>, vector<33x32xf32> -> vector<33x32xf32>
    %320 = vector.extract_strided_slice %186 {offsets = [3, 0], sizes = [1, 32], strides = [1, 1]} : vector<6x32xf32> to vector<1x32xf32>
    %321 = vector.broadcast %320 : vector<1x32xf32> to vector<33x32xf32>
    %322 = arith.addf %319, %321 : vector<33x32xf32>
    %323 = arith.addf %305, %322 : vector<33x32xf32>
    %324 = vector.extract_strided_slice %186 {offsets = [4, 0], sizes = [1, 32], strides = [1, 1]} : vector<6x32xf32> to vector<1x32xf32>
    %325 = vector.extract_strided_slice %186 {offsets = [5, 0], sizes = [1, 32], strides = [1, 1]} : vector<6x32xf32> to vector<1x32xf32>
    %cst_141 = arith.constant dense<0.000000e+00> : vector<33xf32>
    %326 = vector.multi_reduction <add>, %323, %cst_141 [1] : vector<33x32xf32> to vector<33xf32>
    %327 = vector.shape_cast %326 : vector<33xf32> to vector<33x1xf32>
    %cst_142 = arith.constant 3.200000e+01 : f32
    %328 = vector.broadcast %cst_142 : f32 to vector<33x1xf32>
    %329 = arith.divf %327, %328 : vector<33x1xf32>
    %330 = vector.broadcast %329 : vector<33x1xf32> to vector<33x32xf32>
    %331 = arith.subf %323, %330 : vector<33x32xf32>
    %332 = arith.mulf %331, %331 : vector<33x32xf32>
    %cst_143 = arith.constant dense<0.000000e+00> : vector<33xf32>
    %333 = vector.multi_reduction <add>, %332, %cst_143 [1] : vector<33x32xf32> to vector<33xf32>
    %334 = vector.shape_cast %333 : vector<33xf32> to vector<33x1xf32>
    %cst_144 = arith.constant 3.200000e+01 : f32
    %335 = vector.broadcast %cst_144 : f32 to vector<33x1xf32>
    %336 = arith.divf %334, %335 : vector<33x1xf32>
    %cst_145 = arith.constant 9.99999974E-6 : f32
    %337 = vector.broadcast %cst_145 : f32 to vector<33x1xf32>
    %338 = arith.addf %336, %337 : vector<33x1xf32>
    %339 = math.rsqrt %338 : vector<33x1xf32>
    %340 = vector.broadcast %339 : vector<33x1xf32> to vector<33x32xf32>
    %341 = arith.mulf %331, %340 : vector<33x32xf32>
    %342 = vector.broadcast %324 : vector<1x32xf32> to vector<33x32xf32>
    %343 = arith.mulf %341, %342 : vector<33x32xf32>
    %344 = vector.broadcast %325 : vector<1x32xf32> to vector<33x32xf32>
    %345 = arith.addf %343, %344 : vector<33x32xf32>
    %346 = vector.extract_strided_slice %345 {offsets = [16, 0], sizes = [17, 32], strides = [1, 1]} : vector<33x32xf32> to vector<17x32xf32>
    %347 = arith.truncf %346 : vector<17x32xf32> to vector<17x32xbf16>
    %c0_146 = arith.constant 0 : index
    %c0_147 = arith.constant 0 : index
    %c0_148 = arith.constant 0 : index
    %348 = vector.load %arg15[%c0_146, %c0_147, %c0_148] : memref<4x32x72xbf16, #tpu.memory_space<vmem>>, vector<1x32x72xbf16>
    %349 = vector.shape_cast %348 : vector<1x32x72xbf16> to vector<32x72xbf16>
    %cst_149 = arith.constant dense<0.000000e+00> : vector<17x72xf32>
    %350 = tpu.matmul %347, %349, %cst_149 {dimension_numbers = #tpu.dot_dimension_numbers<[1], [0], [0], [1], [0, 0, 1, 1], [], []>} : vector<17x32xbf16>, vector<32x72xbf16>, vector<17x72xf32> -> vector<17x72xf32>
    %c0_150 = arith.constant 0 : index
    %c0_151 = arith.constant 0 : index
    %c0_152 = arith.constant 0 : index
    %351 = vector.load %arg16[%c0_150, %c0_151, %c0_152] : memref<4x17x72xf32, #tpu.memory_space<vmem>>, vector<1x17x72xf32>
    %352 = vector.shape_cast %351 : vector<1x17x72xf32> to vector<17x72xf32>
    %353 = arith.addf %350, %352 : vector<17x72xf32>
    %354 = vector.extract_strided_slice %353 {offsets = [0, 0], sizes = [8, 32], strides = [1, 1]} : vector<17x72xf32> to vector<8x32xf32>
    %355 = arith.addf %5, %354 : vector<8x32xf32>
    %356 = vector.extract_strided_slice %353 {offsets = [8, 32], sizes = [8, 32], strides = [1, 1]} : vector<17x72xf32> to vector<8x32xf32>
    %357 = arith.addf %6, %356 : vector<8x32xf32>
    %358 = vector.extract_strided_slice %353 {offsets = [16, 64], sizes = [1, 8], strides = [1, 1]} : vector<17x72xf32> to vector<1x8xf32>
    %359 = arith.addf %7, %358 : vector<1x8xf32>
    %360 = vector.extract_strided_slice %355 {offsets = [0, 0], sizes = [8, 16], strides = [1, 1]} : vector<8x32xf32> to vector<8x16xf32>
    %361 = vector.extract_strided_slice %355 {offsets = [0, 16], sizes = [8, 16], strides = [1, 1]} : vector<8x32xf32> to vector<8x16xf32>
    %362 = vector.extract_strided_slice %357 {offsets = [0, 0], sizes = [8, 16], strides = [1, 1]} : vector<8x32xf32> to vector<8x16xf32>
    %363 = vector.extract_strided_slice %357 {offsets = [0, 16], sizes = [8, 16], strides = [1, 1]} : vector<8x32xf32> to vector<8x16xf32>
    %364 = arith.mulf %360, %360 : vector<8x16xf32>
    %365 = arith.mulf %361, %361 : vector<8x16xf32>
    %366 = arith.addf %364, %365 : vector<8x16xf32>
    %cst_153 = arith.constant 9.99999993E-9 : f32
    %367 = vector.broadcast %cst_153 : f32 to vector<8x16xf32>
    %368 = arith.addf %366, %367 : vector<8x16xf32>
    %369 = math.rsqrt %368 : vector<8x16xf32>
    %370 = arith.mulf %362, %362 : vector<8x16xf32>
    %371 = arith.mulf %363, %363 : vector<8x16xf32>
    %372 = arith.addf %370, %371 : vector<8x16xf32>
    %cst_154 = arith.constant 9.99999993E-9 : f32
    %373 = vector.broadcast %cst_154 : f32 to vector<8x16xf32>
    %374 = arith.addf %372, %373 : vector<8x16xf32>
    %375 = math.rsqrt %374 : vector<8x16xf32>
    %376 = arith.mulf %360, %369 : vector<8x16xf32>
    %377 = arith.mulf %361, %369 : vector<8x16xf32>
    %378 = tpu.concatenate %376, %377 in 1 : vector<8x16xf32>, vector<8x16xf32> -> vector<8x32xf32>
    %379 = arith.mulf %362, %375 : vector<8x16xf32>
    %380 = arith.mulf %363, %375 : vector<8x16xf32>
    %381 = tpu.concatenate %379, %380 in 1 : vector<8x16xf32>, vector<8x16xf32> -> vector<8x32xf32>
    %cst_155 = arith.constant 0.000000e+00 : f32
    %382 = vector.broadcast %cst_155 : f32 to vector<8x40xf32>
    %383 = tpu.concatenate %378, %382 in 1 : vector<8x32xf32>, vector<8x40xf32> -> vector<8x72xf32>
    %cst_156 = arith.constant 0.000000e+00 : f32
    %384 = vector.broadcast %cst_156 : f32 to vector<8x32xf32>
    %cst_157 = arith.constant 0.000000e+00 : f32
    %385 = vector.broadcast %cst_157 : f32 to vector<8x8xf32>
    %386 = tpu.concatenate %384, %381, %385 in 1 : vector<8x32xf32>, vector<8x32xf32>, vector<8x8xf32> -> vector<8x72xf32>
    %cst_158 = arith.constant 0.000000e+00 : f32
    %387 = vector.broadcast %cst_158 : f32 to vector<1x64xf32>
    %388 = tpu.concatenate %387, %359 in 1 : vector<1x64xf32>, vector<1x8xf32> -> vector<1x72xf32>
    %389 = tpu.concatenate %383, %386, %388 in 0 : vector<8x72xf32>, vector<8x72xf32>, vector<1x72xf32> -> vector<17x72xf32>
    %390 = arith.truncf %389 : vector<17x72xf32> to vector<17x72xbf16>
    %c1_159 = arith.constant 1 : index
    %c0_160 = arith.constant 0 : index
    %c0_161 = arith.constant 0 : index
    %391 = vector.load %arg3[%c1_159, %c0_160, %c0_161] : memref<4x72x32xbf16, #tpu.memory_space<vmem>>, vector<1x72x32xbf16>
    %392 = vector.shape_cast %391 : vector<1x72x32xbf16> to vector<72x32xbf16>
    %cst_162 = arith.constant dense<0.000000e+00> : vector<17x32xf32>
    %393 = tpu.matmul %390, %392, %cst_162 {dimension_numbers = #tpu.dot_dimension_numbers<[1], [0], [0], [1], [0, 0, 1, 1], [], []>} : vector<17x72xbf16>, vector<72x32xbf16>, vector<17x32xf32> -> vector<17x32xf32>
    %394 = tpu.concatenate %4, %393 in 0 : vector<16x32xf32>, vector<17x32xf32> -> vector<33x32xf32>
    %c1_163 = arith.constant 1 : index
    %c0_164 = arith.constant 0 : index
    %c0_165 = arith.constant 0 : index
    %395 = vector.load %arg4[%c1_163, %c0_164, %c0_165] : memref<4x33x32xf32, #tpu.memory_space<vmem>>, vector<1x33x32xf32>
    %396 = vector.shape_cast %395 : vector<1x33x32xf32> to vector<33x32xf32>
    %397 = arith.addf %394, %396 : vector<33x32xf32>
    %c1_166 = arith.constant 1 : index
    %c0_167 = arith.constant 0 : index
    %c0_168 = arith.constant 0 : index
    %c0_169 = arith.constant 0 : index
    %398 = vector.load %arg11[%c1_166, %c0_167, %c0_168, %c0_169] : memref<4x2x6x32xf32, #tpu.memory_space<vmem>>, vector<1x1x6x32xf32>
    %399 = vector.shape_cast %398 : vector<1x1x6x32xf32> to vector<6x32xf32>
    %400 = arith.truncf %397 : vector<33x32xf32> to vector<33x32xbf16>
    %c1_170 = arith.constant 1 : index
    %c0_171 = arith.constant 0 : index
    %c0_172 = arith.constant 0 : index
    %c0_173 = arith.constant 0 : index
    %401 = vector.load %arg8[%c1_170, %c0_171, %c0_172, %c0_173] : memref<4x2x32x96xbf16, #tpu.memory_space<vmem>>, vector<1x1x32x96xbf16>
    %402 = vector.shape_cast %401 : vector<1x1x32x96xbf16> to vector<32x96xbf16>
    %cst_174 = arith.constant dense<0.000000e+00> : vector<33x96xf32>
    %403 = tpu.matmul %400, %402, %cst_174 {dimension_numbers = #tpu.dot_dimension_numbers<[1], [0], [0], [1], [0, 0, 1, 1], [], []>} : vector<33x32xbf16>, vector<32x96xbf16>, vector<33x96xf32> -> vector<33x96xf32>
    %c1_175 = arith.constant 1 : index
    %c0_176 = arith.constant 0 : index
    %c0_177 = arith.constant 0 : index
    %c0_178 = arith.constant 0 : index
    %404 = vector.load %arg9[%c1_175, %c0_176, %c0_177, %c0_178] : memref<4x2x1x96xf32, #tpu.memory_space<vmem>>, vector<1x1x1x96xf32>
    %405 = vector.shape_cast %404 : vector<1x1x1x96xf32> to vector<1x96xf32>
    %406 = vector.broadcast %405 : vector<1x96xf32> to vector<33x96xf32>
    %407 = arith.addf %403, %406 : vector<33x96xf32>
    %408 = vector.extract_strided_slice %407 {offsets = [0, 0], sizes = [33, 8], strides = [1, 1]} : vector<33x96xf32> to vector<33x8xf32>
    %409 = arith.truncf %408 : vector<33x8xf32> to vector<33x8xbf16>
    %410 = vector.extract_strided_slice %407 {offsets = [0, 32], sizes = [33, 8], strides = [1, 1]} : vector<33x96xf32> to vector<33x8xf32>
    %411 = arith.truncf %410 : vector<33x8xf32> to vector<33x8xbf16>
    %412 = vector.extract_strided_slice %407 {offsets = [0, 64], sizes = [33, 8], strides = [1, 1]} : vector<33x96xf32> to vector<33x8xf32>
    %413 = arith.truncf %412 : vector<33x8xf32> to vector<33x8xbf16>
    %cst_179 = arith.constant dense<0.000000e+00> : vector<33x33xf32>
    %414 = tpu.matmul %409, %411, %cst_179 {dimension_numbers = #tpu.dot_dimension_numbers<[1], [1], [0], [0], [0, 0, 1, 0], [], []>} : vector<33x8xbf16>, vector<33x8xbf16>, vector<33x33xf32> -> vector<33x33xf32>
    %cst_180 = arith.constant 0.353553385 : f32
    %415 = vector.broadcast %cst_180 : f32 to vector<33x33xf32>
    %416 = arith.mulf %414, %415 : vector<33x33xf32>
    %cst_181 = arith.constant dense<0xFF800000> : vector<33xf32>
    %417 = vector.multi_reduction <maximumf>, %416, %cst_181 [1] : vector<33x33xf32> to vector<33xf32>
    %418 = vector.shape_cast %417 : vector<33xf32> to vector<33x1xf32>
    %419 = vector.broadcast %418 : vector<33x1xf32> to vector<33x33xf32>
    %420 = arith.subf %416, %419 : vector<33x33xf32>
    %421 = math.exp %420 : vector<33x33xf32>
    %cst_182 = arith.constant dense<0.000000e+00> : vector<33xf32>
    %422 = vector.multi_reduction <add>, %421, %cst_182 [1] : vector<33x33xf32> to vector<33xf32>
    %423 = vector.shape_cast %422 : vector<33xf32> to vector<33x1xf32>
    %424 = vector.broadcast %423 : vector<33x1xf32> to vector<33x33xf32>
    %425 = arith.divf %421, %424 : vector<33x33xf32>
    %426 = arith.truncf %425 : vector<33x33xf32> to vector<33x33xbf16>
    %cst_183 = arith.constant dense<0.000000e+00> : vector<33x8xf32>
    %427 = tpu.matmul %426, %413, %cst_183 {dimension_numbers = #tpu.dot_dimension_numbers<[1], [0], [0], [1], [0, 0, 1, 1], [], []>} : vector<33x33xbf16>, vector<33x8xbf16>, vector<33x8xf32> -> vector<33x8xf32>
    %428 = vector.extract_strided_slice %407 {offsets = [0, 8], sizes = [33, 8], strides = [1, 1]} : vector<33x96xf32> to vector<33x8xf32>
    %429 = arith.truncf %428 : vector<33x8xf32> to vector<33x8xbf16>
    %430 = vector.extract_strided_slice %407 {offsets = [0, 40], sizes = [33, 8], strides = [1, 1]} : vector<33x96xf32> to vector<33x8xf32>
    %431 = arith.truncf %430 : vector<33x8xf32> to vector<33x8xbf16>
    %432 = vector.extract_strided_slice %407 {offsets = [0, 72], sizes = [33, 8], strides = [1, 1]} : vector<33x96xf32> to vector<33x8xf32>
    %433 = arith.truncf %432 : vector<33x8xf32> to vector<33x8xbf16>
    %cst_184 = arith.constant dense<0.000000e+00> : vector<33x33xf32>
    %434 = tpu.matmul %429, %431, %cst_184 {dimension_numbers = #tpu.dot_dimension_numbers<[1], [1], [0], [0], [0, 0, 1, 0], [], []>} : vector<33x8xbf16>, vector<33x8xbf16>, vector<33x33xf32> -> vector<33x33xf32>
    %cst_185 = arith.constant 0.353553385 : f32
    %435 = vector.broadcast %cst_185 : f32 to vector<33x33xf32>
    %436 = arith.mulf %434, %435 : vector<33x33xf32>
    %cst_186 = arith.constant dense<0xFF800000> : vector<33xf32>
    %437 = vector.multi_reduction <maximumf>, %436, %cst_186 [1] : vector<33x33xf32> to vector<33xf32>
    %438 = vector.shape_cast %437 : vector<33xf32> to vector<33x1xf32>
    %439 = vector.broadcast %438 : vector<33x1xf32> to vector<33x33xf32>
    %440 = arith.subf %436, %439 : vector<33x33xf32>
    %441 = math.exp %440 : vector<33x33xf32>
    %cst_187 = arith.constant dense<0.000000e+00> : vector<33xf32>
    %442 = vector.multi_reduction <add>, %441, %cst_187 [1] : vector<33x33xf32> to vector<33xf32>
    %443 = vector.shape_cast %442 : vector<33xf32> to vector<33x1xf32>
    %444 = vector.broadcast %443 : vector<33x1xf32> to vector<33x33xf32>
    %445 = arith.divf %441, %444 : vector<33x33xf32>
    %446 = arith.truncf %445 : vector<33x33xf32> to vector<33x33xbf16>
    %cst_188 = arith.constant dense<0.000000e+00> : vector<33x8xf32>
    %447 = tpu.matmul %446, %433, %cst_188 {dimension_numbers = #tpu.dot_dimension_numbers<[1], [0], [0], [1], [0, 0, 1, 1], [], []>} : vector<33x33xbf16>, vector<33x8xbf16>, vector<33x8xf32> -> vector<33x8xf32>
    %448 = vector.extract_strided_slice %407 {offsets = [0, 16], sizes = [33, 8], strides = [1, 1]} : vector<33x96xf32> to vector<33x8xf32>
    %449 = arith.truncf %448 : vector<33x8xf32> to vector<33x8xbf16>
    %450 = vector.extract_strided_slice %407 {offsets = [0, 48], sizes = [33, 8], strides = [1, 1]} : vector<33x96xf32> to vector<33x8xf32>
    %451 = arith.truncf %450 : vector<33x8xf32> to vector<33x8xbf16>
    %452 = vector.extract_strided_slice %407 {offsets = [0, 80], sizes = [33, 8], strides = [1, 1]} : vector<33x96xf32> to vector<33x8xf32>
    %453 = arith.truncf %452 : vector<33x8xf32> to vector<33x8xbf16>
    %cst_189 = arith.constant dense<0.000000e+00> : vector<33x33xf32>
    %454 = tpu.matmul %449, %451, %cst_189 {dimension_numbers = #tpu.dot_dimension_numbers<[1], [1], [0], [0], [0, 0, 1, 0], [], []>} : vector<33x8xbf16>, vector<33x8xbf16>, vector<33x33xf32> -> vector<33x33xf32>
    %cst_190 = arith.constant 0.353553385 : f32
    %455 = vector.broadcast %cst_190 : f32 to vector<33x33xf32>
    %456 = arith.mulf %454, %455 : vector<33x33xf32>
    %cst_191 = arith.constant dense<0xFF800000> : vector<33xf32>
    %457 = vector.multi_reduction <maximumf>, %456, %cst_191 [1] : vector<33x33xf32> to vector<33xf32>
    %458 = vector.shape_cast %457 : vector<33xf32> to vector<33x1xf32>
    %459 = vector.broadcast %458 : vector<33x1xf32> to vector<33x33xf32>
    %460 = arith.subf %456, %459 : vector<33x33xf32>
    %461 = math.exp %460 : vector<33x33xf32>
    %cst_192 = arith.constant dense<0.000000e+00> : vector<33xf32>
    %462 = vector.multi_reduction <add>, %461, %cst_192 [1] : vector<33x33xf32> to vector<33xf32>
    %463 = vector.shape_cast %462 : vector<33xf32> to vector<33x1xf32>
    %464 = vector.broadcast %463 : vector<33x1xf32> to vector<33x33xf32>
    %465 = arith.divf %461, %464 : vector<33x33xf32>
    %466 = arith.truncf %465 : vector<33x33xf32> to vector<33x33xbf16>
    %cst_193 = arith.constant dense<0.000000e+00> : vector<33x8xf32>
    %467 = tpu.matmul %466, %453, %cst_193 {dimension_numbers = #tpu.dot_dimension_numbers<[1], [0], [0], [1], [0, 0, 1, 1], [], []>} : vector<33x33xbf16>, vector<33x8xbf16>, vector<33x8xf32> -> vector<33x8xf32>
    %468 = vector.extract_strided_slice %407 {offsets = [0, 24], sizes = [33, 8], strides = [1, 1]} : vector<33x96xf32> to vector<33x8xf32>
    %469 = arith.truncf %468 : vector<33x8xf32> to vector<33x8xbf16>
    %470 = vector.extract_strided_slice %407 {offsets = [0, 56], sizes = [33, 8], strides = [1, 1]} : vector<33x96xf32> to vector<33x8xf32>
    %471 = arith.truncf %470 : vector<33x8xf32> to vector<33x8xbf16>
    %472 = vector.extract_strided_slice %407 {offsets = [0, 88], sizes = [33, 8], strides = [1, 1]} : vector<33x96xf32> to vector<33x8xf32>
    %473 = arith.truncf %472 : vector<33x8xf32> to vector<33x8xbf16>
    %cst_194 = arith.constant dense<0.000000e+00> : vector<33x33xf32>
    %474 = tpu.matmul %469, %471, %cst_194 {dimension_numbers = #tpu.dot_dimension_numbers<[1], [1], [0], [0], [0, 0, 1, 0], [], []>} : vector<33x8xbf16>, vector<33x8xbf16>, vector<33x33xf32> -> vector<33x33xf32>
    %cst_195 = arith.constant 0.353553385 : f32
    %475 = vector.broadcast %cst_195 : f32 to vector<33x33xf32>
    %476 = arith.mulf %474, %475 : vector<33x33xf32>
    %cst_196 = arith.constant dense<0xFF800000> : vector<33xf32>
    %477 = vector.multi_reduction <maximumf>, %476, %cst_196 [1] : vector<33x33xf32> to vector<33xf32>
    %478 = vector.shape_cast %477 : vector<33xf32> to vector<33x1xf32>
    %479 = vector.broadcast %478 : vector<33x1xf32> to vector<33x33xf32>
    %480 = arith.subf %476, %479 : vector<33x33xf32>
    %481 = math.exp %480 : vector<33x33xf32>
    %cst_197 = arith.constant dense<0.000000e+00> : vector<33xf32>
    %482 = vector.multi_reduction <add>, %481, %cst_197 [1] : vector<33x33xf32> to vector<33xf32>
    %483 = vector.shape_cast %482 : vector<33xf32> to vector<33x1xf32>
    %484 = vector.broadcast %483 : vector<33x1xf32> to vector<33x33xf32>
    %485 = arith.divf %481, %484 : vector<33x33xf32>
    %486 = arith.truncf %485 : vector<33x33xf32> to vector<33x33xbf16>
    %cst_198 = arith.constant dense<0.000000e+00> : vector<33x8xf32>
    %487 = tpu.matmul %486, %473, %cst_198 {dimension_numbers = #tpu.dot_dimension_numbers<[1], [0], [0], [1], [0, 0, 1, 1], [], []>} : vector<33x33xbf16>, vector<33x8xbf16>, vector<33x8xf32> -> vector<33x8xf32>
    %488 = tpu.concatenate %427, %447, %467, %487 in 1 : vector<33x8xf32>, vector<33x8xf32>, vector<33x8xf32>, vector<33x8xf32> -> vector<33x32xf32>
    %489 = arith.truncf %488 : vector<33x32xf32> to vector<33x32xbf16>
    %c1_199 = arith.constant 1 : index
    %c0_200 = arith.constant 0 : index
    %c0_201 = arith.constant 0 : index
    %c0_202 = arith.constant 0 : index
    %490 = vector.load %arg10[%c1_199, %c0_200, %c0_201, %c0_202] : memref<4x2x32x32xbf16, #tpu.memory_space<vmem>>, vector<1x1x32x32xbf16>
    %491 = vector.shape_cast %490 : vector<1x1x32x32xbf16> to vector<32x32xbf16>
    %cst_203 = arith.constant dense<0.000000e+00> : vector<33x32xf32>
    %492 = tpu.matmul %489, %491, %cst_203 {dimension_numbers = #tpu.dot_dimension_numbers<[1], [0], [0], [1], [0, 0, 1, 1], [], []>} : vector<33x32xbf16>, vector<32x32xbf16>, vector<33x32xf32> -> vector<33x32xf32>
    %493 = vector.extract_strided_slice %399 {offsets = [0, 0], sizes = [1, 32], strides = [1, 1]} : vector<6x32xf32> to vector<1x32xf32>
    %494 = vector.broadcast %493 : vector<1x32xf32> to vector<33x32xf32>
    %495 = arith.addf %492, %494 : vector<33x32xf32>
    %496 = arith.addf %397, %495 : vector<33x32xf32>
    %497 = vector.extract_strided_slice %399 {offsets = [1, 0], sizes = [1, 32], strides = [1, 1]} : vector<6x32xf32> to vector<1x32xf32>
    %498 = vector.extract_strided_slice %399 {offsets = [2, 0], sizes = [1, 32], strides = [1, 1]} : vector<6x32xf32> to vector<1x32xf32>
    %cst_204 = arith.constant dense<0.000000e+00> : vector<33xf32>
    %499 = vector.multi_reduction <add>, %496, %cst_204 [1] : vector<33x32xf32> to vector<33xf32>
    %500 = vector.shape_cast %499 : vector<33xf32> to vector<33x1xf32>
    %cst_205 = arith.constant 3.200000e+01 : f32
    %501 = vector.broadcast %cst_205 : f32 to vector<33x1xf32>
    %502 = arith.divf %500, %501 : vector<33x1xf32>
    %503 = vector.broadcast %502 : vector<33x1xf32> to vector<33x32xf32>
    %504 = arith.subf %496, %503 : vector<33x32xf32>
    %505 = arith.mulf %504, %504 : vector<33x32xf32>
    %cst_206 = arith.constant dense<0.000000e+00> : vector<33xf32>
    %506 = vector.multi_reduction <add>, %505, %cst_206 [1] : vector<33x32xf32> to vector<33xf32>
    %507 = vector.shape_cast %506 : vector<33xf32> to vector<33x1xf32>
    %cst_207 = arith.constant 3.200000e+01 : f32
    %508 = vector.broadcast %cst_207 : f32 to vector<33x1xf32>
    %509 = arith.divf %507, %508 : vector<33x1xf32>
    %cst_208 = arith.constant 9.99999974E-6 : f32
    %510 = vector.broadcast %cst_208 : f32 to vector<33x1xf32>
    %511 = arith.addf %509, %510 : vector<33x1xf32>
    %512 = math.rsqrt %511 : vector<33x1xf32>
    %513 = vector.broadcast %512 : vector<33x1xf32> to vector<33x32xf32>
    %514 = arith.mulf %504, %513 : vector<33x32xf32>
    %515 = vector.broadcast %497 : vector<1x32xf32> to vector<33x32xf32>
    %516 = arith.mulf %514, %515 : vector<33x32xf32>
    %517 = vector.broadcast %498 : vector<1x32xf32> to vector<33x32xf32>
    %518 = arith.addf %516, %517 : vector<33x32xf32>
    %519 = arith.truncf %518 : vector<33x32xf32> to vector<33x32xbf16>
    %c1_209 = arith.constant 1 : index
    %c0_210 = arith.constant 0 : index
    %c0_211 = arith.constant 0 : index
    %c0_212 = arith.constant 0 : index
    %520 = vector.load %arg12[%c1_209, %c0_210, %c0_211, %c0_212] : memref<4x2x32x64xbf16, #tpu.memory_space<vmem>>, vector<1x1x32x64xbf16>
    %521 = vector.shape_cast %520 : vector<1x1x32x64xbf16> to vector<32x64xbf16>
    %cst_213 = arith.constant dense<0.000000e+00> : vector<33x64xf32>
    %522 = tpu.matmul %519, %521, %cst_213 {dimension_numbers = #tpu.dot_dimension_numbers<[1], [0], [0], [1], [0, 0, 1, 1], [], []>} : vector<33x32xbf16>, vector<32x64xbf16>, vector<33x64xf32> -> vector<33x64xf32>
    %c1_214 = arith.constant 1 : index
    %c0_215 = arith.constant 0 : index
    %c0_216 = arith.constant 0 : index
    %c0_217 = arith.constant 0 : index
    %523 = vector.load %arg13[%c1_214, %c0_215, %c0_216, %c0_217] : memref<4x2x1x64xf32, #tpu.memory_space<vmem>>, vector<1x1x1x64xf32>
    %524 = vector.shape_cast %523 : vector<1x1x1x64xf32> to vector<1x64xf32>
    %525 = vector.broadcast %524 : vector<1x64xf32> to vector<33x64xf32>
    %526 = arith.addf %522, %525 : vector<33x64xf32>
    %cst_218 = arith.constant 0.000000e+00 : f32
    %527 = vector.broadcast %cst_218 : f32 to vector<33x64xf32>
    %528 = arith.maximumf %526, %527 : vector<33x64xf32>
    %529 = arith.truncf %528 : vector<33x64xf32> to vector<33x64xbf16>
    %c1_219 = arith.constant 1 : index
    %c0_220 = arith.constant 0 : index
    %c0_221 = arith.constant 0 : index
    %c0_222 = arith.constant 0 : index
    %530 = vector.load %arg14[%c1_219, %c0_220, %c0_221, %c0_222] : memref<4x2x64x32xbf16, #tpu.memory_space<vmem>>, vector<1x1x64x32xbf16>
    %531 = vector.shape_cast %530 : vector<1x1x64x32xbf16> to vector<64x32xbf16>
    %cst_223 = arith.constant dense<0.000000e+00> : vector<33x32xf32>
    %532 = tpu.matmul %529, %531, %cst_223 {dimension_numbers = #tpu.dot_dimension_numbers<[1], [0], [0], [1], [0, 0, 1, 1], [], []>} : vector<33x64xbf16>, vector<64x32xbf16>, vector<33x32xf32> -> vector<33x32xf32>
    %533 = vector.extract_strided_slice %399 {offsets = [3, 0], sizes = [1, 32], strides = [1, 1]} : vector<6x32xf32> to vector<1x32xf32>
    %534 = vector.broadcast %533 : vector<1x32xf32> to vector<33x32xf32>
    %535 = arith.addf %532, %534 : vector<33x32xf32>
    %536 = arith.addf %518, %535 : vector<33x32xf32>
    %537 = vector.extract_strided_slice %399 {offsets = [4, 0], sizes = [1, 32], strides = [1, 1]} : vector<6x32xf32> to vector<1x32xf32>
    %538 = vector.extract_strided_slice %399 {offsets = [5, 0], sizes = [1, 32], strides = [1, 1]} : vector<6x32xf32> to vector<1x32xf32>
    %cst_224 = arith.constant dense<0.000000e+00> : vector<33xf32>
    %539 = vector.multi_reduction <add>, %536, %cst_224 [1] : vector<33x32xf32> to vector<33xf32>
    %540 = vector.shape_cast %539 : vector<33xf32> to vector<33x1xf32>
    %cst_225 = arith.constant 3.200000e+01 : f32
    %541 = vector.broadcast %cst_225 : f32 to vector<33x1xf32>
    %542 = arith.divf %540, %541 : vector<33x1xf32>
    %543 = vector.broadcast %542 : vector<33x1xf32> to vector<33x32xf32>
    %544 = arith.subf %536, %543 : vector<33x32xf32>
    %545 = arith.mulf %544, %544 : vector<33x32xf32>
    %cst_226 = arith.constant dense<0.000000e+00> : vector<33xf32>
    %546 = vector.multi_reduction <add>, %545, %cst_226 [1] : vector<33x32xf32> to vector<33xf32>
    %547 = vector.shape_cast %546 : vector<33xf32> to vector<33x1xf32>
    %cst_227 = arith.constant 3.200000e+01 : f32
    %548 = vector.broadcast %cst_227 : f32 to vector<33x1xf32>
    %549 = arith.divf %547, %548 : vector<33x1xf32>
    %cst_228 = arith.constant 9.99999974E-6 : f32
    %550 = vector.broadcast %cst_228 : f32 to vector<33x1xf32>
    %551 = arith.addf %549, %550 : vector<33x1xf32>
    %552 = math.rsqrt %551 : vector<33x1xf32>
    %553 = vector.broadcast %552 : vector<33x1xf32> to vector<33x32xf32>
    %554 = arith.mulf %544, %553 : vector<33x32xf32>
    %555 = vector.broadcast %537 : vector<1x32xf32> to vector<33x32xf32>
    %556 = arith.mulf %554, %555 : vector<33x32xf32>
    %557 = vector.broadcast %538 : vector<1x32xf32> to vector<33x32xf32>
    %558 = arith.addf %556, %557 : vector<33x32xf32>
    %c1_229 = arith.constant 1 : index
    %c1_230 = arith.constant 1 : index
    %c0_231 = arith.constant 0 : index
    %c0_232 = arith.constant 0 : index
    %559 = vector.load %arg11[%c1_229, %c1_230, %c0_231, %c0_232] : memref<4x2x6x32xf32, #tpu.memory_space<vmem>>, vector<1x1x6x32xf32>
    %560 = vector.shape_cast %559 : vector<1x1x6x32xf32> to vector<6x32xf32>
    %561 = arith.truncf %558 : vector<33x32xf32> to vector<33x32xbf16>
    %c1_233 = arith.constant 1 : index
    %c1_234 = arith.constant 1 : index
    %c0_235 = arith.constant 0 : index
    %c0_236 = arith.constant 0 : index
    %562 = vector.load %arg8[%c1_233, %c1_234, %c0_235, %c0_236] : memref<4x2x32x96xbf16, #tpu.memory_space<vmem>>, vector<1x1x32x96xbf16>
    %563 = vector.shape_cast %562 : vector<1x1x32x96xbf16> to vector<32x96xbf16>
    %cst_237 = arith.constant dense<0.000000e+00> : vector<33x96xf32>
    %564 = tpu.matmul %561, %563, %cst_237 {dimension_numbers = #tpu.dot_dimension_numbers<[1], [0], [0], [1], [0, 0, 1, 1], [], []>} : vector<33x32xbf16>, vector<32x96xbf16>, vector<33x96xf32> -> vector<33x96xf32>
    %c1_238 = arith.constant 1 : index
    %c1_239 = arith.constant 1 : index
    %c0_240 = arith.constant 0 : index
    %c0_241 = arith.constant 0 : index
    %565 = vector.load %arg9[%c1_238, %c1_239, %c0_240, %c0_241] : memref<4x2x1x96xf32, #tpu.memory_space<vmem>>, vector<1x1x1x96xf32>
    %566 = vector.shape_cast %565 : vector<1x1x1x96xf32> to vector<1x96xf32>
    %567 = vector.broadcast %566 : vector<1x96xf32> to vector<33x96xf32>
    %568 = arith.addf %564, %567 : vector<33x96xf32>
    %569 = vector.extract_strided_slice %568 {offsets = [0, 0], sizes = [33, 8], strides = [1, 1]} : vector<33x96xf32> to vector<33x8xf32>
    %570 = arith.truncf %569 : vector<33x8xf32> to vector<33x8xbf16>
    %571 = vector.extract_strided_slice %568 {offsets = [0, 32], sizes = [33, 8], strides = [1, 1]} : vector<33x96xf32> to vector<33x8xf32>
    %572 = arith.truncf %571 : vector<33x8xf32> to vector<33x8xbf16>
    %573 = vector.extract_strided_slice %568 {offsets = [0, 64], sizes = [33, 8], strides = [1, 1]} : vector<33x96xf32> to vector<33x8xf32>
    %574 = arith.truncf %573 : vector<33x8xf32> to vector<33x8xbf16>
    %cst_242 = arith.constant dense<0.000000e+00> : vector<33x33xf32>
    %575 = tpu.matmul %570, %572, %cst_242 {dimension_numbers = #tpu.dot_dimension_numbers<[1], [1], [0], [0], [0, 0, 1, 0], [], []>} : vector<33x8xbf16>, vector<33x8xbf16>, vector<33x33xf32> -> vector<33x33xf32>
    %cst_243 = arith.constant 0.353553385 : f32
    %576 = vector.broadcast %cst_243 : f32 to vector<33x33xf32>
    %577 = arith.mulf %575, %576 : vector<33x33xf32>
    %cst_244 = arith.constant dense<0xFF800000> : vector<33xf32>
    %578 = vector.multi_reduction <maximumf>, %577, %cst_244 [1] : vector<33x33xf32> to vector<33xf32>
    %579 = vector.shape_cast %578 : vector<33xf32> to vector<33x1xf32>
    %580 = vector.broadcast %579 : vector<33x1xf32> to vector<33x33xf32>
    %581 = arith.subf %577, %580 : vector<33x33xf32>
    %582 = math.exp %581 : vector<33x33xf32>
    %cst_245 = arith.constant dense<0.000000e+00> : vector<33xf32>
    %583 = vector.multi_reduction <add>, %582, %cst_245 [1] : vector<33x33xf32> to vector<33xf32>
    %584 = vector.shape_cast %583 : vector<33xf32> to vector<33x1xf32>
    %585 = vector.broadcast %584 : vector<33x1xf32> to vector<33x33xf32>
    %586 = arith.divf %582, %585 : vector<33x33xf32>
    %587 = arith.truncf %586 : vector<33x33xf32> to vector<33x33xbf16>
    %cst_246 = arith.constant dense<0.000000e+00> : vector<33x8xf32>
    %588 = tpu.matmul %587, %574, %cst_246 {dimension_numbers = #tpu.dot_dimension_numbers<[1], [0], [0], [1], [0, 0, 1, 1], [], []>} : vector<33x33xbf16>, vector<33x8xbf16>, vector<33x8xf32> -> vector<33x8xf32>
    %589 = vector.extract_strided_slice %568 {offsets = [0, 8], sizes = [33, 8], strides = [1, 1]} : vector<33x96xf32> to vector<33x8xf32>
    %590 = arith.truncf %589 : vector<33x8xf32> to vector<33x8xbf16>
    %591 = vector.extract_strided_slice %568 {offsets = [0, 40], sizes = [33, 8], strides = [1, 1]} : vector<33x96xf32> to vector<33x8xf32>
    %592 = arith.truncf %591 : vector<33x8xf32> to vector<33x8xbf16>
    %593 = vector.extract_strided_slice %568 {offsets = [0, 72], sizes = [33, 8], strides = [1, 1]} : vector<33x96xf32> to vector<33x8xf32>
    %594 = arith.truncf %593 : vector<33x8xf32> to vector<33x8xbf16>
    %cst_247 = arith.constant dense<0.000000e+00> : vector<33x33xf32>
    %595 = tpu.matmul %590, %592, %cst_247 {dimension_numbers = #tpu.dot_dimension_numbers<[1], [1], [0], [0], [0, 0, 1, 0], [], []>} : vector<33x8xbf16>, vector<33x8xbf16>, vector<33x33xf32> -> vector<33x33xf32>
    %cst_248 = arith.constant 0.353553385 : f32
    %596 = vector.broadcast %cst_248 : f32 to vector<33x33xf32>
    %597 = arith.mulf %595, %596 : vector<33x33xf32>
    %cst_249 = arith.constant dense<0xFF800000> : vector<33xf32>
    %598 = vector.multi_reduction <maximumf>, %597, %cst_249 [1] : vector<33x33xf32> to vector<33xf32>
    %599 = vector.shape_cast %598 : vector<33xf32> to vector<33x1xf32>
    %600 = vector.broadcast %599 : vector<33x1xf32> to vector<33x33xf32>
    %601 = arith.subf %597, %600 : vector<33x33xf32>
    %602 = math.exp %601 : vector<33x33xf32>
    %cst_250 = arith.constant dense<0.000000e+00> : vector<33xf32>
    %603 = vector.multi_reduction <add>, %602, %cst_250 [1] : vector<33x33xf32> to vector<33xf32>
    %604 = vector.shape_cast %603 : vector<33xf32> to vector<33x1xf32>
    %605 = vector.broadcast %604 : vector<33x1xf32> to vector<33x33xf32>
    %606 = arith.divf %602, %605 : vector<33x33xf32>
    %607 = arith.truncf %606 : vector<33x33xf32> to vector<33x33xbf16>
    %cst_251 = arith.constant dense<0.000000e+00> : vector<33x8xf32>
    %608 = tpu.matmul %607, %594, %cst_251 {dimension_numbers = #tpu.dot_dimension_numbers<[1], [0], [0], [1], [0, 0, 1, 1], [], []>} : vector<33x33xbf16>, vector<33x8xbf16>, vector<33x8xf32> -> vector<33x8xf32>
    %609 = vector.extract_strided_slice %568 {offsets = [0, 16], sizes = [33, 8], strides = [1, 1]} : vector<33x96xf32> to vector<33x8xf32>
    %610 = arith.truncf %609 : vector<33x8xf32> to vector<33x8xbf16>
    %611 = vector.extract_strided_slice %568 {offsets = [0, 48], sizes = [33, 8], strides = [1, 1]} : vector<33x96xf32> to vector<33x8xf32>
    %612 = arith.truncf %611 : vector<33x8xf32> to vector<33x8xbf16>
    %613 = vector.extract_strided_slice %568 {offsets = [0, 80], sizes = [33, 8], strides = [1, 1]} : vector<33x96xf32> to vector<33x8xf32>
    %614 = arith.truncf %613 : vector<33x8xf32> to vector<33x8xbf16>
    %cst_252 = arith.constant dense<0.000000e+00> : vector<33x33xf32>
    %615 = tpu.matmul %610, %612, %cst_252 {dimension_numbers = #tpu.dot_dimension_numbers<[1], [1], [0], [0], [0, 0, 1, 0], [], []>} : vector<33x8xbf16>, vector<33x8xbf16>, vector<33x33xf32> -> vector<33x33xf32>
    %cst_253 = arith.constant 0.353553385 : f32
    %616 = vector.broadcast %cst_253 : f32 to vector<33x33xf32>
    %617 = arith.mulf %615, %616 : vector<33x33xf32>
    %cst_254 = arith.constant dense<0xFF800000> : vector<33xf32>
    %618 = vector.multi_reduction <maximumf>, %617, %cst_254 [1] : vector<33x33xf32> to vector<33xf32>
    %619 = vector.shape_cast %618 : vector<33xf32> to vector<33x1xf32>
    %620 = vector.broadcast %619 : vector<33x1xf32> to vector<33x33xf32>
    %621 = arith.subf %617, %620 : vector<33x33xf32>
    %622 = math.exp %621 : vector<33x33xf32>
    %cst_255 = arith.constant dense<0.000000e+00> : vector<33xf32>
    %623 = vector.multi_reduction <add>, %622, %cst_255 [1] : vector<33x33xf32> to vector<33xf32>
    %624 = vector.shape_cast %623 : vector<33xf32> to vector<33x1xf32>
    %625 = vector.broadcast %624 : vector<33x1xf32> to vector<33x33xf32>
    %626 = arith.divf %622, %625 : vector<33x33xf32>
    %627 = arith.truncf %626 : vector<33x33xf32> to vector<33x33xbf16>
    %cst_256 = arith.constant dense<0.000000e+00> : vector<33x8xf32>
    %628 = tpu.matmul %627, %614, %cst_256 {dimension_numbers = #tpu.dot_dimension_numbers<[1], [0], [0], [1], [0, 0, 1, 1], [], []>} : vector<33x33xbf16>, vector<33x8xbf16>, vector<33x8xf32> -> vector<33x8xf32>
    %629 = vector.extract_strided_slice %568 {offsets = [0, 24], sizes = [33, 8], strides = [1, 1]} : vector<33x96xf32> to vector<33x8xf32>
    %630 = arith.truncf %629 : vector<33x8xf32> to vector<33x8xbf16>
    %631 = vector.extract_strided_slice %568 {offsets = [0, 56], sizes = [33, 8], strides = [1, 1]} : vector<33x96xf32> to vector<33x8xf32>
    %632 = arith.truncf %631 : vector<33x8xf32> to vector<33x8xbf16>
    %633 = vector.extract_strided_slice %568 {offsets = [0, 88], sizes = [33, 8], strides = [1, 1]} : vector<33x96xf32> to vector<33x8xf32>
    %634 = arith.truncf %633 : vector<33x8xf32> to vector<33x8xbf16>
    %cst_257 = arith.constant dense<0.000000e+00> : vector<33x33xf32>
    %635 = tpu.matmul %630, %632, %cst_257 {dimension_numbers = #tpu.dot_dimension_numbers<[1], [1], [0], [0], [0, 0, 1, 0], [], []>} : vector<33x8xbf16>, vector<33x8xbf16>, vector<33x33xf32> -> vector<33x33xf32>
    %cst_258 = arith.constant 0.353553385 : f32
    %636 = vector.broadcast %cst_258 : f32 to vector<33x33xf32>
    %637 = arith.mulf %635, %636 : vector<33x33xf32>
    %cst_259 = arith.constant dense<0xFF800000> : vector<33xf32>
    %638 = vector.multi_reduction <maximumf>, %637, %cst_259 [1] : vector<33x33xf32> to vector<33xf32>
    %639 = vector.shape_cast %638 : vector<33xf32> to vector<33x1xf32>
    %640 = vector.broadcast %639 : vector<33x1xf32> to vector<33x33xf32>
    %641 = arith.subf %637, %640 : vector<33x33xf32>
    %642 = math.exp %641 : vector<33x33xf32>
    %cst_260 = arith.constant dense<0.000000e+00> : vector<33xf32>
    %643 = vector.multi_reduction <add>, %642, %cst_260 [1] : vector<33x33xf32> to vector<33xf32>
    %644 = vector.shape_cast %643 : vector<33xf32> to vector<33x1xf32>
    %645 = vector.broadcast %644 : vector<33x1xf32> to vector<33x33xf32>
    %646 = arith.divf %642, %645 : vector<33x33xf32>
    %647 = arith.truncf %646 : vector<33x33xf32> to vector<33x33xbf16>
    %cst_261 = arith.constant dense<0.000000e+00> : vector<33x8xf32>
    %648 = tpu.matmul %647, %634, %cst_261 {dimension_numbers = #tpu.dot_dimension_numbers<[1], [0], [0], [1], [0, 0, 1, 1], [], []>} : vector<33x33xbf16>, vector<33x8xbf16>, vector<33x8xf32> -> vector<33x8xf32>
    %649 = tpu.concatenate %588, %608, %628, %648 in 1 : vector<33x8xf32>, vector<33x8xf32>, vector<33x8xf32>, vector<33x8xf32> -> vector<33x32xf32>
    %650 = arith.truncf %649 : vector<33x32xf32> to vector<33x32xbf16>
    %c1_262 = arith.constant 1 : index
    %c1_263 = arith.constant 1 : index
    %c0_264 = arith.constant 0 : index
    %c0_265 = arith.constant 0 : index
    %651 = vector.load %arg10[%c1_262, %c1_263, %c0_264, %c0_265] : memref<4x2x32x32xbf16, #tpu.memory_space<vmem>>, vector<1x1x32x32xbf16>
    %652 = vector.shape_cast %651 : vector<1x1x32x32xbf16> to vector<32x32xbf16>
    %cst_266 = arith.constant dense<0.000000e+00> : vector<33x32xf32>
    %653 = tpu.matmul %650, %652, %cst_266 {dimension_numbers = #tpu.dot_dimension_numbers<[1], [0], [0], [1], [0, 0, 1, 1], [], []>} : vector<33x32xbf16>, vector<32x32xbf16>, vector<33x32xf32> -> vector<33x32xf32>
    %654 = vector.extract_strided_slice %560 {offsets = [0, 0], sizes = [1, 32], strides = [1, 1]} : vector<6x32xf32> to vector<1x32xf32>
    %655 = vector.broadcast %654 : vector<1x32xf32> to vector<33x32xf32>
    %656 = arith.addf %653, %655 : vector<33x32xf32>
    %657 = arith.addf %558, %656 : vector<33x32xf32>
    %658 = vector.extract_strided_slice %560 {offsets = [1, 0], sizes = [1, 32], strides = [1, 1]} : vector<6x32xf32> to vector<1x32xf32>
    %659 = vector.extract_strided_slice %560 {offsets = [2, 0], sizes = [1, 32], strides = [1, 1]} : vector<6x32xf32> to vector<1x32xf32>
    %cst_267 = arith.constant dense<0.000000e+00> : vector<33xf32>
    %660 = vector.multi_reduction <add>, %657, %cst_267 [1] : vector<33x32xf32> to vector<33xf32>
    %661 = vector.shape_cast %660 : vector<33xf32> to vector<33x1xf32>
    %cst_268 = arith.constant 3.200000e+01 : f32
    %662 = vector.broadcast %cst_268 : f32 to vector<33x1xf32>
    %663 = arith.divf %661, %662 : vector<33x1xf32>
    %664 = vector.broadcast %663 : vector<33x1xf32> to vector<33x32xf32>
    %665 = arith.subf %657, %664 : vector<33x32xf32>
    %666 = arith.mulf %665, %665 : vector<33x32xf32>
    %cst_269 = arith.constant dense<0.000000e+00> : vector<33xf32>
    %667 = vector.multi_reduction <add>, %666, %cst_269 [1] : vector<33x32xf32> to vector<33xf32>
    %668 = vector.shape_cast %667 : vector<33xf32> to vector<33x1xf32>
    %cst_270 = arith.constant 3.200000e+01 : f32
    %669 = vector.broadcast %cst_270 : f32 to vector<33x1xf32>
    %670 = arith.divf %668, %669 : vector<33x1xf32>
    %cst_271 = arith.constant 9.99999974E-6 : f32
    %671 = vector.broadcast %cst_271 : f32 to vector<33x1xf32>
    %672 = arith.addf %670, %671 : vector<33x1xf32>
    %673 = math.rsqrt %672 : vector<33x1xf32>
    %674 = vector.broadcast %673 : vector<33x1xf32> to vector<33x32xf32>
    %675 = arith.mulf %665, %674 : vector<33x32xf32>
    %676 = vector.broadcast %658 : vector<1x32xf32> to vector<33x32xf32>
    %677 = arith.mulf %675, %676 : vector<33x32xf32>
    %678 = vector.broadcast %659 : vector<1x32xf32> to vector<33x32xf32>
    %679 = arith.addf %677, %678 : vector<33x32xf32>
    %680 = arith.truncf %679 : vector<33x32xf32> to vector<33x32xbf16>
    %c1_272 = arith.constant 1 : index
    %c1_273 = arith.constant 1 : index
    %c0_274 = arith.constant 0 : index
    %c0_275 = arith.constant 0 : index
    %681 = vector.load %arg12[%c1_272, %c1_273, %c0_274, %c0_275] : memref<4x2x32x64xbf16, #tpu.memory_space<vmem>>, vector<1x1x32x64xbf16>
    %682 = vector.shape_cast %681 : vector<1x1x32x64xbf16> to vector<32x64xbf16>
    %cst_276 = arith.constant dense<0.000000e+00> : vector<33x64xf32>
    %683 = tpu.matmul %680, %682, %cst_276 {dimension_numbers = #tpu.dot_dimension_numbers<[1], [0], [0], [1], [0, 0, 1, 1], [], []>} : vector<33x32xbf16>, vector<32x64xbf16>, vector<33x64xf32> -> vector<33x64xf32>
    %c1_277 = arith.constant 1 : index
    %c1_278 = arith.constant 1 : index
    %c0_279 = arith.constant 0 : index
    %c0_280 = arith.constant 0 : index
    %684 = vector.load %arg13[%c1_277, %c1_278, %c0_279, %c0_280] : memref<4x2x1x64xf32, #tpu.memory_space<vmem>>, vector<1x1x1x64xf32>
    %685 = vector.shape_cast %684 : vector<1x1x1x64xf32> to vector<1x64xf32>
    %686 = vector.broadcast %685 : vector<1x64xf32> to vector<33x64xf32>
    %687 = arith.addf %683, %686 : vector<33x64xf32>
    %cst_281 = arith.constant 0.000000e+00 : f32
    %688 = vector.broadcast %cst_281 : f32 to vector<33x64xf32>
    %689 = arith.maximumf %687, %688 : vector<33x64xf32>
    %690 = arith.truncf %689 : vector<33x64xf32> to vector<33x64xbf16>
    %c1_282 = arith.constant 1 : index
    %c1_283 = arith.constant 1 : index
    %c0_284 = arith.constant 0 : index
    %c0_285 = arith.constant 0 : index
    %691 = vector.load %arg14[%c1_282, %c1_283, %c0_284, %c0_285] : memref<4x2x64x32xbf16, #tpu.memory_space<vmem>>, vector<1x1x64x32xbf16>
    %692 = vector.shape_cast %691 : vector<1x1x64x32xbf16> to vector<64x32xbf16>
    %cst_286 = arith.constant dense<0.000000e+00> : vector<33x32xf32>
    %693 = tpu.matmul %690, %692, %cst_286 {dimension_numbers = #tpu.dot_dimension_numbers<[1], [0], [0], [1], [0, 0, 1, 1], [], []>} : vector<33x64xbf16>, vector<64x32xbf16>, vector<33x32xf32> -> vector<33x32xf32>
    %694 = vector.extract_strided_slice %560 {offsets = [3, 0], sizes = [1, 32], strides = [1, 1]} : vector<6x32xf32> to vector<1x32xf32>
    %695 = vector.broadcast %694 : vector<1x32xf32> to vector<33x32xf32>
    %696 = arith.addf %693, %695 : vector<33x32xf32>
    %697 = arith.addf %679, %696 : vector<33x32xf32>
    %698 = vector.extract_strided_slice %560 {offsets = [4, 0], sizes = [1, 32], strides = [1, 1]} : vector<6x32xf32> to vector<1x32xf32>
    %699 = vector.extract_strided_slice %560 {offsets = [5, 0], sizes = [1, 32], strides = [1, 1]} : vector<6x32xf32> to vector<1x32xf32>
    %cst_287 = arith.constant dense<0.000000e+00> : vector<33xf32>
    %700 = vector.multi_reduction <add>, %697, %cst_287 [1] : vector<33x32xf32> to vector<33xf32>
    %701 = vector.shape_cast %700 : vector<33xf32> to vector<33x1xf32>
    %cst_288 = arith.constant 3.200000e+01 : f32
    %702 = vector.broadcast %cst_288 : f32 to vector<33x1xf32>
    %703 = arith.divf %701, %702 : vector<33x1xf32>
    %704 = vector.broadcast %703 : vector<33x1xf32> to vector<33x32xf32>
    %705 = arith.subf %697, %704 : vector<33x32xf32>
    %706 = arith.mulf %705, %705 : vector<33x32xf32>
    %cst_289 = arith.constant dense<0.000000e+00> : vector<33xf32>
    %707 = vector.multi_reduction <add>, %706, %cst_289 [1] : vector<33x32xf32> to vector<33xf32>
    %708 = vector.shape_cast %707 : vector<33xf32> to vector<33x1xf32>
    %cst_290 = arith.constant 3.200000e+01 : f32
    %709 = vector.broadcast %cst_290 : f32 to vector<33x1xf32>
    %710 = arith.divf %708, %709 : vector<33x1xf32>
    %cst_291 = arith.constant 9.99999974E-6 : f32
    %711 = vector.broadcast %cst_291 : f32 to vector<33x1xf32>
    %712 = arith.addf %710, %711 : vector<33x1xf32>
    %713 = math.rsqrt %712 : vector<33x1xf32>
    %714 = vector.broadcast %713 : vector<33x1xf32> to vector<33x32xf32>
    %715 = arith.mulf %705, %714 : vector<33x32xf32>
    %716 = vector.broadcast %698 : vector<1x32xf32> to vector<33x32xf32>
    %717 = arith.mulf %715, %716 : vector<33x32xf32>
    %718 = vector.broadcast %699 : vector<1x32xf32> to vector<33x32xf32>
    %719 = arith.addf %717, %718 : vector<33x32xf32>
    %720 = vector.extract_strided_slice %719 {offsets = [16, 0], sizes = [17, 32], strides = [1, 1]} : vector<33x32xf32> to vector<17x32xf32>
    %721 = arith.truncf %720 : vector<17x32xf32> to vector<17x32xbf16>
    %c1_292 = arith.constant 1 : index
    %c0_293 = arith.constant 0 : index
    %c0_294 = arith.constant 0 : index
    %722 = vector.load %arg15[%c1_292, %c0_293, %c0_294] : memref<4x32x72xbf16, #tpu.memory_space<vmem>>, vector<1x32x72xbf16>
    %723 = vector.shape_cast %722 : vector<1x32x72xbf16> to vector<32x72xbf16>
    %cst_295 = arith.constant dense<0.000000e+00> : vector<17x72xf32>
    %724 = tpu.matmul %721, %723, %cst_295 {dimension_numbers = #tpu.dot_dimension_numbers<[1], [0], [0], [1], [0, 0, 1, 1], [], []>} : vector<17x32xbf16>, vector<32x72xbf16>, vector<17x72xf32> -> vector<17x72xf32>
    %c1_296 = arith.constant 1 : index
    %c0_297 = arith.constant 0 : index
    %c0_298 = arith.constant 0 : index
    %725 = vector.load %arg16[%c1_296, %c0_297, %c0_298] : memref<4x17x72xf32, #tpu.memory_space<vmem>>, vector<1x17x72xf32>
    %726 = vector.shape_cast %725 : vector<1x17x72xf32> to vector<17x72xf32>
    %727 = arith.addf %724, %726 : vector<17x72xf32>
    %728 = vector.extract_strided_slice %727 {offsets = [0, 0], sizes = [8, 32], strides = [1, 1]} : vector<17x72xf32> to vector<8x32xf32>
    %729 = arith.addf %378, %728 : vector<8x32xf32>
    %730 = vector.extract_strided_slice %727 {offsets = [8, 32], sizes = [8, 32], strides = [1, 1]} : vector<17x72xf32> to vector<8x32xf32>
    %731 = arith.addf %381, %730 : vector<8x32xf32>
    %732 = vector.extract_strided_slice %727 {offsets = [16, 64], sizes = [1, 8], strides = [1, 1]} : vector<17x72xf32> to vector<1x8xf32>
    %733 = arith.addf %359, %732 : vector<1x8xf32>
    %734 = vector.extract_strided_slice %729 {offsets = [0, 0], sizes = [8, 16], strides = [1, 1]} : vector<8x32xf32> to vector<8x16xf32>
    %735 = vector.extract_strided_slice %729 {offsets = [0, 16], sizes = [8, 16], strides = [1, 1]} : vector<8x32xf32> to vector<8x16xf32>
    %736 = vector.extract_strided_slice %731 {offsets = [0, 0], sizes = [8, 16], strides = [1, 1]} : vector<8x32xf32> to vector<8x16xf32>
    %737 = vector.extract_strided_slice %731 {offsets = [0, 16], sizes = [8, 16], strides = [1, 1]} : vector<8x32xf32> to vector<8x16xf32>
    %738 = arith.mulf %734, %734 : vector<8x16xf32>
    %739 = arith.mulf %735, %735 : vector<8x16xf32>
    %740 = arith.addf %738, %739 : vector<8x16xf32>
    %cst_299 = arith.constant 9.99999993E-9 : f32
    %741 = vector.broadcast %cst_299 : f32 to vector<8x16xf32>
    %742 = arith.addf %740, %741 : vector<8x16xf32>
    %743 = math.rsqrt %742 : vector<8x16xf32>
    %744 = arith.mulf %736, %736 : vector<8x16xf32>
    %745 = arith.mulf %737, %737 : vector<8x16xf32>
    %746 = arith.addf %744, %745 : vector<8x16xf32>
    %cst_300 = arith.constant 9.99999993E-9 : f32
    %747 = vector.broadcast %cst_300 : f32 to vector<8x16xf32>
    %748 = arith.addf %746, %747 : vector<8x16xf32>
    %749 = math.rsqrt %748 : vector<8x16xf32>
    %750 = arith.mulf %734, %743 : vector<8x16xf32>
    %751 = arith.mulf %735, %743 : vector<8x16xf32>
    %752 = tpu.concatenate %750, %751 in 1 : vector<8x16xf32>, vector<8x16xf32> -> vector<8x32xf32>
    %753 = arith.mulf %736, %749 : vector<8x16xf32>
    %754 = arith.mulf %737, %749 : vector<8x16xf32>
    %755 = tpu.concatenate %753, %754 in 1 : vector<8x16xf32>, vector<8x16xf32> -> vector<8x32xf32>
    %cst_301 = arith.constant 0.000000e+00 : f32
    %756 = vector.broadcast %cst_301 : f32 to vector<1x56xf32>
    %757 = tpu.concatenate %733, %756 in 1 : vector<1x8xf32>, vector<1x56xf32> -> vector<1x64xf32>
    %758 = tpu.concatenate %752, %755 in 1 : vector<8x32xf32>, vector<8x32xf32> -> vector<8x64xf32>
    %759 = tpu.concatenate %758, %757 in 0 : vector<8x64xf32>, vector<1x64xf32> -> vector<9x64xf32>
    %c0_302 = arith.constant 0 : index
    %c0_303 = arith.constant 0 : index
    %c0_304 = arith.constant 0 : index
    %760 = vector.load %arg17[%c0_302, %c0_303, %c0_304] : memref<1x9x64xf32, #tpu.memory_space<vmem>>, vector<1x9x64xf32>
    %761 = vector.shape_cast %760 : vector<1x9x64xf32> to vector<9x64xf32>
    %762 = vector.shape_cast %759 : vector<9x64xf32> to vector<1x9x64xf32>
    tpu.vector_store %arg17[%c0_302, %c0_303, %c0_304], %762 {strides = array<i32>} : memref<1x9x64xf32, #tpu.memory_space<vmem>>, vector<1x9x64xf32>,
    return
  }
  func.func @transform_0(%arg0: i32) -> (i32, i32, i32) {
    %c0_i32 = arith.constant 0 : i32
    %c0_i32_0 = arith.constant 0 : i32
    %c0_i32_1 = arith.constant 0 : i32
    return %arg0, %c0_i32, %c0_i32_0 : i32, i32, i32
  }
  func.func @transform_1(%arg0: i32) -> (i32, i32) {
    %c0_i32 = arith.constant 0 : i32
    %c0_i32_0 = arith.constant 0 : i32
    %c0_i32_1 = arith.constant 0 : i32
    return %c0_i32, %c0_i32_0 : i32, i32
  }
  func.func @transform_2(%arg0: i32) -> (i32, i32, i32) {
    %c0_i32 = arith.constant 0 : i32
    %c0_i32_0 = arith.constant 0 : i32
    %c0_i32_1 = arith.constant 0 : i32
    %c0_i32_2 = arith.constant 0 : i32
    return %c0_i32, %c0_i32_0, %c0_i32_1 : i32, i32, i32
  }
  func.func @transform_3(%arg0: i32) -> (i32, i32, i32) {
    %c0_i32 = arith.constant 0 : i32
    %c0_i32_0 = arith.constant 0 : i32
    %c0_i32_1 = arith.constant 0 : i32
    %c0_i32_2 = arith.constant 0 : i32
    return %c0_i32, %c0_i32_0, %c0_i32_1 : i32, i32, i32
  }
  func.func @transform_4(%arg0: i32) -> (i32, i32) {
    %c0_i32 = arith.constant 0 : i32
    %c0_i32_0 = arith.constant 0 : i32
    %c0_i32_1 = arith.constant 0 : i32
    return %c0_i32, %c0_i32_0 : i32, i32
  }
  func.func @transform_5(%arg0: i32) -> (i32, i32) {
    %c0_i32 = arith.constant 0 : i32
    %c0_i32_0 = arith.constant 0 : i32
    %c0_i32_1 = arith.constant 0 : i32
    return %c0_i32, %c0_i32_0 : i32, i32
  }
  func.func @transform_6(%arg0: i32) -> (i32, i32) {
    %c0_i32 = arith.constant 0 : i32
    %c0_i32_0 = arith.constant 0 : i32
    %c0_i32_1 = arith.constant 0 : i32
    return %c0_i32, %c0_i32_0 : i32, i32
  }
  func.func @transform_7(%arg0: i32) -> (i32, i32, i32, i32) {
    %c0_i32 = arith.constant 0 : i32
    %c0_i32_0 = arith.constant 0 : i32
    %c0_i32_1 = arith.constant 0 : i32
    %c0_i32_2 = arith.constant 0 : i32
    %c0_i32_3 = arith.constant 0 : i32
    return %c0_i32, %c0_i32_0, %c0_i32_1, %c0_i32_2 : i32, i32, i32, i32
  }
  func.func @transform_8(%arg0: i32) -> (i32, i32, i32, i32) {
    %c0_i32 = arith.constant 0 : i32
    %c0_i32_0 = arith.constant 0 : i32
    %c0_i32_1 = arith.constant 0 : i32
    %c0_i32_2 = arith.constant 0 : i32
    %c0_i32_3 = arith.constant 0 : i32
    return %c0_i32, %c0_i32_0, %c0_i32_1, %c0_i32_2 : i32, i32, i32, i32
  }
  func.func @transform_9(%arg0: i32) -> (i32, i32, i32, i32) {
    %c0_i32 = arith.constant 0 : i32
    %c0_i32_0 = arith.constant 0 : i32
    %c0_i32_1 = arith.constant 0 : i32
    %c0_i32_2 = arith.constant 0 : i32
    %c0_i32_3 = arith.constant 0 : i32
    return %c0_i32, %c0_i32_0, %c0_i32_1, %c0_i32_2 : i32, i32, i32, i32
  }
  func.func @transform_10(%arg0: i32) -> (i32, i32, i32, i32) {
    %c0_i32 = arith.constant 0 : i32
    %c0_i32_0 = arith.constant 0 : i32
    %c0_i32_1 = arith.constant 0 : i32
    %c0_i32_2 = arith.constant 0 : i32
    %c0_i32_3 = arith.constant 0 : i32
    return %c0_i32, %c0_i32_0, %c0_i32_1, %c0_i32_2 : i32, i32, i32, i32
  }
  func.func @transform_11(%arg0: i32) -> (i32, i32, i32, i32) {
    %c0_i32 = arith.constant 0 : i32
    %c0_i32_0 = arith.constant 0 : i32
    %c0_i32_1 = arith.constant 0 : i32
    %c0_i32_2 = arith.constant 0 : i32
    %c0_i32_3 = arith.constant 0 : i32
    return %c0_i32, %c0_i32_0, %c0_i32_1, %c0_i32_2 : i32, i32, i32, i32
  }
  func.func @transform_12(%arg0: i32) -> (i32, i32, i32, i32) {
    %c0_i32 = arith.constant 0 : i32
    %c0_i32_0 = arith.constant 0 : i32
    %c0_i32_1 = arith.constant 0 : i32
    %c0_i32_2 = arith.constant 0 : i32
    %c0_i32_3 = arith.constant 0 : i32
    return %c0_i32, %c0_i32_0, %c0_i32_1, %c0_i32_2 : i32, i32, i32, i32
  }
  func.func @transform_13(%arg0: i32) -> (i32, i32, i32, i32) {
    %c0_i32 = arith.constant 0 : i32
    %c0_i32_0 = arith.constant 0 : i32
    %c0_i32_1 = arith.constant 0 : i32
    %c0_i32_2 = arith.constant 0 : i32
    %c0_i32_3 = arith.constant 0 : i32
    return %c0_i32, %c0_i32_0, %c0_i32_1, %c0_i32_2 : i32, i32, i32, i32
  }
  func.func @transform_14(%arg0: i32) -> (i32, i32, i32) {
    %c0_i32 = arith.constant 0 : i32
    %c0_i32_0 = arith.constant 0 : i32
    %c0_i32_1 = arith.constant 0 : i32
    %c0_i32_2 = arith.constant 0 : i32
    return %c0_i32, %c0_i32_0, %c0_i32_1 : i32, i32, i32
  }
  func.func @transform_15(%arg0: i32) -> (i32, i32, i32) {
    %c0_i32 = arith.constant 0 : i32
    %c0_i32_0 = arith.constant 0 : i32
    %c0_i32_1 = arith.constant 0 : i32
    %c0_i32_2 = arith.constant 0 : i32
    return %c0_i32, %c0_i32_0, %c0_i32_1 : i32, i32, i32
  }
  func.func @transform_16(%arg0: i32) -> (i32, i32, i32) {
    %c0_i32 = arith.constant 0 : i32
    %c0_i32_0 = arith.constant 0 : i32
    %c0_i32_1 = arith.constant 0 : i32
    return %arg0, %c0_i32, %c0_i32_0 : i32, i32, i32
  }
}

</mosaic_0001>

<bundles_post_ra>
// kernel: svd_transformer_forward.1
= control target key start
LH: loop header
LB: loop body
LE: loop exit
PB: predicated region body
PF: predicated region fallthrough
CT: control target
= control target key end

     0   :  { %s7989_s21 = smov 0   ;;  %s10947_s0 = inlined_call_operand.vmem [shape: f32[2,16,32], index: 0, kind: input, shape index: {}]   ;;  %s10948_s1 = inlined_call_operand.vmem [shape: bf16[32,32], index: 1, kind: input, shape index: {}]   ;;  %s10949_s2 = inlined_call_operand.vmem [shape: bf16[4,72,32], index: 2, kind: input, shape index: {}]   ;;  %s10950_s3 = inlined_call_operand.vmem [shape: f32[4,33,32], index: 3, kind: input, shape index: {}]   ;;  %s10951_s4 = inlined_call_operand.vmem [shape: f32[8,32], index: 4, kind: input, shape index: {}]   ;;  %s10952_s5 = inlined_call_operand.vmem [shape: f32[8,32], index: 5, kind: input, shape index: {}]   ;;  %s10953_s6 = inlined_call_operand.vmem [shape: f32[1,8], index: 6, kind: input, shape index: {}]   ;;  %s10954_s7 = inlined_call_operand.vmem [shape: bf16[4,2,32,96], index: 7, kind: input, shape index: {}]   ;;  %s10955_s8 = inlined_call_operand.vmem [shape: f32[4,2,1,96], index: 8, kind: input, shape index: {}]   ;;  %s10956_s9 = inlined_call_operand.vmem [shape: bf16[4,2,32,32], index: 9, kind: input, shape index: {}]   ;;  %s10957_s10 = inlined_call_operand.vmem [shape: f32[4,2,6,32], index: 10, kind: input, shape index: {}]   ;;  %s10958_s11 = inlined_call_operand.vmem [shape: bf16[4,2,32,64], index: 11, kind: input, shape index: {}]   ;;  %s10959_s12 = inlined_call_operand.vmem [shape: f32[4,2,1,64], index: 12, kind: input, shape index: {}]   ;;  %s10960_s13 = inlined_call_operand.vmem [shape: bf16[4,2,64,32], index: 13, kind: input, shape index: {}]   ;;  %s10961_s14 = inlined_call_operand.vmem [shape: bf16[4,32,72], index: 14, kind: input, shape index: {}]   ;;  %s10962_s15 = inlined_call_operand.vmem [shape: f32[4,17,72], index: 15, kind: input, shape index: {}]   ;;  %s10963_s16 = inlined_call_operand.vmem [shape: f32[2,9,64], index: 16, kind: output, shape index: {}]  }
   0x1   :  { %11002 = sst [smem:[#allocation4_spill]] %s10947_s0 }
   0x2   :  { %11003 = sst [smem:[#allocation5_spill]] %s10948_s1 }
   0x3   :  { %11004 = sst [smem:[#allocation6_spill]] %s10949_s2 }
   0x4   :  { %11005 = sst [smem:[#allocation7_spill]] %s10950_s3 }
   0x5   :  { %11006 = sst [smem:[#allocation8_spill]] %s10951_s4 }
   0x6   :  { %11007 = sst [smem:[#allocation9_spill]] %s10952_s5 }
   0x7   :  { %11008 = sst [smem:[#allocation10_spill]] %s10953_s6 }
   0x8   :  { %11009 = sst [smem:[#allocation11_spill]] %s10963_s16 }
   0x9 LB: > { %11010 = sst [smem:[#allocation2_spill]] %s7885_s21  ;;  %s6795_s22 = sadd.s32 4294967295, %s7885_s21   ;;  %s7885_s21 = sphi %s7989_s21, %s26_s21  }
   0xa   : > { %p6799_p0 = scmp.ge.s32.totalorder %s7885_s21, 1  ;;  %p462_p1 = scmp.lt.s32.totalorder %s7885_s21, 3 }
   0xc   : > { %p463_p2 = pnand %p6799_p0, %p462_p1 }
   0xe   : > { %466 = sbr.rel (%p463_p2) target bundleno = 10512 (0x2910), region = 84 }
  0x13   : > { %s11011_s5 = sld [smem:[#allocation9_spill]]  ;;  %s10965_s25 = smov 32   ;;  %vm622_vm0 = vcmask 1043456   ;;  %vm10986_vm1 = vcmask 261120   ;;  %v7274_v15 = vld [vmem:[%s10954_s7 + $0x8] sm:$0xff]  ;;  %vm10984_vm2 = vcmask 523264  }
  0x14   : > { %s11012_s1 = sld [smem:[#allocation5_spill]]  ;;  %p512_p3 = scmp.lt.s32.totalorder %s6795_s22, 1  ;;  %693 = vmatpush.bf16.msra.mxu2 %v7274_v15  ;;  %v7273_v17 = vld [vmem:[%s10954_s7] sm:$0xff]  ;;  %vm10983_vm3 = vcmask 588800   ;;  %vm911_vm4 = vcmask 1040384   ;;  %v7892_v63 = vmov 0  }
  0x15   : > { %s11013_s2 = sld [smem:[#allocation6_spill]]  ;;  %s10975_s29 = smov 64   ;;  %v7467_v46 = vld [vmem:[%s10955_s8] ss:$0 sm:$0xff]  ;;  %vm722_vm5 = vcmask 64512   ;;  %vm769_vm6 = vcmask 269312  }
  0x16   : > { %s11014_s6 = sld [smem:[#allocation10_spill]]  ;;  %s11221_s22 = smov (!%p512_p3, %s6795_s22), 1  ;;  %vm782_vm7 = vcmask 262144  }
  0x17   : > { %11015 = sst [smem:[#allocation3_spill]] %s11221_s22  ;;  %s10964_s19 = sshll.u32 %s11221_s22, 4 }
  0x18   : > { %s11016_s24 = sld [smem:[#allocation4_spill]]  ;;  %694 = vmatpush.bf16.msra.mxu2 %v7273_v17  ;;  %s10996_s20 = smov 96  }
  0x19   : > { %v561_v0 = vld [vmem:[%s11011_s5] sm:$0xff]  ;;  %s11017_s4 = sld [smem:[#allocation8_spill]]  ;;  %s10990_s23 = smov 120  }
  0x1a   : > { %565 = vrot.lane.b32.xlu0 %v561_v0, %s10965_s25  ;;  %v7268_v1 = vld [vmem:[%s11012_s1 + $0x8] sm:$0xff]  ;;  %v7267_v4 = vld [vmem:[%s11012_s1] sm:$0xff]  ;;  %s11018_s3 = sld [smem:[#allocation7_spill]]  ;;  %v8120_v0 = vsel %vm911_vm4, 65535, %v7892_v63  ;;  %s10992_s27 = smov 72  }
  0x1b   : > { %v587_v2 = vld [vmem:[%s11013_s2 + $0x20] sm:$0xf]  ;;  %552 = vmatpush.bf16.msra.mxu0 %v7268_v1  ;;  %v7272_v11 = vld [vmem:[%s11013_s2 + $0x18] sm:$0xff]  ;;  %v7271_v12 = vld [vmem:[%s11013_s2 + $0x10] sm:$0xff]  ;;  %s10988_s28 = smov 104   ;;  %s10998_s30 = smov 112  }
  0x1c   : > { %v7466_v3 = vld [vmem:[%s11014_s6] ss:$0 sm:$0xff]  ;;  %v605_v5 = vunpack.c.l.b16 %v587_v2  ;;  %v7270_v13 = vld [vmem:[%s11013_s2 + $0x8] sm:$0xff]  ;;  %s10971_s0 = smov 56   ;;  %s10973_s17 = smov 48  }
  0x1d   : > { %v7269_v14 = vld [vmem:[%s11013_s2] sm:$0xff]  ;;  %s10969_s18 = smov 40   ;;  %s10979_s25 = smov 16  }
  0x1e   : > { %v610_v6 = vpack.c.b16 %v605_v5, %v605_v5  ;;  %s516_s26 = scalar_lea.vmem %s11016_s24, %s10964_s19  ;;  %s10994_s24 = smov 88  }
  0x1f   : > { %553 = vmatpush.bf16.msra.mxu0 %v7267_v4  ;;  %v523_v7 = vld [vmem:[%s516_s26] sm:$0xff]  ;;  %v524_v8 = vld [vmem:[%s516_s26 + $0x8] sm:$0xff]  ;;  %s10981_s26 = smov 80   ;;  %s10967_s19 = smov 8  }
  0x20   : > { %v624_v9 = vsel %vm622_vm0, %v610_v6, 0  ;;  %v525_v10 = vpack.c.bf16 %v524_v8, %v523_v7  ;;  %v560_v16 = vld [vmem:[%s11017_s4] sm:$0xff]  ;;  %v645_v28 = vld [vmem:[%s11018_s3 + $0x8] sm:$0xff]  ;;  %v646_v34 = vld [vmem:[%s11018_s3 + $0x10] sm:$0xff]  ;;  %s11087_s16 = smov 112   ;;  %s11088_s21 = smov 96  }
  0x21   : > { %629 = vmatpush.bf16.msra.mxu1 %v624_v9  ;;  %v563_v19 = vsel %vm10986_vm1, %v560_v16, 0.0  ;;  %v644_v27 = vld [vmem:[%s11018_s3] sm:$0xff]  ;;  %v647_v35 = vld [vmem:[%s11018_s3 + $0x18] sm:$0xff]  ;;  %s11100_s1 = smov 120   ;;  %s11101_s22 = smov 104  }
  0x22   : > { %573 = vrot.lane.b32.xlu0 %v7466_v3, %s10975_s29  ;;  %6812 = vmatmul.msk.bf16.vlgmr.msra.gmra.mxu0 %vm10986_vm1, %v525_v10  ;;  %v648_v41 = vld [vmem:[%s11018_s3 + $0x20] sm:$0x1] }
  0x25   : > { %630 = vmatpush.bf16.msra.mxu1 %v7272_v11 }
  0x29   : > { %631 = vmatpush.bf16.msra.mxu1 %v7271_v12 }
  0x2d   : > { %632 = vmatpush.bf16.msra.mxu1 %v7270_v13 }
  0x31   : > { %633 = vmatpush.bf16.msra.mxu1 %v7269_v14 }
  0x8c   : > { %v566_v18 = vpop.permute.xlu0 %565 }
  0x8d   : > { %v568_v20 = vsel %vm10986_vm1, 0.0, %v566_v18 }
  0x8e   : > { %v570_v21 = vsel %vm10984_vm2, %v568_v20, 0.0 }
  0x8f   : > { %v577_v22 = vpack.c.bf16 %v570_v21, %v563_v19 }
  0x91   : > { %6829 = vmatmul.msk.bf16.vlgmr.msra.gmra.mxu1 %vm10983_vm3, %v577_v22 }
  0x94   : > { %v574_v23 = vpop.permute.xlu0 %573 }
  0x95   : > { %v576_v24 = vsel %vm10984_vm2, 0.0, %v574_v23 }
  0x96   : > { %v578_v25 = vpack.c.bf16 %v576_v24, %v576_v24 }
  0x9f   : > { %v8050_v26 = vpop.f32.mrf.mxu0 }
  0xa0   : > { %v8060_v29 = vadd.f32 %v644_v27, %v8050_v26 }
  0xa1   : > { %6830 = vmatmul.msk.bf16.gmra.mxu1 %vm10983_vm3, %v578_v25 }
  0xa7   : > { %v8062_v30 = vpop.f32.mrf.mxu0 }
  0xa8   : > { %v8065_v31 = vadd.f32 %v645_v28, %v8062_v30 }
  0xaa   : > { %v655_v32 = vpack.c.bf16 %v8065_v31, %v8060_v29 }
  0xac   : > { %6839 = vmatmul.msk.bf16.vlgmr.msra.gmra.mxu2 %vm10986_vm1, %v655_v32 }
 0x10e   : > { %v635_v33 = vpop.f32.mrf.mxu1 }
 0x10f   : > { %v8076_v37 = vadd.f32 %v646_v34, %v635_v33 }
 0x116   : > { %v637_v36 = vpop.f32.mrf.mxu1 }
 0x117   : > { %v8078_v38 = vadd.f32 %v647_v35, %v637_v36 }
 0x119   : > { %v656_v39 = vpack.c.bf16 %v8078_v38, %v8076_v37 }
 0x11b   : > { %6840 = vmatmul.msk.bf16.gmra.mxu2 %vm10986_vm1, %v656_v39 }
 0x11e   : > { %v640_v40 = vpop.f32.mrf.mxu1 }
 0x11f   : > { %v8086_v42 = vadd.f32 %v648_v41, %v640_v40 }
 0x121   : > { %v657_v44 = vpack.c.bf16 %v8086_v42, %v8086_v42 }
 0x126   : > { %v642_v43 = vpop.f32.mrf.mxu1 }
 0x12b   : > { %6841 = vmatmul.msk.bf16.gmra.mxu2 %vm10986_vm1, %v657_v44 }
 0x12f   : > { %v696_v45 = vpop.f32.mrf.mxu2 }
 0x130   : > { %v697_v47 = vadd.f32 %v7467_v46, %v696_v45 }
 0x137   : > { %v698_v48 = vpop.f32.mrf.mxu2 }
 0x138   : > { %v699_v49 = vadd.f32 %v7467_v46, %v698_v48 }
 0x13a   : > { %v8094_v50 = vpack.c.bf16 %v699_v49, %v697_v47 }
 0x13c   : > { %716 = vrot.lane.b32.xlu2 %v8094_v50, %s10996_s20 }
 0x144   : > { %894 = vrot.lane.b32.xlu2 %v8094_v50, %s10975_s29 }
 0x14c   : > { %940 = vrot.lane.b32.xlu2 %v8094_v50, %s10990_s23 }
 0x196   : > { %v717_v60 = vpop.permute.xlu2 %716 }
 0x197   : > { %v733_v12 = vsel %vm722_vm5, %v717_v60, 0 }
 0x19e   : > { %v701_v51 = vpop.f32.mrf.mxu2  ;;  %v895_v61 = vpop.permute.xlu2 %894 }
 0x19f   : > { %v702_v53 = vadd.f32 %v7467_v46, %v701_v51 }
 0x1a6   : > { %v703_v52 = vpop.f32.mrf.mxu2  ;;  %v941_v62 = vpop.permute.xlu2 %940 }
 0x1a7   : > { %v704_v54 = vadd.f32 %v7467_v46, %v703_v52 }
 0x1a9   : > { %v8102_v55 = vpack.c.bf16 %v704_v54, %v702_v53 }
 0x1ab   : > { %896 = vrot.lane.b32.xlu0 %v8102_v55, %s10975_s29 }
 0x1ae   : > { %v706_v56 = vpop.f32.mrf.mxu2 }
 0x1af   : > { %v707_v57 = vadd.f32 %v7467_v46, %v706_v56 }
 0x1b1   : > { %v8106_v58 = vpack.c.bf16 %v707_v57, %v707_v57 }
 0x1b3   : > { %720 = vrot.lane.b32.xlu1 %v8106_v58, %s10996_s20  ;;  %946 = vrot.lane.b32.xlu0 %v8094_v50, %s10994_s24 }
 0x1b4   : > { %898 = vrot.lane.b32.xlu2 %v8106_v58, %s10975_s29  ;;  %s11028_s29 = smov 56  }
 0x1b6   : > { %v708_v59 = vpop.f32.mrf.mxu2 }
 0x1bb   : > { %718 = vrot.lane.b32.xlu1 %v8102_v55, %s10996_s20  ;;  %950 = vrot.lane.b32.xlu0 %v8106_v58, %s10994_s24 }
 0x1c3   : > { %948 = vrot.lane.b32.xlu1 %v8102_v55, %s10994_s24 }
 0x20e   : > { %v899_v1 = vpop.permute.xlu2 %898 }
 0x20f   : > { %v915_v2 = vand.u32 %v8120_v0, %v899_v1 }
 0x211   : > { %922 = vmatpush.bf16.msrb.mxu0 %v915_v2 }
 0x21d   : > { %v897_v3 = vpop.permute.xlu0 %896 }
 0x21e   : > { %923 = vmatpush.bf16.msrb.mxu0 %v897_v3 }
 0x222   : > { %924 = vmatpush.bf16.msrb.mxu0 %v895_v61 }
 0x225   : > { %v721_v4 = vpop.permute.xlu1 %720  ;;  %v947_v5 = vpop.permute.xlu0 %946 }
 0x226   : > { %v739_v6 = vsel %vm722_vm5, %v721_v4, 0  ;;  %v962_v14 = vsel %vm722_vm5, %v947_v5, 0 }
 0x227   : > { %746 = vmatpush.bf16.xpose.msra.mxu3 %v739_v6 }
 0x22d   : > { %v719_v7 = vpop.permute.xlu1 %718  ;;  %v951_v8 = vpop.permute.xlu0 %950 }
 0x22e   : > { %v736_v9 = vsel %vm722_vm5, %v719_v7, 0  ;;  %v968_v10 = vsel %vm722_vm5, %v951_v8, 0 }
 0x22f   : > { %747 = vmatpush.bf16.xpose.msra.mxu3 %v736_v9  ;;  %975 = vmatpush.bf16.xpose.msrb.mxu1 %v968_v10 }
 0x235   : > { %v949_v11 = vpop.permute.xlu1 %948 }
 0x236   : > { %v965_v13 = vsel %vm722_vm5, %v949_v11, 0 }
 0x237   : > { %748 = vmatpush.bf16.xpose.msra.mxu3 %v733_v12  ;;  %976 = vmatpush.bf16.xpose.msrb.mxu1 %v965_v13 }
 0x23e   : > { %6842 = vmatmul.msk.bf16.vlgmr.msra.gmra.mxu3 %vm722_vm5, %v8094_v50 }
 0x23f   : > { %977 = vmatpush.bf16.xpose.msrb.mxu1 %v962_v14 }
 0x246   : > { %6848 = vmatmul.msk.bf16.vlgmr.msrb.gmra.mxu1 %vm722_vm5, %v941_v62 }
 0x24e   : > { %6843 = vmatmul.msk.bf16.gmra.mxu3 %vm722_vm5, %v8102_v55 }
 0x25e   : > { %6844 = vmatmul.msk.bf16.gmra.mxu3 %vm722_vm5, %v8106_v58 }
 0x2c1   : > { %v750_v15 = vpop.f32.mrf.mxu3 }
 0x2c2   : > { %v764_v16 = vmul.f32 0.35355338, %v750_v15 }
 0x2c3   : > { %v979_v12 = vpop.f32.mrf.mxu1 }
 0x2c4   : > { %v770_v17 = vsel %vm769_vm6, %v764_v16, -inf }
 0x2c5   : > { %771 = vmax.xlane.f32.xlu2 %v770_v17 }
 0x2c9   : > { %v752_v18 = vpop.f32.mrf.mxu3 }
 0x2ca   : > { %v765_v19 = vmul.f32 0.35355338, %v752_v18 }
 0x2cc   : > { %v773_v20 = vsel %vm769_vm6, %v765_v19, -inf }
 0x2cd   : > { %774 = vmax.xlane.f32.xlu0 %v773_v20 }
 0x2d1   : > { %v755_v21 = vpop.f32.mrf.mxu3 }
 0x2d2   : > { %v766_v22 = vmul.f32 0.35355338, %v755_v21 }
 0x2d4   : > { %v776_v23 = vsel %vm769_vm6, %v766_v22, -inf }
 0x2d5   : > { %777 = vmax.xlane.f32.xlu1 %v776_v23 }
 0x2d9   : > { %v757_v24 = vpop.f32.mrf.mxu3 }
 0x2da   : > { %v767_v25 = vmul.f32 0.35355338, %v757_v24 }
 0x2dc   : > { %v779_v27 = vsel %vm769_vm6, %v767_v25, -inf }
 0x2dd   : > { %780 = vmax.xlane.f32.xlu2 %v779_v27 }
 0x2e1   : > { %1174 = vrot.lane.b32.xlu0 %v8106_v58, %s10981_s26  ;;  %v760_v28 = vpop.f32.mrf.mxu3 }
 0x2e2   : > { %v768_v32 = vmul.f32 0.35355338, %v760_v28 }
 0x2e4   : > { %v783_v33 = vsel %vm782_vm7, %v768_v32, -inf }
 0x2e5   : > { %784 = vmax.xlane.f32.xlu2 %v783_v33 }
 0x2e9   : > { %1172 = vrot.lane.b32.xlu0 %v8102_v55, %s10981_s26  ;;  %v762_v34 = vpop.f32.mrf.mxu3 }
 0x2f1   : > { %1396 = vrot.lane.b32.xlu0 %v8102_v55, %s10992_s27 }
 0x2fd   : > { %1398 = vrot.lane.b32.xlu2 %v8106_v58, %s10992_s27 }
 0x338   : > { %v772_v35 = vpop.xlane.xlu2 %771 }
 0x339   : > { %v786_v36 = vsub.f32 %v764_v16, %v772_v35 }
 0x33b   : > { %v791_v39 = vmul.f32 1.442695, %v786_v36 }
 0x33d   : > { %7475 = vpow2.f32 %v791_v39 }
 0x340   : > { %v775_v40 = vpop.xlane.xlu0 %774 }
 0x341   : > { %v787_v41 = vsub.f32 %v765_v19, %v775_v40  ;;  %v981_v19 = vpop.f32.mrf.mxu1 }
 0x342   : > { %v8193_v23 = vmul.f32 0.35355338, %v981_v19 }
 0x343   : > { %v8149_v43 = vpop.eup %7475  ;;  %v793_v44 = vmul.f32 1.442695, %v787_v41 }
 0x344   : > { %v801_v45 = vsel %vm769_vm6, %v8149_v43, 0.0  ;;  %v1001_v36 = vsel %vm769_vm6, %v8193_v23, -inf }
 0x345   : > { %7477 = vpow2.f32 %v793_v44  ;;  %802 = vadd.xlane.f32.xlu1 %v801_v45 }
 0x348   : > { %v778_v2 = vpop.xlane.xlu1 %777 }
 0x349   : > { %v788_v3 = vsub.f32 %v766_v22, %v778_v2 }
 0x34b   : > { %v8153_v46 = vpop.eup %7477  ;;  %v795_v4 = vmul.f32 1.442695, %v788_v3 }
 0x34c   : > { %v804_v47 = vsel %vm769_vm6, %v8153_v46, 0.0 }
 0x34d   : > { %805 = vadd.xlane.f32.xlu2 %v804_v47 }
 0x350   : > { %v781_v48 = vpop.xlane.xlu2 %780 }
 0x351   : > { %v789_v49 = vsub.f32 %v767_v25, %v781_v48 }
 0x353   : > { %v797_v51 = vmul.f32 1.442695, %v789_v49  ;;  %v1175_v52 = vpop.permute.xlu0 %1174 }
 0x354   : > { %v1192_v53 = vsel %vm722_vm5, %v1175_v52, 0  ;;  %v8201_v52 = vmul.f32 0.35355338, %v979_v12 }
 0x355   : > { %7479 = vpow2.f32 %v797_v51  ;;  %1199 = vmatpush.bf16.xpose.msra.mxu0 %v1192_v53 }
 0x356   : > { %7481 = vpow2.f32 %v795_v4  ;;  %v998_v53 = vsel %vm769_vm6, %v8201_v52, -inf }
 0x358   : > { %v785_v54 = vpop.xlane.xlu2 %784 }
 0x359   : > { %v790_v5 = vsub.f32 %v768_v32, %v785_v54 }
 0x35b   : > { %v8158_v56 = vpop.eup %7479  ;;  %v1173_v57 = vpop.permute.xlu0 %1172  ;;  %v799_v6 = vmul.f32 1.442695, %v790_v5 }
 0x35c   : > { %v1189_v59 = vsel %vm722_vm5, %v1173_v57, 0  ;;  %v810_v60 = vsel %vm769_vm6, %v8158_v56, 0.0  ;;  %v8175_v7 = vpop.eup %7481 }
 0x35d   : > { %1200 = vmatpush.bf16.xpose.msra.mxu0 %v1189_v59  ;;  %811 = vadd.xlane.f32.xlu0 %v810_v60  ;;  %7483 = vpow2.f32 %v799_v6  ;;  %v807_v8 = vsel %vm769_vm6, %v8175_v7, 0.0 }
 0x35e   : > { %942 = vrot.lane.b32.xlu1 %v8102_v55, %s10990_s23 }
 0x360   : > { %v1399_v61 = vpop.permute.xlu2 %1398 }
 0x361   : > { %v1416_v62 = vsel %vm722_vm5, %v1399_v61, 0 }
 0x362   : > { %1423 = vmatpush.bf16.xpose.msra.mxu1 %v1416_v62 }
 0x363   : > { %v1397_v63 = vpop.permute.xlu0 %1396  ;;  %v8179_v9 = vpop.eup %7483 }
 0x364   : > { %v1413_v1 = vsel %vm722_vm5, %v1397_v63, 0  ;;  %v813_v10 = vsel %vm782_vm7, %v8179_v9, 0.0 }
 0x365   : > { %1388 = vrot.lane.b32.xlu2 %v8094_v50, %s10988_s28 }
 0x36a   : > { %1424 = vmatpush.bf16.xpose.msra.mxu1 %v1413_v1 }
 0x371   : > { %1394 = vrot.lane.b32.xlu0 %v8094_v50, %s10992_s27 }
 0x379   : > { %1166 = vrot.lane.b32.xlu0 %v8102_v55, %s10998_s30 }
 0x381   : > { %1392 = vrot.lane.b32.xlu0 %v8106_v58, %s10988_s28 }
 0x388   : > { %808 = vadd.xlane.f32.xlu1 %v807_v8 }
 0x38e   : > { %814 = vadd.xlane.f32.xlu2 %v813_v10 }
 0x3a1   : > { %944 = vrot.lane.b32.xlu1 %v8106_v58, %s10990_s23 }
 0x3a6   : > { %1168 = vrot.lane.b32.xlu2 %v8106_v58, %s10998_s30 }
 0x3a9   : > { %1170 = vrot.lane.b32.xlu1 %v8094_v50, %s10981_s26  ;;  %s11026_s26 = smov 64  }
 0x3b1   : > { %1164 = vrot.lane.b32.xlu1 %v8094_v50, %s10998_s30 }
 0x3b8   : > { %v803_v11 = vpop.xlane.xlu1 %802 }
 0x3b9   : > { %7485 = vrcp.f32 %v803_v11  ;;  %1390 = vrot.lane.b32.xlu1 %v8102_v55, %s10988_s28  ;;  %v827_v22 = vand.u32 2147483648, %v803_v11  ;;  %vm821_vm9 = vweird.f32 %v803_v11  ;;  %v825_v24 = vand.u32 2147483647, %v803_v11 }
 0x3bb   : > { %v828_v34 = vor.u32 1.1754944e-38, %v827_v22  ;;  %vm826_vm12 = vcmp.eq.f32.partialorder %v825_v24, 8.507059e+37 }
 0x3bf   : > { %v7486_v13 = vpop.eup %7485 }
 0x3c0   : > { %v817_v14 = vmul.f32 %v7486_v13, %v803_v11  ;;  %v806_v15 = vpop.xlane.xlu2 %805  ;;  %vm822_vm8 = vweird.f32 %v7486_v13 }
 0x3c1   : > { %7487 = vrcp.f32 %v806_v15  ;;  %vm823_vm10 = vmor %vm821_vm9, %vm822_vm8  ;;  %v842_v27 = vand.u32 2147483648, %v806_v15  ;;  %v840_v32 = vand.u32 2147483647, %v806_v15  ;;  %vm836_vm13 = vweird.f32 %v806_v15 }
 0x3c2   : > { %v818_v16 = vsub.f32 1.0, %v817_v14 }
 0x3c3   : > { %v843_v39 = vor.u32 1.1754944e-38, %v842_v27  ;;  %vm841_vm15 = vcmp.eq.f32.partialorder %v840_v32, 8.507059e+37 }
 0x3c4   : > { %v819_v17 = vmul.f32 %v7486_v13, %v818_v16 }
 0x3c6   : > { %v820_v20 = vadd.f32 %v7486_v13, %v819_v17 }
 0x3c7   : > { %v7488_v18 = vpop.eup %7487 }
 0x3c8   : > { %v832_v21 = vmul.f32 %v7488_v18, %v806_v15  ;;  %vm837_vm11 = vweird.f32 %v7488_v18  ;;  %v824_v33 = vsel %vm823_vm10, %v7486_v13, %v820_v20 }
 0x3c9   : > { %vm838_vm14 = vmor %vm836_vm13, %vm837_vm11  ;;  %v829_v40 = vsel %vm826_vm12, %v828_v34, %v824_v33 }
 0x3ca   : > { %v833_v25 = vsub.f32 1.0, %v832_v21  ;;  %v830_v47 = vmul.f32 %v8149_v43, %v829_v40  ;;  %v1389_v43 = vpop.permute.xlu2 %1388 }
 0x3cc   : > { %v834_v28 = vmul.f32 %v7488_v18, %v833_v25 }
 0x3ce   : > { %v835_v35 = vadd.f32 %v7488_v18, %v834_v28 }
 0x3cf   : > { %1002 = vmax.xlane.f32.xlu2 %v1001_v36 }
 0x3d0   : > { %v943_v41 = vpop.permute.xlu1 %942  ;;  %v839_v44 = vsel %vm838_vm14, %v7488_v18, %v835_v35  ;;  %v812_v51 = vpop.xlane.xlu0 %811 }
 0x3d1   : > { %6849 = vmatmul.msk.bf16.gmra.mxu1 %vm722_vm5, %v943_v41  ;;  %v844_v45 = vsel %vm841_vm15, %v843_v39, %v839_v44  ;;  %7489 = vrcp.f32 %v812_v51  ;;  %v872_v4 = vand.u32 2147483648, %v812_v51  ;;  %vm866_vm8 = vweird.f32 %v812_v51 }
 0x3d2   : > { %v845_v48 = vmul.f32 %v8153_v46, %v844_v45  ;;  %v870_v6 = vand.u32 2147483647, %v812_v51 }
 0x3d3   : > { %v873_v14 = vor.u32 1.1754944e-38, %v872_v4 }
 0x3d4   : > { %v891_v49 = vpack.c.bf16 %v845_v48, %v830_v47  ;;  %vm871_vm12 = vcmp.eq.f32.partialorder %v870_v6, 8.507059e+37 }
 0x3d6   : > { %6845 = vmatmul.msk.bf16.vlgmr.msrb.gmra.mxu0 %vm769_vm6, %v891_v49 }
 0x3d7   : > { %v7490_v59 = vpop.eup %7489 }
 0x3d8   : > { %v862_v60 = vmul.f32 %v7490_v59, %v812_v51  ;;  %vm867_vm4 = vweird.f32 %v7490_v59 }
 0x3d9   : > { %vm868_vm9 = vmor %vm866_vm8, %vm867_vm4 }
 0x3da   : > { %v863_v61 = vsub.f32 1.0, %v862_v60 }
 0x3dc   : > { %v864_v62 = vmul.f32 %v7490_v59, %v863_v61 }
 0x3de   : > { %v865_v3 = vadd.f32 %v7490_v59, %v864_v62 }
 0x3e0   : > { %v869_v12 = vsel %vm868_vm9, %v7490_v59, %v865_v3 }
 0x3e1   : > { %v874_v18 = vsel %vm871_vm12, %v873_v14, %v869_v12 }
 0x3e2   : > { %v875_v24 = vmul.f32 %v8158_v56, %v874_v18 }
 0x3e3   : > { %999 = vmax.xlane.f32.xlu1 %v998_v53  ;;  %v1395_v54 = vpop.permute.xlu0 %1394 }
 0x3e4   : > { %v1410_v57 = vsel %vm722_vm5, %v1395_v54, 0 }
 0x3e5   : > { %1425 = vmatpush.bf16.xpose.msra.mxu1 %v1410_v57 }
 0x3eb   : > { %v1167_v47 = vpop.permute.xlu0 %1166 }
 0x3f3   : > { %v1393_v48 = vpop.permute.xlu0 %1392 }
 0x3fb   : > { %v809_v46 = vpop.xlane.xlu1 %808 }
 0x3fc   : > { %7491 = vrcp.f32 %v809_v46  ;;  %v857_v8 = vand.u32 2147483648, %v809_v46  ;;  %v855_v11 = vand.u32 2147483647, %v809_v46  ;;  %vm851_vm11 = vweird.f32 %v809_v46 }
 0x3fe   : > { %v858_v17 = vor.u32 1.1754944e-38, %v857_v8  ;;  %vm856_vm14 = vcmp.eq.f32.partialorder %v855_v11, 8.507059e+37 }
 0x401   : > { %v815_v63 = vpop.xlane.xlu2 %814 }
 0x402   : > { %v7492_v1 = vpop.eup %7491  ;;  %7493 = vrcp.f32 %v815_v63  ;;  %v887_v32 = vand.u32 2147483648, %v815_v63  ;;  %vm881_vm4 = vweird.f32 %v815_v63  ;;  %v885_v34 = vand.u32 2147483647, %v815_v63 }
 0x403   : > { %v847_v2 = vmul.f32 %v7492_v1, %v809_v46  ;;  %vm852_vm10 = vweird.f32 %v7492_v1 }
 0x404   : > { %vm853_vm13 = vmor %vm851_vm11, %vm852_vm10  ;;  %v888_v36 = vor.u32 1.1754944e-38, %v887_v32  ;;  %vm886_vm9 = vcmp.eq.f32.partialorder %v885_v34, 8.507059e+37 }
 0x405   : > { %v848_v5 = vsub.f32 1.0, %v847_v2 }
 0x407   : > { %v849_v10 = vmul.f32 %v7492_v1, %v848_v5 }
 0x408   : > { %v7494_v13 = vpop.eup %7493 }
 0x409   : > { %v877_v15 = vmul.f32 %v7494_v13, %v815_v63  ;;  %v850_v16 = vadd.f32 %v7492_v1, %v849_v10  ;;  %vm882_vm15 = vweird.f32 %v7494_v13  ;;  %v1169_v51 = vpop.permute.xlu2 %1168 }
 0x40a   : > { %vm883_vm8 = vmor %vm881_vm4, %vm882_vm15 }
 0x40b   : > { %v878_v19 = vsub.f32 1.0, %v877_v15  ;;  %v854_v20 = vsel %vm853_vm13, %v7492_v1, %v850_v16 }
 0x40c   : > { %v859_v21 = vsel %vm856_vm14, %v858_v17, %v854_v20 }
 0x40d   : > { %v860_v22 = vmul.f32 %v8175_v7, %v859_v21  ;;  %v879_v25 = vmul.f32 %v7494_v13, %v878_v19 }
 0x40f   : > { %v892_v27 = vpack.c.bf16 %v875_v24, %v860_v22  ;;  %v880_v28 = vadd.f32 %v7494_v13, %v879_v25 }
 0x411   : > { %6846 = vmatmul.msk.bf16.gmra.mxu0 %vm769_vm6, %v892_v27  ;;  %v884_v35 = vsel %vm883_vm8, %v7494_v13, %v880_v28 }
 0x412   : > { %v889_v39 = vsel %vm886_vm9, %v888_v36, %v884_v35 }
 0x413   : > { %v945_v33 = vpop.permute.xlu1 %944  ;;  %v890_v56 = vmul.f32 %v8179_v9, %v889_v39 }
 0x414   : > { %6850 = vmatmul.msk.bf16.gmra.mxu1 %vm722_vm5, %v945_v33 }
 0x415   : > { %v893_v41 = vpack.c.bf16 %v890_v56, %v890_v56 }
 0x41b   : > { %v1171_v7 = vpop.permute.xlu1 %1170 }
 0x41c   : > { %v1186_v40 = vsel %vm722_vm5, %v1171_v7, 0 }
 0x41d   : > { %1201 = vmatpush.bf16.xpose.msra.mxu0 %v1186_v40 }
 0x421   : > { %6847 = vmatmul.msk.bf16.gmra.mxu0 %vm769_vm6, %v893_v41 }
 0x423   : > { %v1165_v44 = vpop.permute.xlu1 %1164 }
 0x424   : > { %6860 = vmatmul.msk.bf16.vlgmr.msra.gmra.mxu1 %vm722_vm5, %v1389_v43 }
 0x42b   : > { %v1391_v45 = vpop.permute.xlu1 %1390 }
 0x431   : > { %6854 = vmatmul.msk.bf16.vlgmr.msra.gmra.mxu0 %vm722_vm5, %v1165_v44 }
 0x434   : > { %6861 = vmatmul.msk.bf16.gmra.mxu1 %vm722_vm5, %v1391_v45 }
 0x441   : > { %6855 = vmatmul.msk.bf16.gmra.mxu0 %vm722_vm5, %v1167_v47 }
 0x442   : > { %v1003_v6 = vpop.xlane.xlu2 %1002 }
 0x443   : > { %v1014_v10 = vsub.f32 %v8193_v23, %v1003_v6 }
 0x444   : > { %6862 = vmatmul.msk.bf16.gmra.mxu1 %vm722_vm5, %v1393_v48 }
 0x445   : > { %v1020_v12 = vmul.f32 1.442695, %v1014_v10 }
 0x44e   : > { %v984_v9 = vpop.f32.mrf.mxu1 }
 0x44f   : > { %v8218_v49 = vmul.f32 0.35355338, %v984_v9 }
 0x451   : > { %6856 = vmatmul.msk.bf16.gmra.mxu0 %vm722_vm5, %v1169_v51  ;;  %v1004_v53 = vsel %vm769_vm6, %v8218_v49, -inf }
 0x452   : > { %1005 = vmax.xlane.f32.xlu0 %v1004_v53 }
 0x453   : > { %v8229_v63 = vpop.f32.mrf.mxu0 }
 0x456   : > { %v986_v54 = vpop.f32.mrf.mxu1  ;;  %v1000_v57 = vpop.xlane.xlu1 %999 }
 0x457   : > { %v996_v59 = vmul.f32 0.35355338, %v986_v54  ;;  %v1013_v60 = vsub.f32 %v8201_v52, %v1000_v57 }
 0x459   : > { %v1018_v43 = vmul.f32 1.442695, %v1013_v60  ;;  %v1007_v61 = vsel %vm769_vm6, %v996_v59, -inf }
 0x45a   : > { %1008 = vmax.xlane.f32.xlu1 %v1007_v61 }
 0x45b   : > { %7495 = vpow2.f32 %v1018_v43  ;;  %v8231_v1 = vpop.f32.mrf.mxu0 }
 0x45c   : > { %7497 = vpow2.f32 %v1020_v12 }
 0x461   : > { %v8225_v46 = vpop.eup %7495 }
 0x462   : > { %v1028_v62 = vsel %vm769_vm6, %v8225_v46, 0.0  ;;  %v8242_v17 = vpop.eup %7497 }
 0x463   : > { %1029 = vadd.xlane.f32.xlu1 %v1028_v62  ;;  %v1031_v21 = vsel %vm769_vm6, %v8242_v17, 0.0 }
 0x48e   : > { %v8233_v2 = vpop.f32.mrf.mxu0 }
 0x491   : > { %v989_v3 = vpop.f32.mrf.mxu1 }
 0x492   : > { %v997_v4 = vmul.f32 0.35355338, %v989_v3 }
 0x494   : > { %v1010_v52 = vsel %vm782_vm7, %v997_v4, -inf }
 0x495   : > { %1011 = vmax.xlane.f32.xlu2 %v1010_v52 }
 0x496   : > { %v8236_v5 = vpop.f32.mrf.mxu0 }
 0x499   : > { %v991_v8 = vpop.f32.mrf.mxu1 }
 0x49e   : > { %v8239_v11 = vpop.f32.mrf.mxu0 }
 0x4a1   : > { %v1427_v13 = vpop.f32.mrf.mxu1 }
 0x4a2   : > { %v1441_v14 = vmul.f32 0.35355338, %v1427_v13 }
 0x4a4   : > { %v1446_v15 = vsel %vm769_vm6, %v1441_v14, -inf }
 0x4a5   : > { %1447 = vmax.xlane.f32.xlu2 %v1446_v15 }
 0x4a6   : > { %v938_v16 = vpop.f32.mrf.mxu0 }
 0x4a9   : > { %v1429_v18 = vpop.f32.mrf.mxu1 }
 0x4aa   : > { %v1442_v19 = vmul.f32 0.35355338, %v1429_v18 }
 0x4ac   : > { %v1449_v20 = vsel %vm769_vm6, %v1442_v19, -inf }
 0x4ad   : > { %1450 = vmax.xlane.f32.xlu0 %v1449_v20  ;;  %1032 = vadd.xlane.f32.xlu2 %v1031_v21 }
 0x4ae   : > { %v8247_v23 = vpop.f32.mrf.mxu0 }
 0x4b1   : > { %v1432_v22 = vpop.f32.mrf.mxu1 }
 0x4b2   : > { %v8249_v24 = vmul.f32 0.35355338, %v1432_v22 }
 0x4b4   : > { %v1452_v25 = vsel %vm769_vm6, %v8249_v24, -inf }
 0x4b5   : > { %1453 = vmax.xlane.f32.xlu1 %v1452_v25 }
 0x4b6   : > { %v1205_v27 = vpop.f32.mrf.mxu0 }
 0x4b7   : > { %v8278_v62 = vmul.f32 0.35355338, %v1205_v27 }
 0x4b9   : > { %v1434_v28 = vpop.f32.mrf.mxu1 }
 0x4ba   : > { %v8253_v32 = vmul.f32 0.35355338, %v1434_v28  ;;  %v8305_v28 = vmul.f32 0.35355338, %v8247_v23 }
 0x4bc   : > { %v1455_v33 = vsel %vm769_vm6, %v8253_v32, -inf }
 0x4bd   : > { %1456 = vmax.xlane.f32.xlu2 %v1455_v33 }
 0x4be   : > { %v1208_v34 = vpop.f32.mrf.mxu0 }
 0x4bf   : > { %v8286_v12 = vmul.f32 0.35355338, %v1208_v34 }
 0x4c1   : > { %1125 = vrot.lane.b32.xlu0 %v8106_v58, %s10971_s0  ;;  %v1437_v35 = vpop.f32.mrf.mxu1  ;;  %v1228_v20 = vsel %vm769_vm6, %v8286_v12, -inf }
 0x4c2   : > { %v8276_v61 = vmul.f32 0.35355338, %v1437_v35 }
 0x4c4   : > { %v1458_v6 = vsel %vm782_vm7, %v8276_v61, -inf }
 0x4c5   : > { %v1006_v44 = vpop.xlane.xlu0 %1005 }
 0x4c6   : > { %v1210_v36 = vpop.f32.mrf.mxu0  ;;  %v1015_v48 = vsub.f32 %v8218_v49, %v1006_v44 }
 0x4c7   : > { %v8284_v10 = vmul.f32 0.35355338, %v1210_v36  ;;  %v1222_v36 = vsel %vm769_vm6, %v8305_v28, -inf }
 0x4c8   : > { %v1022_v51 = vmul.f32 1.442695, %v1015_v48 }
 0x4c9   : > { %v1439_v39 = vpop.f32.mrf.mxu1  ;;  %v1231_v16 = vsel %vm769_vm6, %v8284_v10, -inf }
 0x4cd   : > { %v1009_v7 = vpop.xlane.xlu1 %1008 }
 0x4ce   : > { %v1016_v56 = vsub.f32 %v996_v59, %v1009_v7  ;;  %1123 = vrot.lane.b32.xlu1 %v8102_v55, %s10971_s0  ;;  %v1213_v40 = vpop.f32.mrf.mxu0 }
 0x4cf   : > { %v8296_v22 = vmul.f32 0.35355338, %v1213_v40 }
 0x4d0   : > { %v1024_v41 = vmul.f32 1.442695, %v1016_v56 }
 0x4d2   : > { %7499 = vpow2.f32 %v1024_v41 }
 0x4d3   : > { %7501 = vpow2.f32 %v1022_v51 }
 0x4d6   : > { %v1215_v45 = vpop.f32.mrf.mxu0  ;;  %v1030_v33 = vpop.xlane.xlu1 %1029 }
 0x4d7   : > { %vm1048_vm14 = vweird.f32 %v1030_v33 }
 0x4d8   : > { %v8261_v47 = vpop.eup %7499 }
 0x4d9   : > { %v1037_v9 = vsel %vm769_vm6, %v8261_v47, 0.0  ;;  %v8266_v53 = vpop.eup %7501 }
 0x4da   : > { %1038 = vadd.xlane.f32.xlu2 %v1037_v9  ;;  %v1034_v54 = vsel %vm769_vm6, %v8266_v53, 0.0 }
 0x4eb   : > { %1035 = vadd.xlane.f32.xlu0 %v1034_v54 }
 0x4f2   : > { %1121 = vrot.lane.b32.xlu2 %v8094_v50, %s10971_s0  ;;  %s11029_s0 = smov 40  }
 0x508   : > { %v1012_v57 = vpop.xlane.xlu2 %1011 }
 0x509   : > { %v1017_v59 = vsub.f32 %v997_v4, %v1012_v57  ;;  %v1225_v4 = vsel %vm769_vm6, %v8278_v62, -inf }
 0x50b   : > { %v1026_v60 = vmul.f32 1.442695, %v1017_v59 }
 0x50d   : > { %7503 = vpow2.f32 %v1026_v60 }
 0x513   : > { %v8272_v49 = vpop.eup %7503 }
 0x514   : > { %v1040_v43 = vsel %vm782_vm7, %v8272_v49, 0.0 }
 0x515   : > { %1041 = vadd.xlane.f32.xlu1 %v1040_v43 }
 0x518   : > { %v1448_v3 = vpop.xlane.xlu2 %1447 }
 0x519   : > { %v1461_v52 = vsub.f32 %v1441_v14, %v1448_v3  ;;  %v1054_v3 = vand.u32 2147483648, %v1030_v33 }
 0x51b   : > { %v1466_v8 = vmul.f32 1.442695, %v1461_v52  ;;  %1459 = vmax.xlane.f32.xlu2 %v1458_v6  ;;  %v1052_v52 = vand.u32 2147483647, %v1030_v33 }
 0x51d   : > { %7505 = vpow2.f32 %v1466_v8  ;;  %1226 = vmax.xlane.f32.xlu1 %v1225_v4  ;;  %vm1053_vm8 = vcmp.eq.f32.partialorder %v1052_v52, 8.507059e+37 }
 0x520   : > { %v1451_v13 = vpop.xlane.xlu0 %1450  ;;  %v1033_v34 = vpop.xlane.xlu2 %1032 }
 0x521   : > { %v1462_v15 = vsub.f32 %v1442_v19, %v1451_v13  ;;  %v1234_v19 = vsel %vm782_vm7, %v8296_v22, -inf  ;;  %v1069_v59 = vand.u32 2147483648, %v1033_v34  ;;  %vm1063_vm12 = vweird.f32 %v1033_v34 }
 0x522   : > { %v1067_v43 = vand.u32 2147483647, %v1033_v34 }
 0x523   : > { %v8290_v14 = vpop.eup %7505  ;;  %v1468_v18 = vmul.f32 1.442695, %v1462_v15  ;;  %1232 = vmax.xlane.f32.xlu2 %v1231_v16  ;;  %v1070_v4 = vor.u32 1.1754944e-38, %v1069_v59  ;;  %v1055_v15 = vor.u32 1.1754944e-38, %v1054_v3 }
 0x524   : > { %v1476_v21 = vsel %vm769_vm6, %v8290_v14, 0.0  ;;  %vm1068_vm4 = vcmp.eq.f32.partialorder %v1067_v43, 8.507059e+37 }
 0x525   : > { %7507 = vpow2.f32 %v1468_v18  ;;  %1229 = vmax.xlane.f32.xlu1 %v1228_v20  ;;  %1477 = vadd.xlane.f32.xlu0 %v1476_v21 }
 0x526   : > { %7509 = vrcp.f32 %v1033_v34 }
 0x527   : > { %7511 = vrcp.f32 %v1030_v33 }
 0x528   : > { %v8310_v7 = vpop.xlane.xlu1 %1453 }
 0x52b   : > { %v8300_v25 = vpop.eup %7507  ;;  %1235 = vmax.xlane.f32.xlu2 %v1234_v19 }
 0x52c   : > { %v1479_v27 = vsel %vm769_vm6, %v8300_v25, 0.0  ;;  %v7510_v56 = vpop.eup %7509 }
 0x52d   : > { %1480 = vadd.xlane.f32.xlu0 %v1479_v27  ;;  %v7512_v40 = vpop.eup %7511  ;;  %v1059_v41 = vmul.f32 %v7510_v56, %v1033_v34  ;;  %vm1064_vm10 = vweird.f32 %v7510_v56 }
 0x52e   : > { %v1044_v23 = vmul.f32 %v7512_v40, %v1030_v33  ;;  %vm1049_vm11 = vweird.f32 %v7512_v40  ;;  %vm1065_vm13 = vmor %vm1063_vm12, %vm1064_vm10 }
 0x52f   : > { %v1060_v45 = vsub.f32 1.0, %v1059_v41  ;;  %vm1050_vm15 = vmor %vm1048_vm14, %vm1049_vm11 }
 0x530   : > { %v1045_v48 = vsub.f32 1.0, %v1044_v23  ;;  %v8314_v51 = vpop.xlane.xlu2 %1456 }
 0x531   : > { %v1061_v9 = vmul.f32 %v7510_v56, %v1060_v45 }
 0x532   : > { %v1046_v54 = vmul.f32 %v7512_v40, %v1045_v48 }
 0x533   : > { %v1126_v35 = vpop.permute.xlu0 %1125  ;;  %v1062_v57 = vadd.f32 %v7510_v56, %v1061_v9 }
 0x534   : > { %v1139_v39 = vand.u32 %v1126_v35, %v8120_v0  ;;  %v1047_v60 = vadd.f32 %v7512_v40, %v1046_v54 }
 0x535   : > { %1223 = vmax.xlane.f32.xlu0 %v1222_v36  ;;  %v1066_v8 = vsel %vm1065_vm13, %v7510_v56, %v1062_v57 }
 0x536   : > { %1146 = vmatpush.bf16.msrb.mxu2 %v1139_v39  ;;  %v1051_v13 = vsel %vm1050_vm15, %v7512_v40, %v1047_v60  ;;  %v1071_v16 = vsel %vm1068_vm4, %v1070_v4, %v1066_v8 }
 0x537   : > { %v1072_v18 = vmul.f32 %v8242_v17, %v1071_v16 }
 0x53e   : > { %1349 = vrot.lane.b32.xlu1 %v8106_v58, %s10973_s17 }
 0x540   : > { %v1124_v44 = vpop.permute.xlu1 %1123 }
 0x541   : > { %1147 = vmatpush.bf16.msrb.mxu2 %v1124_v44 }
 0x549   : > { %1573 = vrot.lane.b32.xlu0 %v8106_v58, %s10969_s18  ;;  %v1056_v58 = vsel %vm1053_vm8, %v1055_v15, %v1051_v13 }
 0x54a   : > { %v1057_v21 = vmul.f32 %v8225_v46, %v1056_v58 }
 0x54c   : > { %v1118_v27 = vpack.c.bf16 %v1072_v18, %v1057_v21 }
 0x54d   : > { %v1039_v6 = vpop.xlane.xlu2 %1038 }
 0x54e   : > { %7513 = vrcp.f32 %v1039_v6  ;;  %v1099_v41 = vand.u32 2147483648, %v1039_v6  ;;  %vm1093_vm10 = vweird.f32 %v1039_v6  ;;  %v1097_v23 = vand.u32 2147483647, %v1039_v6 }
 0x550   : > { %v1100_v9 = vor.u32 1.1754944e-38, %v1099_v41  ;;  %vm1098_vm14 = vcmp.eq.f32.partialorder %v1097_v23, 8.507059e+37 }
 0x551   : > { %1347 = vrot.lane.b32.xlu0 %v8102_v55, %s10973_s17 }
 0x554   : > { %v7514_v19 = vpop.eup %7513 }
 0x555   : > { %v1122_v20 = vpop.permute.xlu2 %1121  ;;  %v1089_v33 = vmul.f32 %v7514_v19, %v1039_v6  ;;  %vm1094_vm9 = vweird.f32 %v7514_v19 }
 0x556   : > { %1148 = vmatpush.bf16.msrb.mxu2 %v1122_v20  ;;  %vm1095_vm11 = vmor %vm1093_vm10, %vm1094_vm9 }
 0x557   : > { %v1090_v34 = vsub.f32 1.0, %v1089_v33 }
 0x559   : > { %6851 = vmatmul.msk.bf16.vlgmr.msrb.gmra.mxu2 %vm769_vm6, %v1118_v27  ;;  %v1091_v36 = vmul.f32 %v7514_v19, %v1090_v34 }
 0x55b   : > { %v1092_v40 = vadd.f32 %v7514_v19, %v1091_v36 }
 0x55d   : > { %v1096_v48 = vsel %vm1095_vm11, %v7514_v19, %v1092_v40 }
 0x55e   : > { %v1036_v35 = vpop.xlane.xlu0 %1035  ;;  %v1101_v59 = vsel %vm1098_vm14, %v1100_v9, %v1096_v48 }
 0x55f   : > { %7515 = vrcp.f32 %v1036_v35  ;;  %v1084_v44 = vand.u32 2147483648, %v1036_v35  ;;  %v1082_v45 = vand.u32 2147483647, %v1036_v35  ;;  %vm1078_vm13 = vweird.f32 %v1036_v35 }
 0x560   : > { %v1102_v52 = vmul.f32 %v8261_v47, %v1101_v59  ;;  %v1463_v59 = vsub.f32 %v8249_v24, %v8310_v7 }
 0x561   : > { %v1085_v57 = vor.u32 1.1754944e-38, %v1084_v44  ;;  %vm1083_vm4 = vcmp.eq.f32.partialorder %v1082_v45, 8.507059e+37 }
 0x565   : > { %v7516_v39 = vpop.eup %7515 }
 0x566   : > { %v1074_v56 = vmul.f32 %v7516_v39, %v1036_v35  ;;  %vm1079_vm12 = vweird.f32 %v7516_v39 }
 0x567   : > { %vm1080_vm15 = vmor %vm1078_vm13, %vm1079_vm12 }
 0x568   : > { %v1075_v17 = vsub.f32 1.0, %v1074_v56 }
 0x56a   : > { %v1076_v46 = vmul.f32 %v7516_v39, %v1075_v17 }
 0x56c   : > { %v1077_v54 = vadd.f32 %v7516_v39, %v1076_v46 }
 0x56e   : > { %v1081_v60 = vsel %vm1080_vm15, %v7516_v39, %v1077_v54 }
 0x56f   : > { %v1086_v43 = vsel %vm1083_vm4, %v1085_v57, %v1081_v60 }
 0x570   : > { %v1087_v3 = vmul.f32 %v8266_v53, %v1086_v43  ;;  %v1470_v43 = vmul.f32 1.442695, %v1463_v59 }
 0x572   : > { %v1119_v6 = vpack.c.bf16 %v1102_v52, %v1087_v3 }
 0x574   : > { %6852 = vmatmul.msk.bf16.gmra.mxu2 %vm769_vm6, %v1119_v6 }
 0x588   : > { %v1042_v8 = vpop.xlane.xlu1 %1041 }
 0x589   : > { %7517 = vrcp.f32 %v1042_v8  ;;  %v1114_v19 = vand.u32 2147483648, %v1042_v8  ;;  %v1112_v53 = vand.u32 2147483647, %v1042_v8  ;;  %vm1108_vm9 = vweird.f32 %v1042_v8 }
 0x58b   : > { %v1115_v36 = vor.u32 1.1754944e-38, %v1114_v19  ;;  %vm1113_vm11 = vcmp.eq.f32.partialorder %v1112_v53, 8.507059e+37 }
 0x58e   : > { %v8326_v4 = vpop.xlane.xlu2 %1459 }
 0x58f   : > { %v7518_v13 = vpop.eup %7517 }
 0x590   : > { %v1104_v15 = vmul.f32 %v7518_v13, %v1042_v8  ;;  %v1227_v16 = vpop.xlane.xlu1 %1226  ;;  %vm1109_vm8 = vweird.f32 %v7518_v13 }
 0x591   : > { %v1238_v58 = vsub.f32 %v8278_v62, %v1227_v16  ;;  %vm1110_vm10 = vmor %vm1108_vm9, %vm1109_vm8 }
 0x592   : > { %v1105_v18 = vsub.f32 1.0, %v1104_v15  ;;  %v1464_v15 = vsub.f32 %v8253_v32, %v8314_v51 }
 0x593   : > { %v1244_v20 = vmul.f32 1.442695, %v1238_v58 }
 0x594   : > { %v1106_v21 = vmul.f32 %v7518_v13, %v1105_v18  ;;  %v1472_v16 = vmul.f32 1.442695, %v1464_v15 }
 0x595   : > { %7519 = vpow2.f32 %v1244_v20 }
 0x596   : > { %v8329_v47 = vpop.xlane.xlu2 %1232  ;;  %v1107_v27 = vadd.f32 %v7518_v13, %v1106_v21 }
 0x597   : > { %v1240_v32 = vsub.f32 %v8284_v10, %v8329_v47 }
 0x598   : > { %v1230_v33 = vpop.xlane.xlu1 %1229  ;;  %v8331_v34 = vpop.xlane.xlu0 %1477  ;;  %v1111_v35 = vsel %vm1110_vm10, %v7518_v13, %v1107_v27 }
 0x599   : > { %v1239_v39 = vsub.f32 %v8286_v12, %v1230_v33  ;;  %v1116_v62 = vsel %vm1113_vm11, %v1115_v36, %v1111_v35  ;;  %v1248_v51 = vmul.f32 1.442695, %v1240_v32 }
 0x59a   : > { %v1117_v41 = vmul.f32 %v8272_v49, %v1116_v62 }
 0x59b   : > { %v8334_v56 = vpop.eup %7519  ;;  %v1246_v40 = vmul.f32 1.442695, %v1239_v39 }
 0x59c   : > { %v1255_v17 = vsel %vm769_vm6, %v8334_v56, 0.0  ;;  %v1120_v23 = vpack.c.bf16 %v1117_v41, %v1117_v41 }
 0x59d   : > { %7521 = vpow2.f32 %v1246_v40  ;;  %1256 = vadd.xlane.f32.xlu0 %v1255_v17 }
 0x59e   : > { %v1236_v44 = vpop.xlane.xlu2 %1235  ;;  %6853 = vmatmul.msk.bf16.gmra.mxu2 %vm769_vm6, %v1120_v23 }
 0x59f   : > { %v1241_v46 = vsub.f32 %v8296_v22, %v1236_v44 }
 0x5a0   : > { %v8341_v45 = vpop.xlane.xlu0 %1480 }
 0x5a1   : > { %v1250_v12 = vmul.f32 1.442695, %v1241_v46  ;;  %v1465_v46 = vsub.f32 %v8276_v61, %v8326_v4 }
 0x5a3   : > { %v8343_v48 = vpop.eup %7521  ;;  %7523 = vpow2.f32 %v1250_v12 }
 0x5a4   : > { %v1258_v49 = vsel %vm769_vm6, %v8343_v48, 0.0 }
 0x5a5   : > { %1259 = vadd.xlane.f32.xlu1 %v1258_v49 }
 0x5a8   : > { %v1224_v9 = vpop.xlane.xlu0 %1223 }
 0x5a9   : > { %v8347_v54 = vpop.eup %7523  ;;  %v1237_v57 = vsub.f32 %v8305_v28, %v1224_v9 }
 0x5aa   : > { %v1264_v22 = vsel %vm782_vm7, %v8347_v54, 0.0 }
 0x5ab   : > { %v1242_v60 = vmul.f32 1.442695, %v1237_v57  ;;  %v1474_v57 = vmul.f32 1.442695, %v1465_v46  ;;  %v1515_v46 = vand.u32 2147483647, %v8341_v45 }
 0x5ad   : > { %7525 = vpow2.f32 %v1242_v60  ;;  %1265 = vadd.xlane.f32.xlu1 %v1264_v22 }
 0x5ae   : > { %7527 = vpow2.f32 %v1470_v43 }
 0x5af   : > { %7529 = vpow2.f32 %v1472_v16 }
 0x5b0   : > { %v1350_v3 = vpop.permute.xlu1 %1349  ;;  %7531 = vpow2.f32 %v1248_v51 }
 0x5b1   : > { %1571 = vrot.lane.b32.xlu0 %v8102_v55, %s10969_s18  ;;  %v1363_v52 = vand.u32 %v1350_v3, %v8120_v0 }
 0x5b3   : > { %v8357_v6 = vpop.eup %7525  ;;  %1370 = vmatpush.bf16.msrb.mxu3 %v1363_v52 }
 0x5b4   : > { %v1252_v24 = vsel %vm769_vm6, %v8357_v6, 0.0  ;;  %v8361_v28 = vpop.eup %7527 }
 0x5b5   : > { %1253 = vadd.xlane.f32.xlu2 %v1252_v24  ;;  %v1482_v13 = vsel %vm769_vm6, %v8361_v28, 0.0  ;;  %v8370_v58 = vpop.eup %7529 }
 0x5b6   : > { %v1485_v18 = vsel %vm769_vm6, %v8370_v58, 0.0  ;;  %v8377_v27 = vpop.eup %7531 }
 0x5b7   : > { %v1261_v33 = vsel %vm769_vm6, %v8377_v27, 0.0 }
 0x5bb   : > { %v1574_v7 = vpop.permute.xlu0 %1573 }
 0x5bc   : > { %v1587_v8 = vand.u32 %v1574_v7, %v8120_v0 }
 0x5bd   : > { %1483 = vadd.xlane.f32.xlu2 %v1482_v13 }
 0x5be   : > { %1594 = vmatpush.bf16.msra.mxu2 %v1587_v8 }
 0x5c3   : > { %v1348_v55 = vpop.permute.xlu0 %1347 }
 0x5c4   : > { %1371 = vmatpush.bf16.msrb.mxu3 %v1348_v55 }
 0x5d5   : > { %1345 = vrot.lane.b32.xlu2 %v8094_v50, %s10973_s17  ;;  %s11052_s17 = smov 8  }
 0x5db   : > { %1486 = vadd.xlane.f32.xlu0 %v1485_v18 }
 0x5dc   : > { %v1150_v20 = vpop.f32.mrf.mxu2 }
 0x5e4   : > { %v1152_v21 = vpop.f32.mrf.mxu2 }
 0x5e5   : > { %v7346_v19 = vpack.i.bf16 %v1152_v21, %v1150_v20 }
 0x5e7   : > { %7347 = vrot.lane.b32.xlu1 %v7346_v19, %s10967_s19 }
 0x5f7   : > { %v1155_v53 = vpop.f32.mrf.mxu2 }
 0x5fe   : > { %1262 = vadd.xlane.f32.xlu2 %v1261_v33 }
 0x5ff   : > { %v1157_v35 = vpop.f32.mrf.mxu2 }
 0x600   : > { %v7361_v36 = vpack.i.bf16 %v1157_v35, %v1155_v53 }
 0x602   : > { %7362 = vrot.lane.b32.xlu1 %v7361_v36, %s10967_s19 }
 0x610   : > { %v1257_v39 = vpop.xlane.xlu0 %1256 }
 0x611   : > { %7533 = vrcp.f32 %v1257_v39  ;;  %v1293_v59 = vand.u32 2147483648, %v1257_v39  ;;  %vm1287_vm13 = vweird.f32 %v1257_v39  ;;  %v1291_v60 = vand.u32 2147483647, %v1257_v39 }
 0x613   : > { %v1294_v7 = vor.u32 1.1754944e-38, %v1293_v59  ;;  %vm1292_vm4 = vcmp.eq.f32.partialorder %v1291_v60, 8.507059e+37  ;;  %v1500_v59 = vand.u32 2147483647, %v8331_v34 }
 0x616   : > { %1569 = vrot.lane.b32.xlu2 %v8094_v50, %s10969_s18  ;;  %s11027_s18 = smov 48  }
 0x617   : > { %v7534_v62 = vpop.eup %7533 }
 0x618   : > { %v1283_v40 = vmul.f32 %v7534_v62, %v1257_v39  ;;  %vm1288_vm12 = vweird.f32 %v7534_v62 }
 0x619   : > { %vm1289_vm14 = vmor %vm1287_vm13, %vm1288_vm12  ;;  %vm1511_vm13 = vweird.f32 %v8341_v45 }
 0x61a   : > { %v1284_v41 = vsub.f32 1.0, %v1283_v40 }
 0x61c   : > { %v1285_v44 = vmul.f32 %v7534_v62, %v1284_v41 }
 0x61e   : > { %v1286_v49 = vadd.f32 %v7534_v62, %v1285_v44 }
 0x620   : > { %v1290_v24 = vsel %vm1289_vm14, %v7534_v62, %v1286_v49 }
 0x621   : > { %v1160_v10 = vpop.f32.mrf.mxu2  ;;  %v1295_v8 = vsel %vm1292_vm4, %v1294_v7, %v1290_v24 }
 0x622   : > { %v1296_v18 = vmul.f32 %v8334_v56, %v1295_v8 }
 0x623   : > { %v1572_v47 = vpop.permute.xlu0 %1571 }
 0x624   : > { %1595 = vmatpush.bf16.msra.mxu2 %v1572_v47 }
 0x628   : > { %v1254_v17 = vpop.xlane.xlu2 %1253 }
 0x629   : > { %7535 = vrcp.f32 %v1254_v17  ;;  %v1162_v23 = vpop.f32.mrf.mxu2  ;;  %v1278_v43 = vand.u32 2147483648, %v1254_v17  ;;  %v1276_v52 = vand.u32 2147483647, %v1254_v17  ;;  %vm1272_vm8 = vweird.f32 %v1254_v17 }
 0x62a   : > { %7537 = vpow2.f32 %v1474_v57 }
 0x62b   : > { %v1279_v4 = vor.u32 1.1754944e-38, %v1278_v43  ;;  %vm1277_vm10 = vcmp.eq.f32.partialorder %v1276_v52, 8.507059e+37  ;;  %7539 = vrcp.f32 %v8341_v45 }
 0x62c   : > { %7541 = vrcp.f32 %v8331_v34 }
 0x62f   : > { %v7536_v12 = vpop.eup %7535 }
 0x630   : > { %v1268_v9 = vmul.f32 %v7536_v12, %v1254_v17  ;;  %v8386_v50 = vpop.xlane.xlu2 %1483  ;;  %vm1273_vm15 = vweird.f32 %v7536_v12  ;;  %v8390_v20 = vpop.eup %7537  ;;  %v1517_v17 = vand.u32 2147483648, %v8341_v45 }
 0x631   : > { %vm1274_vm9 = vmor %vm1272_vm8, %vm1273_vm15  ;;  %v1488_v19 = vsel %vm782_vm7, %v8390_v20, 0.0  ;;  %v7540_v32 = vpop.eup %7539  ;;  %vm1496_vm15 = vweird.f32 %v8331_v34  ;;  %vm1516_vm8 = vcmp.eq.f32.partialorder %v1515_v46, 8.507059e+37 }
 0x632   : > { %v1269_v22 = vsub.f32 1.0, %v1268_v9  ;;  %v7542_v51 = vpop.eup %7541  ;;  %v1507_v56 = vmul.f32 %v7540_v32, %v8341_v45  ;;  %vm1512_vm11 = vweird.f32 %v7540_v32  ;;  %v1518_v45 = vor.u32 1.1754944e-38, %v1517_v17 }
 0x633   : > { %v1492_v53 = vmul.f32 %v7542_v51, %v8331_v34  ;;  %vm1497_vm12 = vweird.f32 %v7542_v51  ;;  %vm8419_vm14 = vmor %vm1511_vm13, %vm1512_vm11 }
 0x634   : > { %v1270_v3 = vmul.f32 %v7536_v12, %v1269_v22  ;;  %v1508_v33 = vsub.f32 1.0, %v1507_v56  ;;  %vm1498_vm4 = vmor %vm1496_vm15, %vm1497_vm12 }
 0x635   : > { %v1493_v36 = vsub.f32 1.0, %v1492_v53 }
 0x636   : > { %v1271_v61 = vadd.f32 %v7536_v12, %v1270_v3  ;;  %v1509_v62 = vmul.f32 %v7540_v32, %v1508_v33 }
 0x638   : > { %v1346_v13 = vpop.permute.xlu2 %1345  ;;  %v1275_v55 = vsel %vm1274_vm9, %v7536_v12, %v1271_v61  ;;  %v1510_v40 = vadd.f32 %v7540_v32, %v1509_v62  ;;  %v1502_v12 = vand.u32 2147483648, %v8331_v34  ;;  %vm1501_vm9 = vcmp.eq.f32.partialorder %v1500_v59, 8.507059e+37 }
 0x639   : > { %1372 = vmatpush.bf16.msrb.mxu3 %v1346_v13  ;;  %v1280_v15 = vsel %vm1277_vm10, %v1279_v4, %v1275_v55 }
 0x63a   : > { %v1281_v16 = vmul.f32 %v8357_v6, %v1280_v15  ;;  %v8398_v6 = vpop.xlane.xlu1 %1259  ;;  %v1514_v60 = vsel %vm8419_vm14, %v7540_v32, %v1510_v40  ;;  %v1503_v52 = vor.u32 1.1754944e-38, %v1502_v12 }
 0x63b   : > { %7543 = vrcp.f32 %v8398_v6  ;;  %v1519_v24 = vsel %vm1516_vm8, %v1518_v45, %v1514_v60  ;;  %vm1302_vm11 = vweird.f32 %v8398_v6  ;;  %v1532_v60 = vand.u32 2147483648, %v8386_v50 }
 0x63c   : > { %v1342_v21 = vpack.c.bf16 %v1296_v18, %v1281_v16  ;;  %v1520_v13 = vmul.f32 %v8300_v25, %v1519_v24  ;;  %v1306_v16 = vand.u32 2147483647, %v8398_v6 }
 0x63e   : > { %6857 = vmatmul.msk.bf16.vlgmr.msrb.gmra.mxu3 %vm769_vm6, %v1342_v21  ;;  %v1308_v21 = vand.u32 2147483648, %v8398_v6  ;;  %vm1307_vm13 = vcmp.eq.f32.partialorder %v1306_v16, 8.507059e+37 }
 0x63f   : > { %1489 = vadd.xlane.f32.xlu2 %v1488_v19 }
 0x641   : > { %v8405_v39 = vpop.eup %7543 }
 0x642   : > { %v1298_v47 = vmul.f32 %v8405_v39, %v8398_v6  ;;  %v8411_v41 = vpop.xlane.xlu1 %1265  ;;  %vm1303_vm10 = vweird.f32 %v8405_v39 }
 0x643   : > { %vm8447_vm12 = vmor %vm1302_vm11, %vm1303_vm10  ;;  %vm1526_vm11 = vweird.f32 %v8386_v50 }
 0x644   : > { %v1299_v9 = vsub.f32 1.0, %v1298_v47  ;;  %v1309_v47 = vor.u32 1.1754944e-38, %v1308_v21 }
 0x646   : > { %v1300_v7 = vmul.f32 %v8405_v39, %v1299_v9 }
 0x648   : > { %v1301_v15 = vadd.f32 %v8405_v39, %v1300_v7 }
 0x64e   : > { %v8403_v35 = vpop.xlane.xlu0 %1486 }
 0x64f   : > { %7545 = vrcp.f32 %v8403_v35  ;;  %v1547_v46 = vand.u32 2147483648, %v8403_v35  ;;  %v1545_v59 = vand.u32 2147483647, %v8403_v35 }
 0x650   : > { %7547 = vrcp.f32 %v8386_v50 }
 0x651   : > { %7549 = vrcp.f32 %v8411_v41 }
 0x655   : > { %v8414_v23 = vpop.eup %7545 }
 0x656   : > { %v8424_v57 = vpop.eup %7547  ;;  %v1537_v22 = vmul.f32 %v8414_v23, %v8403_v35  ;;  %vm1542_vm14 = vweird.f32 %v8414_v23 }
 0x657   : > { %1625 = vrot.lane.b32.xlu2 %v1160_v10, %s10967_s19  ;;  %v1494_v10 = vmul.f32 %v7542_v51, %v1493_v36  ;;  %v1522_v61 = vmul.f32 %v8424_v57, %v8386_v50  ;;  %v8435_v34 = vpop.eup %7549  ;;  %vm1527_vm8 = vweird.f32 %v8424_v57  ;;  %s10977_s19 = smov 24  }
 0x658   : > { %v1538_v8 = vsub.f32 1.0, %v1537_v22  ;;  %v1328_v19 = vmul.f32 %v8435_v34, %v8411_v41 }
 0x659   : > { %v1495_v44 = vadd.f32 %v7542_v51, %v1494_v10  ;;  %v1523_v55 = vsub.f32 1.0, %v1522_v61  ;;  %v1305_v10 = vsel %vm8447_vm12, %v8405_v39, %v1301_v15  ;;  %v1336_v15 = vand.u32 2147483647, %v8411_v41 }
 0x65a   : > { %v1310_v12 = vsel %vm1307_vm13, %v1309_v47, %v1305_v10 }
 0x65b   : > { %v1499_v3 = vsel %vm1498_vm4, %v7542_v51, %v1495_v44  ;;  %v1539_v51 = vmul.f32 %v8414_v23, %v1538_v8  ;;  %v1524_v36 = vmul.f32 %v8424_v57, %v1523_v55  ;;  %vm1541_vm4 = vweird.f32 %v8403_v35 }
 0x65c   : > { %v1504_v4 = vsel %vm1501_vm9, %v1503_v52, %v1499_v3  ;;  %vm8462_vm10 = vmor %vm1541_vm4, %vm1542_vm14  ;;  %v1530_v3 = vand.u32 2147483647, %v8386_v50  ;;  %v1311_v52 = vmul.f32 %v8343_v48, %v1310_v12  ;;  %v1548_v35 = vor.u32 1.1754944e-38, %v1547_v46 }
 0x65d   : > { %v1505_v32 = vmul.f32 %v8290_v14, %v1504_v4  ;;  %v1329_v14 = vsub.f32 1.0, %v1328_v19  ;;  %v1540_v44 = vadd.f32 %v8414_v23, %v1539_v51  ;;  %v1525_v49 = vadd.f32 %v8424_v57, %v1524_v36  ;;  %vm1528_vm14 = vmor %vm1526_vm11, %vm1527_vm8 }
 0x65e   : > { %v1533_v8 = vor.u32 1.1754944e-38, %v1532_v60  ;;  %vm1531_vm4 = vcmp.eq.f32.partialorder %v1530_v3, 8.507059e+37  ;;  %vm1333_vm8 = vweird.f32 %v8435_v34  ;;  %vm1337_vm11 = vcmp.eq.f32.partialorder %v1336_v15, 8.507059e+37 }
 0x65f   : > { %v1566_v53 = vpack.c.bf16 %v1520_v13, %v1505_v32  ;;  %v1529_v61 = vsel %vm1528_vm14, %v8424_v57, %v1525_v49  ;;  %v1330_v4 = vmul.f32 %v8435_v34, %v1329_v14 }
 0x660   : > { %v1534_v55 = vsel %vm1531_vm4, %v1533_v8, %v1529_v61  ;;  %vm1677_vm4 = vcmask 130048  }
 0x661   : > { %v1535_v57 = vmul.f32 %v8361_v28, %v1534_v55 }
 0x671   : > { %v1263_v43 = vpop.xlane.xlu2 %1262 }
 0x672   : > { %7551 = vrcp.f32 %v1263_v43  ;;  %v1323_v6 = vand.u32 2147483648, %v1263_v43  ;;  %v1321_v17 = vand.u32 2147483647, %v1263_v43  ;;  %vm1317_vm9 = vweird.f32 %v1263_v43 }
 0x674   : > { %v1324_v45 = vor.u32 1.1754944e-38, %v1323_v6  ;;  %vm1322_vm13 = vcmp.eq.f32.partialorder %v1321_v17, 8.507059e+37 }
 0x678   : > { %v7552_v18 = vpop.eup %7551 }
 0x679   : > { %v1313_v25 = vmul.f32 %v7552_v18, %v1263_v43  ;;  %v1570_v56 = vpop.permute.xlu2 %1569  ;;  %vm1318_vm15 = vweird.f32 %v7552_v18  ;;  %v1544_v43 = vsel %vm8462_vm10, %v8414_v23, %v1540_v44  ;;  %v1331_v23 = vadd.f32 %v8435_v34, %v1330_v4 }
 0x67a   : > { %1596 = vmatpush.bf16.msra.mxu2 %v1570_v56  ;;  %vm1319_vm12 = vmor %vm1317_vm9, %vm1318_vm15  ;;  %vm1546_vm15 = vcmp.eq.f32.partialorder %v1545_v59, 8.507059e+37  ;;  %vm1332_vm9 = vweird.f32 %v8411_v41 }
 0x67b   : > { %v1314_v62 = vsub.f32 1.0, %v1313_v25  ;;  %v1549_v50 = vsel %vm1546_vm15, %v1548_v35, %v1544_v43  ;;  %vm1334_vm10 = vmor %vm1332_vm9, %vm1333_vm8  ;;  %v7348_v35 = vpop.permute.xlu1 %7347  ;;  %vm10987_vm8 = vcmask 195584  }
 0x67c   : > { %v1550_v48 = vmul.f32 %v8370_v58, %v1549_v50  ;;  %v7349_v61 = vunpack.i.l.bf16 %v7348_v35 }
 0x67d   : > { %v1315_v40 = vmul.f32 %v7552_v18, %v1314_v62  ;;  %6863 = vmatmul.msk.bf16.vlgmr.msra.gmra.mxu2 %vm769_vm6, %v1566_v53 }
 0x67e   : > { %v1567_v16 = vpack.c.bf16 %v1550_v48, %v1535_v57  ;;  %v1672_v55 = vsel %vm722_vm5, %v8229_v63, %v7349_v61 }
 0x67f   : > { %v1316_v39 = vadd.f32 %v7552_v18, %v1315_v40 }
 0x681   : > { %v1320_v22 = vsel %vm1319_vm12, %v7552_v18, %v1316_v39  ;;  %v1335_v18 = vsel %vm1334_vm10, %v8435_v34, %v1331_v23  ;;  %vm10985_vm10 = vcmask 253952  }
 0x682   : > { %v1325_v24 = vsel %vm1322_vm13, %v1324_v45, %v1320_v22  ;;  %v7276_v22 = vld [vmem:[%s10956_s9 + $0x8] sm:$0xff] }
 0x683   : > { %v1326_v7 = vmul.f32 %v8377_v27, %v1325_v24  ;;  %v1338_v27 = vand.u32 2147483648, %v8411_v41  ;;  %1724 = vmatpush.bf16.msrb.mxu0 %v7276_v22 }
 0x685   : > { %v1343_v13 = vpack.c.bf16 %v1326_v7, %v1311_v52  ;;  %v1339_v21 = vor.u32 1.1754944e-38, %v1338_v27  ;;  %v7275_v52 = vld [vmem:[%s10956_s9] sm:$0xff]  ;;  %v7350_v7 = vunpack.i.h.bf16 %v7348_v35 }
 0x687   : > { %6858 = vmatmul.msk.bf16.gmra.mxu3 %vm769_vm6, %v1343_v13  ;;  %v1340_v58 = vsel %vm1337_vm11, %v1339_v21, %v1335_v18  ;;  %1725 = vmatpush.bf16.msrb.mxu0 %v7275_v52  ;;  %v1673_v13 = vsel %vm722_vm5, %v8231_v1, %v7350_v7  ;;  %v7363_v21 = vpop.permute.xlu1 %7362  ;;  %v7903_v7 = vmov 32.0  }
 0x688   : > { %v1341_v19 = vmul.f32 %v8347_v54, %v1340_v58  ;;  %v7364_v1 = vunpack.i.l.bf16 %v7363_v21 }
 0x68a   : > { %v1344_v32 = vpack.c.bf16 %v1341_v19, %v1341_v19  ;;  %v7365_v19 = vunpack.i.h.bf16 %v7363_v21 }
 0x68d   : > { %6864 = vmatmul.msk.bf16.gmra.mxu2 %vm769_vm6, %v1567_v16 }
 0x697   : > { %6859 = vmatmul.msk.bf16.gmra.mxu3 %vm769_vm6, %v1344_v32 }
 0x6b2   : > { %v1490_v51 = vpop.xlane.xlu2 %1489 }
 0x6b3   : > { %7553 = vrcp.f32 %v1490_v51  ;;  %v1562_v41 = vand.u32 2147483648, %v1490_v51  ;;  %v1560_v33 = vand.u32 2147483647, %v1490_v51  ;;  %vm1556_vm13 = vweird.f32 %v1490_v51 }
 0x6b4   : > { %7555 = vrcp.f32 %v7903_v7 }
 0x6b5   : > { %v1563_v62 = vor.u32 1.1754944e-38, %v1562_v41  ;;  %vm1561_vm15 = vcmp.eq.f32.partialorder %v1560_v33, 8.507059e+37 }
 0x6b9   : > { %v7554_v28 = vpop.eup %7553 }
 0x6ba   : > { %v1552_v25 = vmul.f32 %v7554_v28, %v1490_v51  ;;  %vm1557_vm12 = vweird.f32 %v7554_v28  ;;  %v7556_v61 = vpop.eup %7555 }
 0x6bb   : > { %vm1558_vm14 = vmor %vm1556_vm13, %vm1557_vm12  ;;  %vm1767_vm9 = vweird.f32 %v7556_v61 }
 0x6bc   : > { %v1553_v56 = vsub.f32 1.0, %v1552_v25  ;;  %v1674_v25 = vsel %vm722_vm5, %v8233_v2, %v7364_v1 }
 0x6be   : > { %v1554_v53 = vmul.f32 %v7554_v28, %v1553_v56 }
 0x6c0   : > { %v1555_v34 = vadd.f32 %v7554_v28, %v1554_v53 }
 0x6c1   : > { %v1374_v36 = vpop.f32.mrf.mxu3 }
 0x6c2   : > { %v1559_v10 = vsel %vm1558_vm14, %v7554_v28, %v1555_v34  ;;  %v1675_v28 = vsel %vm722_vm5, %v8236_v5, %v7365_v19 }
 0x6c3   : > { %v1564_v54 = vsel %vm1561_vm15, %v1563_v62, %v1559_v10  ;;  %v1626_v10 = vpop.permute.xlu2 %1625 }
 0x6c4   : > { %v1565_v14 = vmul.f32 %v8390_v20, %v1564_v54  ;;  %v1676_v5 = vsel %vm722_vm5, %v8239_v11, %v1626_v10  ;;  %v7277_v10 = vld [vmem:[%s10958_s11] sm:$0xff] }
 0x6c6   : > { %v1568_v6 = vpack.c.bf16 %v1565_v14, %v1565_v14 }
 0x6c8   : > { %6865 = vmatmul.msk.bf16.gmra.mxu2 %vm769_vm6, %v1568_v6 }
 0x6c9   : > { %v1376_v47 = vpop.f32.mrf.mxu3 }
 0x6ca   : > { %v7351_v40 = vpack.i.bf16 %v1376_v47, %v1374_v36 }
 0x6cc   : > { %7352 = vrot.lane.b32.xlu0 %v7351_v40, %s10979_s25  ;;  %v8531_v40 = vld [vmem:[%s10957_s10] sm:$0x3f] }
 0x6cd   : > { %v8587_v7 = vperm.slane %v8531_v40, 1 }
 0x700   : > { %v1598_v17 = vpop.f32.mrf.mxu2 }
 0x708   : > { %v1600_v44 = vpop.f32.mrf.mxu2 }
 0x709   : > { %v7356_v46 = vpack.i.bf16 %v1600_v44, %v1598_v17  ;;  %v1696_v17 = vperm.slane %v8531_v40, 0 }
 0x70a   : > { %v1379_v12 = vpop.f32.mrf.mxu3 }
 0x70b   : > { %7357 = vrot.lane.b32.xlu0 %v7356_v46, %s10977_s19 }
 0x710   : > { %v1603_v39 = vpop.f32.mrf.mxu2 }
 0x712   : > { %v1381_v49 = vpop.f32.mrf.mxu3 }
 0x713   : > { %v7366_v9 = vpack.i.bf16 %v1381_v49, %v1379_v12 }
 0x715   : > { %7367 = vrot.lane.b32.xlu0 %v7366_v9, %s10979_s25 }
 0x718   : > { %v1605_v20 = vpop.f32.mrf.mxu2 }
 0x719   : > { %v7371_v59 = vpack.i.bf16 %v1605_v20, %v1603_v39 }
 0x71a   : > { %v1384_v60 = vpop.f32.mrf.mxu3 }
 0x71b   : > { %7372 = vrot.lane.b32.xlu1 %v7371_v59, %s10977_s19 }
 0x71d   : > { %1645 = vrot.lane.b32.xlu0 %v1384_v60, %s10979_s25  ;;  %s11053_s25 = smov 16  }
 0x722   : > { %v1386_v45 = vpop.f32.mrf.mxu3 }
 0x73e   : > { %v7353_v24 = vpop.permute.xlu0 %7352 }
 0x73f   : > { %v7355_v4 = vunpack.i.h.bf16 %v7353_v24  ;;  %v7354_v8 = vunpack.i.l.bf16 %v7353_v24 }
 0x741   : > { %v1679_v27 = vsel %vm1677_vm4, %v1673_v13, %v7355_v4  ;;  %v1678_v57 = vsel %vm1677_vm4, %v1672_v55, %v7354_v8  ;;  %v1763_v4 = vmul.f32 32.0, %v7556_v61 }
 0x743   : > { %v1764_v8 = vsub.f32 1.0, %v1763_v4 }
 0x74b   : > { %v1608_v3 = vpop.f32.mrf.mxu2 }
 0x74c   : > { %1665 = vrot.lane.b32.xlu1 %v1608_v3, %s10977_s19  ;;  %s11025_s19 = smov 80  }
 0x753   : > { %v1610_v43 = vpop.f32.mrf.mxu2 }
 0x77d   : > { %v7358_v50 = vpop.permute.xlu0 %7357 }
 0x77e   : > { %v7360_v48 = vunpack.i.h.bf16 %v7358_v50  ;;  %v7359_v23 = vunpack.i.l.bf16 %v7358_v50  ;;  %v1765_v50 = vmul.f32 %v7556_v61, %v1764_v8 }
 0x780   : > { %v1685_v15 = vsel %vm10987_vm8, %v1679_v27, %v7360_v48  ;;  %v1684_v16 = vsel %vm10987_vm8, %v1678_v57, %v7359_v23 }
 0x781   : > { %v1689_v18 = vpack.c.bf16 %v1685_v15, %v1684_v16 }
 0x783   : > { %6874 = vmatmul.msk.bf16.vlgmr.msrb.gmra.mxu0 %vm10986_vm1, %v1689_v18 }
 0x787   : > { %v7368_v58 = vpop.permute.xlu0 %7367 }
 0x788   : > { %v7370_v32 = vunpack.i.h.bf16 %v7368_v58  ;;  %v7369_v51 = vunpack.i.l.bf16 %v7368_v58 }
 0x78a   : > { %v1680_v53 = vsel %vm1677_vm4, %v1674_v25, %v7369_v51  ;;  %v1681_v33 = vsel %vm1677_vm4, %v1675_v28, %v7370_v32 }
 0x78d   : > { %v7373_v63 = vpop.permute.xlu1 %7372 }
 0x78e   : > { %v7375_v56 = vunpack.i.h.bf16 %v7373_v63  ;;  %v7374_v41 = vunpack.i.l.bf16 %v7373_v63 }
 0x78f   : > { %v1646_v54 = vpop.permute.xlu0 %1645 }
 0x790   : > { %v1686_v34 = vsel %vm10987_vm8, %v1680_v53, %v7374_v41  ;;  %v1687_v36 = vsel %vm10987_vm8, %v1681_v33, %v7375_v56  ;;  %v1682_v2 = vsel %vm1677_vm4, %v1676_v5, %v1646_v54  ;;  %v7278_v33 = vld [vmem:[%s10958_s11 + $0x8] sm:$0xff] }
 0x791   : > { %v1690_v62 = vpack.c.bf16 %v1687_v36, %v1686_v34  ;;  %1914 = vmatpush.bf16.msra.mxu3 %v7278_v33 }
 0x793   : > { %6875 = vmatmul.msk.bf16.gmra.mxu0 %vm10986_vm1, %v1690_v62 }
 0x795   : > { %1915 = vmatpush.bf16.msra.mxu3 %v7277_v10 }
 0x7be   : > { %v1666_v14 = vpop.permute.xlu1 %1665 }
 0x7bf   : > { %v1688_v6 = vsel %vm10987_vm8, %v1682_v2, %v1666_v14 }
 0x7c0   : > { %v1691_v47 = vpack.c.bf16 %v1688_v6, %v1688_v6 }
 0x7c2   : > { %6876 = vmatmul.msk.bf16.gmra.mxu0 %vm10986_vm1, %v1691_v47 }
 0x800   : > { %v1727_v44 = vpop.f32.mrf.mxu0 }
 0x801   : > { %v1728_v46 = vadd.f32 %v1727_v44, %v1696_v17 }
 0x803   : > { %v1741_v12 = vadd.f32 %v1728_v46, %v8060_v29 }
 0x805   : > { %v1746_v11 = vsel %vm10986_vm1, %v1741_v12, 0.0 }
 0x806   : > { %1747 = vadd.xlane.f32.xlu0 %v1746_v11 }
 0x808   : > { %v1729_v39 = vpop.f32.mrf.mxu0 }
 0x809   : > { %v1730_v49 = vadd.f32 %v1729_v39, %v1696_v17 }
 0x80b   : > { %v1742_v9 = vadd.f32 %v1730_v49, %v8065_v31 }
 0x80d   : > { %v1749_v20 = vsel %vm10986_vm1, %v1742_v9, 0.0 }
 0x80e   : > { %1750 = vadd.xlane.f32.xlu1 %v1749_v20 }
 0x810   : > { %v1732_v59 = vpop.f32.mrf.mxu0 }
 0x811   : > { %v1733_v60 = vadd.f32 %v1732_v59, %v1696_v17 }
 0x813   : > { %v1743_v45 = vadd.f32 %v1733_v60, %v8076_v37  ;;  %v1766_v37 = vadd.f32 %v7556_v61, %v1765_v50 }
 0x815   : > { %v1752_v22 = vsel %vm10986_vm1, %v1743_v45, 0.0  ;;  %v8542_v13 = vsel %vm1767_vm9, %v7556_v61, %v1766_v37 }
 0x816   : > { %1753 = vadd.xlane.f32.xlu2 %v1752_v22 }
 0x818   : > { %v1734_v3 = vpop.f32.mrf.mxu0 }
 0x819   : > { %v1735_v43 = vadd.f32 %v1734_v3, %v1696_v17 }
 0x81b   : > { %v1744_v29 = vadd.f32 %v1735_v43, %v8078_v38 }
 0x81d   : > { %v1755_v52 = vsel %vm10986_vm1, %v1744_v29, 0.0 }
 0x81e   : > { %1756 = vadd.xlane.f32.xlu0 %v1755_v52 }
 0x83f   : > { %v1737_v24 = vpop.f32.mrf.mxu0 }
 0x840   : > { %v1738_v35 = vadd.f32 %v1737_v24, %v1696_v17 }
 0x842   : > { %v1745_v18 = vadd.f32 %v1738_v35, %v8086_v42 }
 0x844   : > { %v1759_v19 = vsel %vm10985_vm10, %v1745_v18, 0.0 }
 0x847   : > { %v1739_v31 = vpop.f32.mrf.mxu0 }
 0x879   : > { %v1748_v55 = vpop.xlane.xlu0 %1747 }
 0x87a   : > { %v1769_v48 = vmul.f32 %v8542_v13, %v1748_v55 }
 0x87c   : > { %v8545_v38 = vsub.f32 %v1741_v12, %v1769_v48 }
 0x87e   : > { %v1779_v23 = vmul.f32 %v8545_v38, %v8545_v38 }
 0x880   : > { %v1784_v27 = vsel %vm10986_vm1, %v1779_v23, 0.0 }
 0x881   : > { %1785 = vadd.xlane.f32.xlu1 %v1784_v27  ;;  %v1751_v57 = vpop.xlane.xlu1 %1750  ;;  %v1870_v27 = vperm.slane %v8531_v40, 2 }
 0x882   : > { %v1770_v15 = vmul.f32 %v8542_v13, %v1751_v57 }
 0x884   : > { %v8551_v16 = vsub.f32 %v1742_v9, %v1770_v15 }
 0x886   : > { %v1780_v21 = vmul.f32 %v8551_v16, %v8551_v16 }
 0x888   : > { %v1787_v58 = vsel %vm10986_vm1, %v1780_v21, 0.0 }
 0x889   : > { %1788 = vadd.xlane.f32.xlu0 %v1787_v58  ;;  %1760 = vadd.xlane.f32.xlu1 %v1759_v19  ;;  %v1754_v1 = vpop.xlane.xlu2 %1753 }
 0x88a   : > { %v1771_v32 = vmul.f32 %v8542_v13, %v1754_v1 }
 0x88c   : > { %v8559_v51 = vsub.f32 %v1743_v45, %v1771_v32 }
 0x88e   : > { %v1781_v63 = vmul.f32 %v8559_v51, %v8559_v51 }
 0x890   : > { %v1790_v42 = vsel %vm10986_vm1, %v1781_v63, 0.0 }
 0x891   : > { %v1757_v28 = vpop.xlane.xlu0 %1756  ;;  %1791 = vadd.xlane.f32.xlu2 %v1790_v42 }
 0x892   : > { %v1772_v25 = vmul.f32 %v8542_v13, %v1757_v28 }
 0x894   : > { %v8565_v56 = vsub.f32 %v1744_v29, %v1772_v25 }
 0x896   : > { %v1782_v41 = vmul.f32 %v8565_v56, %v8565_v56 }
 0x898   : > { %v1793_v53 = vsel %vm10986_vm1, %v1782_v41, 0.0 }
 0x899   : > { %1794 = vadd.xlane.f32.xlu0 %v1793_v53 }
 0x8f4   : > { %v1786_v34 = vpop.xlane.xlu1 %1785 }
 0x8f5   : > { %v1799_v36 = vmul.f32 %v1786_v34, %v8542_v13 }
 0x8f7   : > { %v1804_v62 = vadd.f32 1e-05, %v1799_v36 }
 0x8f9   : > { %7557 = vrsqrt.f32 %v1804_v62  ;;  %vm1815_vm12 = vweird.f32 %v1804_v62 }
 0x8fc   : > { %v1789_v54 = vpop.xlane.xlu0 %1788  ;;  %v1761_v5 = vpop.xlane.xlu1 %1760 }
 0x8fd   : > { %v1800_v2 = vmul.f32 %v1789_v54, %v8542_v13  ;;  %v1773_v14 = vmul.f32 %v8542_v13, %v1761_v5 }
 0x8ff   : > { %v7558_v6 = vpop.eup %7557  ;;  %v1805_v47 = vadd.f32 1e-05, %v1800_v2  ;;  %v8579_v17 = vsub.f32 %v1745_v18, %v1773_v14  ;;  %v7281_v14 = vld [vmem:[%s10960_s13 + $0x10] sm:$0xff] }
 0x900   : > { %v1810_v44 = vmul.f32 %v7558_v6, %v1804_v62  ;;  %vm1816_vm11 = vweird.f32 %v7558_v6 }
 0x901   : > { %7559 = vrsqrt.f32 %v1805_v47  ;;  %v1783_v46 = vmul.f32 %v8579_v17, %v8579_v17  ;;  %vm1817_vm13 = vmor %vm1815_vm12, %vm1816_vm11  ;;  %vm1825_vm15 = vweird.f32 %v1805_v47 }
 0x902   : > { %v1811_v12 = vmul.f32 %v7558_v6, %v1810_v44 }
 0x903   : > { %v1796_v11 = vsel %vm10985_vm10, %v1783_v46, 0.0  ;;  %v7280_v46 = vld [vmem:[%s10960_s13 + $0x8] sm:$0xff] }
 0x904   : > { %v1812_v39 = vmul.f32 0.5, %v1811_v12  ;;  %1797 = vadd.xlane.f32.xlu1 %v1796_v11  ;;  %v1792_v49 = vpop.xlane.xlu2 %1791 }
 0x905   : > { %v1801_v9 = vmul.f32 %v1792_v49, %v8542_v13 }
 0x906   : > { %v1813_v20 = vsub.f32 1.5, %v1812_v39  ;;  %v7279_v39 = vld [vmem:[%s10960_s13] sm:$0xff] }
 0x907   : > { %v7560_v59 = vpop.eup %7559  ;;  %v1806_v60 = vadd.f32 1e-05, %v1801_v9 }
 0x908   : > { %v1814_v45 = vmul.f32 %v7558_v6, %v1813_v20  ;;  %v1820_v22 = vmul.f32 %v7560_v59, %v1805_v47  ;;  %vm1826_vm14 = vweird.f32 %v7560_v59 }
 0x909   : > { %7561 = vrsqrt.f32 %v1806_v60  ;;  %vm1827_vm9 = vmor %vm1825_vm15, %vm1826_vm14  ;;  %vm1835_vm12 = vweird.f32 %v1806_v60 }
 0x90a   : > { %v1821_v3 = vmul.f32 %v7560_v59, %v1820_v22  ;;  %v1818_v43 = vsel %vm1817_vm13, %v7558_v6, %v1814_v45 }
 0x90b   : > { %v1859_v61 = vmul.f32 %v1818_v43, %v8545_v38 }
 0x90c   : > { %v1822_v29 = vmul.f32 0.5, %v1821_v3  ;;  %v1795_v52 = vpop.xlane.xlu0 %1794  ;;  %v7468_v3 = vld [vmem:[%s10959_s12] ss:$0 sm:$0xff] }
 0x90d   : > { %v1802_v24 = vmul.f32 %v1795_v52, %v8542_v13  ;;  %v1865_v48 = vmul.f32 %v8587_v7, %v1859_v61 }
 0x90e   : > { %v1823_v35 = vsub.f32 1.5, %v1822_v29 }
 0x90f   : > { %v7562_v31 = vpop.eup %7561  ;;  %v1807_v4 = vadd.f32 1e-05, %v1802_v24  ;;  %v8594_v38 = vadd.f32 %v1870_v27, %v1865_v48 }
 0x910   : > { %v1824_v8 = vmul.f32 %v7560_v59, %v1823_v35  ;;  %v1830_v50 = vmul.f32 %v7562_v31, %v1806_v60  ;;  %vm1836_vm11 = vweird.f32 %v7562_v31 }
 0x911   : > { %7563 = vrsqrt.f32 %v1807_v4  ;;  %vm1837_vm13 = vmor %vm1835_vm12, %vm1836_vm11  ;;  %vm1845_vm15 = vweird.f32 %v1807_v4 }
 0x912   : > { %v1828_v37 = vsel %vm1827_vm9, %v7560_v59, %v1824_v8  ;;  %v1831_v55 = vmul.f32 %v7562_v31, %v1830_v50 }
 0x913   : > { %v1860_v23 = vmul.f32 %v1828_v37, %v8551_v16 }
 0x914   : > { %v1832_v57 = vmul.f32 0.5, %v1831_v55 }
 0x915   : > { %v1866_v15 = vmul.f32 %v8587_v7, %v1860_v23 }
 0x916   : > { %v1833_v18 = vsub.f32 1.5, %v1832_v57 }
 0x917   : > { %v7564_v21 = vpop.eup %7563  ;;  %v8596_v58 = vadd.f32 %v1870_v27, %v1866_v15  ;;  %v1947_v15 = vperm.slane %v8531_v40, 3 }
 0x918   : > { %v1834_v19 = vmul.f32 %v7562_v31, %v1833_v18  ;;  %v1840_v1 = vmul.f32 %v7564_v21, %v1807_v4  ;;  %vm1846_vm14 = vweird.f32 %v7564_v21 }
 0x919   : > { %v1876_v32 = vpack.c.bf16 %v8596_v58, %v8594_v38  ;;  %vm1847_vm9 = vmor %vm1845_vm15, %vm1846_vm14 }
 0x91a   : > { %v1841_v63 = vmul.f32 %v7564_v21, %v1840_v1  ;;  %v1838_v16 = vsel %vm1837_vm13, %v7562_v31, %v1834_v19 }
 0x91b   : > { %6885 = vmatmul.msk.bf16.vlgmr.msra.gmra.mxu3 %vm10986_vm1, %v1876_v32  ;;  %v1861_v25 = vmul.f32 %v1838_v16, %v8559_v51 }
 0x91c   : > { %v1842_v42 = vmul.f32 0.5, %v1841_v63 }
 0x91d   : > { %v1867_v34 = vmul.f32 %v8587_v7, %v1861_v25 }
 0x91e   : > { %v1843_v28 = vsub.f32 1.5, %v1842_v42 }
 0x91f   : > { %v8605_v62 = vadd.f32 %v1870_v27, %v1867_v34 }
 0x920   : > { %v1844_v41 = vmul.f32 %v7564_v21, %v1843_v28 }
 0x922   : > { %v1848_v53 = vsel %vm1847_vm9, %v7564_v21, %v1844_v41 }
 0x923   : > { %v1862_v33 = vmul.f32 %v1848_v53, %v8565_v56  ;;  %v7282_v56 = vld [vmem:[%s10960_s13 + $0x18] sm:$0xff] }
 0x924   : > { %1985 = vmatpush.bf16.msrb.mxu1 %v7282_v56 }
 0x925   : > { %v1868_v36 = vmul.f32 %v8587_v7, %v1862_v33 }
 0x927   : > { %v8607_v10 = vadd.f32 %v1870_v27, %v1868_v36 }
 0x928   : > { %1986 = vmatpush.bf16.msrb.mxu1 %v7281_v14 }
 0x929   : > { %v1877_v54 = vpack.c.bf16 %v8607_v10, %v8605_v62 }
 0x92b   : > { %6886 = vmatmul.msk.bf16.gmra.mxu3 %vm10986_vm1, %v1877_v54 }
 0x92c   : > { %1987 = vmatpush.bf16.msrb.mxu1 %v7280_v46 }
 0x930   : > { %1988 = vmatpush.bf16.msrb.mxu1 %v7279_v39 }
 0x977   : > { %v1798_v51 = vpop.xlane.xlu1 %1797 }
 0x978   : > { %v1803_v5 = vmul.f32 %v1798_v51, %v8542_v13 }
 0x97a   : > { %v1808_v2 = vadd.f32 1e-05, %v1803_v5 }
 0x97c   : > { %7565 = vrsqrt.f32 %v1808_v2  ;;  %vm1855_vm12 = vweird.f32 %v1808_v2 }
 0x982   : > { %v7566_v6 = vpop.eup %7565 }
 0x983   : > { %v1850_v47 = vmul.f32 %v7566_v6, %v1808_v2  ;;  %vm1856_vm11 = vweird.f32 %v7566_v6 }
 0x984   : > { %vm1857_vm13 = vmor %vm1855_vm12, %vm1856_vm11 }
 0x985   : > { %v1851_v44 = vmul.f32 %v7566_v6, %v1850_v47 }
 0x987   : > { %v1852_v12 = vmul.f32 0.5, %v1851_v44 }
 0x989   : > { %v1853_v11 = vsub.f32 1.5, %v1852_v12 }
 0x98b   : > { %v1854_v49 = vmul.f32 %v7566_v6, %v1853_v11 }
 0x98d   : > { %v1858_v9 = vsel %vm1857_vm13, %v7566_v6, %v1854_v49 }
 0x98e   : > { %v1863_v20 = vmul.f32 %v1858_v9, %v8579_v17 }
 0x990   : > { %v1869_v59 = vmul.f32 %v8587_v7, %v1863_v20 }
 0x992   : > { %v1875_v60 = vadd.f32 %v1870_v27, %v1869_v59 }
 0x994   : > { %v1878_v45 = vpack.c.bf16 %v1875_v60, %v1875_v60 }
 0x996   : > { %6887 = vmatmul.msk.bf16.gmra.mxu3 %vm10986_vm1, %v1878_v45 }
 0x99e   : > { %v1917_v22 = vpop.f32.mrf.mxu3 }
 0x99f   : > { %v1918_v43 = vadd.f32 %v7468_v3, %v1917_v22 }
 0x9a1   : > { %v1931_v24 = vmax.f32 %v1918_v43, 0.0 }
 0x9a6   : > { %v1919_v29 = vpop.f32.mrf.mxu3 }
 0x9a7   : > { %v1920_v52 = vadd.f32 %v7468_v3, %v1919_v29 }
 0x9a9   : > { %v1932_v35 = vmax.f32 %v1920_v52, 0.0 }
 0x9ab   : > { %v1936_v31 = vpack.c.bf16 %v1932_v35, %v1931_v24 }
 0x9ad   : > { %6904 = vmatmul.msk.bf16.vlgmr.msrb.gmra.mxu1 %vm10984_vm2, %v1936_v31 }
 0x9ae   : > { %v1922_v17 = vpop.f32.mrf.mxu3 }
 0x9af   : > { %v1923_v61 = vadd.f32 %v7468_v3, %v1922_v17  ;;  %v7284_v17 = vld [vmem:[%s10954_s7 + $0x18] sm:$0xff] }
 0x9b0   : > { %2173 = vmatpush.bf16.msrb.mxu2 %v7284_v17 }
 0x9b1   : > { %v1933_v8 = vmax.f32 %v1923_v61, 0.0 }
 0x9b6   : > { %v1924_v7 = vpop.f32.mrf.mxu3 }
 0x9b7   : > { %v1925_v4 = vadd.f32 %v7468_v3, %v1924_v7 }
 0x9b9   : > { %v1934_v50 = vmax.f32 %v1925_v4, 0.0 }
 0x9bb   : > { %v1937_v37 = vpack.c.bf16 %v1934_v50, %v1933_v8  ;;  %v7283_v8 = vld [vmem:[%s10954_s7 + $0x10] sm:$0xff] }
 0x9bc   : > { %2174 = vmatpush.bf16.msrb.mxu2 %v7283_v8 }
 0x9bd   : > { %6905 = vmatmul.msk.bf16.gmra.mxu1 %vm10984_vm2, %v1937_v37 }
 0xa19   : > { %v1927_v55 = vpop.f32.mrf.mxu3 }
 0xa1a   : > { %v1928_v48 = vadd.f32 %v7468_v3, %v1927_v55 }
 0xa1c   : > { %v1935_v23 = vmax.f32 %v1928_v48, 0.0 }
 0xa1e   : > { %v1938_v27 = vpack.c.bf16 %v1935_v23, %v1935_v23 }
 0xa20   : > { %6906 = vmatmul.msk.bf16.gmra.mxu1 %vm10984_vm2, %v1938_v27 }
 0xa21   : > { %v1929_v57 = vpop.f32.mrf.mxu3 }
 0xa2a   : > { %v1990_v18 = vpop.f32.mrf.mxu1 }
 0xa2b   : > { %v1991_v21 = vadd.f32 %v1990_v18, %v1947_v15 }
 0xa2d   : > { %v2004_v19 = vadd.f32 %v1991_v21, %v8594_v38 }
 0xa2f   : > { %v2009_v1 = vsel %vm10986_vm1, %v2004_v19, 0.0 }
 0xa30   : > { %2010 = vadd.xlane.f32.xlu2 %v2009_v1 }
 0xa32   : > { %v1992_v32 = vpop.f32.mrf.mxu1 }
 0xa33   : > { %v1993_v63 = vadd.f32 %v1992_v32, %v1947_v15 }
 0xa35   : > { %v2005_v16 = vadd.f32 %v1993_v63, %v8596_v58 }
 0xa37   : > { %v2012_v42 = vsel %vm10986_vm1, %v2005_v16, 0.0 }
 0xa38   : > { %2013 = vadd.xlane.f32.xlu0 %v2012_v42 }
 0xa3a   : > { %v1995_v28 = vpop.f32.mrf.mxu1 }
 0xa3b   : > { %v1996_v25 = vadd.f32 %v1995_v28, %v1947_v15 }
 0xa3d   : > { %v2006_v41 = vadd.f32 %v1996_v25, %v8605_v62 }
 0xa3f   : > { %v2015_v53 = vsel %vm10986_vm1, %v2006_v41, 0.0 }
 0xa40   : > { %2016 = vadd.xlane.f32.xlu1 %v2015_v53 }
 0xa42   : > { %v1997_v33 = vpop.f32.mrf.mxu1 }
 0xa43   : > { %v1998_v34 = vadd.f32 %v1997_v33, %v1947_v15 }
 0xa45   : > { %v2007_v38 = vadd.f32 %v1998_v34, %v8607_v10  ;;  %v2119_v34 = vperm.slane %v8531_v40, 4 }
 0xa47   : > { %v2018_v36 = vsel %vm10986_vm1, %v2007_v38, 0.0 }
 0xa48   : > { %2019 = vadd.xlane.f32.xlu2 %v2018_v36 }
 0xa9d   : > { %v2000_v54 = vpop.f32.mrf.mxu1 }
 0xa9e   : > { %v2001_v51 = vadd.f32 %v2000_v54, %v1947_v15 }
 0xaa0   : > { %v2008_v58 = vadd.f32 %v2001_v51, %v1875_v60 }
 0xaa2   : > { %v2021_v5 = vsel %vm10985_vm10, %v2008_v58, 0.0 }
 0xaa3   : > { %2022 = vadd.xlane.f32.xlu0 %v2021_v5  ;;  %v2011_v2 = vpop.xlane.xlu2 %2010 }
 0xaa4   : > { %v2024_v56 = vmul.f32 %v2011_v2, %v8542_v13 }
 0xaa5   : > { %v2002_v62 = vpop.f32.mrf.mxu1 }
 0xaa6   : > { %v8645_v14 = vsub.f32 %v2004_v19, %v2024_v56  ;;  %v2125_v62 = vperm.slane %v8531_v40, 5 }
 0xaa8   : > { %v2034_v6 = vmul.f32 %v8645_v14, %v8645_v14 }
 0xaaa   : > { %v2039_v10 = vsel %vm10986_vm1, %v2034_v6, 0.0 }
 0xaab   : > { %v2014_v47 = vpop.xlane.xlu0 %2013  ;;  %2040 = vadd.xlane.f32.xlu1 %v2039_v10 }
 0xaac   : > { %v2025_v44 = vmul.f32 %v2014_v47, %v8542_v13 }
 0xaae   : > { %v8651_v46 = vsub.f32 %v2005_v16, %v2025_v44 }
 0xab0   : > { %v2035_v12 = vmul.f32 %v8651_v46, %v8651_v46 }
 0xab2   : > { %v2042_v11 = vsel %vm10986_vm1, %v2035_v12, 0.0 }
 0xab3   : > { %2043 = vadd.xlane.f32.xlu2 %v2042_v11  ;;  %v2017_v39 = vpop.xlane.xlu1 %2016 }
 0xab4   : > { %v2026_v49 = vmul.f32 %v2017_v39, %v8542_v13 }
 0xab6   : > { %v8657_v9 = vsub.f32 %v2006_v41, %v2026_v49 }
 0xab8   : > { %v2036_v20 = vmul.f32 %v8657_v9, %v8657_v9 }
 0xaba   : > { %v2045_v59 = vsel %vm10986_vm1, %v2036_v20, 0.0 }
 0xabb   : > { %2046 = vadd.xlane.f32.xlu0 %v2045_v59  ;;  %v2020_v60 = vpop.xlane.xlu2 %2019 }
 0xabc   : > { %v2027_v45 = vmul.f32 %v2020_v60, %v8542_v13 }
 0xabe   : > { %v8663_v22 = vsub.f32 %v2007_v38, %v2027_v45 }
 0xac0   : > { %v2037_v3 = vmul.f32 %v8663_v22, %v8663_v22 }
 0xac2   : > { %v2048_v43 = vsel %vm10986_vm1, %v2037_v3, 0.0 }
 0xac3   : > { %2049 = vadd.xlane.f32.xlu1 %v2048_v43 }
 0xb16   : > { %v2023_v29 = vpop.xlane.xlu0 %2022 }
 0xb17   : > { %v2028_v52 = vmul.f32 %v2023_v29, %v8542_v13 }
 0xb19   : > { %v8669_v24 = vsub.f32 %v2008_v58, %v2028_v52 }
 0xb1b   : > { %v2038_v35 = vmul.f32 %v8669_v24, %v8669_v24 }
 0xb1d   : > { %v2051_v31 = vsel %vm10985_vm10, %v2038_v35, 0.0 }
 0xb1e   : > { %2052 = vadd.xlane.f32.xlu2 %v2051_v31  ;;  %v2041_v61 = vpop.xlane.xlu1 %2040 }
 0xb1f   : > { %v2054_v7 = vmul.f32 %v2041_v61, %v8542_v13 }
 0xb21   : > { %v2059_v4 = vadd.f32 1e-05, %v2054_v7 }
 0xb23   : > { %7567 = vrsqrt.f32 %v2059_v4  ;;  %vm2070_vm15 = vweird.f32 %v2059_v4 }
 0xb26   : > { %v2044_v50 = vpop.xlane.xlu2 %2043 }
 0xb27   : > { %v2055_v37 = vmul.f32 %v2044_v50, %v8542_v13 }
 0xb29   : > { %v7568_v55 = vpop.eup %7567  ;;  %v2060_v48 = vadd.f32 1e-05, %v2055_v37 }
 0xb2a   : > { %v2065_v23 = vmul.f32 %v7568_v55, %v2059_v4  ;;  %vm2071_vm14 = vweird.f32 %v7568_v55 }
 0xb2b   : > { %7569 = vrsqrt.f32 %v2060_v48  ;;  %vm2072_vm9 = vmor %vm2070_vm15, %vm2071_vm14  ;;  %vm2080_vm12 = vweird.f32 %v2060_v48 }
 0xb2c   : > { %v2066_v27 = vmul.f32 %v7568_v55, %v2065_v23 }
 0xb2e   : > { %v2067_v57 = vmul.f32 0.5, %v2066_v27  ;;  %v2047_v15 = vpop.xlane.xlu0 %2046 }
 0xb2f   : > { %v2056_v18 = vmul.f32 %v2047_v15, %v8542_v13 }
 0xb30   : > { %v2068_v21 = vsub.f32 1.5, %v2067_v57 }
 0xb31   : > { %v7570_v19 = vpop.eup %7569  ;;  %v2061_v1 = vadd.f32 1e-05, %v2056_v18 }
 0xb32   : > { %v2069_v32 = vmul.f32 %v7568_v55, %v2068_v21  ;;  %v2075_v63 = vmul.f32 %v7570_v19, %v2060_v48  ;;  %vm2081_vm11 = vweird.f32 %v7570_v19 }
 0xb33   : > { %7571 = vrsqrt.f32 %v2061_v1  ;;  %vm2082_vm13 = vmor %vm2080_vm12, %vm2081_vm11  ;;  %vm2090_vm15 = vweird.f32 %v2061_v1 }
 0xb34   : > { %v2076_v16 = vmul.f32 %v7570_v19, %v2075_v63  ;;  %v2073_v42 = vsel %vm2072_vm9, %v7568_v55, %v2069_v32 }
 0xb35   : > { %v2114_v38 = vmul.f32 %v2073_v42, %v8645_v14 }
 0xb36   : > { %v2077_v28 = vmul.f32 0.5, %v2076_v16  ;;  %v2050_v25 = vpop.xlane.xlu1 %2049 }
 0xb37   : > { %v2057_v41 = vmul.f32 %v2050_v25, %v8542_v13  ;;  %v2120_v2 = vmul.f32 %v2119_v34, %v2114_v38 }
 0xb38   : > { %v2078_v53 = vsub.f32 1.5, %v2077_v28 }
 0xb39   : > { %v7572_v33 = vpop.eup %7571  ;;  %v2062_v36 = vadd.f32 1e-05, %v2057_v41  ;;  %v8688_v12 = vadd.f32 %v2125_v62, %v2120_v2 }
 0xb3a   : > { %v2079_v54 = vmul.f32 %v7570_v19, %v2078_v53  ;;  %v2085_v51 = vmul.f32 %v7572_v33, %v2061_v1  ;;  %vm2091_vm14 = vweird.f32 %v7572_v33  ;;  %v7469_v1 = vld [vmem:[%s10955_s8 + $0x1] ss:$0 sm:$0xff] }
 0xb3b   : > { %7573 = vrsqrt.f32 %v2062_v36  ;;  %vm2092_vm9 = vmor %vm2090_vm15, %vm2091_vm14  ;;  %vm2100_vm12 = vweird.f32 %v2062_v36 }
 0xb3c   : > { %v2083_v58 = vsel %vm2082_vm13, %v7570_v19, %v2079_v54  ;;  %v2086_v5 = vmul.f32 %v7572_v33, %v2085_v51 }
 0xb3d   : > { %v2115_v56 = vmul.f32 %v2083_v58, %v8651_v46 }
 0xb3e   : > { %v2087_v6 = vmul.f32 0.5, %v2086_v5 }
 0xb3f   : > { %v2121_v10 = vmul.f32 %v2119_v34, %v2115_v56 }
 0xb40   : > { %v2088_v47 = vsub.f32 1.5, %v2087_v6 }
 0xb41   : > { %v7574_v44 = vpop.eup %7573  ;;  %v8690_v14 = vadd.f32 %v2125_v62, %v2121_v10 }
 0xb42   : > { %v2089_v11 = vmul.f32 %v7572_v33, %v2088_v47  ;;  %v2095_v39 = vmul.f32 %v7574_v44, %v2062_v36  ;;  %vm2101_vm11 = vweird.f32 %v7574_v44 }
 0xb43   : > { %v2133_v49 = vpack.c.bf16 %v8690_v14, %v8688_v12  ;;  %vm2102_vm13 = vmor %vm2100_vm12, %vm2101_vm11 }
 0xb44   : > { %v2096_v20 = vmul.f32 %v7574_v44, %v2095_v39  ;;  %v2093_v40 = vsel %vm2092_vm9, %v7572_v33, %v2089_v11 }
 0xb45   : > { %6921 = vmatmul.msk.bf16.vlgmr.msrb.gmra.mxu2 %vm10986_vm1, %v2133_v49  ;;  %v2116_v60 = vmul.f32 %v2093_v40, %v8657_v9 }
 0xb46   : > { %v2097_v46 = vmul.f32 0.5, %v2096_v20 }
 0xb47   : > { %v2122_v29 = vmul.f32 %v2119_v34, %v2116_v60 }
 0xb48   : > { %v2098_v59 = vsub.f32 1.5, %v2097_v46 }
 0xb49   : > { %v8697_v35 = vadd.f32 %v2125_v62, %v2122_v29 }
 0xb4a   : > { %v2099_v45 = vmul.f32 %v7574_v44, %v2098_v59 }
 0xb4c   : > { %v2103_v3 = vsel %vm2102_vm13, %v7574_v44, %v2099_v45 }
 0xb4d   : > { %v2117_v43 = vmul.f32 %v2103_v3, %v8663_v22 }
 0xb4f   : > { %v2123_v52 = vmul.f32 %v2119_v34, %v2117_v43 }
 0xb51   : > { %v8699_v31 = vadd.f32 %v2125_v62, %v2123_v52 }
 0xb53   : > { %v2134_v17 = vpack.c.bf16 %v8699_v31, %v8697_v35 }
 0xb55   : > { %6922 = vmatmul.msk.bf16.gmra.mxu2 %vm10986_vm1, %v2134_v17 }
 0xb91   : > { %v2053_v61 = vpop.xlane.xlu2 %2052 }
 0xb92   : > { %v2058_v9 = vmul.f32 %v2053_v61, %v8542_v13 }
 0xb94   : > { %v2063_v7 = vadd.f32 1e-05, %v2058_v9 }
 0xb96   : > { %7575 = vrsqrt.f32 %v2063_v7  ;;  %vm2110_vm15 = vweird.f32 %v2063_v7 }
 0xb9c   : > { %v7576_v4 = vpop.eup %7575 }
 0xb9d   : > { %v2105_v8 = vmul.f32 %v7576_v4, %v2063_v7  ;;  %vm2111_vm14 = vweird.f32 %v7576_v4 }
 0xb9e   : > { %vm2112_vm9 = vmor %vm2110_vm15, %vm2111_vm14 }
 0xb9f   : > { %v2106_v50 = vmul.f32 %v7576_v4, %v2105_v8 }
 0xba1   : > { %v2107_v22 = vmul.f32 0.5, %v2106_v50 }
 0xba3   : > { %v2108_v37 = vsub.f32 1.5, %v2107_v22 }
 0xba5   : > { %v2109_v55 = vmul.f32 %v7576_v4, %v2108_v37 }
 0xba7   : > { %v2113_v48 = vsel %vm2112_vm9, %v7576_v4, %v2109_v55 }
 0xba8   : > { %v2118_v23 = vmul.f32 %v2113_v48, %v8669_v24 }
 0xbaa   : > { %v2124_v27 = vmul.f32 %v2119_v34, %v2118_v23 }
 0xbac   : > { %v8706_v57 = vadd.f32 %v2125_v62, %v2124_v27 }
 0xbae   : > { %v2135_v15 = vpack.c.bf16 %v8706_v57, %v8706_v57 }
 0xbb0   : > { %6923 = vmatmul.msk.bf16.gmra.mxu2 %vm10986_vm1, %v2135_v15 }
 0xbc8   : > { %v2176_v18 = vpop.f32.mrf.mxu2 }
 0xbc9   : > { %v2177_v28 = vadd.f32 %v7469_v1, %v2176_v18 }
 0xbd0   : > { %v2178_v21 = vpop.f32.mrf.mxu2 }
 0xbd1   : > { %v2179_v24 = vadd.f32 %v7469_v1, %v2178_v21 }
 0xbd3   : > { %v8718_v25 = vpack.c.bf16 %v2179_v24, %v2177_v28 }
 0xbd8   : > { %v2181_v19 = vpop.f32.mrf.mxu2 }
 0xbd9   : > { %v2182_v63 = vadd.f32 %v7469_v1, %v2181_v19 }
 0xbe0   : > { %v2183_v32 = vpop.f32.mrf.mxu2 }
 0xbe1   : > { %v2184_v16 = vadd.f32 %v7469_v1, %v2183_v32 }
 0xbe3   : > { %v8714_v42 = vpack.c.bf16 %v2184_v16, %v2182_v63 }
 0xbe5   : > { %2198 = vrot.lane.b32.xlu2 %v8714_v42, %s10996_s20 }
 0xbed   : > { %2414 = vrot.lane.b32.xlu2 %v8718_v25, %s10990_s23 }
 0xc33   : > { %v2186_v41 = vpop.f32.mrf.mxu2 }
 0xc34   : > { %v2187_v53 = vadd.f32 %v7469_v1, %v2186_v41 }
 0xc36   : > { %v8722_v33 = vpack.c.bf16 %v2187_v53, %v2187_v53 }
 0xc38   : > { %2872 = vrot.lane.b32.xlu2 %v8722_v33, %s10992_s27  ;;  %2424 = vrot.lane.b32.xlu1 %v8722_v33, %s10994_s24 }
 0xc39   : > { %2200 = vrot.lane.b32.xlu0 %v8722_v33, %s10996_s20 }
 0xc3b   : > { %v2188_v34 = vpop.f32.mrf.mxu2 }
 0xc3f   : > { %v2199_v38 = vpop.permute.xlu2 %2198 }
 0xc40   : > { %2870 = vrot.lane.b32.xlu2 %v8714_v42, %s10992_s27  ;;  %2196 = vrot.lane.b32.xlu1 %v8718_v25, %s10996_s20  ;;  %v2215_v6 = vsel %vm722_vm5, %v2199_v38, 0 }
 0xc41   : > { %2422 = vrot.lane.b32.xlu0 %v8714_v42, %s10994_s24 }
 0xc47   : > { %v2415_v36 = vpop.permute.xlu2 %2414 }
 0xc48   : > { %2638 = vrot.lane.b32.xlu2 %v8718_v25, %s10998_s30  ;;  %2416 = vrot.lane.b32.xlu1 %v8714_v42, %s10990_s23 }
 0xc49   : > { %2420 = vrot.lane.b32.xlu0 %v8718_v25, %s10994_s24  ;;  %s11098_s24 = smov 88  }
 0xc50   : > { %2864 = vrot.lane.b32.xlu2 %v8714_v42, %s10988_s28  ;;  %2646 = vrot.lane.b32.xlu1 %v8714_v42, %s11025_s19 }
 0xc51   : > { %2648 = vrot.lane.b32.xlu0 %v8722_v33, %s11025_s19 }
 0xc58   : > { %2371 = vrot.lane.b32.xlu2 %v8718_v25, %s11026_s26  ;;  %2644 = vrot.lane.b32.xlu1 %v8718_v25, %s11025_s19 }
 0xc59   : > { %2418 = vrot.lane.b32.xlu0 %v8722_v33, %s10990_s23 }
 0xc60   : > { %2642 = vrot.lane.b32.xlu2 %v8722_v33, %s10998_s30  ;;  %2862 = vrot.lane.b32.xlu1 %v8718_v25, %s10988_s28 }
 0xc61   : > { %2868 = vrot.lane.b32.xlu0 %v8718_v25, %s10992_s27  ;;  %s11099_s27 = smov 72  }
 0xc68   : > { %2866 = vrot.lane.b32.xlu2 %v8722_v33, %s10988_s28  ;;  %2373 = vrot.lane.b32.xlu1 %v8714_v42, %s11026_s26  ;;  %s11054_s28 = smov 24  }
 0xc69   : > { %2640 = vrot.lane.b32.xlu0 %v8714_v42, %s10998_s30  ;;  %s11089_s30 = smov 32  }
 0xc70   : > { %2823 = vrot.lane.b32.xlu2 %v8722_v33, %s11027_s18  ;;  %2821 = vrot.lane.b32.xlu1 %v8714_v42, %s11027_s18 }
 0xc71   : > { %2597 = vrot.lane.b32.xlu0 %v8714_v42, %s11028_s29 }
 0xc78   : > { %2375 = vrot.lane.b32.xlu1 %v8722_v33, %s11026_s26 }
 0xc79   : > { %2595 = vrot.lane.b32.xlu0 %v8718_v25, %s11028_s29 }
 0xc81   : > { %2599 = vrot.lane.b32.xlu0 %v8722_v33, %s11028_s29 }
 0xc89   : > { %3047 = vrot.lane.b32.xlu0 %v8722_v33, %s11029_s0 }
 0xc92   : > { %v2873_v51 = vpop.permute.xlu2 %2872 }
 0xc93   : > { %v2890_v20 = vsel %vm722_vm5, %v2873_v51, 0 }
 0xc9a   : > { %v2871_v47 = vpop.permute.xlu2 %2870 }
 0xc9b   : > { %v2887_v45 = vsel %vm722_vm5, %v2871_v47, 0 }
 0xca2   : > { %v2639_v40 = vpop.permute.xlu2 %2638 }
 0xcaa   : > { %v2425_v54 = vpop.permute.xlu1 %2424  ;;  %v2865_v3 = vpop.permute.xlu2 %2864 }
 0xcab   : > { %v2442_v58 = vsel %vm722_vm5, %v2425_v54, 0  ;;  %v2201_v5 = vpop.permute.xlu0 %2200 }
 0xcac   : > { %v2218_v2 = vsel %vm722_vm5, %v2201_v5, 0  ;;  %2449 = vmatpush.bf16.xpose.msra.mxu1 %v2442_v58 }
 0xcad   : > { %2225 = vmatpush.bf16.xpose.msra.mxu0 %v2218_v2 }
 0xcb2   : > { %v2197_v56 = vpop.permute.xlu1 %2196  ;;  %v2372_v61 = vpop.permute.xlu2 %2371 }
 0xcb3   : > { %v2423_v62 = vpop.permute.xlu0 %2422  ;;  %v2212_v39 = vsel %vm722_vm5, %v2197_v56, 0 }
 0xcb4   : > { %v2439_v10 = vsel %vm722_vm5, %v2423_v62, 0 }
 0xcb5   : > { %2226 = vmatpush.bf16.xpose.msra.mxu0 %v2215_v6  ;;  %2450 = vmatpush.bf16.xpose.msra.mxu1 %v2439_v10 }
 0xcba   : > { %v2417_v44 = vpop.permute.xlu1 %2416  ;;  %v2643_v22 = vpop.permute.xlu2 %2642 }
 0xcbb   : > { %v2421_v11 = vpop.permute.xlu0 %2420 }
 0xcbc   : > { %v2436_v49 = vsel %vm722_vm5, %v2421_v11, 0 }
 0xcbd   : > { %2227 = vmatpush.bf16.xpose.msra.mxu0 %v2212_v39  ;;  %2451 = vmatpush.bf16.xpose.msra.mxu1 %v2436_v49 }
 0xcc2   : > { %v2647_v46 = vpop.permute.xlu1 %2646  ;;  %v2867_v48 = vpop.permute.xlu2 %2866 }
 0xcc3   : > { %v2649_v59 = vpop.permute.xlu0 %2648  ;;  %v2663_v52 = vsel %vm722_vm5, %v2647_v46, 0 }
 0xcc4   : > { %v2666_v60 = vsel %vm722_vm5, %v2649_v59, 0  ;;  %6924 = vmatmul.msk.bf16.vlgmr.msra.gmra.mxu0 %vm722_vm5, %v8718_v25  ;;  %6930 = vmatmul.msk.bf16.vlgmr.msra.gmra.mxu1 %vm722_vm5, %v2415_v36 }
 0xcc5   : > { %2897 = vmatpush.bf16.xpose.msrb.mxu1 %v2890_v20  ;;  %2673 = vmatpush.bf16.xpose.msrb.mxu0 %v2666_v60 }
 0xcca   : > { %v2645_v43 = vpop.permute.xlu1 %2644  ;;  %v2824_v18 = vpop.permute.xlu2 %2823 }
 0xccb   : > { %v2419_v29 = vpop.permute.xlu0 %2418  ;;  %v2660_v7 = vsel %vm722_vm5, %v2645_v43, 0  ;;  %v2837_v19 = vand.u32 %v2824_v18, %v8120_v0 }
 0xccd   : > { %2898 = vmatpush.bf16.xpose.msrb.mxu1 %v2887_v45  ;;  %2674 = vmatpush.bf16.xpose.msrb.mxu0 %v2663_v52 }
 0xcd2   : > { %v2863_v17 = vpop.permute.xlu1 %2862 }
 0xcd3   : > { %v2869_v9 = vpop.permute.xlu0 %2868 }
 0xcd4   : > { %6925 = vmatmul.msk.bf16.gmra.mxu0 %vm722_vm5, %v8714_v42  ;;  %6931 = vmatmul.msk.bf16.gmra.mxu1 %vm722_vm5, %v2417_v44  ;;  %v2884_v4 = vsel %vm722_vm5, %v2869_v9, 0 }
 0xcd5   : > { %2675 = vmatpush.bf16.xpose.msrb.mxu0 %v2660_v7  ;;  %2899 = vmatpush.bf16.xpose.msrb.mxu1 %v2884_v4 }
 0xcda   : > { %v2374_v8 = vpop.permute.xlu1 %2373 }
 0xcdb   : > { %v2641_v50 = vpop.permute.xlu0 %2640 }
 0xce2   : > { %v2822_v37 = vpop.permute.xlu1 %2821 }
 0xce3   : > { %v2598_v55 = vpop.permute.xlu0 %2597 }
 0xce4   : > { %6926 = vmatmul.msk.bf16.gmra.mxu0 %vm722_vm5, %v8722_v33  ;;  %6932 = vmatmul.msk.bf16.gmra.mxu1 %vm722_vm5, %v2419_v29 }
 0xcea   : > { %v2376_v23 = vpop.permute.xlu1 %2375 }
 0xceb   : > { %v2389_v27 = vand.u32 %v2376_v23, %v8120_v0  ;;  %v2596_v15 = vpop.permute.xlu0 %2595 }
 0xced   : > { %2396 = vmatpush.bf16.msrb.mxu3 %v2389_v27 }
 0xcf1   : > { %2397 = vmatpush.bf16.msrb.mxu3 %v2374_v8 }
 0xcf3   : > { %v2600_v21 = vpop.permute.xlu0 %2599 }
 0xcf4   : > { %v2613_v1 = vand.u32 %v2600_v21, %v8120_v0  ;;  %6936 = vmatmul.msk.bf16.vlgmr.msrb.gmra.mxu0 %vm722_vm5, %v2639_v40  ;;  %6942 = vmatmul.msk.bf16.vlgmr.msrb.gmra.mxu1 %vm722_vm5, %v2863_v17 }
 0xcf5   : > { %2398 = vmatpush.bf16.msrb.mxu3 %v2372_v61 }
 0xcf6   : > { %2620 = vmatpush.bf16.msra.mxu2 %v2613_v1 }
 0xcf9   : > { %2844 = vmatpush.bf16.msra.mxu3 %v2837_v19 }
 0xcfa   : > { %2621 = vmatpush.bf16.msra.mxu2 %v2598_v55 }
 0xcfb   : > { %v3048_v32 = vpop.permute.xlu0 %3047 }
 0xcfc   : > { %v3061_v63 = vand.u32 %v3048_v32, %v8120_v0 }
 0xcfd   : > { %2845 = vmatpush.bf16.msra.mxu3 %v2822_v37 }
 0xcfe   : > { %2622 = vmatpush.bf16.msra.mxu2 %v2596_v15 }
 0xd02   : > { %3068 = vmatpush.bf16.msrb.mxu2 %v3061_v63 }
 0xd04   : > { %6937 = vmatmul.msk.bf16.gmra.mxu0 %vm722_vm5, %v2641_v50  ;;  %6943 = vmatmul.msk.bf16.gmra.mxu1 %vm722_vm5, %v2865_v3 }
 0xd14   : > { %6938 = vmatmul.msk.bf16.gmra.mxu0 %vm722_vm5, %v2643_v22  ;;  %6944 = vmatmul.msk.bf16.gmra.mxu1 %vm722_vm5, %v2867_v48 }
 0xd41   : > { %v2229_v16 = vpop.f32.mrf.mxu0  ;;  %v2453_v24 = vpop.f32.mrf.mxu1 }
 0xd42   : > { %v8811_v28 = vmul.f32 0.35355338, %v2229_v16  ;;  %v8813_v41 = vmul.f32 0.35355338, %v2453_v24 }
 0xd44   : > { %v2248_v53 = vsel %vm769_vm6, %v8811_v28, -inf  ;;  %v2472_v33 = vsel %vm769_vm6, %v8813_v41, -inf }
 0xd45   : > { %2249 = vmax.xlane.f32.xlu1 %v2248_v53  ;;  %2473 = vmax.xlane.f32.xlu2 %v2472_v33 }
 0xd49   : > { %v2231_v34 = vpop.f32.mrf.mxu0  ;;  %v2455_v38 = vpop.f32.mrf.mxu1 }
 0xd4a   : > { %v8819_v36 = vmul.f32 0.35355338, %v2231_v34  ;;  %v8821_v54 = vmul.f32 0.35355338, %v2455_v38 }
 0xd4c   : > { %v2251_v51 = vsel %vm769_vm6, %v8819_v36, -inf  ;;  %v2475_v58 = vsel %vm769_vm6, %v8821_v54, -inf }
 0xd4d   : > { %2252 = vmax.xlane.f32.xlu0 %v2251_v51  ;;  %2476 = vmax.xlane.f32.xlu1 %v2475_v58 }
 0xd51   : > { %v2234_v5 = vpop.f32.mrf.mxu0  ;;  %v2458_v2 = vpop.f32.mrf.mxu1 }
 0xd52   : > { %v8827_v56 = vmul.f32 0.35355338, %v2234_v5  ;;  %v8829_v62 = vmul.f32 0.35355338, %v2458_v2 }
 0xd54   : > { %v2254_v6 = vsel %vm769_vm6, %v8827_v56, -inf  ;;  %v2478_v10 = vsel %vm769_vm6, %v8829_v62, -inf }
 0xd55   : > { %2255 = vmax.xlane.f32.xlu0 %v2254_v6  ;;  %2479 = vmax.xlane.f32.xlu1 %v2478_v10 }
 0xd59   : > { %v2236_v47 = vpop.f32.mrf.mxu0  ;;  %v2460_v44 = vpop.f32.mrf.mxu1 }
 0xd5a   : > { %v8835_v11 = vmul.f32 0.35355338, %v2236_v47  ;;  %v8837_v39 = vmul.f32 0.35355338, %v2460_v44 }
 0xd5c   : > { %v2257_v49 = vsel %vm769_vm6, %v8835_v11, -inf  ;;  %v2481_v20 = vsel %vm769_vm6, %v8837_v39, -inf }
 0xd5d   : > { %2258 = vmax.xlane.f32.xlu2 %v2257_v49  ;;  %2482 = vmax.xlane.f32.xlu0 %v2481_v20 }
 0xd61   : > { %v2239_v40 = vpop.f32.mrf.mxu0  ;;  %v2463_v46 = vpop.f32.mrf.mxu1 }
 0xd62   : > { %v8843_v59 = vmul.f32 0.35355338, %v2239_v40  ;;  %v8845_v60 = vmul.f32 0.35355338, %v2463_v46 }
 0xd64   : > { %v2260_v45 = vsel %vm782_vm7, %v8843_v59, -inf  ;;  %v2484_v3 = vsel %vm782_vm7, %v8845_v60, -inf }
 0xd65   : > { %2261 = vmax.xlane.f32.xlu2 %v2260_v45  ;;  %2485 = vmax.xlane.f32.xlu1 %v2484_v3 }
 0xd69   : > { %v2241_v43 = vpop.f32.mrf.mxu0  ;;  %v2465_v29 = vpop.f32.mrf.mxu1 }
 0xd71   : > { %v2677_v52 = vpop.f32.mrf.mxu0  ;;  %v2901_v17 = vpop.f32.mrf.mxu1 }
 0xd72   : > { %v8851_v61 = vmul.f32 0.35355338, %v2677_v52  ;;  %v8853_v9 = vmul.f32 0.35355338, %v2901_v17 }
 0xd74   : > { %v2920_v7 = vsel %vm769_vm6, %v8853_v9, -inf  ;;  %v2696_v4 = vsel %vm769_vm6, %v8851_v61, -inf }
 0xd75   : > { %2921 = vmax.xlane.f32.xlu1 %v2920_v7  ;;  %2697 = vmax.xlane.f32.xlu0 %v2696_v4 }
 0xd79   : > { %v2679_v8 = vpop.f32.mrf.mxu0  ;;  %v2903_v50 = vpop.f32.mrf.mxu1 }
 0xd7a   : > { %v8859_v22 = vmul.f32 0.35355338, %v2679_v8  ;;  %v8861_v37 = vmul.f32 0.35355338, %v2903_v50 }
 0xd7c   : > { %v2923_v55 = vsel %vm769_vm6, %v8861_v37, -inf  ;;  %v2699_v48 = vsel %vm769_vm6, %v8859_v22, -inf }
 0xd7d   : > { %2924 = vmax.xlane.f32.xlu0 %v2923_v55  ;;  %2700 = vmax.xlane.f32.xlu2 %v2699_v48 }
 0xd81   : > { %v2682_v23 = vpop.f32.mrf.mxu0  ;;  %v2906_v27 = vpop.f32.mrf.mxu1 }
 0xd82   : > { %v8867_v15 = vmul.f32 0.35355338, %v2682_v23  ;;  %v8869_v18 = vmul.f32 0.35355338, %v2906_v27 }
 0xd84   : > { %v2702_v21 = vsel %vm769_vm6, %v8867_v15, -inf  ;;  %v2926_v19 = vsel %vm769_vm6, %v8869_v18, -inf }
 0xd85   : > { %2703 = vmax.xlane.f32.xlu0 %v2702_v21  ;;  %2927 = vmax.xlane.f32.xlu2 %v2926_v19 }
 0xd89   : > { %v2684_v1 = vpop.f32.mrf.mxu0  ;;  %v2908_v32 = vpop.f32.mrf.mxu1 }
 0xd8a   : > { %v8875_v63 = vmul.f32 0.35355338, %v2684_v1  ;;  %v8877_v16 = vmul.f32 0.35355338, %v2908_v32 }
 0xd8c   : > { %v2705_v24 = vsel %vm769_vm6, %v8875_v63, -inf  ;;  %v2929_v53 = vsel %vm769_vm6, %v8877_v16, -inf }
 0xd8d   : > { %2706 = vmax.xlane.f32.xlu1 %v2705_v24  ;;  %2930 = vmax.xlane.f32.xlu0 %v2929_v53 }
 0xd91   : > { %v8883_v33 = vpop.f32.mrf.mxu0  ;;  %v8885_v34 = vpop.f32.mrf.mxu1 }
 0xd99   : > { %v2689_v38 = vpop.f32.mrf.mxu0  ;;  %v2913_v51 = vpop.f32.mrf.mxu1 }
 0xdb8   : > { %v2250_v58 = vpop.xlane.xlu1 %2249  ;;  %v2474_v5 = vpop.xlane.xlu2 %2473 }
 0xdb9   : > { %v2263_v2 = vsub.f32 %v8811_v28, %v2250_v58  ;;  %v2487_v6 = vsub.f32 %v8813_v41, %v2474_v5 }
 0xdbb   : > { %v2268_v10 = vmul.f32 1.442695, %v2263_v2  ;;  %v2492_v47 = vmul.f32 1.442695, %v2487_v6 }
 0xdbd   : > { %7577 = vpow2.f32 %v2268_v10 }
 0xdbe   : > { %7579 = vpow2.f32 %v2492_v47 }
 0xdc0   : > { %v2253_v44 = vpop.xlane.xlu0 %2252  ;;  %v2477_v49 = vpop.xlane.xlu1 %2476 }
 0xdc1   : > { %v2264_v20 = vsub.f32 %v8819_v36, %v2253_v44  ;;  %v2488_v40 = vsub.f32 %v8821_v54, %v2477_v49 }
 0xdc3   : > { %v8891_v46 = vpop.eup %7577  ;;  %v2270_v45 = vmul.f32 1.442695, %v2264_v20  ;;  %v2494_v3 = vmul.f32 1.442695, %v2488_v40 }
 0xdc4   : > { %v8893_v43 = vpop.eup %7579  ;;  %v2278_v28 = vsel %vm769_vm6, %v8891_v46, 0.0 }
 0xdc5   : > { %7581 = vpow2.f32 %v2270_v45  ;;  %2279 = vadd.xlane.f32.xlu2 %v2278_v28  ;;  %v2502_v41 = vsel %vm769_vm6, %v8893_v43, 0.0 }
 0xdc6   : > { %7583 = vpow2.f32 %v2494_v3  ;;  %2503 = vadd.xlane.f32.xlu0 %v2502_v41 }
 0xdc8   : > { %v2256_v29 = vpop.xlane.xlu0 %2255  ;;  %v2480_v36 = vpop.xlane.xlu1 %2479 }
 0xdc9   : > { %v2265_v54 = vsub.f32 %v8827_v56, %v2256_v29  ;;  %v2489_v52 = vsub.f32 %v8829_v62, %v2480_v36 }
 0xdcb   : > { %v8901_v17 = vpop.eup %7581  ;;  %v2272_v7 = vmul.f32 1.442695, %v2265_v54  ;;  %v2496_v4 = vmul.f32 1.442695, %v2489_v52 }
 0xdcc   : > { %v8903_v8 = vpop.eup %7583  ;;  %v2281_v50 = vsel %vm769_vm6, %v8901_v17, 0.0 }
 0xdcd   : > { %7585 = vpow2.f32 %v2272_v7  ;;  %2282 = vadd.xlane.f32.xlu1 %v2281_v50  ;;  %v2505_v55 = vsel %vm769_vm6, %v8903_v8, 0.0 }
 0xdce   : > { %7587 = vpow2.f32 %v2496_v4  ;;  %2506 = vadd.xlane.f32.xlu2 %v2505_v55 }
 0xdd0   : > { %v2483_v48 = vpop.xlane.xlu0 %2482  ;;  %v2259_v56 = vpop.xlane.xlu2 %2258 }
 0xdd1   : > { %v2490_v62 = vsub.f32 %v8837_v39, %v2483_v48  ;;  %v2266_v23 = vsub.f32 %v8835_v11, %v2259_v56 }
 0xdd3   : > { %v8911_v27 = vpop.eup %7585  ;;  %v2498_v21 = vmul.f32 1.442695, %v2490_v62  ;;  %v2274_v19 = vmul.f32 1.442695, %v2266_v23 }
 0xdd4   : > { %v8913_v1 = vpop.eup %7587  ;;  %v2284_v32 = vsel %vm769_vm6, %v8911_v27, 0.0 }
 0xdd5   : > { %7589 = vpow2.f32 %v2498_v21  ;;  %v2508_v24 = vsel %vm769_vm6, %v8913_v1, 0.0  ;;  %2285 = vadd.xlane.f32.xlu0 %v2284_v32 }
 0xdd6   : > { %7591 = vpow2.f32 %v2274_v19  ;;  %2509 = vadd.xlane.f32.xlu2 %v2508_v24 }
 0xdd8   : > { %v2486_v53 = vpop.xlane.xlu1 %2485  ;;  %v2262_v39 = vpop.xlane.xlu2 %2261 }
 0xdd9   : > { %v2491_v11 = vsub.f32 %v8845_v60, %v2486_v53  ;;  %v2267_v38 = vsub.f32 %v8843_v59, %v2262_v39 }
 0xddb   : > { %v8921_v51 = vpop.eup %7589  ;;  %v2500_v58 = vmul.f32 1.442695, %v2491_v11  ;;  %v2276_v5 = vmul.f32 1.442695, %v2267_v38 }
 0xddc   : > { %v8923_v2 = vpop.eup %7591  ;;  %v2511_v6 = vsel %vm769_vm6, %v8921_v51, 0.0 }
 0xddd   : > { %7593 = vpow2.f32 %v2500_v58  ;;  %2512 = vadd.xlane.f32.xlu1 %v2511_v6  ;;  %v2287_v10 = vsel %vm769_vm6, %v8923_v2, 0.0 }
 0xdde   : > { %7595 = vpow2.f32 %v2276_v5  ;;  %2288 = vadd.xlane.f32.xlu2 %v2287_v10 }
 0xde3   : > { %v8929_v47 = vpop.eup %7593 }
 0xde4   : > { %v8931_v60 = vpop.eup %7595  ;;  %v2514_v59 = vsel %vm782_vm7, %v8929_v47, 0.0 }
 0xde5   : > { %v2290_v44 = vsel %vm782_vm7, %v8931_v60, 0.0 }
 0xde6   : > { %2515 = vadd.xlane.f32.xlu2 %v2514_v59  ;;  %2291 = vadd.xlane.f32.xlu0 %v2290_v44 }
 0xde8   : > { %v2922_v49 = vpop.xlane.xlu1 %2921  ;;  %v2698_v20 = vpop.xlane.xlu0 %2697 }
 0xde9   : > { %v2935_v40 = vsub.f32 %v8853_v9, %v2922_v49  ;;  %v2711_v45 = vsub.f32 %v8851_v61, %v2698_v20 }
 0xdeb   : > { %v2940_v3 = vmul.f32 1.442695, %v2935_v40  ;;  %v2716_v28 = vmul.f32 1.442695, %v2711_v45 }
 0xded   : > { %7597 = vpow2.f32 %v2940_v3  ;;  %v8986_v3 = vmul.f32 0.35355338, %v8883_v33 }
 0xdee   : > { %7599 = vpow2.f32 %v2716_v28 }
 0xdf0   : > { %v2925_v41 = vpop.xlane.xlu0 %2924  ;;  %v2701_v29 = vpop.xlane.xlu2 %2700 }
 0xdf1   : > { %v2712_v36 = vsub.f32 %v8859_v22, %v2701_v29  ;;  %v2936_v4 = vsub.f32 %v8861_v37, %v2925_v41 }
 0xdf3   : > { %v8940_v54 = vpop.eup %7597  ;;  %v2718_v52 = vmul.f32 1.442695, %v2712_v36  ;;  %v2942_v50 = vmul.f32 1.442695, %v2936_v4 }
 0xdf4   : > { %v8942_v7 = vpop.eup %7599  ;;  %v2950_v9 = vsel %vm769_vm6, %v8940_v54, 0.0 }
 0xdf5   : > { %v2726_v61 = vsel %vm769_vm6, %v8942_v7, 0.0  ;;  %2951 = vadd.xlane.f32.xlu0 %v2950_v9  ;;  %7601 = vpow2.f32 %v2718_v52  ;;  %v2708_v52 = vsel %vm782_vm7, %v8986_v3, -inf }
 0xdf6   : > { %2727 = vadd.xlane.f32.xlu1 %v2726_v61  ;;  %7603 = vpow2.f32 %v2942_v50 }
 0xdf8   : > { %v2704_v55 = vpop.xlane.xlu0 %2703  ;;  %v2928_v5 = vpop.xlane.xlu2 %2927 }
 0xdf9   : > { %v2713_v22 = vsub.f32 %v8867_v15, %v2704_v55  ;;  %v2937_v6 = vsub.f32 %v8869_v18, %v2928_v5 }
 0xdfb   : > { %v2720_v48 = vmul.f32 1.442695, %v2713_v22  ;;  %v8950_v56 = vpop.eup %7601  ;;  %v2944_v44 = vmul.f32 1.442695, %v2937_v6 }
 0xdfc   : > { %v2729_v37 = vsel %vm769_vm6, %v8950_v56, 0.0  ;;  %v8956_v32 = vpop.eup %7603 }
 0xdfd   : > { %7605 = vpow2.f32 %v2720_v48  ;;  %v2953_v11 = vsel %vm769_vm6, %v8956_v32, 0.0 }
 0xdfe   : > { %2730 = vadd.xlane.f32.xlu1 %v2729_v37 }
 0xe00   : > { %v2707_v62 = vpop.xlane.xlu1 %2706  ;;  %v2931_v23 = vpop.xlane.xlu0 %2930 }
 0xe01   : > { %v2714_v21 = vsub.f32 %v8875_v63, %v2707_v62  ;;  %v2938_v19 = vsub.f32 %v8877_v16, %v2931_v23 }
 0xe03   : > { %v8958_v24 = vpop.eup %7605  ;;  %v2722_v15 = vmul.f32 1.442695, %v2714_v21  ;;  %v2946_v53 = vmul.f32 1.442695, %v2938_v19 }
 0xe04   : > { %v2732_v39 = vsel %vm769_vm6, %v8958_v24, 0.0 }
 0xe05   : > { %7607 = vpow2.f32 %v2722_v15  ;;  %2733 = vadd.xlane.f32.xlu0 %v2732_v39 }
 0xe06   : > { %7609 = vpow2.f32 %v2946_v53  ;;  %2954 = vadd.xlane.f32.xlu1 %v2953_v11 }
 0xe0b   : > { %v8964_v38 = vpop.eup %7607 }
 0xe0c   : > { %v8966_v63 = vpop.eup %7609  ;;  %v2735_v16 = vsel %vm769_vm6, %v8964_v38, 0.0 }
 0xe0d   : > { %2736 = vadd.xlane.f32.xlu2 %v2735_v16  ;;  %v2959_v58 = vsel %vm769_vm6, %v8966_v63, 0.0 }
 0xe0e   : > { %2960 = vadd.xlane.f32.xlu0 %v2959_v58 }
 0xe1f   : > { %3045 = vrot.lane.b32.xlu1 %v8714_v42, %s11029_s0 }
 0xe22   : > { %3043 = vrot.lane.b32.xlu0 %v8718_v25, %s11029_s0 }
 0xe25   : > { %2819 = vrot.lane.b32.xlu2 %v8718_v25, %s11027_s18 }
 0xe38   : > { %v2280_v10 = vpop.xlane.xlu2 %2279 }
 0xe39   : > { %v2504_v59 = vpop.xlane.xlu0 %2503  ;;  %7611 = vrcp.f32 %v2280_v10  ;;  %v2302_v29 = vand.u32 2147483647, %v2280_v10  ;;  %vm2298_vm11 = vweird.f32 %v2280_v10  ;;  %v2304_v61 = vand.u32 2147483648, %v2280_v10 }
 0xe3a   : > { %7613 = vrcp.f32 %v2504_v59  ;;  %vm2522_vm12 = vweird.f32 %v2504_v59  ;;  %v2526_v55 = vand.u32 2147483647, %v2504_v59  ;;  %v2528_v22 = vand.u32 2147483648, %v2504_v59 }
 0xe3b   : > { %7615 = vpow2.f32 %v2944_v44  ;;  %vm9000_vm15 = vcmp.eq.f32.partialorder %v2302_v29, 8.507059e+37 }
 0xe3c   : > { %vm9017_vm2 = vcmp.eq.f32.partialorder %v2526_v55, 8.507059e+37  ;;  %v2529_v29 = vor.u32 1.1754944e-38, %v2528_v22 }
 0xe3f   : > { %v8979_v49 = vpop.eup %7611 }
 0xe40   : > { %v8981_v20 = vpop.eup %7613  ;;  %v2294_v42 = vmul.f32 %v8979_v49, %v2280_v10  ;;  %v2283_v40 = vpop.xlane.xlu1 %2282  ;;  %vm2299_vm14 = vweird.f32 %v8979_v49 }
 0xe41   : > { %v2518_v45 = vmul.f32 %v8981_v20, %v2504_v59  ;;  %7617 = vrcp.f32 %v2283_v40  ;;  %v2507_v25 = vpop.xlane.xlu2 %2506  ;;  %v8988_v41 = vpop.eup %7615  ;;  %vm2523_vm13 = vweird.f32 %v8981_v20  ;;  %v2317_v53 = vand.u32 2147483647, %v2283_v40  ;;  %vm9027_vm1 = vmor %vm2298_vm11, %vm2299_vm14 }
 0xe42   : > { %7619 = vrcp.f32 %v2507_v25  ;;  %v2295_v28 = vsub.f32 1.0, %v2294_v42  ;;  %v2956_v33 = vsel %vm769_vm6, %v8988_v41, 0.0  ;;  %v2319_v11 = vand.u32 2147483648, %v2283_v40  ;;  %vm9013_vm3 = vmor %vm2522_vm12, %vm2523_vm13 }
 0xe43   : > { %v2519_v18 = vsub.f32 1.0, %v2518_v45  ;;  %v2541_v5 = vand.u32 2147483647, %v2507_v25  ;;  %v2543_v6 = vand.u32 2147483648, %v2507_v25  ;;  %v2305_v45 = vor.u32 1.1754944e-38, %v2304_v61 }
 0xe44   : > { %v2296_v9 = vmul.f32 %v8979_v49, %v2295_v28  ;;  %vm2313_vm12 = vweird.f32 %v2283_v40  ;;  %vm9038_vm8 = vcmp.eq.f32.partialorder %v2317_v53, 8.507059e+37 }
 0xe45   : > { %v2520_v36 = vmul.f32 %v8981_v20, %v2519_v18  ;;  %vm2542_vm14 = vcmp.eq.f32.partialorder %v2541_v5, 8.507059e+37  ;;  %v2544_v22 = vor.u32 1.1754944e-38, %v2543_v6 }
 0xe46   : > { %v2297_v39 = vadd.f32 %v8979_v49, %v2296_v9 }
 0xe47   : > { %v7618_v4 = vpop.eup %7617  ;;  %v2521_v19 = vadd.f32 %v8981_v20, %v2520_v36 }
 0xe48   : > { %v7620_v50 = vpop.eup %7619  ;;  %v2309_v48 = vmul.f32 %v7618_v4, %v2283_v40  ;;  %v8996_v37 = vpop.xlane.xlu0 %2285  ;;  %vm2314_vm9 = vweird.f32 %v7618_v4  ;;  %v2301_v9 = vsel %vm9027_vm1, %v8979_v49, %v2297_v39  ;;  %v2320_v40 = vor.u32 1.1754944e-38, %v2319_v11 }
 0xe49   : > { %v2533_v23 = vmul.f32 %v7620_v50, %v2507_v25  ;;  %2957 = vadd.xlane.f32.xlu1 %v2956_v33  ;;  %v9004_v21 = vpop.xlane.xlu2 %2509  ;;  %7621 = vrcp.f32 %v8996_v37  ;;  %vm2538_vm10 = vweird.f32 %v7620_v50  ;;  %v2525_v28 = vsel %vm9013_vm3, %v8981_v20, %v2521_v19  ;;  %vm9034_vm13 = vmor %vm2313_vm12, %vm2314_vm9 }
 0xe4a   : > { %v2310_v15 = vsub.f32 1.0, %v2309_v48  ;;  %7623 = vrcp.f32 %v9004_v21  ;;  %vm2537_vm3 = vweird.f32 %v2507_v25  ;;  %v2334_v44 = vand.u32 2147483648, %v8996_v37 }
 0xe4b   : > { %v2534_v16 = vsub.f32 1.0, %v2533_v23  ;;  %vm2539_vm11 = vmor %vm2537_vm3, %vm2538_vm10  ;;  %v2530_v23 = vsel %vm9017_vm2, %v2529_v29, %v2525_v28  ;;  %vm2328_vm1 = vweird.f32 %v8996_v37  ;;  %v2558_v29 = vand.u32 2147483648, %v9004_v21 }
 0xe4c   : > { %v2311_v58 = vmul.f32 %v7618_v4, %v2310_v15 }
 0xe4d   : > { %v2535_v18 = vmul.f32 %v7620_v50, %v2534_v16 }
 0xe4e   : > { %v2312_v36 = vadd.f32 %v7618_v4, %v2311_v58 }
 0xe4f   : > { %v2536_v33 = vadd.f32 %v7620_v50, %v2535_v18  ;;  %v9042_v10 = vpop.eup %7621 }
 0xe50   : > { %v2316_v55 = vsel %vm9034_vm13, %v7618_v4, %v2312_v36  ;;  %v9046_v49 = vpop.xlane.xlu1 %2512  ;;  %v9048_v48 = vpop.eup %7623  ;;  %v2324_v25 = vmul.f32 %v9042_v10, %v8996_v37  ;;  %v2306_v4 = vsel %vm9000_vm15, %v2305_v45, %v2301_v9  ;;  %v2332_v9 = vand.u32 2147483647, %v8996_v37 }
 0xe51   : > { %v2540_v19 = vsel %vm2539_vm11, %v7620_v50, %v2536_v33  ;;  %7625 = vrcp.f32 %v9046_v49  ;;  %2709 = vmax.xlane.f32.xlu1 %v2708_v52  ;;  %v9055_v15 = vpop.xlane.xlu2 %2288  ;;  %v2321_v53 = vsel %vm9038_vm8, %v2320_v40, %v2316_v55  ;;  %v2548_v11 = vmul.f32 %v9048_v48, %v9004_v21 }
 0xe52   : > { %v2545_v39 = vsel %vm2542_vm14, %v2544_v22, %v2540_v19  ;;  %v9064_v50 = vmul.f32 0.35355338, %v8885_v34  ;;  %v2325_v58 = vsub.f32 1.0, %v2324_v25  ;;  %v2531_v52 = vmul.f32 %v8893_v43, %v2530_v23 }
 0xe53   : > { %v2546_v16 = vmul.f32 %v8903_v8, %v2545_v39  ;;  %v2549_v5 = vsub.f32 1.0, %v2548_v11  ;;  %7627 = vrcp.f32 %v9055_v15  ;;  %v2307_v62 = vmul.f32 %v8891_v46, %v2306_v4 }
 0xe54   : > { %v2322_v6 = vmul.f32 %v8901_v17, %v2321_v53  ;;  %v2326_v34 = vmul.f32 %v9042_v10, %v2325_v58  ;;  %v2932_v8 = vsel %vm782_vm7, %v9064_v50, -inf  ;;  %vm2553_vm2 = vweird.f32 %v9048_v48 }
 0xe55   : > { %v2550_v42 = vmul.f32 %v9048_v48, %v2549_v5  ;;  %v2592_v45 = vpack.c.bf16 %v2546_v16, %v2531_v52  ;;  %vm2552_vm8 = vweird.f32 %v9004_v21  ;;  %v2556_v17 = vand.u32 2147483647, %v9004_v21 }
 0xe56   : > { %v2368_v28 = vpack.c.bf16 %v2322_v6, %v2307_v62  ;;  %v2573_v33 = vand.u32 2147483648, %v9046_v49  ;;  %v2335_v55 = vor.u32 1.1754944e-38, %v2334_v44  ;;  %vm9094_vm10 = vmor %vm2552_vm8, %vm2553_vm2  ;;  %v2327_v22 = vadd.f32 %v9042_v10, %v2326_v34 }
 0xe57   : > { %v7626_v18 = vpop.eup %7625  ;;  %v2551_v43 = vadd.f32 %v9048_v48, %v2550_v42  ;;  %6933 = vmatmul.msk.bf16.vlgmr.msra.gmra.mxu2 %vm769_vm6, %v2592_v45  ;;  %vm2329_vm15 = vweird.f32 %v9042_v10  ;;  %v2571_v19 = vand.u32 2147483647, %v9046_v49  ;;  %vm2557_vm12 = vcmp.eq.f32.partialorder %v2556_v17, 8.507059e+37 }
 0xe58   : > { %v2563_v46 = vmul.f32 %v7626_v18, %v9046_v49  ;;  %6927 = vmatmul.msk.bf16.vlgmr.msrb.gmra.mxu3 %vm769_vm6, %v2368_v28  ;;  %vm2568_vm9 = vweird.f32 %v7626_v18  ;;  %v2559_v4 = vor.u32 1.1754944e-38, %v2558_v29  ;;  %v2349_v39 = vand.u32 2147483648, %v9055_v15  ;;  %vm9110_vm3 = vmor %vm2328_vm1, %vm2329_vm15 }
 0xe59   : > { %v9085_v59 = vpop.xlane.xlu0 %2291  ;;  %2933 = vmax.xlane.f32.xlu1 %v2932_v8  ;;  %v9087_v36 = vpop.xlane.xlu2 %2515  ;;  %v2555_v25 = vsel %vm9094_vm10, %v9048_v48, %v2551_v43  ;;  %vm2567_vm13 = vweird.f32 %v9046_v49  ;;  %v2574_v16 = vor.u32 1.1754944e-38, %v2573_v33  ;;  %v2347_v52 = vand.u32 2147483647, %v9055_v15 }
 0xe5a   : > { %v7628_v61 = vpop.eup %7627  ;;  %v2564_v20 = vsub.f32 1.0, %v2563_v46  ;;  %7629 = vrcp.f32 %v9085_v59  ;;  %vm2569_vm11 = vmor %vm2567_vm13, %vm2568_vm9  ;;  %v2331_v48 = vsel %vm9110_vm3, %v9042_v10, %v2327_v22  ;;  %v2560_v62 = vsel %vm2557_vm12, %v2559_v4, %v2555_v25 }
 0xe5b   : > { %v2339_v40 = vmul.f32 %v7628_v61, %v9055_v15  ;;  %7631 = vrcp.f32 %v9087_v36  ;;  %vm2344_vm14 = vweird.f32 %v7628_v61  ;;  %vm2572_vm2 = vcmp.eq.f32.partialorder %v2571_v19, 8.507059e+37 }
 0xe5c   : > { %v2565_v23 = vmul.f32 %v7626_v18, %v2564_v20  ;;  %vm2343_vm8 = vweird.f32 %v9055_v15  ;;  %vm2333_vm10 = vcmp.eq.f32.partialorder %v2332_v9, 8.507059e+37  ;;  %v2350_v45 = vor.u32 1.1754944e-38, %v2349_v39 }
 0xe5d   : > { %v2340_v53 = vsub.f32 1.0, %v2339_v40  ;;  %v2336_v8 = vsel %vm2333_vm10, %v2335_v55, %v2331_v48  ;;  %vm2345_vm1 = vmor %vm2343_vm8, %vm2344_vm14  ;;  %v2561_v10 = vmul.f32 %v8913_v1, %v2560_v62  ;;  %vm2348_vm15 = vcmp.eq.f32.partialorder %v2347_v52, 8.507059e+37 }
 0xe5e   : > { %v2566_v11 = vadd.f32 %v7626_v18, %v2565_v23  ;;  %v2337_v9 = vmul.f32 %v8911_v27, %v2336_v8  ;;  %v2588_v1 = vand.u32 2147483648, %v9087_v36  ;;  %vm2582_vm13 = vweird.f32 %v9087_v36 }
 0xe5f   : > { %v2341_v5 = vmul.f32 %v7628_v61, %v2340_v53  ;;  %v2364_v27 = vand.u32 2147483648, %v9085_v59  ;;  %v2362_v22 = vand.u32 2147483647, %v9085_v59 }
 0xe60   : > { %v7630_v6 = vpop.eup %7629  ;;  %v2570_v37 = vsel %vm2569_vm11, %v7626_v18, %v2566_v11  ;;  %vm2358_vm11 = vweird.f32 %v9085_v59  ;;  %v2589_v19 = vor.u32 1.1754944e-38, %v2588_v1 }
 0xe61   : > { %v7632_v49 = vpop.eup %7631  ;;  %v2354_v44 = vmul.f32 %v7630_v6, %v9085_v59  ;;  %v2342_v42 = vadd.f32 %v7628_v61, %v2341_v5  ;;  %v2575_v34 = vsel %vm2572_vm2, %v2574_v16, %v2570_v37  ;;  %vm2359_vm12 = vweird.f32 %v7630_v6 }
 0xe62   : > { %v2578_v28 = vmul.f32 %v7632_v49, %v9087_v36  ;;  %v2576_v43 = vmul.f32 %v8921_v51, %v2575_v34  ;;  %vm2583_vm9 = vweird.f32 %v7632_v49  ;;  %vm2360_vm14 = vmor %vm2358_vm11, %vm2359_vm12  ;;  %v2365_v4 = vor.u32 1.1754944e-38, %v2364_v27 }
 0xe63   : > { %v2355_v46 = vsub.f32 1.0, %v2354_v44  ;;  %v2346_v17 = vsel %vm2345_vm1, %v7628_v61, %v2342_v42  ;;  %vm2584_vm3 = vmor %vm2582_vm13, %vm2583_vm9  ;;  %vm2363_vm8 = vcmp.eq.f32.partialorder %v2362_v22, 8.507059e+37 }
 0xe64   : > { %v2579_v15 = vsub.f32 1.0, %v2578_v28  ;;  %v2351_v29 = vsel %vm2348_vm15, %v2350_v45, %v2346_v17  ;;  %v2593_v18 = vpack.c.bf16 %v2576_v43, %v2561_v10 }
 0xe65   : > { %v2352_v20 = vmul.f32 %v8923_v2, %v2351_v29  ;;  %v2356_v33 = vmul.f32 %v7630_v6, %v2355_v46  ;;  %v2586_v2 = vand.u32 2147483647, %v9087_v36 }
 0xe66   : > { %v2580_v21 = vmul.f32 %v7632_v49, %v2579_v15 }
 0xe67   : > { %v2369_v40 = vpack.c.bf16 %v2352_v20, %v2337_v9  ;;  %6934 = vmatmul.msk.bf16.gmra.mxu2 %vm769_vm6, %v2593_v18  ;;  %v2357_v61 = vadd.f32 %v7630_v6, %v2356_v33  ;;  %vm2587_vm2 = vcmp.eq.f32.partialorder %v2586_v2, 8.507059e+37 }
 0xe68   : > { %v2581_v55 = vadd.f32 %v7632_v49, %v2580_v21  ;;  %v9136_v11 = vpop.xlane.xlu0 %2951 }
 0xe69   : > { %6928 = vmatmul.msk.bf16.gmra.mxu3 %vm769_vm6, %v2369_v40  ;;  %v9128_v51 = vpop.xlane.xlu1 %2727  ;;  %v2361_v25 = vsel %vm2360_vm14, %v7630_v6, %v2357_v61 }
 0xe6a   : > { %7633 = vrcp.f32 %v9128_v51  ;;  %v2585_v23 = vsel %vm2584_vm3, %v7632_v49, %v2581_v55  ;;  %v2366_v16 = vsel %vm2363_vm8, %v2365_v4, %v2361_v25  ;;  %v2752_v10 = vand.u32 2147483648, %v9128_v51 }
 0xe6b   : > { %v2590_v53 = vsel %vm2587_vm2, %v2589_v19, %v2585_v23  ;;  %v2367_v59 = vmul.f32 %v8931_v60, %v2366_v16  ;;  %vm2746_vm9 = vweird.f32 %v9128_v51  ;;  %v2750_v15 = vand.u32 2147483647, %v9128_v51 }
 0xe6c   : > { %v2591_v52 = vmul.f32 %v8929_v47, %v2590_v53  ;;  %v2753_v40 = vor.u32 1.1754944e-38, %v2752_v10 }
 0xe6d   : > { %v2370_v62 = vpack.c.bf16 %v2367_v59, %v2367_v59  ;;  %vm2751_vm11 = vcmp.eq.f32.partialorder %v2750_v15, 8.507059e+37 }
 0xe6e   : > { %v2594_v48 = vpack.c.bf16 %v2591_v52, %v2591_v52 }
 0xe70   : > { %v7634_v39 = vpop.eup %7633 }
 0xe71   : > { %v2731_v58 = vpop.xlane.xlu1 %2730  ;;  %v2742_v36 = vmul.f32 %v7634_v39, %v9128_v51  ;;  %vm2747_vm1 = vweird.f32 %v7634_v39 }
 0xe72   : > { %7635 = vrcp.f32 %v2731_v58  ;;  %v2767_v34 = vand.u32 2147483648, %v2731_v58  ;;  %v2765_v8 = vand.u32 2147483647, %v2731_v58  ;;  %vm2761_vm15 = vweird.f32 %v2731_v58  ;;  %vm2748_vm13 = vmor %vm2746_vm9, %vm2747_vm1 }
 0xe73   : > { %v2743_v5 = vsub.f32 1.0, %v2742_v36  ;;  %7637 = vrcp.f32 %v9136_v11  ;;  %v2976_v36 = vand.u32 2147483648, %v9136_v11 }
 0xe74   : > { %v2768_v9 = vor.u32 1.1754944e-38, %v2767_v34  ;;  %vm2766_vm3 = vcmp.eq.f32.partialorder %v2765_v8, 8.507059e+37 }
 0xe75   : > { %v2744_v42 = vmul.f32 %v7634_v39, %v2743_v5  ;;  %v2977_v10 = vor.u32 1.1754944e-38, %v2976_v36 }
 0xe77   : > { %6935 = vmatmul.msk.bf16.gmra.mxu2 %vm769_vm6, %v2594_v48  ;;  %v2745_v28 = vadd.f32 %v7634_v39, %v2744_v42  ;;  %v2974_v48 = vand.u32 2147483647, %v9136_v11 }
 0xe78   : > { %v7636_v6 = vpop.eup %7635  ;;  %v9143_v37 = vpop.xlane.xlu0 %2733 }
 0xe79   : > { %v2757_v49 = vmul.f32 %v7636_v6, %v2731_v58  ;;  %6929 = vmatmul.msk.bf16.gmra.mxu3 %vm769_vm6, %v2370_v62  ;;  %v9146_v44 = vpop.xlane.xlu1 %2954  ;;  %7639 = vrcp.f32 %v9143_v37  ;;  %v9149_v60 = vpop.eup %7637  ;;  %vm2762_vm10 = vweird.f32 %v7636_v6  ;;  %v2749_v33 = vsel %vm2748_vm13, %v7634_v39, %v2745_v28 }
 0xe7a   : > { %7641 = vrcp.f32 %v9146_v44  ;;  %v2966_v43 = vmul.f32 %v9149_v60, %v9136_v11  ;;  %vm2763_vm12 = vmor %vm2761_vm15, %vm2762_vm10  ;;  %v2754_v51 = vsel %vm2751_vm11, %v2753_v40, %v2749_v33  ;;  %v2991_v58 = vand.u32 2147483648, %v9146_v44 }
 0xe7b   : > { %v2758_v47 = vsub.f32 1.0, %v2757_v49  ;;  %v2755_v4 = vmul.f32 %v8942_v7, %v2754_v51  ;;  %vm2971_vm2 = vweird.f32 %v9149_v60  ;;  %vm2985_vm8 = vweird.f32 %v9146_v44 }
 0xe7c   : > { %v2967_v55 = vsub.f32 1.0, %v2966_v43  ;;  %v2989_v7 = vand.u32 2147483647, %v9146_v44  ;;  %vm2970_vm10 = vweird.f32 %v9136_v11  ;;  %v2782_v43 = vand.u32 2147483648, %v9143_v37 }
 0xe7d   : > { %v2759_v45 = vmul.f32 %v7636_v6, %v2758_v47  ;;  %v2780_v15 = vand.u32 2147483647, %v9143_v37 }
 0xe7e   : > { %v2968_v19 = vmul.f32 %v9149_v60, %v2967_v55 }
 0xe7f   : > { %v2760_v46 = vadd.f32 %v7636_v6, %v2759_v45  ;;  %v9155_v17 = vpop.eup %7639 }
 0xe80   : > { %v9159_v29 = vpop.xlane.xlu2 %2736  ;;  %v7642_v20 = vpop.eup %7641  ;;  %v2772_v21 = vmul.f32 %v9155_v17, %v9143_v37  ;;  %v2969_v5 = vadd.f32 %v9149_v60, %v2968_v19  ;;  %vm2777_vm9 = vweird.f32 %v9155_v17 }
 0xe81   : > { %v2764_v18 = vsel %vm2763_vm12, %v7636_v6, %v2760_v46  ;;  %7643 = vrcp.f32 %v9159_v29  ;;  %v2981_v61 = vmul.f32 %v7642_v20, %v9146_v44  ;;  %vm2986_vm14 = vweird.f32 %v7642_v20  ;;  %v9182_v6 = vpop.xlane.xlu0 %2960  ;;  %vm9189_vm12 = vmor %vm2970_vm10, %vm2971_vm2 }
 0xe82   : > { %v2769_v1 = vsel %vm2766_vm3, %v2768_v9, %v2764_v18  ;;  %v2773_v22 = vsub.f32 1.0, %v2772_v21  ;;  %vm9178_vm1 = vmor %vm2985_vm8, %vm2986_vm14  ;;  %v2992_v44 = vor.u32 1.1754944e-38, %v2991_v58  ;;  %v2797_v47 = vand.u32 2147483648, %v9159_v29 }
 0xe83   : > { %v2982_v27 = vsub.f32 1.0, %v2981_v61  ;;  %v2770_v2 = vmul.f32 %v8950_v56, %v2769_v1  ;;  %vm2791_vm13 = vweird.f32 %v9159_v29  ;;  %v2795_v28 = vand.u32 2147483647, %v9159_v29 }
 0xe84   : > { %v2774_v52 = vmul.f32 %v9155_v17, %v2773_v22  ;;  %v2973_v8 = vsel %vm9189_vm12, %v9149_v60, %v2969_v5  ;;  %vm2990_vm3 = vcmp.eq.f32.partialorder %v2989_v7, 8.507059e+37  ;;  %vm2776_vm14 = vweird.f32 %v9143_v37 }
 0xe85   : > { %v2983_v25 = vmul.f32 %v7642_v20, %v2982_v27  ;;  %v2816_v59 = vpack.c.bf16 %v2770_v2, %v2755_v4  ;;  %vm2975_vm2 = vcmp.eq.f32.partialorder %v2974_v48, 8.507059e+37  ;;  %vm2778_vm8 = vmor %vm2776_vm14, %vm2777_vm9  ;;  %v2798_v60 = vor.u32 1.1754944e-38, %v2797_v47 }
 0xe86   : > { %v2775_v45 = vadd.f32 %v9155_v17, %v2774_v52  ;;  %vm2796_vm10 = vcmp.eq.f32.partialorder %v2795_v28, 8.507059e+37  ;;  %v2783_v21 = vor.u32 1.1754944e-38, %v2782_v43  ;;  %7645 = vrcp.f32 %v9182_v6 }
 0xe87   : > { %v7644_v23 = vpop.eup %7643  ;;  %v2984_v16 = vadd.f32 %v7642_v20, %v2983_v25  ;;  %vm3015_vm9 = vweird.f32 %v9182_v6 }
 0xe88   : > { %v2787_v53 = vmul.f32 %v7644_v23, %v9159_v29  ;;  %v2820_v39 = vpop.permute.xlu2 %2819  ;;  %vm2792_vm15 = vweird.f32 %v7644_v23  ;;  %v2779_v33 = vsel %vm2778_vm8, %v9155_v17, %v2775_v45 }
 0xe89   : > { %2846 = vmatpush.bf16.msra.mxu3 %v2820_v39  ;;  %v2988_v42 = vsel %vm9178_vm1, %v7642_v20, %v2984_v16  ;;  %vm9201_vm11 = vmor %vm2791_vm13, %vm2792_vm15  ;;  %v2978_v20 = vsel %vm2975_vm2, %v2977_v10, %v2973_v8  ;;  %vm2781_vm1 = vcmp.eq.f32.partialorder %v2780_v15, 8.507059e+37  ;;  %v3019_v16 = vand.u32 2147483647, %v9182_v6 }
 0xe8a   : > { %v2788_v56 = vsub.f32 1.0, %v2787_v53  ;;  %v2993_v18 = vsel %vm2990_vm3, %v2992_v44, %v2988_v42  ;;  %v2979_v1 = vmul.f32 %v8940_v54, %v2978_v20  ;;  %v2784_v61 = vsel %vm2781_vm1, %v2783_v21, %v2779_v33 }
 0xe8b   : > { %v2994_v40 = vmul.f32 %v8956_v32, %v2993_v18  ;;  %v2785_v2 = vmul.f32 %v8958_v24, %v2784_v61  ;;  %v3021_v24 = vand.u32 2147483648, %v9182_v6  ;;  %vm3020_vm3 = vcmp.eq.f32.partialorder %v3019_v16, 8.507059e+37 }
 0xe8c   : > { %v2789_v49 = vmul.f32 %v7644_v23, %v2788_v56  ;;  %6939 = vmatmul.msk.bf16.vlgmr.msra.gmra.mxu3 %vm769_vm6, %v2816_v59  ;;  %v7646_v32 = vpop.eup %7645 }
 0xe8d   : > { %v3040_v27 = vpack.c.bf16 %v2994_v40, %v2979_v1  ;;  %v3011_v17 = vmul.f32 %v7646_v32, %v9182_v6  ;;  %vm3016_vm15 = vweird.f32 %v7646_v32  ;;  %v3022_v7 = vor.u32 1.1754944e-38, %v3021_v24 }
 0xe8e   : > { %v2790_v34 = vadd.f32 %v7644_v23, %v2789_v49  ;;  %vm3017_vm12 = vmor %vm3015_vm9, %vm3016_vm15 }
 0xe90   : > { %v2794_v29 = vsel %vm9201_vm11, %v7644_v23, %v2790_v34  ;;  %v3012_v23 = vsub.f32 1.0, %v3011_v17 }
 0xe91   : > { %v3046_v9 = vpop.permute.xlu1 %3045  ;;  %v2799_v55 = vsel %vm2796_vm10, %v2798_v60, %v2794_v29 }
 0xe92   : > { %3069 = vmatpush.bf16.msrb.mxu2 %v3046_v9  ;;  %v2800_v51 = vmul.f32 %v8964_v38, %v2799_v55  ;;  %v3013_v54 = vmul.f32 %v7646_v32, %v3012_v23 }
 0xe94   : > { %v3044_v37 = vpop.permute.xlu0 %3043  ;;  %v2817_v22 = vpack.c.bf16 %v2800_v51, %v2785_v2  ;;  %v3014_v4 = vadd.f32 %v7646_v32, %v3013_v54 }
 0xe96   : > { %3070 = vmatpush.bf16.msrb.mxu2 %v3044_v37  ;;  %v3018_v5 = vsel %vm3017_vm12, %v7646_v32, %v3014_v4 }
 0xe99   : > { %6945 = vmatmul.msk.bf16.vlgmr.msrb.gmra.mxu2 %vm769_vm6, %v3040_v27 }
 0xe9c   : > { %6940 = vmatmul.msk.bf16.gmra.mxu3 %vm769_vm6, %v2817_v22 }
 0xebc   : > { %v2958_v19 = vpop.xlane.xlu1 %2957 }
 0xebd   : > { %7647 = vrcp.f32 %v2958_v19  ;;  %v3006_v36 = vand.u32 2147483648, %v2958_v19  ;;  %v3004_v59 = vand.u32 2147483647, %v2958_v19  ;;  %vm3000_vm11 = vweird.f32 %v2958_v19 }
 0xebf   : > { %v3007_v62 = vor.u32 1.1754944e-38, %v3006_v36  ;;  %vm3005_vm2 = vcmp.eq.f32.partialorder %v3004_v59, 8.507059e+37 }
 0xec3   : > { %v7648_v25 = vpop.eup %7647 }
 0xec4   : > { %v2996_v38 = vmul.f32 %v7648_v25, %v2958_v19  ;;  %v2710_v53 = vpop.xlane.xlu1 %2709  ;;  %vm3001_vm13 = vweird.f32 %v7648_v25 }
 0xec5   : > { %v2715_v39 = vsub.f32 %v8986_v3, %v2710_v53  ;;  %vm3002_vm14 = vmor %vm3000_vm11, %vm3001_vm13  ;;  %v3023_v3 = vsel %vm3020_vm3, %v3022_v7, %v3018_v5 }
 0xec6   : > { %v2997_v58 = vsub.f32 1.0, %v2996_v38  ;;  %v3024_v11 = vmul.f32 %v8966_v63, %v3023_v3 }
 0xec7   : > { %v2724_v52 = vmul.f32 1.442695, %v2715_v39 }
 0xec8   : > { %v2998_v56 = vmul.f32 %v7648_v25, %v2997_v58 }
 0xec9   : > { %7649 = vpow2.f32 %v2724_v52 }
 0xeca   : > { %v2999_v48 = vadd.f32 %v7648_v25, %v2998_v56 }
 0xecc   : > { %v2934_v49 = vpop.xlane.xlu1 %2933  ;;  %v3003_v42 = vsel %vm3002_vm14, %v7648_v25, %v2999_v48  ;;  %vm11057_vm14 = vcmask 261120  }
 0xecd   : > { %v2939_v6 = vsub.f32 %v9064_v50, %v2934_v49  ;;  %v3008_v44 = vsel %vm3005_vm2, %v3007_v62, %v3003_v42 }
 0xece   : > { %v3009_v47 = vmul.f32 %v8988_v41, %v3008_v44 }
 0xecf   : > { %v7650_v45 = vpop.eup %7649  ;;  %v2948_v34 = vmul.f32 1.442695, %v2939_v6 }
 0xed0   : > { %v2738_v28 = vsel %vm782_vm7, %v7650_v45, 0.0  ;;  %v3041_v8 = vpack.c.bf16 %v3024_v11, %v3009_v47 }
 0xed1   : > { %7651 = vpow2.f32 %v2948_v34  ;;  %2739 = vadd.xlane.f32.xlu2 %v2738_v28 }
 0xed2   : > { %6946 = vmatmul.msk.bf16.gmra.mxu2 %vm769_vm6, %v3041_v8  ;;  %v7286_v8 = vld [vmem:[%s10956_s9 + $0x18] sm:$0xff] }
 0xed3   : > { %3197 = vmatpush.bf16.msra.mxu0 %v7286_v8 }
 0xed7   : > { %v9229_v10 = vpop.eup %7651 }
 0xed8   : > { %v2962_v43 = vsel %vm782_vm7, %v9229_v10, 0.0 }
 0xed9   : > { %2963 = vadd.xlane.f32.xlu0 %v2962_v43  ;;  %v7024_v43 = vld [vmem:[%s11013_s2 + $0x44] sm:$0xf] }
 0xeda   : > { %v2624_v50 = vpop.f32.mrf.mxu2 }
 0xedb   : > { %v9233_v46 = vpop.f32.mrf.mxu3 }
 0xee2   : > { %v2626_v41 = vpop.f32.mrf.mxu2 }
 0xee3   : > { %v9235_v63 = vpop.f32.mrf.mxu3  ;;  %v7376_v15 = vpack.i.bf16 %v2626_v41, %v2624_v50  ;;  %v3693_v50 = vunpack.c.l.b16 %v7024_v43 }
 0xee5   : > { %7377 = vrot.lane.b32.xlu1 %v7376_v15, %s11052_s17  ;;  %v3698_v41 = vpack.c.b16 %v3693_v50, %v3693_v50  ;;  %v7285_v15 = vld [vmem:[%s10956_s9 + $0x10] sm:$0xff] }
 0xee6   : > { %3198 = vmatpush.bf16.msra.mxu0 %v7285_v15 }
 0xeea   : > { %v2629_v18 = vpop.f32.mrf.mxu2 }
 0xeec   : > { %v9238_v29 = vpop.f32.mrf.mxu3 }
 0xef2   : > { %v2631_v60 = vpop.f32.mrf.mxu2 }
 0xef3   : > { %v7391_v20 = vpack.i.bf16 %v2631_v60, %v2629_v18 }
 0xef4   : > { %v9240_v9 = vpop.f32.mrf.mxu3 }
 0xef5   : > { %7392 = vrot.lane.b32.xlu2 %v7391_v20, %s11052_s17 }
 0xefa   : > { %v2634_v33 = vpop.f32.mrf.mxu2 }
 0xefc   : > { %v9243_v21 = vpop.f32.mrf.mxu3 }
 0xf02   : > { %v2636_v40 = vpop.f32.mrf.mxu2 }
 0xf04   : > { %v2412_v55 = vpop.f32.mrf.mxu3 }
 0xf0f   : > { %v2848_v37 = vpop.f32.mrf.mxu3 }
 0xf17   : > { %v2850_v1 = vpop.f32.mrf.mxu3 }
 0xf18   : > { %v7381_v61 = vpack.i.bf16 %v2850_v1, %v2848_v37 }
 0xf1a   : > { %7382 = vrot.lane.b32.xlu1 %v7381_v61, %s11053_s25 }
 0xf1c   : > { %v3072_v51 = vpop.f32.mrf.mxu2 }
 0xf1f   : > { %v2853_v27 = vpop.f32.mrf.mxu3 }
 0xf24   : > { %v3074_v2 = vpop.f32.mrf.mxu2 }
 0xf25   : > { %v7386_v22 = vpack.i.bf16 %v3074_v2, %v3072_v51 }
 0xf27   : > { %7387 = vrot.lane.b32.xlu1 %v7386_v22, %s11054_s28  ;;  %v2855_v32 = vpop.f32.mrf.mxu3 }
 0xf28   : > { %v7396_v17 = vpack.i.bf16 %v2855_v32, %v2853_v27 }
 0xf2a   : > { %7397 = vrot.lane.b32.xlu0 %v7396_v17, %s11053_s25 }
 0xf44   : > { %v2740_v23 = vpop.xlane.xlu2 %2739 }
 0xf45   : > { %7653 = vrcp.f32 %v2740_v23  ;;  %v2812_v38 = vand.u32 2147483648, %v2740_v23  ;;  %v2810_v24 = vand.u32 2147483647, %v2740_v23  ;;  %vm2806_vm10 = vweird.f32 %v2740_v23 }
 0xf47   : > { %v2813_v58 = vor.u32 1.1754944e-38, %v2812_v38  ;;  %vm2811_vm15 = vcmp.eq.f32.partialorder %v2810_v24, 8.507059e+37 }
 0xf4b   : > { %v7654_v19 = vpop.eup %7653 }
 0xf4c   : > { %v2802_v54 = vmul.f32 %v7654_v19, %v2740_v23  ;;  %v2964_v25 = vpop.xlane.xlu0 %2963  ;;  %vm2807_vm8 = vweird.f32 %v7654_v19 }
 0xf4d   : > { %7655 = vrcp.f32 %v2964_v25  ;;  %vm2808_vm1 = vmor %vm2806_vm10, %vm2807_vm8  ;;  %v3036_v48 = vand.u32 2147483648, %v2964_v25  ;;  %v3034_v49 = vand.u32 2147483647, %v2964_v25  ;;  %vm3030_vm12 = vweird.f32 %v2964_v25 }
 0xf4e   : > { %v2803_v4 = vsub.f32 1.0, %v2802_v54  ;;  %vm11060_vm10 = vmmov %vm11057_vm14 }
 0xf4f   : > { %v3037_v6 = vor.u32 1.1754944e-38, %v3036_v48  ;;  %vm3035_vm3 = vcmp.eq.f32.partialorder %v3034_v49, 8.507059e+37  ;;  %v9286_v48 = vld [vmem:[%s10957_s10 + $0x8] sm:$0x3f] }
 0xf50   : > { %v2804_v53 = vmul.f32 %v7654_v19, %v2803_v4 }
 0xf52   : > { %v2805_v39 = vadd.f32 %v7654_v19, %v2804_v53 }
 0xf53   : > { %v7656_v16 = vpop.eup %7655 }
 0xf54   : > { %v3026_v36 = vmul.f32 %v7656_v16, %v2964_v25  ;;  %v2809_v52 = vsel %vm2808_vm1, %v7654_v19, %v2805_v39  ;;  %vm3031_vm9 = vweird.f32 %v7656_v16  ;;  %v7393_v19 = vpop.permute.xlu2 %7392  ;;  %vm11061_vm1 = vmmov %vm11060_vm10 }
 0xf55   : > { %v3077_v56 = vpop.f32.mrf.mxu2  ;;  %v2814_v59 = vsel %vm2811_vm15, %v2813_v58, %v2809_v52  ;;  %vm3032_vm13 = vmor %vm3030_vm12, %vm3031_vm9  ;;  %v7395_v25 = vunpack.i.h.bf16 %v7393_v19 }
 0xf56   : > { %v3027_v5 = vsub.f32 1.0, %v3026_v36  ;;  %v2815_v7 = vmul.f32 %v7650_v45, %v2814_v59  ;;  %vm11062_vm15 = vmmov %vm11061_vm1 }
 0xf57   : > { %v7378_v18 = vpop.permute.xlu1 %7377  ;;  %v3149_v53 = vsel %vm722_vm5, %v9240_v9, %v7395_v25  ;;  %vm11064_vm12 = vmmov %vm11061_vm1 }
 0xf58   : > { %v3028_v62 = vmul.f32 %v7656_v16, %v3027_v5  ;;  %v2818_v3 = vpack.c.bf16 %v2815_v7, %v2815_v7  ;;  %v7380_v20 = vunpack.i.h.bf16 %v7378_v18 }
 0xf5a   : > { %6941 = vmatmul.msk.bf16.gmra.mxu3 %vm769_vm6, %v2818_v3  ;;  %v3029_v42 = vadd.f32 %v7656_v16, %v3028_v62  ;;  %v3147_v1 = vsel %vm722_vm5, %v9235_v63, %v7380_v20  ;;  %v7394_v63 = vunpack.i.l.bf16 %v7393_v19  ;;  %v3169_v62 = vperm.slane %v9286_v48, 0 }
 0xf5c   : > { %v3033_v44 = vsel %vm3032_vm13, %v7656_v16, %v3029_v42  ;;  %v3148_v24 = vsel %vm722_vm5, %v9238_v29, %v7394_v63  ;;  %vm11065_vm13 = vmmov %vm11061_vm1 }
 0xf5d   : > { %v3079_v47 = vpop.f32.mrf.mxu2  ;;  %v3038_v11 = vsel %vm3035_vm3, %v3037_v6, %v3033_v44  ;;  %vm11066_vm3 = vmmov %vm11061_vm1 }
 0xf5e   : > { %v7401_v34 = vpack.i.bf16 %v3079_v47, %v3077_v56  ;;  %v3039_v28 = vmul.f32 %v9229_v10, %v3038_v11  ;;  %v3710_v10 = vsel %vm622_vm0, %v3698_v41, 0  ;;  %vm11055_vm0 = vcmask 195584  }
 0xf5f   : > { %3715 = vmatpush.bf16.msrb.mxu0 %v3710_v10  ;;  %vm11056_vm11 = vmmov %vm11055_vm0 }
 0xf60   : > { %7402 = vrot.lane.b32.xlu1 %v7401_v34, %s11054_s28  ;;  %v3042_v45 = vpack.c.bf16 %v3039_v28, %v3039_v28  ;;  %vm11058_vm2 = vmmov %vm11055_vm0 }
 0xf61   : > { %vm11059_vm8 = vmmov %vm11055_vm0 }
 0xf62   : > { %6947 = vmatmul.msk.bf16.gmra.mxu2 %vm769_vm6, %v3042_v45  ;;  %vm11063_vm9 = vmmov %vm11055_vm0 }
 0xf68   : > { %3099 = vrot.lane.b32.xlu1 %v2634_v33, %s11052_s17  ;;  %v7379_v33 = vunpack.i.l.bf16 %v7378_v18 }
 0xf6a   : > { %v3146_v61 = vsel %vm722_vm5, %v9233_v46, %v7379_v33 }
 0xf8c   : > { %v7383_v60 = vpop.permute.xlu1 %7382 }
 0xf8d   : > { %v7385_v40 = vunpack.i.h.bf16 %v7383_v60  ;;  %v7384_v55 = vunpack.i.l.bf16 %v7383_v60 }
 0xf8f   : > { %v3152_v2 = vsel %vm1677_vm4, %v3147_v1, %v7385_v40  ;;  %v3151_v22 = vsel %vm1677_vm4, %v3146_v61, %v7384_v55 }
 0xf99   : > { %v7388_v37 = vpop.permute.xlu1 %7387 }
 0xf9a   : > { %v7390_v51 = vunpack.i.h.bf16 %v7388_v37  ;;  %v7389_v27 = vunpack.i.l.bf16 %v7388_v37 }
 0xf9c   : > { %v3156_v32 = vsel %vm11055_vm0, %v3151_v22, %v7389_v27  ;;  %v3157_v17 = vsel %vm11056_vm11, %v3152_v2, %v7390_v51  ;;  %v7398_v54 = vpop.permute.xlu0 %7397  ;;  %vm11067_vm0 = vmmov %vm11061_vm1 }
 0xf9d   : > { %v3161_v23 = vpack.c.bf16 %v3157_v17, %v3156_v32  ;;  %v7400_v4 = vunpack.i.h.bf16 %v7398_v54  ;;  %v7399_v38 = vunpack.i.l.bf16 %v7398_v54  ;;  %vm11068_vm11 = vmmov %vm11067_vm0 }
 0xf9f   : > { %6960 = vmatmul.msk.bf16.vlgmr.msra.gmra.mxu0 %vm11057_vm14, %v3161_v23  ;;  %v3153_v58 = vsel %vm1677_vm4, %v3148_v24, %v7399_v38  ;;  %v3154_v36 = vsel %vm1677_vm4, %v3149_v53, %v7400_v4  ;;  %vm11069_vm14 = vmmov %vm11067_vm0 }
 0xfd2   : > { %v7403_v46 = vpop.permute.xlu1 %7402 }
 0xfd3   : > { %v7405_v39 = vunpack.i.h.bf16 %v7403_v46  ;;  %v7404_v16 = vunpack.i.l.bf16 %v7403_v46 }
 0xfd5   : > { %v3158_v52 = vsel %vm11058_vm2, %v3153_v58, %v7404_v16  ;;  %v3159_v56 = vsel %vm11059_vm8, %v3154_v36, %v7405_v39  ;;  %vm11070_vm2 = vmmov %vm11067_vm0  ;;  %vm11071_vm8 = vcmask 253952  }
 0xfd6   : > { %v3162_v59 = vpack.c.bf16 %v3159_v56, %v3158_v52  ;;  %v7288_v56 = vld [vmem:[%s10958_s11 + $0x18] sm:$0xff] }
 0xfd7   : > { %3381 = vmatpush.bf16.msrb.mxu3 %v7288_v56 }
 0xfd8   : > { %6961 = vmatmul.msk.bf16.gmra.mxu0 %vm11060_vm10, %v3162_v59 }
 0xfda   : > { %v3100_v28 = vpop.permute.xlu1 %3099 }
 0xfdb   : > { %v3150_v50 = vsel %vm722_vm5, %v9243_v21, %v3100_v28 }
 0xfdd   : > { %v2858_v5 = vpop.f32.mrf.mxu3 }
 0xfde   : > { %3119 = vrot.lane.b32.xlu1 %v2858_v5, %s11053_s25 }
 0xfe5   : > { %v2860_v9 = vpop.f32.mrf.mxu3  ;;  %v3082_v7 = vpop.f32.mrf.mxu2 }
 0xfe6   : > { %3139 = vrot.lane.b32.xlu0 %v3082_v7, %s11054_s28 }
 0xfed   : > { %v3084_v29 = vpop.f32.mrf.mxu2 }
0x101c   : > { %v3200_v3 = vpop.f32.mrf.mxu0 }
0x101d   : > { %v3201_v49 = vadd.f32 %v3200_v3, %v3169_v62 }
0x101f   : > { %v3214_v42 = vadd.f32 %v3201_v49, %v8688_v12 }
0x1021   : > { %v3219_v6 = vsel %vm11061_vm1, %v3214_v42, 0.0 }
0x1022   : > { %3220 = vadd.xlane.f32.xlu2 %v3219_v6 }
0x1024   : > { %v3202_v44 = vpop.f32.mrf.mxu0 }
0x1025   : > { %v3203_v47 = vadd.f32 %v3202_v44, %v3169_v62 }
0x1027   : > { %v3215_v11 = vadd.f32 %v3203_v47, %v8690_v14 }
0x1029   : > { %v3222_v34 = vsel %vm11062_vm15, %v3215_v11, 0.0 }
0x102a   : > { %3223 = vadd.xlane.f32.xlu1 %v3222_v34 }
0x1050   : > { %v3120_v45 = vpop.permute.xlu1 %3119 }
0x1051   : > { %v3155_v41 = vsel %vm1677_vm4, %v3150_v50, %v3120_v45  ;;  %v9329_v45 = vperm.slane %v9286_v48, 1 }
0x1055   : > { %v3205_v8 = vpop.f32.mrf.mxu0 }
0x1056   : > { %v3206_v43 = vadd.f32 %v3205_v8, %v3169_v62 }
0x1058   : > { %v3216_v12 = vadd.f32 %v3206_v43, %v8697_v35  ;;  %v3140_v10 = vpop.permute.xlu0 %3139 }
0x1059   : > { %v3160_v15 = vsel %vm11063_vm9, %v3155_v41, %v3140_v10  ;;  %v9332_v41 = vperm.slane %v9286_v48, 2 }
0x105a   : > { %v3163_v18 = vpack.c.bf16 %v3160_v15, %v3160_v15  ;;  %v3225_v14 = vsel %vm11064_vm12, %v3216_v12, 0.0 }
0x105b   : > { %3226 = vadd.xlane.f32.xlu0 %v3225_v14 }
0x105c   : > { %6962 = vmatmul.msk.bf16.gmra.mxu0 %vm11065_vm13, %v3163_v18 }
0x105d   : > { %v3207_v60 = vpop.f32.mrf.mxu0 }
0x105e   : > { %v3208_v20 = vadd.f32 %v3207_v60, %v3169_v62 }
0x1060   : > { %v3217_v33 = vadd.f32 %v3208_v20, %v8699_v31 }
0x1062   : > { %v3228_v40 = vsel %vm11066_vm3, %v3217_v33, 0.0  ;;  %vm11072_vm3 = vmmov %vm11067_vm0 }
0x1063   : > { %3229 = vadd.xlane.f32.xlu2 %v3228_v40 }
0x1095   : > { %v3221_v21 = vpop.xlane.xlu2 %3220 }
0x1096   : > { %v3234_v55 = vmul.f32 %v3221_v21, %v8542_v13 }
0x1098   : > { %v3239_v35 = vsub.f32 %v3214_v42, %v3234_v55 }
0x109a   : > { %v3244_v37 = vmul.f32 %v3239_v35, %v3239_v35 }
0x109c   : > { %v3249_v1 = vsel %vm11067_vm0, %v3244_v37, 0.0  ;;  %vm11073_vm0 = vmmov %vm11071_vm8 }
0x109d   : > { %v3224_v61 = vpop.xlane.xlu1 %3223  ;;  %3250 = vadd.xlane.f32.xlu1 %v3249_v1 }
0x109e   : > { %v3235_v51 = vmul.f32 %v3224_v61, %v8542_v13 }
0x10a0   : > { %v3240_v27 = vsub.f32 %v3215_v11, %v3235_v51 }
0x10a2   : > { %v3245_v2 = vmul.f32 %v3240_v27, %v3240_v27 }
0x10a4   : > { %v3252_v22 = vsel %vm11068_vm11, %v3245_v2, 0.0 }
0x10a5   : > { %3253 = vadd.xlane.f32.xlu0 %v3252_v22 }
0x10ce   : > { %v3227_v31 = vpop.xlane.xlu0 %3226 }
0x10cf   : > { %v3236_v32 = vmul.f32 %v3227_v31, %v8542_v13 }
0x10d1   : > { %v9307_v17 = vsub.f32 %v3216_v12, %v3236_v32 }
0x10d3   : > { %v3246_v23 = vmul.f32 %v9307_v17, %v9307_v17 }
0x10d5   : > { %v3255_v19 = vsel %vm11069_vm14, %v3246_v23, 0.0 }
0x10d6   : > { %v3230_v54 = vpop.xlane.xlu2 %3229  ;;  %3256 = vadd.xlane.f32.xlu2 %v3255_v19 }
0x10d7   : > { %v3237_v25 = vmul.f32 %v3230_v54, %v8542_v13 }
0x10d9   : > { %v9313_v63 = vsub.f32 %v3217_v33, %v3237_v25  ;;  %v3210_v4 = vpop.f32.mrf.mxu0 }
0x10da   : > { %v3211_v38 = vadd.f32 %v3210_v4, %v3169_v62 }
0x10db   : > { %v3247_v46 = vmul.f32 %v9313_v63, %v9313_v63 }
0x10dc   : > { %v3218_v53 = vadd.f32 %v3211_v38, %v8706_v57  ;;  %v7287_v57 = vld [vmem:[%s10958_s11 + $0x10] sm:$0xff] }
0x10dd   : > { %v3258_v24 = vsel %vm11070_vm2, %v3247_v46, 0.0  ;;  %3382 = vmatpush.bf16.msrb.mxu3 %v7287_v57 }
0x10de   : > { %3259 = vadd.xlane.f32.xlu1 %v3258_v24  ;;  %v3231_v39 = vsel %vm11071_vm8, %v3218_v53, 0.0 }
0x10df   : > { %3232 = vadd.xlane.f32.xlu0 %v3231_v39 }
0x10e1   : > { %v3212_v16 = vpop.f32.mrf.mxu0 }
0x1110   : > { %v3251_v58 = vpop.xlane.xlu1 %3250 }
0x1111   : > { %v3264_v36 = vmul.f32 %v3251_v58, %v8542_v13 }
0x1113   : > { %v3269_v52 = vadd.f32 1e-05, %v3264_v36 }
0x1115   : > { %7657 = vrsqrt.f32 %v3269_v52  ;;  %vm3280_vm1 = vweird.f32 %v3269_v52 }
0x1118   : > { %v3254_v59 = vpop.xlane.xlu0 %3253 }
0x1119   : > { %v3265_v5 = vmul.f32 %v3254_v59, %v8542_v13 }
0x111b   : > { %v7658_v9 = vpop.eup %7657  ;;  %v3270_v7 = vadd.f32 1e-05, %v3265_v5  ;;  %v7290_v5 = vld [vmem:[%s10960_s13 + $0x28] sm:$0xff] }
0x111c   : > { %v3275_v29 = vmul.f32 %v7658_v9, %v3269_v52  ;;  %vm3281_vm10 = vweird.f32 %v7658_v9 }
0x111d   : > { %7659 = vrsqrt.f32 %v3270_v7  ;;  %vm3282_vm15 = vmor %vm3280_vm1, %vm3281_vm10  ;;  %vm3290_vm12 = vweird.f32 %v3270_v7 }
0x111e   : > { %v3276_v62 = vmul.f32 %v7658_v9, %v3275_v29  ;;  %v7470_v29 = vld [vmem:[%s10959_s12 + $0x1] ss:$0 sm:$0xff] }
0x1120   : > { %v3277_v3 = vmul.f32 0.5, %v3276_v62 }
0x1122   : > { %v3278_v49 = vsub.f32 1.5, %v3277_v3 }
0x1123   : > { %v7660_v42 = vpop.eup %7659 }
0x1124   : > { %v3279_v6 = vmul.f32 %v7658_v9, %v3278_v49  ;;  %v3285_v44 = vmul.f32 %v7660_v42, %v3270_v7  ;;  %vm3291_vm9 = vweird.f32 %v7660_v42 }
0x1125   : > { %vm3292_vm13 = vmor %vm3290_vm12, %vm3291_vm9  ;;  %vm11075_vm9 = vcmask 523264  }
0x1126   : > { %v3286_v47 = vmul.f32 %v7660_v42, %v3285_v44  ;;  %v3283_v11 = vsel %vm3282_vm15, %v7658_v9, %v3279_v6  ;;  %vm11074_vm15 = vmmov %vm11072_vm3  ;;  %v7289_v9 = vld [vmem:[%s10960_s13 + $0x20] sm:$0xff] }
0x1127   : > { %v3324_v8 = vmul.f32 %v3283_v11, %v3239_v35 }
0x1128   : > { %v3287_v34 = vmul.f32 0.5, %v3286_v47 }
0x1129   : > { %v3330_v12 = vmul.f32 %v9329_v45, %v3324_v8 }
0x112a   : > { %v3288_v28 = vsub.f32 1.5, %v3287_v34 }
0x112b   : > { %v3336_v18 = vadd.f32 %v9332_v41, %v3330_v12 }
0x112c   : > { %v3289_v43 = vmul.f32 %v7660_v42, %v3288_v28  ;;  %v7300_v28 = vld [vmem:[%s10954_s7 + $0x28] sm:$0xff] }
0x112d   : > { %3783 = vmatpush.bf16.msra.mxu3 %v7300_v28 }
0x112e   : > { %v3293_v50 = vsel %vm3292_vm13, %v7660_v42, %v3289_v43  ;;  %v7299_v43 = vld [vmem:[%s10954_s7 + $0x20] sm:$0xff] }
0x112f   : > { %v3325_v10 = vmul.f32 %v3293_v50, %v3240_v27 }
0x1131   : > { %v3331_v15 = vmul.f32 %v9329_v45, %v3325_v10  ;;  %3784 = vmatpush.bf16.msra.mxu3 %v7299_v43 }
0x1133   : > { %v3337_v14 = vadd.f32 %v9332_v41, %v3331_v15 }
0x1135   : > { %v3341_v60 = vpack.c.bf16 %v3337_v14, %v3336_v18 }
0x1137   : > { %6976 = vmatmul.msk.bf16.vlgmr.msrb.gmra.mxu3 %vm11072_vm3, %v3341_v60 }
0x1149   : > { %v3257_v20 = vpop.xlane.xlu2 %3256 }
0x114a   : > { %v3266_v33 = vmul.f32 %v3257_v20, %v8542_v13 }
0x114c   : > { %v3271_v40 = vadd.f32 1e-05, %v3266_v33 }
0x114e   : > { %7661 = vrsqrt.f32 %v3271_v40  ;;  %vm3300_vm14 = vweird.f32 %v3271_v40 }
0x1151   : > { %v3260_v21 = vpop.xlane.xlu1 %3259 }
0x1152   : > { %v3267_v55 = vmul.f32 %v3260_v21, %v8542_v13  ;;  %v3233_v35 = vpop.xlane.xlu0 %3232  ;;  %v7043_v21 = vld [vmem:[%s11018_s3 + $0x28] sm:$0xff] }
0x1153   : > { %v3238_v37 = vmul.f32 %v3233_v35, %v8542_v13 }
0x1154   : > { %v7662_v1 = vpop.eup %7661  ;;  %v3272_v61 = vadd.f32 1e-05, %v3267_v55  ;;  %v7044_v55 = vld [vmem:[%s11018_s3 + $0x30] sm:$0xff] }
0x1155   : > { %v3295_v51 = vmul.f32 %v7662_v1, %v3271_v40  ;;  %v9342_v27 = vsub.f32 %v3218_v53, %v3238_v37  ;;  %vm3301_vm11 = vweird.f32 %v7662_v1  ;;  %v9394_v37 = vadd.f32 %v7043_v21, %v8050_v26 }
0x1156   : > { %7663 = vrsqrt.f32 %v3272_v61  ;;  %vm3302_vm2 = vmor %vm3300_vm14, %vm3301_vm11  ;;  %vm3310_vm10 = vweird.f32 %v3272_v61 }
0x1157   : > { %v3296_v2 = vmul.f32 %v7662_v1, %v3295_v51  ;;  %v3248_v22 = vmul.f32 %v9342_v27, %v9342_v27  ;;  %vm11078_vm14 = vmmov %vm11075_vm9 }
0x1159   : > { %v3297_v31 = vmul.f32 0.5, %v3296_v2  ;;  %v3261_v32 = vsel %vm11073_vm0, %v3248_v22, 0.0  ;;  %vm11076_vm0 = vmmov %vm11074_vm15 }
0x115a   : > { %3262 = vadd.xlane.f32.xlu2 %v3261_v32  ;;  %vm11077_vm11 = vmmov %vm11076_vm0 }
0x115b   : > { %v3298_v23 = vsub.f32 1.5, %v3297_v31 }
0x115c   : > { %v7664_v19 = vpop.eup %7663 }
0x115d   : > { %v3299_v54 = vmul.f32 %v7662_v1, %v3298_v23  ;;  %v3305_v25 = vmul.f32 %v7664_v19, %v3272_v61  ;;  %vm3311_vm8 = vweird.f32 %v7664_v19 }
0x115e   : > { %vm3312_vm1 = vmor %vm3310_vm10, %vm3311_vm8 }
0x115f   : > { %v3306_v4 = vmul.f32 %v7664_v19, %v3305_v25  ;;  %v3303_v38 = vsel %vm3302_vm2, %v7662_v1, %v3299_v54  ;;  %v9397_v1 = vadd.f32 %v7044_v55, %v8062_v30  ;;  %vm11079_vm2 = vmmov %vm11075_vm9  ;;  %v3415_v25 = vperm.slane %v9286_v48, 3 }
0x1160   : > { %v3326_v24 = vmul.f32 %v3303_v38, %v9307_v17  ;;  %v7292_v17 = vld [vmem:[%s10960_s13 + $0x38] sm:$0xff]  ;;  %vm11080_vm8 = vmmov %vm11076_vm0 }
0x1161   : > { %v3307_v46 = vmul.f32 0.5, %v3306_v4  ;;  %3453 = vmatpush.bf16.msra.mxu1 %v7292_v17  ;;  %vm11081_vm10 = vmmov %vm11076_vm0 }
0x1162   : > { %v3332_v36 = vmul.f32 %v9329_v45, %v3326_v24 }
0x1163   : > { %v3308_v53 = vsub.f32 1.5, %v3307_v46 }
0x1164   : > { %v9352_v56 = vadd.f32 %v9332_v41, %v3332_v36 }
0x1165   : > { %v3309_v39 = vmul.f32 %v7664_v19, %v3308_v53 }
0x1167   : > { %v3313_v16 = vsel %vm3312_vm1, %v7664_v19, %v3309_v39  ;;  %vm11082_vm1 = vcmask 253952  }
0x1168   : > { %v3327_v58 = vmul.f32 %v3313_v16, %v9313_v63  ;;  %v7291_v63 = vld [vmem:[%s10960_s13 + $0x30] sm:$0xff] }
0x1169   : > { %3454 = vmatpush.bf16.msra.mxu1 %v7291_v63 }
0x116a   : > { %v3333_v52 = vmul.f32 %v9329_v45, %v3327_v58 }
0x116c   : > { %v9355_v57 = vadd.f32 %v9332_v41, %v3333_v52 }
0x116d   : > { %3455 = vmatpush.bf16.msra.mxu1 %v7290_v5 }
0x116e   : > { %v3342_v59 = vpack.c.bf16 %v9355_v57, %v9352_v56 }
0x1170   : > { %6977 = vmatmul.msk.bf16.gmra.mxu3 %vm11074_vm15, %v3342_v59  ;;  %vm11083_vm15 = vmmov %vm11076_vm0 }
0x1171   : > { %3456 = vmatpush.bf16.msra.mxu1 %v7289_v9 }
0x11ba   : > { %v3384_v7 = vpop.f32.mrf.mxu3 }
0x11bb   : > { %v3385_v62 = vadd.f32 %v7470_v29, %v3384_v7 }
0x11bd   : > { %v3398_v42 = vmax.f32 %v3385_v62, 0.0 }
0x11c2   : > { %v3386_v3 = vpop.f32.mrf.mxu3 }
0x11c3   : > { %v3387_v49 = vadd.f32 %v7470_v29, %v3386_v3 }
0x11c5   : > { %v3399_v6 = vmax.f32 %v3387_v49, 0.0 }
0x11c7   : > { %v3403_v44 = vpack.c.bf16 %v3399_v6, %v3398_v42 }
0x11c9   : > { %7003 = vmatmul.msk.bf16.vlgmr.msra.gmra.mxu1 %vm11075_vm9, %v3403_v44  ;;  %vm11084_vm9 = vmmov %vm11076_vm0 }
0x11cd   : > { %v3263_v47 = vpop.xlane.xlu2 %3262 }
0x11ce   : > { %v3268_v11 = vmul.f32 %v3263_v47, %v8542_v13 }
0x11d0   : > { %v3273_v34 = vadd.f32 1e-05, %v3268_v11 }
0x11d2   : > { %7665 = vrsqrt.f32 %v3273_v34  ;;  %vm3320_vm13 = vweird.f32 %v3273_v34 }
0x11d8   : > { %v7666_v8 = vpop.eup %7665 }
0x11d9   : > { %v3315_v50 = vmul.f32 %v7666_v8, %v3273_v34  ;;  %vm3321_vm12 = vweird.f32 %v7666_v8 }
0x11da   : > { %vm3322_vm3 = vmor %vm3320_vm13, %vm3321_vm12 }
0x11db   : > { %v3316_v12 = vmul.f32 %v7666_v8, %v3315_v50  ;;  %vm11085_vm12 = vmmov %vm11082_vm1  ;;  %v7294_v50 = vld [vmem:[%s10961_s14 + $0x8] sm:$0xff] }
0x11dc   : > { %3580 = vmatpush.bf16.msra.mxu2 %v7294_v50 }
0x11dd   : > { %v3317_v10 = vmul.f32 0.5, %v3316_v12  ;;  %v7293_v12 = vld [vmem:[%s10961_s14] sm:$0xff] }
0x11df   : > { %v3318_v15 = vsub.f32 1.5, %v3317_v10 }
0x11e0   : > { %3581 = vmatpush.bf16.msra.mxu2 %v7293_v12 }
0x11e1   : > { %v3319_v18 = vmul.f32 %v7666_v8, %v3318_v15 }
0x11e3   : > { %v3323_v14 = vsel %vm3322_vm3, %v7666_v8, %v3319_v18 }
0x11e4   : > { %v3328_v60 = vmul.f32 %v3323_v14, %v9342_v27 }
0x11e6   : > { %v3334_v20 = vmul.f32 %v9329_v45, %v3328_v60  ;;  %v3743_v45 = vpack.c.bf16 %v9397_v1, %v9394_v37 }
0x11e8   : > { %v3340_v33 = vadd.f32 %v9332_v41, %v3334_v20 }
0x11ea   : > { %v3343_v40 = vpack.c.bf16 %v3340_v33, %v3340_v33 }
0x11ec   : > { %6978 = vmatmul.msk.bf16.gmra.mxu3 %vm11076_vm0, %v3343_v40 }
0x11f3   : > { %v3389_v35 = vpop.f32.mrf.mxu3 }
0x11f4   : > { %v3390_v41 = vadd.f32 %v7470_v29, %v3389_v35 }
0x11f6   : > { %v3400_v27 = vmax.f32 %v3390_v41, 0.0 }
0x11fb   : > { %v3391_v61 = vpop.f32.mrf.mxu3 }
0x11fc   : > { %v3392_v51 = vadd.f32 %v7470_v29, %v3391_v61  ;;  %7062 = vmatmul.msk.bf16.vlgmr.msra.gmra.mxu3 %vm11077_vm11, %v3743_v45 }
0x11fe   : > { %v3401_v2 = vmax.f32 %v3392_v51, 0.0 }
0x1200   : > { %v3404_v22 = vpack.c.bf16 %v3401_v2, %v3400_v27  ;;  %v3539_v27 = vperm.slane %v9286_v48, 4 }
0x1202   : > { %7004 = vmatmul.msk.bf16.gmra.mxu1 %vm11078_vm14, %v3404_v22 }
0x1246   : > { %v3458_v31 = vpop.f32.mrf.mxu1 }
0x124e   : > { %v3459_v32 = vpop.f32.mrf.mxu1 }
0x124f   : > { %v3543_v32 = vperm.slane %v9286_v48, 5 }
0x126f   : > { %v3394_v26 = vpop.f32.mrf.mxu3 }
0x1270   : > { %v3395_v23 = vadd.f32 %v7470_v29, %v3394_v26 }
0x1272   : > { %v3402_v19 = vmax.f32 %v3395_v23, 0.0 }
0x1274   : > { %v3405_v30 = vpack.c.bf16 %v3402_v19, %v3402_v19 }
0x1276   : > { %7005 = vmatmul.msk.bf16.gmra.mxu1 %vm11079_vm2, %v3405_v30 }
0x1277   : > { %v3396_v54 = vpop.f32.mrf.mxu3 }
0x127f   : > { %v3461_v4 = vpop.f32.mrf.mxu1 }
0x1280   : > { %v3462_v38 = vadd.f32 %v3461_v4, %v3415_v25 }
0x1282   : > { %v3470_v46 = vadd.f32 %v3462_v38, %v9352_v56 }
0x1284   : > { %v3473_v53 = vsel %vm11080_vm8, %v3470_v46, 0.0 }
0x1285   : > { %3474 = vadd.xlane.f32.xlu1 %v3473_v53 }
0x1287   : > { %v3463_v24 = vpop.f32.mrf.mxu1 }
0x1288   : > { %v3464_v39 = vadd.f32 %v3463_v24, %v3415_v25 }
0x128a   : > { %v3471_v16 = vadd.f32 %v3464_v39, %v9355_v57 }
0x128c   : > { %v3476_v58 = vsel %vm11081_vm10, %v3471_v16, 0.0 }
0x128d   : > { %3477 = vadd.xlane.f32.xlu0 %v3476_v58 }
0x12f3   : > { %v3466_v36 = vpop.f32.mrf.mxu1 }
0x12f4   : > { %v3467_v52 = vadd.f32 %v3466_v36, %v3415_v25 }
0x12f6   : > { %v3472_v59 = vadd.f32 %v3467_v52, %v3340_v33 }
0x12f8   : > { %v3475_v17 = vpop.xlane.xlu1 %3474  ;;  %v3479_v63 = vsel %vm11082_vm1, %v3472_v59, 0.0 }
0x12f9   : > { %v3482_v5 = vmul.f32 %v3475_v17, %v8542_v13  ;;  %3480 = vadd.xlane.f32.xlu0 %v3479_v63 }
0x12fb   : > { %v3485_v56 = vsub.f32 %v3470_v46, %v3482_v5  ;;  %v3468_v9 = vpop.f32.mrf.mxu1  ;;  %v3553_v5 = vld [vmem:[%s10962_s15] sm:$0xff] }
0x12fd   : > { %v3488_v7 = vmul.f32 %v3485_v56, %v3485_v56 }
0x12ff   : > { %v3491_v29 = vsel %vm11083_vm15, %v3488_v7, 0.0  ;;  %v7877_v7 = vld [vmem:[%s11017_s4] sm:$0xff] }
0x1300   : > { %3492 = vadd.xlane.f32.xlu2 %v3491_v29  ;;  %v3478_v62 = vpop.xlane.xlu0 %3477 }
0x1301   : > { %v3483_v57 = vmul.f32 %v3478_v62, %v8542_v13 }
0x1303   : > { %v3486_v3 = vsub.f32 %v3471_v16, %v3483_v57  ;;  %v3554_v57 = vld [vmem:[%s10962_s15 + $0x8] sm:$0xff] }
0x1305   : > { %v3489_v49 = vmul.f32 %v3486_v3, %v3486_v3 }
0x1307   : > { %v3494_v42 = vsel %vm11084_vm9, %v3489_v49, 0.0  ;;  %vm11086_vm9 = vmmov %vm11080_vm8 }
0x1308   : > { %3495 = vadd.xlane.f32.xlu1 %v3494_v42 }
0x136c   : > { %v3481_v6 = vpop.xlane.xlu0 %3480 }
0x136d   : > { %v3484_v44 = vmul.f32 %v3481_v6, %v8542_v13 }
0x136f   : > { %v3487_v47 = vsub.f32 %v3472_v59, %v3484_v44 }
0x1371   : > { %v3490_v11 = vmul.f32 %v3487_v47, %v3487_v47 }
0x1373   : > { %v3493_v34 = vpop.xlane.xlu2 %3492  ;;  %v3497_v28 = vsel %vm11085_vm12, %v3490_v11, 0.0 }
0x1374   : > { %v3500_v8 = vmul.f32 %v3493_v34, %v8542_v13  ;;  %3498 = vadd.xlane.f32.xlu2 %v3497_v28 }
0x1376   : > { %v3503_v43 = vadd.f32 1e-05, %v3500_v8 }
0x1378   : > { %7667 = vrsqrt.f32 %v3503_v43  ;;  %vm3512_vm3 = vweird.f32 %v3503_v43 }
0x137b   : > { %v3496_v10 = vpop.xlane.xlu1 %3495 }
0x137c   : > { %v3501_v15 = vmul.f32 %v3496_v10, %v8542_v13 }
0x137e   : > { %v7668_v18 = vpop.eup %7667  ;;  %v3504_v14 = vadd.f32 1e-05, %v3501_v15 }
0x137f   : > { %v3507_v60 = vmul.f32 %v7668_v18, %v3503_v43  ;;  %vm3513_vm13 = vweird.f32 %v7668_v18 }
0x1380   : > { %7669 = vrsqrt.f32 %v3504_v14  ;;  %vm3514_vm0 = vmor %vm3512_vm3, %vm3513_vm13  ;;  %vm3522_vm14 = vweird.f32 %v3504_v14 }
0x1381   : > { %v3508_v20 = vmul.f32 %v7668_v18, %v3507_v60  ;;  %v7878_v60 = vld [vmem:[%s11011_s5] sm:$0xff] }
0x1383   : > { %v3509_v33 = vmul.f32 0.5, %v3508_v20 }
0x1385   : > { %v3510_v40 = vsub.f32 1.5, %v3509_v33 }
0x1386   : > { %v7670_v21 = vpop.eup %7669 }
0x1387   : > { %v3511_v55 = vmul.f32 %v7668_v18, %v3510_v40  ;;  %v3517_v35 = vmul.f32 %v7670_v21, %v3504_v14  ;;  %vm3523_vm11 = vweird.f32 %v7670_v21  ;;  %v562_v40 = vld [vmem:[%s11014_s6] sm:$0x1] }
0x1388   : > { %vm3524_vm2 = vmor %vm3522_vm14, %vm3523_vm11 }
0x1389   : > { %v3518_v45 = vmul.f32 %v7670_v21, %v3517_v35  ;;  %v3515_v41 = vsel %vm3514_vm0, %v7668_v18, %v3511_v55 }
0x138a   : > { %v3536_v2 = vmul.f32 %v3515_v41, %v3485_v56 }
0x138b   : > { %v3519_v61 = vmul.f32 0.5, %v3518_v45 }
0x138c   : > { %v3540_v26 = vmul.f32 %v3539_v27, %v3536_v2 }
0x138d   : > { %v3520_v51 = vsub.f32 1.5, %v3519_v61 }
0x138e   : > { %v3544_v30 = vadd.f32 %v3543_v32, %v3540_v26 }
0x138f   : > { %v3521_v22 = vmul.f32 %v7670_v21, %v3520_v51 }
0x1391   : > { %v3525_v31 = vsel %vm3524_vm2, %v7670_v21, %v3521_v22  ;;  %vm11090_vm2 = vmmov %vm11080_vm8 }
0x1392   : > { %v3537_v23 = vmul.f32 %v3525_v31, %v3486_v3 }
0x1394   : > { %v3541_v19 = vmul.f32 %v3539_v27, %v3537_v23  ;;  %v7298_v23 = vld [vmem:[%s11013_s2 + $0x3c] sm:$0xff] }
0x1395   : > { %3716 = vmatpush.bf16.msrb.mxu0 %v7298_v23 }
0x1396   : > { %v3545_v54 = vadd.f32 %v3543_v32, %v3541_v19  ;;  %v7297_v19 = vld [vmem:[%s11013_s2 + $0x34] sm:$0xff] }
0x1398   : > { %v3547_v25 = vpack.c.bf16 %v3545_v54, %v3544_v30  ;;  %v7296_v30 = vld [vmem:[%s11013_s2 + $0x2c] sm:$0xff] }
0x1399   : > { %3717 = vmatpush.bf16.msrb.mxu0 %v7297_v19 }
0x139a   : > { %7014 = vmatmul.msk.bf16.vlgmr.msra.gmra.mxu2 %vm11080_vm8, %v3547_v25  ;;  %vm11091_vm8 = vmmov %vm11090_vm2 }
0x139d   : > { %3718 = vmatpush.bf16.msrb.mxu0 %v7296_v30 }
0x13e7   : > { %v3499_v4 = vpop.xlane.xlu2 %3498 }
0x13e8   : > { %v3502_v38 = vmul.f32 %v3499_v4, %v8542_v13 }
0x13ea   : > { %v3505_v46 = vadd.f32 1e-05, %v3502_v38 }
0x13ec   : > { %7671 = vrsqrt.f32 %v3505_v46  ;;  %vm3532_vm1 = vweird.f32 %v3505_v46 }
0x13f2   : > { %v7672_v53 = vpop.eup %7671 }
0x13f3   : > { %v3527_v24 = vmul.f32 %v7672_v53, %v3505_v46  ;;  %vm3533_vm10 = vweird.f32 %v7672_v53  ;;  %v7295_v46 = vld [vmem:[%s11013_s2 + $0x24] sm:$0xff] }
0x13f4   : > { %vm3534_vm15 = vmor %vm3532_vm1, %vm3533_vm10  ;;  %3719 = vmatpush.bf16.msrb.mxu0 %v7295_v46  ;;  %vm11092_vm10 = vcmask 523264   ;;  %vm11093_vm1 = vcmask 588800  }
0x13f5   : > { %v3528_v39 = vmul.f32 %v7672_v53, %v3527_v24 }
0x13f7   : > { %v3529_v16 = vmul.f32 0.5, %v3528_v39 }
0x13f9   : > { %v3530_v58 = vsub.f32 1.5, %v3529_v16 }
0x13fb   : > { %v3531_v48 = vmul.f32 %v7672_v53, %v3530_v58 }
0x13fd   : > { %v3535_v36 = vsel %vm3534_vm15, %v7672_v53, %v3531_v48  ;;  %vm11094_vm15 = vmmov %vm11092_vm10 }
0x13fe   : > { %v3538_v52 = vmul.f32 %v3535_v36, %v3487_v47  ;;  %v3555_v47 = vld [vmem:[%s10962_s15 + $0x10] sm:$0x1] }
0x1400   : > { %v3542_v59 = vmul.f32 %v3539_v27, %v3538_v52 }
0x1402   : > { %v3546_v17 = vadd.f32 %v3543_v32, %v3542_v59 }
0x1404   : > { %v3548_v63 = vpack.c.bf16 %v3546_v17, %v3546_v17 }
0x1406   : > { %7015 = vmatmul.msk.bf16.gmra.mxu2 %vm11086_vm9, %v3548_v63  ;;  %vm11095_vm9 = vmmov %vm11093_vm1 }
0x141d   : > { %v3583_v56 = vpop.f32.mrf.mxu2 }
0x141e   : > { %v3584_v9 = vadd.f32 %v3583_v56, %v3553_v5 }
0x1420   : > { %v9435_v29 = vadd.f32 %v7877_v7, %v3584_v9  ;;  %v7045_v9 = vld [vmem:[%s11018_s3 + $0x38] sm:$0xff]  ;;  %v7046_v7 = vld [vmem:[%s11018_s3 + $0x40] sm:$0xff] }
0x1422   : > { %v3603_v62 = vmul.f32 %v9435_v29, %v9435_v29 }
0x1424   : > { %3605 = vrot.lane.b32.xlu2 %v3603_v62, %s11087_s16 }
0x1425   : > { %v3585_v3 = vpop.f32.mrf.mxu2 }
0x1426   : > { %v3586_v49 = vadd.f32 %v3585_v3, %v3554_v57 }
0x1428   : > { %3594 = vrot.lane.b32.xlu1 %v3586_v49, %s11088_s21 }
0x147e   : > { %v3606_v42 = vpop.permute.xlu2 %3605 }
0x147f   : > { %v3608_v6 = vadd.f32 %v3606_v42, %v3603_v62  ;;  %v7047_v42 = vld [vmem:[%s11018_s3 + $0x48] sm:$0x1]  ;;  %s11216_s3 = smov 32  }
0x1481   : > { %v3609_v44 = vadd.f32 1e-08, %v3608_v6 }
0x1483   : > { %7673 = vrsqrt.f32 %v3609_v44  ;;  %vm3616_vm13 = vweird.f32 %v3609_v44 }
0x1489   : > { %v7674_v11 = vpop.eup %7673  ;;  %v3588_v34 = vpop.f32.mrf.mxu2 }
0x148a   : > { %v3611_v28 = vmul.f32 %v7674_v11, %v3609_v44  ;;  %v3589_v8 = vadd.f32 %v3588_v34, %v3555_v47  ;;  %vm3617_vm12 = vweird.f32 %v7674_v11 }
0x148b   : > { %vm3618_vm3 = vmor %vm3616_vm13, %vm3617_vm12 }
0x148c   : > { %v3612_v43 = vmul.f32 %v7674_v11, %v3611_v28  ;;  %3599 = vrot.lane.b32.xlu1 %v3589_v8, %s11026_s26  ;;  %vm11096_vm12 = vmmov %vm11090_vm2  ;;  %v7471_v8 = vld [vmem:[%s10955_s8 + $0x2] ss:$0 sm:$0xff] }
0x148d   : > { %vm11097_vm13 = vmmov %vm11090_vm2 }
0x148e   : > { %v3613_v50 = vmul.f32 0.5, %v3612_v43 }
0x1490   : > { %v3614_v12 = vsub.f32 1.5, %v3613_v50 }
0x1491   : > { %v3590_v10 = vpop.f32.mrf.mxu2 }
0x1492   : > { %v3615_v15 = vmul.f32 %v7674_v11, %v3614_v12 }
0x1494   : > { %v3619_v18 = vsel %vm3618_vm3, %v7674_v11, %v3615_v15  ;;  %v3786_v11 = vpop.f32.mrf.mxu3 }
0x1495   : > { %3639 = vrot.lane.b32.xlu2 %v3619_v18, %s11053_s25  ;;  %v3637_v39 = vmul.f32 %v3619_v18, %v9435_v29 }
0x149a   : > { %v3595_v14 = vpop.permute.xlu1 %3594 }
0x149b   : > { %v3597_v20 = vadd.f32 %v7878_v60, %v3595_v14  ;;  %v3787_v14 = vadd.f32 %v7471_v8, %v3786_v11 }
0x149c   : > { %v3788_v34 = vpop.f32.mrf.mxu3 }
0x149d   : > { %v3620_v33 = vmul.f32 %v3597_v20, %v3597_v20  ;;  %v3789_v15 = vadd.f32 %v7471_v8, %v3788_v34 }
0x149f   : > { %3622 = vrot.lane.b32.xlu0 %v3620_v33, %s11087_s16 }
0x14ef   : > { %v3640_v53 = vpop.permute.xlu2 %3639 }
0x14f0   : > { %v3642_v24 = vmul.f32 %v3640_v53, %v9435_v29 }
0x14f2   : > { %v9481_v16 = vsel %vm1677_vm4, %v3637_v39, %v3642_v24 }
0x14f3   : > { %v3651_v36 = vsel %vm11091_vm8, %v9481_v16, 0.0 }
0x14fe   : > { %v3600_v21 = vpop.permute.xlu1 %3599 }
0x14ff   : > { %v9456_v55 = vadd.f32 %v3600_v21, %v562_v40 }
0x1501   : > { %v3659_v35 = vperm.slane %v9456_v55, 0 }
0x1503   : > { %3660 = vrot.lane.b32.xlu1 %v3659_v35, %s11026_s26 }
0x1511   : > { %v3623_v45 = vpop.permute.xlu0 %3622 }
0x1512   : > { %v3625_v41 = vadd.f32 %v3623_v45, %v3620_v33 }
0x1514   : > { %v3626_v61 = vadd.f32 1e-08, %v3625_v41 }
0x1516   : > { %7675 = vrsqrt.f32 %v3626_v61  ;;  %vm3633_vm11 = vweird.f32 %v3626_v61 }
0x151c   : > { %v7676_v51 = vpop.eup %7675 }
0x151d   : > { %v3628_v27 = vmul.f32 %v7676_v51, %v3626_v61  ;;  %vm3634_vm0 = vweird.f32 %v7676_v51 }
0x151e   : > { %vm3635_vm14 = vmor %vm3633_vm11, %vm3634_vm0 }
0x151f   : > { %v3629_v2 = vmul.f32 %v7676_v51, %v3628_v27 }
0x1521   : > { %v3630_v22 = vmul.f32 0.5, %v3629_v2 }
0x1523   : > { %v3631_v31 = vsub.f32 1.5, %v3630_v22 }
0x1525   : > { %v3632_v32 = vmul.f32 %v7676_v51, %v3631_v31 }
0x1527   : > { %v3636_v26 = vsel %vm3635_vm14, %v7676_v51, %v3632_v32 }
0x1528   : > { %3646 = vrot.lane.b32.xlu0 %v3636_v26, %s11053_s25  ;;  %v3644_v25 = vmul.f32 %v3636_v26, %v3597_v20 }
0x1575   : > { %v3661_v17 = vpop.permute.xlu1 %3660 }
0x1576   : > { %v3663_v63 = vsel %vm11094_vm15, 0.0, %v3661_v17 }
0x1577   : > { %v3665_v5 = vpack.c.bf16 %v3663_v63, %v3663_v63 }
0x159a   : > { %v3647_v54 = vpop.permute.xlu0 %3646 }
0x159b   : > { %v3649_v4 = vmul.f32 %v3647_v54, %v3597_v20  ;;  %v9518_v20 = vpack.c.bf16 %v3789_v15, %v3787_v14 }
0x159d   : > { %v9471_v38 = vsel %vm1677_vm4, %v3644_v25, %v3649_v4 }
0x159e   : > { %3653 = vrot.lane.b32.xlu0 %v9471_v38, %s11089_s30  ;;  %s11215_s30 = sld [smem:[#allocation11_spill]] }
0x1610   : > { %v3654_v58 = vpop.permute.xlu0 %3653 }
0x1611   : > { %v3656_v48 = vsel %vm11090_vm2, 0.0, %v3654_v58 }
0x1612   : > { %v3657_v52 = vsel %vm11092_vm10, %v3656_v48, 0.0 }
0x1613   : > { %v3664_v59 = vpack.c.bf16 %v3657_v52, %v3651_v36 }
0x1615   : > { %7041 = vmatmul.msk.bf16.vlgmr.msrb.gmra.mxu0 %vm11093_vm1, %v3664_v59 }
0x1625   : > { %7042 = vmatmul.msk.bf16.gmra.mxu0 %vm11095_vm9, %v3665_v5 }
0x1692   : > { %v3721_v56 = vpop.f32.mrf.mxu0 }
0x1693   : > { %v9496_v62 = vadd.f32 %v7045_v9, %v3721_v56 }
0x169a   : > { %v3723_v29 = vpop.f32.mrf.mxu0 }
0x169b   : > { %v9498_v57 = vadd.f32 %v7046_v7, %v3723_v29 }
0x169d   : > { %v3744_v3 = vpack.c.bf16 %v9498_v57, %v9496_v62 }
0x169f   : > { %7063 = vmatmul.msk.bf16.gmra.mxu3 %vm11096_vm12, %v3744_v3 }
0x16a2   : > { %v3726_v49 = vpop.f32.mrf.mxu0 }
0x16a3   : > { %v9506_v6 = vadd.f32 %v7047_v42, %v3726_v49 }
0x16a5   : > { %v3745_v47 = vpack.c.bf16 %v9506_v6, %v9506_v6 }
0x16aa   : > { %v3728_v44 = vpop.f32.mrf.mxu0 }
0x16af   : > { %7064 = vmatmul.msk.bf16.gmra.mxu3 %vm11097_vm13, %v3745_v47 }
0x1722   : > { %v3791_v28 = vpop.f32.mrf.mxu3 }
0x1723   : > { %v3792_v50 = vadd.f32 %v7471_v8, %v3791_v28 }
0x172a   : > { %v3793_v43 = vpop.f32.mrf.mxu3 }
0x172b   : > { %v3794_v12 = vadd.f32 %v7471_v8, %v3793_v43 }
0x172d   : > { %v9514_v10 = vpack.c.bf16 %v3794_v12, %v3792_v50 }
0x172f   : > { %3808 = vrot.lane.b32.xlu1 %v9514_v10, %s11088_s21 }
0x1732   : > { %v3796_v18 = vpop.f32.mrf.mxu3 }
0x1733   : > { %v3797_v60 = vadd.f32 %v7471_v8, %v3796_v18 }
0x1735   : > { %v9520_v33 = vpack.c.bf16 %v3797_v60, %v3797_v60 }
0x1737   : > { %4030 = vrot.lane.b32.xlu1 %v9518_v20, %s11098_s24  ;;  %4034 = vrot.lane.b32.xlu0 %v9520_v33, %s11098_s24 }
0x1738   : > { %3810 = vrot.lane.b32.xlu2 %v9520_v33, %s11088_s21 }
0x173a   : > { %v3798_v40 = vpop.f32.mrf.mxu3 }
0x173f   : > { %4258 = vrot.lane.b32.xlu1 %v9520_v33, %s11025_s19  ;;  %3806 = vrot.lane.b32.xlu0 %v9518_v20, %s11088_s21 }
0x1740   : > { %4032 = vrot.lane.b32.xlu2 %v9514_v10, %s11098_s24 }
0x1747   : > { %4478 = vrot.lane.b32.xlu1 %v9518_v20, %s11099_s27  ;;  %4026 = vrot.lane.b32.xlu0 %v9514_v10, %s11100_s1 }
0x1748   : > { %4024 = vrot.lane.b32.xlu2 %v9518_v20, %s11100_s1 }
0x174f   : > { %4028 = vrot.lane.b32.xlu1 %v9520_v33, %s11100_s1  ;;  %4256 = vrot.lane.b32.xlu0 %v9514_v10, %s11025_s19 }
0x1750   : > { %4482 = vrot.lane.b32.xlu2 %v9520_v33, %s11099_s27 }
0x1757   : > { %4250 = vrot.lane.b32.xlu1 %v9514_v10, %s11087_s16  ;;  %4254 = vrot.lane.b32.xlu0 %v9518_v20, %s11025_s19 }
0x1758   : > { %4480 = vrot.lane.b32.xlu2 %v9514_v10, %s11099_s27 }
0x175f   : > { %4207 = vrot.lane.b32.xlu1 %v9514_v10, %s11028_s29  ;;  %4472 = vrot.lane.b32.xlu0 %v9518_v20, %s11101_s22 }
0x1760   : > { %4248 = vrot.lane.b32.xlu2 %v9518_v20, %s11087_s16 }
0x1767   : > { %4476 = vrot.lane.b32.xlu1 %v9520_v33, %s11101_s22  ;;  %3983 = vrot.lane.b32.xlu0 %v9514_v10, %s11026_s26 }
0x1768   : > { %4474 = vrot.lane.b32.xlu2 %v9514_v10, %s11101_s22 }
0x176f   : > { %4657 = vrot.lane.b32.xlu1 %v9520_v33, %s11029_s0  ;;  %3981 = vrot.lane.b32.xlu0 %v9518_v20, %s11026_s26 }
0x1770   : > { %4205 = vrot.lane.b32.xlu2 %v9518_v20, %s11028_s29 }
0x1777   : > { %4252 = vrot.lane.b32.xlu0 %v9520_v33, %s11087_s16 }
0x1778   : > { %4209 = vrot.lane.b32.xlu2 %v9520_v33, %s11028_s29 }
0x177f   : > { %3985 = vrot.lane.b32.xlu0 %v9520_v33, %s11026_s26 }
0x1792   : > { %v3811_v21 = vpop.permute.xlu2 %3810 }
0x1793   : > { %v3828_v35 = vsel %vm722_vm5, %v3811_v21, 0 }
0x1794   : > { %3835 = vmatpush.bf16.xpose.msrb.mxu2 %v3828_v35 }
0x179a   : > { %v4033_v45 = vpop.permute.xlu2 %4032 }
0x179b   : > { %v4049_v54 = vsel %vm722_vm5, %v4033_v45, 0 }
0x17a1   : > { %v3809_v41 = vpop.permute.xlu1 %3808 }
0x17a2   : > { %v4025_v61 = vpop.permute.xlu2 %4024  ;;  %v3825_v51 = vsel %vm722_vm5, %v3809_v41, 0 }
0x17a3   : > { %3836 = vmatpush.bf16.xpose.msrb.mxu2 %v3825_v51 }
0x17a9   : > { %v4031_v27 = vpop.permute.xlu1 %4030  ;;  %v4035_v2 = vpop.permute.xlu0 %4034 }
0x17aa   : > { %v4052_v22 = vsel %vm722_vm5, %v4035_v2, 0  ;;  %v4483_v31 = vpop.permute.xlu2 %4482  ;;  %v4046_v53 = vsel %vm722_vm5, %v4031_v27, 0 }
0x17ab   : > { %4059 = vmatpush.bf16.xpose.msra.mxu0 %v4052_v22  ;;  %v4500_v24 = vsel %vm722_vm5, %v4483_v31, 0 }
0x17b1   : > { %v4259_v32 = vpop.permute.xlu1 %4258  ;;  %v3807_v26 = vpop.permute.xlu0 %3806 }
0x17b2   : > { %v4276_v23 = vsel %vm722_vm5, %v4259_v32, 0  ;;  %v4481_v19 = vpop.permute.xlu2 %4480  ;;  %v3822_v30 = vsel %vm722_vm5, %v3807_v26, 0 }
0x17b3   : > { %3837 = vmatpush.bf16.xpose.msrb.mxu2 %v3822_v30  ;;  %4060 = vmatpush.bf16.xpose.msra.mxu0 %v4049_v54  ;;  %v4497_v52 = vsel %vm722_vm5, %v4481_v19, 0 }
0x17b9   : > { %v4479_v25 = vpop.permute.xlu1 %4478  ;;  %v4027_v4 = vpop.permute.xlu0 %4026 }
0x17ba   : > { %v4249_v46 = vpop.permute.xlu2 %4248  ;;  %7065 = vmatmul.msk.bf16.vlgmr.msrb.gmra.mxu2 %vm722_vm5, %v9518_v20  ;;  %v4494_v56 = vsel %vm722_vm5, %v4479_v25, 0 }
0x17bb   : > { %4283 = vmatpush.bf16.xpose.msra.mxu2 %v4276_v23  ;;  %4061 = vmatpush.bf16.xpose.msra.mxu0 %v4046_v53 }
0x17c1   : > { %v4029_v39 = vpop.permute.xlu1 %4028  ;;  %v4257_v58 = vpop.permute.xlu0 %4256 }
0x17c2   : > { %v4475_v48 = vpop.permute.xlu2 %4474  ;;  %7071 = vmatmul.msk.bf16.vlgmr.msra.gmra.mxu0 %vm722_vm5, %v4025_v61  ;;  %v4273_v36 = vsel %vm722_vm5, %v4257_v58, 0 }
0x17c3   : > { %4507 = vmatpush.bf16.xpose.msrb.mxu0 %v4500_v24  ;;  %4284 = vmatpush.bf16.xpose.msra.mxu2 %v4273_v36 }
0x17c9   : > { %v4251_v59 = vpop.permute.xlu1 %4250  ;;  %v4255_v17 = vpop.permute.xlu0 %4254 }
0x17ca   : > { %v4206_v63 = vpop.permute.xlu2 %4205  ;;  %7066 = vmatmul.msk.bf16.gmra.mxu2 %vm722_vm5, %v9514_v10  ;;  %v4270_v5 = vsel %vm722_vm5, %v4255_v17, 0 }
0x17cb   : > { %4508 = vmatpush.bf16.xpose.msrb.mxu0 %v4497_v52  ;;  %4285 = vmatpush.bf16.xpose.msra.mxu2 %v4270_v5 }
0x17d1   : > { %v4208_v9 = vpop.permute.xlu1 %4207  ;;  %v4473_v7 = vpop.permute.xlu0 %4472 }
0x17d2   : > { %v4210_v29 = vpop.permute.xlu2 %4209  ;;  %7072 = vmatmul.msk.bf16.gmra.mxu0 %vm722_vm5, %v4027_v4 }
0x17d3   : > { %4509 = vmatpush.bf16.xpose.msrb.mxu0 %v4494_v56  ;;  %v4223_v3 = vand.u32 %v4210_v29, %v8120_v0 }
0x17d5   : > { %4230 = vmatpush.bf16.msrb.mxu3 %v4223_v3 }
0x17d9   : > { %4231 = vmatpush.bf16.msrb.mxu3 %v4208_v9  ;;  %v4477_v49 = vpop.permute.xlu1 %4476  ;;  %v3984_v42 = vpop.permute.xlu0 %3983 }
0x17da   : > { %7067 = vmatmul.msk.bf16.gmra.mxu2 %vm722_vm5, %v9520_v33 }
0x17dd   : > { %4232 = vmatpush.bf16.msrb.mxu3 %v4206_v63 }
0x17e1   : > { %v4658_v44 = vpop.permute.xlu1 %4657  ;;  %v3982_v47 = vpop.permute.xlu0 %3981 }
0x17e2   : > { %v4671_v11 = vand.u32 %v4658_v44, %v8120_v0  ;;  %7073 = vmatmul.msk.bf16.gmra.mxu0 %vm722_vm5, %v4029_v39 }
0x17e4   : > { %4678 = vmatpush.bf16.msra.mxu3 %v4671_v11 }
0x17e9   : > { %v4253_v34 = vpop.permute.xlu0 %4252 }
0x17ea   : > { %7077 = vmatmul.msk.bf16.vlgmr.msra.gmra.mxu2 %vm722_vm5, %v4249_v46 }
0x17f1   : > { %v3986_v28 = vpop.permute.xlu0 %3985 }
0x17f2   : > { %v3999_v8 = vand.u32 %v3986_v28, %v8120_v0  ;;  %7083 = vmatmul.msk.bf16.vlgmr.msrb.gmra.mxu0 %vm722_vm5, %v4473_v7 }
0x17f4   : > { %4006 = vmatpush.bf16.msrb.mxu1 %v3999_v8 }
0x17f8   : > { %4007 = vmatpush.bf16.msrb.mxu1 %v3984_v42 }
0x17fa   : > { %7078 = vmatmul.msk.bf16.gmra.mxu2 %vm722_vm5, %v4251_v59 }
0x17fc   : > { %4008 = vmatpush.bf16.msrb.mxu1 %v3982_v47 }
0x1802   : > { %7084 = vmatmul.msk.bf16.gmra.mxu0 %vm722_vm5, %v4475_v48 }
0x180a   : > { %7079 = vmatmul.msk.bf16.gmra.mxu2 %vm722_vm5, %v4253_v34 }
0x1812   : > { %7085 = vmatmul.msk.bf16.gmra.mxu0 %vm722_vm5, %v4477_v49 }
0x183d   : > { %v3839_v43 = vpop.f32.mrf.mxu2 }
0x183e   : > { %v9606_v50 = vmul.f32 0.35355338, %v3839_v43 }
0x183f   : > { %v4063_v12 = vpop.f32.mrf.mxu0 }
0x1840   : > { %v9608_v15 = vmul.f32 0.35355338, %v4063_v12  ;;  %v3858_v18 = vsel %vm769_vm6, %v9606_v50, -inf }
0x1841   : > { %3859 = vmax.xlane.f32.xlu1 %v3858_v18 }
0x1842   : > { %v4082_v14 = vsel %vm769_vm6, %v9608_v15, -inf }
0x1843   : > { %4083 = vmax.xlane.f32.xlu2 %v4082_v14 }
0x1845   : > { %v3841_v60 = vpop.f32.mrf.mxu2 }
0x1846   : > { %v9614_v40 = vmul.f32 0.35355338, %v3841_v60 }
0x1847   : > { %v4065_v21 = vpop.f32.mrf.mxu0 }
0x1848   : > { %v9616_v35 = vmul.f32 0.35355338, %v4065_v21  ;;  %v3861_v45 = vsel %vm769_vm6, %v9614_v40, -inf }
0x184a   : > { %v4085_v41 = vsel %vm769_vm6, %v9616_v35, -inf }
0x184b   : > { %3862 = vmax.xlane.f32.xlu2 %v3861_v45  ;;  %4086 = vmax.xlane.f32.xlu0 %v4085_v41 }
0x184d   : > { %v3844_v61 = vpop.f32.mrf.mxu2 }
0x184e   : > { %v9622_v51 = vmul.f32 0.35355338, %v3844_v61 }
0x184f   : > { %v4068_v27 = vpop.f32.mrf.mxu0 }
0x1850   : > { %v9624_v2 = vmul.f32 0.35355338, %v4068_v27  ;;  %v3864_v22 = vsel %vm769_vm6, %v9622_v51, -inf }
0x1852   : > { %v4088_v31 = vsel %vm769_vm6, %v9624_v2, -inf }
0x1853   : > { %3865 = vmax.xlane.f32.xlu2 %v3864_v22  ;;  %4089 = vmax.xlane.f32.xlu0 %v4088_v31 }
0x1855   : > { %v3846_v32 = vpop.f32.mrf.mxu2 }
0x1856   : > { %v9630_v26 = vmul.f32 0.35355338, %v3846_v32 }
0x1857   : > { %v4070_v23 = vpop.f32.mrf.mxu0 }
0x1858   : > { %v9632_v19 = vmul.f32 0.35355338, %v4070_v23  ;;  %v3867_v30 = vsel %vm769_vm6, %v9630_v26, -inf }
0x185a   : > { %v4091_v54 = vsel %vm769_vm6, %v9632_v19, -inf }
0x185b   : > { %3868 = vmax.xlane.f32.xlu0 %v3867_v30  ;;  %4092 = vmax.xlane.f32.xlu1 %v4091_v54 }
0x185d   : > { %v3849_v25 = vpop.f32.mrf.mxu2 }
0x185e   : > { %v9638_v4 = vmul.f32 0.35355338, %v3849_v25 }
0x185f   : > { %v4073_v46 = vpop.f32.mrf.mxu0 }
0x1860   : > { %v9640_v53 = vmul.f32 0.35355338, %v4073_v46  ;;  %v3870_v24 = vsel %vm782_vm7, %v9638_v4, -inf }
0x1861   : > { %3871 = vmax.xlane.f32.xlu2 %v3870_v24 }
0x1862   : > { %v4094_v39 = vsel %vm782_vm7, %v9640_v53, -inf }
0x1863   : > { %4095 = vmax.xlane.f32.xlu1 %v4094_v39 }
0x1865   : > { %v3851_v58 = vpop.f32.mrf.mxu2 }
0x1867   : > { %v4075_v48 = vpop.f32.mrf.mxu0 }
0x186d   : > { %v4287_v36 = vpop.f32.mrf.mxu2 }
0x186e   : > { %v9646_v52 = vmul.f32 0.35355338, %v4287_v36 }
0x186f   : > { %v4511_v59 = vpop.f32.mrf.mxu0 }
0x1870   : > { %v9648_v17 = vmul.f32 0.35355338, %v4511_v59  ;;  %v4306_v63 = vsel %vm769_vm6, %v9646_v52, -inf }
0x1871   : > { %4307 = vmax.xlane.f32.xlu1 %v4306_v63 }
0x1872   : > { %v4530_v5 = vsel %vm769_vm6, %v9648_v17, -inf }
0x1873   : > { %4531 = vmax.xlane.f32.xlu0 %v4530_v5 }
0x1875   : > { %v4289_v56 = vpop.f32.mrf.mxu2 }
0x1876   : > { %v9654_v9 = vmul.f32 0.35355338, %v4289_v56 }
0x1877   : > { %v4513_v7 = vpop.f32.mrf.mxu0 }
0x1878   : > { %v9656_v29 = vmul.f32 0.35355338, %v4513_v7  ;;  %v4309_v3 = vsel %vm769_vm6, %v9654_v9, -inf }
0x1879   : > { %4310 = vmax.xlane.f32.xlu2 %v4309_v3 }
0x187a   : > { %v4533_v49 = vsel %vm769_vm6, %v9656_v29, -inf }
0x187b   : > { %4534 = vmax.xlane.f32.xlu1 %v4533_v49 }
0x187d   : > { %v4292_v42 = vpop.f32.mrf.mxu2 }
0x187e   : > { %v9662_v44 = vmul.f32 0.35355338, %v4292_v42 }
0x187f   : > { %v4516_v47 = vpop.f32.mrf.mxu0 }
0x1880   : > { %v9664_v11 = vmul.f32 0.35355338, %v4516_v47  ;;  %v4312_v34 = vsel %vm769_vm6, %v9662_v44, -inf }
0x1882   : > { %v4536_v28 = vsel %vm769_vm6, %v9664_v11, -inf }
0x1883   : > { %4313 = vmax.xlane.f32.xlu1 %v4312_v34  ;;  %4537 = vmax.xlane.f32.xlu0 %v4536_v28 }
0x1885   : > { %v4294_v8 = vpop.f32.mrf.mxu2 }
0x1886   : > { %v9670_v43 = vmul.f32 0.35355338, %v4294_v8 }
0x1887   : > { %v4518_v12 = vpop.f32.mrf.mxu0 }
0x1888   : > { %v9672_v18 = vmul.f32 0.35355338, %v4518_v12  ;;  %v4315_v14 = vsel %vm769_vm6, %v9670_v43, -inf }
0x1889   : > { %4316 = vmax.xlane.f32.xlu2 %v4315_v14 }
0x188a   : > { %v4539_v60 = vsel %vm769_vm6, %v9672_v18, -inf }
0x188b   : > { %4540 = vmax.xlane.f32.xlu1 %v4539_v60 }
0x188d   : > { %v9678_v21 = vpop.f32.mrf.mxu2 }
0x188f   : > { %v4521_v45 = vpop.f32.mrf.mxu0 }
0x1890   : > { %v9680_v41 = vmul.f32 0.35355338, %v4521_v45 }
0x1892   : > { %v4542_v61 = vsel %vm782_vm7, %v9680_v41, -inf }
0x1893   : > { %4543 = vmax.xlane.f32.xlu2 %v4542_v61 }
0x1895   : > { %v4299_v27 = vpop.f32.mrf.mxu2 }
0x1897   : > { %v4523_v22 = vpop.f32.mrf.mxu0 }
0x18b4   : > { %v3860_v31 = vpop.xlane.xlu1 %3859 }
0x18b5   : > { %v3873_v32 = vsub.f32 %v9606_v50, %v3860_v31 }
0x18b6   : > { %v4084_v23 = vpop.xlane.xlu2 %4083 }
0x18b7   : > { %v3878_v30 = vmul.f32 1.442695, %v3873_v32  ;;  %v4097_v54 = vsub.f32 %v9608_v15, %v4084_v23 }
0x18b9   : > { %7677 = vpow2.f32 %v3878_v30  ;;  %v4102_v25 = vmul.f32 1.442695, %v4097_v54 }
0x18bb   : > { %7679 = vpow2.f32 %v4102_v25 }
0x18be   : > { %v3863_v46 = vpop.xlane.xlu2 %3862  ;;  %v4087_v24 = vpop.xlane.xlu0 %4086 }
0x18bf   : > { %v9686_v39 = vpop.eup %7677  ;;  %v3874_v58 = vsub.f32 %v9614_v40, %v3863_v46  ;;  %v4098_v48 = vsub.f32 %v9616_v35, %v4087_v24 }
0x18c0   : > { %v3888_v36 = vsel %vm769_vm6, %v9686_v39, 0.0 }
0x18c1   : > { %v9692_v59 = vpop.eup %7679  ;;  %v3880_v50 = vmul.f32 1.442695, %v3874_v58  ;;  %v4104_v63 = vmul.f32 1.442695, %v4098_v48  ;;  %3889 = vadd.xlane.f32.xlu0 %v3888_v36 }
0x18c2   : > { %v4112_v15 = vsel %vm769_vm6, %v9692_v59, 0.0 }
0x18c3   : > { %7681 = vpow2.f32 %v3880_v50  ;;  %4113 = vadd.xlane.f32.xlu2 %v4112_v15 }
0x18c4   : > { %7683 = vpow2.f32 %v4104_v63 }
0x18c6   : > { %v3866_v5 = vpop.xlane.xlu2 %3865  ;;  %v4090_v56 = vpop.xlane.xlu0 %4089 }
0x18c7   : > { %v3875_v40 = vsub.f32 %v9622_v51, %v3866_v5  ;;  %v4099_v35 = vsub.f32 %v9624_v2, %v4090_v56 }
0x18c9   : > { %v9698_v7 = vpop.eup %7681  ;;  %v3882_v3 = vmul.f32 1.442695, %v3875_v40  ;;  %v4106_v49 = vmul.f32 1.442695, %v4099_v35 }
0x18ca   : > { %v9700_v42 = vpop.eup %7683  ;;  %v3891_v47 = vsel %vm769_vm6, %v9698_v7, 0.0 }
0x18cb   : > { %7685 = vpow2.f32 %v3882_v3  ;;  %v4115_v34 = vsel %vm769_vm6, %v9700_v42, 0.0  ;;  %3892 = vadd.xlane.f32.xlu1 %v3891_v47 }
0x18cc   : > { %7687 = vpow2.f32 %v4106_v49  ;;  %4116 = vadd.xlane.f32.xlu0 %v4115_v34 }
0x18ce   : > { %v3869_v28 = vpop.xlane.xlu0 %3868  ;;  %v4093_v51 = vpop.xlane.xlu1 %4092 }
0x18cf   : > { %v3876_v2 = vsub.f32 %v9630_v26, %v3869_v28  ;;  %v4100_v58 = vsub.f32 %v9632_v19, %v4093_v51 }
0x18d1   : > { %v9707_v8 = vpop.eup %7685  ;;  %v3884_v12 = vmul.f32 1.442695, %v3876_v2  ;;  %v4108_v36 = vmul.f32 1.442695, %v4100_v58 }
0x18d2   : > { %v9709_v14 = vpop.eup %7687  ;;  %v3894_v60 = vsel %vm769_vm6, %v9707_v8, 0.0 }
0x18d3   : > { %7689 = vpow2.f32 %v3884_v12  ;;  %3895 = vadd.xlane.f32.xlu1 %v3894_v60  ;;  %v4118_v45 = vsel %vm769_vm6, %v9709_v14, 0.0  ;;  %v9754_v12 = vmul.f32 0.35355338, %v9678_v21 }
0x18d4   : > { %4119 = vadd.xlane.f32.xlu2 %v4118_v45  ;;  %v3872_v61 = vpop.xlane.xlu2 %3871 }
0x18d5   : > { %v3877_v27 = vsub.f32 %v9638_v4, %v3872_v61  ;;  %v4318_v61 = vsel %vm782_vm7, %v9754_v12, -inf }
0x18d6   : > { %v4096_v22 = vpop.xlane.xlu1 %4095 }
0x18d7   : > { %v3886_v31 = vmul.f32 1.442695, %v3877_v27  ;;  %v4101_v26 = vsub.f32 %v9640_v53, %v4096_v22 }
0x18d9   : > { %v9717_v32 = vpop.eup %7689  ;;  %7691 = vpow2.f32 %v3886_v31  ;;  %v4110_v23 = vmul.f32 1.442695, %v4101_v26 }
0x18da   : > { %v3897_v30 = vsel %vm769_vm6, %v9717_v32, 0.0 }
0x18db   : > { %7693 = vpow2.f32 %v4110_v23  ;;  %3898 = vadd.xlane.f32.xlu1 %v3897_v30 }
0x18dc   : > { %7695 = vpow2.f32 %v4108_v36 }
0x18df   : > { %v9721_v54 = vpop.eup %7691 }
0x18e0   : > { %4433 = vrot.lane.b32.xlu0 %v9520_v33, %s11027_s18  ;;  %v3900_v4 = vsel %vm782_vm7, %v9721_v54, 0.0 }
0x18e1   : > { %v9727_v25 = vpop.eup %7693  ;;  %3901 = vadd.xlane.f32.xlu2 %v3900_v4 }
0x18e2   : > { %v4124_v53 = vsel %vm782_vm7, %v9727_v25, 0.0  ;;  %v9737_v5 = vpop.eup %7695 }
0x18e3   : > { %4125 = vadd.xlane.f32.xlu1 %v4124_v53  ;;  %v4121_v19 = vsel %vm769_vm6, %v9737_v5, 0.0 }
0x18e4   : > { %v4308_v46 = vpop.xlane.xlu1 %4307 }
0x18e6   : > { %v4532_v33 = vpop.xlane.xlu0 %4531 }
0x18e7   : > { %v4545_v50 = vsub.f32 %v9648_v17, %v4532_v33  ;;  %v4321_v17 = vsub.f32 %v9646_v52, %v4308_v46 }
0x18e9   : > { %v4550_v63 = vmul.f32 1.442695, %v4545_v50  ;;  %v4326_v34 = vmul.f32 1.442695, %v4321_v17 }
0x18eb   : > { %7697 = vpow2.f32 %v4550_v63 }
0x18ec   : > { %v4311_v49 = vpop.xlane.xlu2 %4310 }
0x18ed   : > { %v4322_v27 = vsub.f32 %v9654_v9, %v4311_v49 }
0x18ee   : > { %v4535_v24 = vpop.xlane.xlu1 %4534 }
0x18ef   : > { %v4546_v51 = vsub.f32 %v9656_v29, %v4535_v24  ;;  %v4328_v31 = vmul.f32 1.442695, %v4322_v27 }
0x18f1   : > { %v9742_v35 = vpop.eup %7697  ;;  %v4552_v45 = vmul.f32 1.442695, %v4546_v51 }
0x18f2   : > { %v4560_v3 = vsel %vm769_vm6, %v9742_v35, 0.0 }
0x18f6   : > { %v4314_v48 = vpop.xlane.xlu1 %4313  ;;  %v4538_v26 = vpop.xlane.xlu0 %4537 }
0x18f7   : > { %v4547_v9 = vsub.f32 %v9664_v11, %v4538_v26 }
0x18f9   : > { %4655 = vrot.lane.b32.xlu2 %v9514_v10, %s11029_s0  ;;  %v4554_v46 = vmul.f32 1.442695, %v4547_v9 }
0x18fc   : > { %4653 = vrot.lane.b32.xlu1 %v9518_v20, %s11029_s0  ;;  %v4317_v60 = vpop.xlane.xlu2 %4316 }
0x18fd   : > { %v4324_v52 = vsub.f32 %v9670_v43, %v4317_v60 }
0x18fe   : > { %v4541_v15 = vpop.xlane.xlu1 %4540 }
0x18ff   : > { %v4548_v56 = vsub.f32 %v9672_v18, %v4541_v15  ;;  %v4323_v18 = vsub.f32 %v9662_v44, %v4314_v48  ;;  %v4332_v22 = vmul.f32 1.442695, %v4324_v52 }
0x1901   : > { %v4556_v40 = vmul.f32 1.442695, %v4548_v56  ;;  %v4330_v2 = vmul.f32 1.442695, %v4323_v18 }
0x1903   : > { %7699 = vpow2.f32 %v4556_v40 }
0x1904   : > { %7701 = vpow2.f32 %v4326_v34 }
0x1905   : > { %7703 = vpow2.f32 %v4330_v2 }
0x1906   : > { %7705 = vpow2.f32 %v4552_v45  ;;  %v4544_v53 = vpop.xlane.xlu2 %4543 }
0x1907   : > { %7707 = vpow2.f32 %v4332_v22  ;;  %v4549_v15 = vsub.f32 %v9680_v41, %v4544_v53 }
0x1908   : > { %7709 = vpow2.f32 %v4328_v31 }
0x1909   : > { %v9747_v47 = vpop.eup %7699  ;;  %7711 = vpow2.f32 %v4554_v46  ;;  %v4558_v34 = vmul.f32 1.442695, %v4549_v15 }
0x190a   : > { %4122 = vadd.xlane.f32.xlu0 %v4121_v19  ;;  %v4569_v28 = vsel %vm769_vm6, %v9747_v47, 0.0  ;;  %v9759_v44 = vpop.eup %7701 }
0x190b   : > { %v4336_v29 = vsel %vm769_vm6, %v9759_v44, 0.0  ;;  %v9764_v21 = vpop.eup %7703 }
0x190c   : > { %v4342_v43 = vsel %vm769_vm6, %v9764_v21, 0.0  ;;  %v9768_v23 = vpop.eup %7705 }
0x190d   : > { %v4563_v30 = vsel %vm769_vm6, %v9768_v23, 0.0  ;;  %v9773_v4 = vpop.eup %7707 }
0x190e   : > { %v4345_v24 = vsel %vm769_vm6, %v9773_v4, 0.0  ;;  %v9779_v58 = vpop.eup %7709 }
0x190f   : > { %v4339_v11 = vsel %vm769_vm6, %v9779_v58, 0.0  ;;  %v9783_v33 = vpop.eup %7711 }
0x1910   : > { %v4566_v56 = vsel %vm769_vm6, %v9783_v33, 0.0 }
0x1912   : > { %4561 = vadd.xlane.f32.xlu0 %v4560_v3 }
0x191a   : > { %4570 = vadd.xlane.f32.xlu0 %v4569_v28 }
0x1922   : > { %4319 = vmax.xlane.f32.xlu2 %v4318_v61 }
0x1926   : > { %4337 = vadd.xlane.f32.xlu1 %v4336_v29 }
0x192a   : > { %4343 = vadd.xlane.f32.xlu2 %v4342_v43 }
0x192e   : > { %4431 = vrot.lane.b32.xlu0 %v9514_v10, %s11027_s18  ;;  %4564 = vadd.xlane.f32.xlu1 %v4563_v30 }
0x1932   : > { %4346 = vadd.xlane.f32.xlu2 %v4345_v24 }
0x1934   : > { %v3890_v48 = vpop.xlane.xlu0 %3889 }
0x1935   : > { %7713 = vrcp.f32 %v3890_v48  ;;  %v3912_v28 = vand.u32 2147483647, %v3890_v48  ;;  %v3914_v2 = vand.u32 2147483648, %v3890_v48  ;;  %vm3908_vm3 = vweird.f32 %v3890_v48 }
0x1936   : > { %4340 = vadd.xlane.f32.xlu1 %v4339_v11  ;;  %v4114_v36 = vpop.xlane.xlu2 %4113 }
0x1937   : > { %7715 = vrcp.f32 %v4114_v36  ;;  %v4136_v41 = vand.u32 2147483647, %v4114_v36  ;;  %vm9788_vm11 = vcmp.eq.f32.partialorder %v3912_v28, 8.507059e+37  ;;  %v3915_v26 = vor.u32 1.1754944e-38, %v3914_v2 }
0x1938   : > { %vm4132_vm2 = vweird.f32 %v4114_v36  ;;  %v4138_v43 = vand.u32 2147483648, %v4114_v36 }
0x1939   : > { %vm9800_vm10 = vcmp.eq.f32.partialorder %v4136_v41, 8.507059e+37 }
0x193b   : > { %v7714_v10 = vpop.eup %7713 }
0x193c   : > { %v3904_v50 = vmul.f32 %v7714_v10, %v3890_v48  ;;  %vm3909_vm0 = vweird.f32 %v7714_v10 }
0x193d   : > { %v7716_v63 = vpop.eup %7715  ;;  %vm9796_vm8 = vmor %vm3908_vm3, %vm3909_vm0 }
0x193e   : > { %v3905_v19 = vsub.f32 1.0, %v3904_v50  ;;  %v4128_v40 = vmul.f32 %v7716_v63, %v4114_v36  ;;  %4567 = vadd.xlane.f32.xlu1 %v4566_v56  ;;  %v3893_v3 = vpop.xlane.xlu1 %3892  ;;  %vm4133_vm14 = vweird.f32 %v7716_v63 }
0x193f   : > { %v4117_v17 = vpop.xlane.xlu0 %4116  ;;  %7717 = vrcp.f32 %v3893_v3  ;;  %v3927_v24 = vand.u32 2147483647, %v3893_v3  ;;  %v3929_v11 = vand.u32 2147483648, %v3893_v3  ;;  %vm9806_vm1 = vmor %vm4132_vm2, %vm4133_vm14  ;;  %vm3923_vm13 = vweird.f32 %v3893_v3 }
0x1940   : > { %v4129_v49 = vsub.f32 1.0, %v4128_v40  ;;  %7719 = vrcp.f32 %v4117_v17  ;;  %v3906_v18 = vmul.f32 %v7714_v10, %v3905_v19  ;;  %v4153_v36 = vand.u32 2147483648, %v4117_v17 }
0x1941   : > { %7721 = vpow2.f32 %v4558_v34  ;;  %v4139_v34 = vor.u32 1.1754944e-38, %v4138_v43  ;;  %vm4147_vm12 = vweird.f32 %v4117_v17  ;;  %vm3928_vm0 = vcmp.eq.f32.partialorder %v3927_v24, 8.507059e+37 }
0x1942   : > { %v4130_v51 = vmul.f32 %v7716_v63, %v4129_v49  ;;  %v3907_v52 = vadd.f32 %v7714_v10, %v3906_v18  ;;  %v4151_v49 = vand.u32 2147483647, %v4117_v17  ;;  %v3930_v41 = vor.u32 1.1754944e-38, %v3929_v11 }
0x1944   : > { %v4131_v29 = vadd.f32 %v7716_v63, %v4130_v51  ;;  %v3911_v50 = vsel %vm9796_vm8, %v7714_v10, %v3907_v52  ;;  %v4154_v52 = vor.u32 1.1754944e-38, %v4153_v36  ;;  %vm4152_vm2 = vcmp.eq.f32.partialorder %v4151_v49, 8.507059e+37 }
0x1945   : > { %v7718_v60 = vpop.eup %7717  ;;  %v3916_v51 = vsel %vm9788_vm11, %v3915_v26, %v3911_v50 }
0x1946   : > { %v7720_v45 = vpop.eup %7719  ;;  %v3919_v27 = vmul.f32 %v7718_v60, %v3893_v3  ;;  %v9792_v22 = vpop.xlane.xlu1 %3895  ;;  %vm3924_vm15 = vweird.f32 %v7718_v60  ;;  %v4135_v19 = vsel %vm9806_vm1, %v7716_v63, %v4131_v29  ;;  %v3917_v61 = vmul.f32 %v9686_v39, %v3916_v51 }
0x1947   : > { %v4143_v31 = vmul.f32 %v7720_v45, %v4117_v17  ;;  %7723 = vrcp.f32 %v9792_v22  ;;  %v9810_v56 = vpop.eup %7721  ;;  %vm4148_vm9 = vweird.f32 %v7720_v45  ;;  %v9814_v10 = vpop.xlane.xlu2 %4119  ;;  %vm3925_vm3 = vmor %vm3923_vm13, %vm3924_vm15  ;;  %v4140_v63 = vsel %vm9800_vm10, %v4139_v34, %v4135_v19 }
0x1948   : > { %v3920_v9 = vsub.f32 1.0, %v3919_v27  ;;  %vm4149_vm14 = vmor %vm4147_vm12, %vm4148_vm9  ;;  %v4141_v30 = vmul.f32 %v9692_v59, %v4140_v63  ;;  %v3944_v59 = vand.u32 2147483648, %v9792_v22  ;;  %vm3938_vm8 = vweird.f32 %v9792_v22 }
0x1949   : > { %v4144_v46 = vsub.f32 1.0, %v4143_v31  ;;  %v3942_v36 = vand.u32 2147483647, %v9792_v22  ;;  %v4166_v19 = vand.u32 2147483647, %v9814_v10 }
0x194a   : > { %v3921_v48 = vmul.f32 %v7718_v60, %v3920_v9  ;;  %v3945_v51 = vor.u32 1.1754944e-38, %v3944_v59 }
0x194b   : > { %v4145_v40 = vmul.f32 %v7720_v45, %v4144_v46  ;;  %vm3943_vm15 = vcmp.eq.f32.partialorder %v3942_v36, 8.507059e+37 }
0x194c   : > { %v3922_v18 = vadd.f32 %v7718_v60, %v3921_v48 }
0x194d   : > { %v7724_v28 = vpop.eup %7723  ;;  %v4146_v2 = vadd.f32 %v7720_v45, %v4145_v40 }
0x194e   : > { %v3926_v27 = vsel %vm3925_vm3, %v7718_v60, %v3922_v18  ;;  %v3934_v17 = vmul.f32 %v7724_v28, %v9792_v22  ;;  %v3899_v29 = vpop.xlane.xlu1 %3898  ;;  %vm3939_vm11 = vweird.f32 %v7724_v28 }
0x194f   : > { %v4150_v3 = vsel %vm4149_vm14, %v7720_v45, %v4146_v2  ;;  %v3931_v31 = vsel %vm3928_vm0, %v3930_v41, %v3926_v27  ;;  %7725 = vrcp.f32 %v3899_v29  ;;  %vm9835_vm10 = vmor %vm3938_vm8, %vm3939_vm11  ;;  %v3959_v40 = vand.u32 2147483648, %v3899_v29 }
0x1950   : > { %v4155_v26 = vsel %vm4152_vm2, %v4154_v52, %v4150_v3  ;;  %v3932_v43 = vmul.f32 %v9698_v7, %v3931_v31  ;;  %v3935_v9 = vsub.f32 1.0, %v3934_v17  ;;  %v3957_v34 = vand.u32 2147483647, %v3899_v29 }
0x1951   : > { %v4156_v53 = vmul.f32 %v9700_v42, %v4155_v26  ;;  %v4572_v42 = vsel %vm782_vm7, %v9810_v56, 0.0  ;;  %vm3953_vm9 = vweird.f32 %v3899_v29  ;;  %v3960_v63 = vor.u32 1.1754944e-38, %v3959_v40 }
0x1952   : > { %v3936_v46 = vmul.f32 %v7724_v28, %v3935_v9  ;;  %v4434_v24 = vpop.permute.xlu0 %4433  ;;  %v3978_v60 = vpack.c.bf16 %v3932_v43, %v3917_v61  ;;  %vm3958_vm13 = vcmp.eq.f32.partialorder %v3957_v34, 8.507059e+37  ;;  %vm4162_vm8 = vweird.f32 %v9814_v10 }
0x1953   : > { %v4447_v11 = vand.u32 %v4434_v24, %v8120_v0  ;;  %v4202_v50 = vpack.c.bf16 %v4156_v53, %v4141_v30 }
0x1954   : > { %7068 = vmatmul.msk.bf16.vlgmr.msrb.gmra.mxu1 %vm769_vm6, %v3978_v60  ;;  %v3902_v45 = vpop.xlane.xlu2 %3901  ;;  %v3937_v39 = vadd.f32 %v7724_v28, %v3936_v46 }
0x1955   : > { %v7726_v15 = vpop.eup %7725  ;;  %7074 = vmatmul.msk.bf16.vlgmr.msrb.gmra.mxu3 %vm769_vm6, %v4202_v50  ;;  %4454 = vmatpush.bf16.msra.mxu1 %v4447_v11  ;;  %7727 = vrcp.f32 %v3902_v45  ;;  %v3974_v43 = vand.u32 2147483648, %v3902_v45  ;;  %vm3968_vm0 = vweird.f32 %v3902_v45  ;;  %v3972_v30 = vand.u32 2147483647, %v3902_v45 }
0x1956   : > { %v3949_v7 = vmul.f32 %v7726_v15, %v3899_v29  ;;  %vm3954_vm1 = vweird.f32 %v7726_v15  ;;  %v9844_v9 = vpop.xlane.xlu1 %4125  ;;  %7729 = vrcp.f32 %v9814_v10 }
0x1957   : > { %4429 = vrot.lane.b32.xlu1 %v9518_v20, %s11027_s18  ;;  %v3941_v20 = vsel %vm9835_vm10, %v7724_v28, %v3937_v39  ;;  %vm3955_vm12 = vmor %vm3953_vm9, %vm3954_vm1  ;;  %v3975_v46 = vor.u32 1.1754944e-38, %v3974_v43  ;;  %vm3973_vm2 = vcmp.eq.f32.partialorder %v3972_v30, 8.507059e+37  ;;  %vm4167_vm9 = vcmp.eq.f32.partialorder %v4166_v19, 8.507059e+37 }
0x1958   : > { %v3950_v48 = vsub.f32 1.0, %v3949_v7  ;;  %4573 = vadd.xlane.f32.xlu0 %v4572_v42  ;;  %v3946_v52 = vsel %vm3943_vm15, %v3945_v51, %v3941_v20  ;;  %v4196_v30 = vand.u32 2147483647, %v9844_v9 }
0x1959   : > { %v3947_v61 = vmul.f32 %v9707_v8, %v3946_v52 }
0x195a   : > { %v3951_v49 = vmul.f32 %v7726_v15, %v3950_v48 }
0x195b   : > { %v7728_v18 = vpop.eup %7727 }
0x195c   : > { %v3952_v2 = vadd.f32 %v7726_v15, %v3951_v49  ;;  %v3964_v41 = vmul.f32 %v7728_v18, %v3902_v45  ;;  %v4656_v22 = vpop.permute.xlu2 %4655  ;;  %vm3969_vm3 = vweird.f32 %v7728_v18  ;;  %v7730_v11 = vpop.eup %7729 }
0x195d   : > { %4679 = vmatpush.bf16.msra.mxu3 %v4656_v22  ;;  %vm3970_vm14 = vmor %vm3968_vm0, %vm3969_vm3  ;;  %v4158_v50 = vmul.f32 %v7730_v11, %v9814_v10  ;;  %vm4163_vm11 = vweird.f32 %v7730_v11  ;;  %vm4192_vm0 = vweird.f32 %v9844_v9 }
0x195e   : > { %v3965_v27 = vsub.f32 1.0, %v3964_v41  ;;  %v3956_v17 = vsel %vm3955_vm12, %v7726_v15, %v3952_v2  ;;  %vm4164_vm10 = vmor %vm4162_vm8, %vm4163_vm11 }
0x195f   : > { %v3961_v3 = vsel %vm3958_vm13, %v3960_v63, %v3956_v17  ;;  %v4159_v39 = vsub.f32 1.0, %v4158_v50 }
0x1960   : > { %v3966_v31 = vmul.f32 %v7728_v18, %v3965_v27  ;;  %v3962_v28 = vmul.f32 %v9717_v32, %v3961_v3 }
0x1961   : > { %v4160_v45 = vmul.f32 %v7730_v11, %v4159_v39 }
0x1962   : > { %v3979_v26 = vpack.c.bf16 %v3962_v28, %v3947_v61  ;;  %v3967_v29 = vadd.f32 %v7728_v18, %v3966_v31 }
0x1963   : > { %v4161_v36 = vadd.f32 %v7730_v11, %v4160_v45 }
0x1964   : > { %7069 = vmatmul.msk.bf16.gmra.mxu1 %vm769_vm6, %v3979_v26  ;;  %v3971_v53 = vsel %vm3970_vm14, %v7728_v18, %v3967_v29  ;;  %v4198_v26 = vand.u32 2147483648, %v9844_v9 }
0x1965   : > { %v3976_v24 = vsel %vm3973_vm2, %v3975_v46, %v3971_v53  ;;  %v4165_v18 = vsel %vm4164_vm10, %v7730_v11, %v4161_v36  ;;  %vm4197_vm2 = vcmp.eq.f32.partialorder %v4196_v30, 8.507059e+37 }
0x1966   : > { %v3977_v8 = vmul.f32 %v9721_v54, %v3976_v24  ;;  %v4168_v54 = vand.u32 2147483648, %v9814_v10  ;;  %v4199_v46 = vor.u32 1.1754944e-38, %v4198_v26 }
0x1968   : > { %v3980_v32 = vpack.c.bf16 %v3977_v8, %v3977_v8  ;;  %v4169_v51 = vor.u32 1.1754944e-38, %v4168_v54 }
0x196a   : > { %v4170_v52 = vsel %vm4167_vm9, %v4169_v51, %v4165_v18 }
0x196b   : > { %v4171_v3 = vmul.f32 %v9709_v14, %v4170_v52 }
0x196e   : > { %v4654_v60 = vpop.permute.xlu1 %4653 }
0x196f   : > { %4680 = vmatpush.bf16.msra.mxu3 %v4654_v60 }
0x1974   : > { %7070 = vmatmul.msk.bf16.gmra.mxu1 %vm769_vm6, %v3980_v32 }
0x197d   : > { %v4123_v15 = vpop.xlane.xlu0 %4122 }
0x197e   : > { %7731 = vrcp.f32 %v4123_v15  ;;  %v4183_v34 = vand.u32 2147483648, %v4123_v15  ;;  %v4181_v20 = vand.u32 2147483647, %v4123_v15  ;;  %vm4177_vm15 = vweird.f32 %v4123_v15 }
0x197f   : > { %7733 = vrcp.f32 %v9844_v9 }
0x1980   : > { %v4184_v63 = vor.u32 1.1754944e-38, %v4183_v34  ;;  %vm4182_vm13 = vcmp.eq.f32.partialorder %v4181_v20, 8.507059e+37 }
0x1984   : > { %v7732_v7 = vpop.eup %7731 }
0x1985   : > { %v7734_v59 = vpop.eup %7733  ;;  %v4173_v42 = vmul.f32 %v7732_v7, %v4123_v15  ;;  %vm4178_vm1 = vweird.f32 %v7732_v7  ;;  %v4562_v27 = vpop.xlane.xlu0 %4561 }
0x1986   : > { %v4188_v40 = vmul.f32 %v7734_v59, %v9844_v9  ;;  %vm4179_vm12 = vmor %vm4177_vm15, %vm4178_vm1  ;;  %vm4193_vm3 = vweird.f32 %v7734_v59  ;;  %7735 = vrcp.f32 %v4562_v27  ;;  %vm4580_vm8 = vweird.f32 %v4562_v27 }
0x1987   : > { %v4174_v48 = vsub.f32 1.0, %v4173_v42  ;;  %vm4194_vm14 = vmor %vm4192_vm0, %vm4193_vm3  ;;  %v4584_v19 = vand.u32 2147483647, %v4562_v27 }
0x1988   : > { %v4189_v41 = vsub.f32 1.0, %v4188_v40 }
0x1989   : > { %v4175_v49 = vmul.f32 %v7732_v7, %v4174_v48  ;;  %v4586_v48 = vand.u32 2147483648, %v4562_v27  ;;  %vm4585_vm15 = vcmp.eq.f32.partialorder %v4584_v19, 8.507059e+37 }
0x198a   : > { %v4190_v17 = vmul.f32 %v7734_v59, %v4189_v41 }
0x198b   : > { %v4176_v2 = vadd.f32 %v7732_v7, %v4175_v49  ;;  %v4587_v41 = vor.u32 1.1754944e-38, %v4586_v48 }
0x198c   : > { %v4191_v28 = vadd.f32 %v7734_v59, %v4190_v17  ;;  %v7736_v60 = vpop.eup %7735 }
0x198d   : > { %v4180_v22 = vsel %vm4179_vm12, %v7732_v7, %v4176_v2  ;;  %v9862_v53 = vpop.xlane.xlu0 %4570  ;;  %v4576_v32 = vmul.f32 %v7736_v60, %v4562_v27  ;;  %vm4581_vm11 = vweird.f32 %v7736_v60 }
0x198e   : > { %v4185_v10 = vsel %vm4182_vm13, %v4184_v63, %v4180_v22  ;;  %vm4582_vm10 = vmor %vm4580_vm8, %vm4581_vm11  ;;  %vm4625_vm0 = vweird.f32 %v9862_v53 }
0x198f   : > { %v4186_v31 = vmul.f32 %v9737_v5, %v4185_v10  ;;  %v4195_v5 = vsel %vm4194_vm14, %v7734_v59, %v4191_v28  ;;  %v4577_v15 = vsub.f32 1.0, %v4576_v32 }
0x1990   : > { %v4200_v8 = vsel %vm4197_vm2, %v4199_v46, %v4195_v5 }
0x1991   : > { %v4203_v61 = vpack.c.bf16 %v4186_v31, %v4171_v3  ;;  %v4201_v11 = vmul.f32 %v9727_v25, %v4200_v8  ;;  %v4578_v7 = vmul.f32 %v7736_v60, %v4577_v15 }
0x1993   : > { %7075 = vmatmul.msk.bf16.gmra.mxu3 %vm769_vm6, %v4203_v61  ;;  %v4204_v45 = vpack.c.bf16 %v4201_v11, %v4201_v11  ;;  %v4579_v42 = vadd.f32 %v7736_v60, %v4578_v7  ;;  %v4631_v11 = vand.u32 2147483648, %v9862_v53 }
0x1995   : > { %v4320_v29 = vpop.xlane.xlu2 %4319  ;;  %v4583_v18 = vsel %vm4582_vm10, %v7736_v60, %v4579_v42  ;;  %v4632_v7 = vor.u32 1.1754944e-38, %v4631_v11 }
0x1996   : > { %v4325_v43 = vsub.f32 %v9754_v12, %v4320_v29  ;;  %v4588_v10 = vsel %vm4585_vm15, %v4587_v41, %v4583_v18 }
0x1997   : > { %v4589_v26 = vmul.f32 %v9742_v35, %v4588_v10  ;;  %v4629_v35 = vand.u32 2147483647, %v9862_v53 }
0x1998   : > { %v4334_v14 = vmul.f32 1.442695, %v4325_v43 }
0x1999   : > { %v9864_v24 = vpop.xlane.xlu1 %4337  ;;  %vm4630_vm2 = vcmp.eq.f32.partialorder %v4629_v35, 8.507059e+37 }
0x199a   : > { %7737 = vpow2.f32 %v4334_v14  ;;  %v4362_v41 = vand.u32 2147483648, %v9864_v24 }
0x199b   : > { %7739 = vrcp.f32 %v9862_v53 }
0x199d   : > { %v9881_v49 = vpop.xlane.xlu2 %4343 }
0x19a0   : > { %v9867_v50 = vpop.eup %7737  ;;  %v4432_v12 = vpop.permute.xlu0 %4431 }
0x19a1   : > { %4455 = vmatpush.bf16.msra.mxu1 %v4432_v12  ;;  %v4565_v9 = vpop.xlane.xlu1 %4564  ;;  %v4348_v39 = vsel %vm782_vm7, %v9867_v50, 0.0  ;;  %v9873_v59 = vpop.eup %7739 }
0x19a2   : > { %7741 = vrcp.f32 %v4565_v9  ;;  %4349 = vadd.xlane.f32.xlu2 %v4348_v39  ;;  %v4621_v40 = vmul.f32 %v9873_v59, %v9862_v53  ;;  %v4601_v20 = vand.u32 2147483648, %v4565_v9  ;;  %v4599_v2 = vand.u32 2147483647, %v4565_v9 }
0x19a3   : > { %7076 = vmatmul.msk.bf16.gmra.mxu3 %vm769_vm6, %v4204_v45  ;;  %7743 = vrcp.f32 %v9864_v24  ;;  %vm4595_vm9 = vweird.f32 %v4565_v9  ;;  %vm4626_vm3 = vweird.f32 %v9873_v59 }
0x19a4   : > { %v4622_v63 = vsub.f32 1.0, %v4621_v40  ;;  %v4602_v17 = vor.u32 1.1754944e-38, %v4601_v20  ;;  %vm4600_vm13 = vcmp.eq.f32.partialorder %v4599_v2, 8.507059e+37  ;;  %vm9904_vm14 = vmor %vm4625_vm0, %vm4626_vm3  ;;  %v4360_v2 = vand.u32 2147483647, %v9864_v24 }
0x19a5   : > { %v9894_v14 = vpop.xlane.xlu2 %4346 }
0x19a6   : > { %v4623_v29 = vmul.f32 %v9873_v59, %v4622_v63 }
0x19a8   : > { %v7742_v25 = vpop.eup %7741  ;;  %v4624_v60 = vadd.f32 %v9873_v59, %v4623_v29 }
0x19a9   : > { %v4591_v36 = vmul.f32 %v7742_v25, %v4565_v9  ;;  %v9876_v54 = vpop.xlane.xlu1 %4340  ;;  %vm4596_vm1 = vweird.f32 %v7742_v25  ;;  %v9883_v22 = vpop.eup %7743 }
0x19aa   : > { %7745 = vrcp.f32 %v9876_v54  ;;  %vm4597_vm12 = vmor %vm4595_vm9, %vm4596_vm1  ;;  %v4352_v43 = vmul.f32 %v9883_v22, %v9864_v24  ;;  %v4628_v9 = vsel %vm9904_vm14, %v9873_v59, %v4624_v60  ;;  %vm4357_vm10 = vweird.f32 %v9883_v22 }
0x19ab   : > { %v4592_v34 = vsub.f32 1.0, %v4591_v36  ;;  %vm4371_vm1 = vweird.f32 %v9876_v54  ;;  %v4377_v59 = vand.u32 2147483648, %v9876_v54  ;;  %v4633_v19 = vsel %vm4630_vm2, %v4632_v7, %v4628_v9 }
0x19ac   : > { %v4353_v8 = vsub.f32 1.0, %v4352_v43  ;;  %v4375_v20 = vand.u32 2147483647, %v9876_v54  ;;  %vm4361_vm2 = vcmp.eq.f32.partialorder %v4360_v2, 8.507059e+37 }
0x19ad   : > { %v4593_v51 = vmul.f32 %v7742_v25, %v4592_v34 }
0x19ae   : > { %v4354_v39 = vmul.f32 %v9883_v22, %v4353_v8  ;;  %vm4376_vm14 = vcmp.eq.f32.partialorder %v4375_v20, 8.507059e+37 }
0x19af   : > { %v4594_v52 = vadd.f32 %v7742_v25, %v4593_v51 }
0x19b0   : > { %v9885_v27 = vpop.eup %7745  ;;  %v4355_v40 = vadd.f32 %v9883_v22, %v4354_v39 }
0x19b1   : > { %v4598_v3 = vsel %vm4597_vm12, %v7742_v25, %v4594_v52  ;;  %v4367_v31 = vmul.f32 %v9885_v27, %v9876_v54  ;;  %v4568_v61 = vpop.xlane.xlu1 %4567  ;;  %vm4372_vm11 = vweird.f32 %v9885_v27  ;;  %vm4356_vm12 = vweird.f32 %v9864_v24 }
0x19b2   : > { %v4603_v28 = vsel %vm4600_vm13, %v4602_v17, %v4598_v3  ;;  %7747 = vrcp.f32 %v4568_v61  ;;  %v4616_v53 = vand.u32 2147483648, %v4568_v61  ;;  %v4614_v36 = vand.u32 2147483647, %v4568_v61  ;;  %vm9921_vm15 = vmor %vm4371_vm1, %vm4372_vm11 }
0x19b3   : > { %v4604_v30 = vmul.f32 %v9768_v23, %v4603_v28  ;;  %v4368_v5 = vsub.f32 1.0, %v4367_v31  ;;  %7749 = vrcp.f32 %v9894_v14  ;;  %vm4610_vm9 = vweird.f32 %v4568_v61  ;;  %vm4358_vm0 = vmor %vm4356_vm12, %vm4357_vm10 }
0x19b4   : > { %7751 = vrcp.f32 %v9881_v49  ;;  %v4617_v63 = vor.u32 1.1754944e-38, %v4616_v53  ;;  %vm4615_vm3 = vcmp.eq.f32.partialorder %v4614_v36, 8.507059e+37  ;;  %v4378_v17 = vor.u32 1.1754944e-38, %v4377_v59 }
0x19b5   : > { %v4650_v46 = vpack.c.bf16 %v4604_v30, %v4589_v26  ;;  %v4369_v23 = vmul.f32 %v9885_v27, %v4368_v5  ;;  %v4634_v31 = vmul.f32 %v9747_v47, %v4633_v19  ;;  %v4359_v24 = vsel %vm4358_vm0, %v9883_v22, %v4355_v40 }
0x19b6   : > { %v4363_v26 = vor.u32 1.1754944e-38, %v4362_v41  ;;  %vm4401_vm10 = vweird.f32 %v9894_v14 }
0x19b7   : > { %7086 = vmatmul.msk.bf16.vlgmr.msra.gmra.mxu3 %vm769_vm6, %v4650_v46  ;;  %v4370_v25 = vadd.f32 %v9885_v27, %v4369_v23  ;;  %v4392_v23 = vand.u32 2147483648, %v9881_v49 }
0x19b8   : > { %v7748_v32 = vpop.eup %7747  ;;  %v4364_v30 = vsel %vm4361_vm2, %v4363_v26, %v4359_v24 }
0x19b9   : > { %v4606_v12 = vmul.f32 %v7748_v32, %v4568_v61  ;;  %vm4611_vm8 = vweird.f32 %v7748_v32  ;;  %v9915_v48 = vpop.eup %7749  ;;  %v4374_v10 = vsel %vm9921_vm15, %v9885_v27, %v4370_v25  ;;  %v4365_v47 = vmul.f32 %v9759_v44, %v4364_v30 }
0x19ba   : > { %v7752_v51 = vpop.eup %7751  ;;  %vm4612_vm13 = vmor %vm4610_vm9, %vm4611_vm8  ;;  %v4397_v52 = vmul.f32 %v9915_v48, %v9894_v14  ;;  %v4379_v29 = vsel %vm4376_vm14, %v4378_v17, %v4374_v10  ;;  %vm4402_vm11 = vweird.f32 %v9915_v48  ;;  %v4405_v44 = vand.u32 2147483647, %v9894_v14 }
0x19bb   : > { %v4607_v45 = vsub.f32 1.0, %v4606_v12  ;;  %v4382_v61 = vmul.f32 %v7752_v51, %v9881_v49  ;;  %v4380_v46 = vmul.f32 %v9779_v58, %v4379_v29  ;;  %v4407_v58 = vand.u32 2147483648, %v9894_v14  ;;  %vm4403_vm1 = vmor %vm4401_vm10, %vm4402_vm11 }
0x19bc   : > { %v4398_v27 = vsub.f32 1.0, %v4397_v52  ;;  %vm4387_vm8 = vweird.f32 %v7752_v51  ;;  %vm4386_vm15 = vweird.f32 %v9881_v49  ;;  %v4390_v12 = vand.u32 2147483647, %v9881_v49 }
0x19bd   : > { %v4608_v42 = vmul.f32 %v7748_v32, %v4607_v45  ;;  %v4383_v5 = vsub.f32 1.0, %v4382_v61  ;;  %vm4388_vm9 = vmor %vm4386_vm15, %vm4387_vm8  ;;  %v4408_v45 = vor.u32 1.1754944e-38, %v4407_v58  ;;  %vm4406_vm12 = vcmp.eq.f32.partialorder %v4405_v44, 8.507059e+37 }
0x19be   : > { %v4399_v22 = vmul.f32 %v9915_v48, %v4398_v27  ;;  %v4393_v25 = vor.u32 1.1754944e-38, %v4392_v23  ;;  %vm11116_vm15 = vcmask 195584  }
0x19bf   : > { %v4609_v18 = vadd.f32 %v7748_v32, %v4608_v42  ;;  %v4384_v8 = vmul.f32 %v7752_v51, %v4383_v5 }
0x19c0   : > { %v4400_v35 = vadd.f32 %v9915_v48, %v4399_v22 }
0x19c1   : > { %v4613_v54 = vsel %vm4612_vm13, %v7748_v32, %v4609_v18  ;;  %v4426_v32 = vpack.c.bf16 %v4380_v46, %v4365_v47  ;;  %v4385_v11 = vadd.f32 %v7752_v51, %v4384_v8  ;;  %vm4391_vm13 = vcmp.eq.f32.partialorder %v4390_v12, 8.507059e+37  ;;  %v7302_v12 = vld [vmem:[%s10956_s9 + $0x28] sm:$0xff] }
0x19c2   : > { %v4618_v3 = vsel %vm4615_vm3, %v4617_v63, %v4613_v54  ;;  %v4404_v15 = vsel %vm4403_vm1, %v9915_v48, %v4400_v35  ;;  %4807 = vmatpush.bf16.msrb.mxu2 %v7302_v12  ;;  %v10013_v12 = vld [vmem:[%s10957_s10 + $0x10] sm:$0x3f] }
0x19c3   : > { %v4619_v28 = vmul.f32 %v9783_v33, %v4618_v3  ;;  %v4389_v7 = vsel %vm4388_vm9, %v7752_v51, %v4385_v11  ;;  %v4409_v42 = vsel %vm4406_vm12, %v4408_v45, %v4404_v15  ;;  %vm11117_vm9 = vmmov %vm11116_vm15  ;;  %vm11118_vm12 = vcmask 261120  }
0x19c4   : > { %v4394_v59 = vsel %vm4391_vm13, %v4393_v25, %v4389_v7  ;;  %v4410_v49 = vmul.f32 %v9773_v4, %v4409_v42  ;;  %vm11119_vm13 = vmmov %vm11117_vm9 }
0x19c5   : > { %v4651_v43 = vpack.c.bf16 %v4634_v31, %v4619_v28  ;;  %v4395_v18 = vmul.f32 %v9764_v21, %v4394_v59  ;;  %v7301_v59 = vld [vmem:[%s10956_s9 + $0x20] sm:$0xff] }
0x19c6   : > { %4808 = vmatpush.bf16.msrb.mxu2 %v7301_v59 }
0x19c7   : > { %7087 = vmatmul.msk.bf16.gmra.mxu3 %vm769_vm6, %v4651_v43  ;;  %v4427_v2 = vpack.c.bf16 %v4410_v49, %v4395_v18 }
0x19c9   : > { %v4430_v60 = vpop.permute.xlu1 %4429 }
0x19ca   : > { %4456 = vmatpush.bf16.msra.mxu1 %v4430_v60 }
0x19cb   : > { %v4574_v33 = vpop.xlane.xlu0 %4573 }
0x19cc   : > { %7753 = vrcp.f32 %v4574_v33  ;;  %v4646_v36 = vand.u32 2147483648, %v4574_v33  ;;  %v4644_v40 = vand.u32 2147483647, %v4574_v33  ;;  %vm4640_vm0 = vweird.f32 %v4574_v33 }
0x19cd   : > { %7080 = vmatmul.msk.bf16.vlgmr.msra.gmra.mxu1 %vm769_vm6, %v4426_v32 }
0x19ce   : > { %v4647_v51 = vor.u32 1.1754944e-38, %v4646_v36  ;;  %vm4645_vm2 = vcmp.eq.f32.partialorder %v4644_v40, 8.507059e+37 }
0x19d1   : > { %v9955_v9 = vpop.f32.mrf.mxu1 }
0x19d2   : > { %v7754_v39 = vpop.eup %7753 }
0x19d3   : > { %v4636_v53 = vmul.f32 %v7754_v39, %v4574_v33  ;;  %vm4641_vm3 = vweird.f32 %v7754_v39 }
0x19d4   : > { %vm4642_vm14 = vmor %vm4640_vm0, %vm4641_vm3 }
0x19d5   : > { %v4637_v14 = vsub.f32 1.0, %v4636_v53  ;;  %vm11120_vm3 = vmmov %vm11117_vm9 }
0x19d6   : > { %vm11121_vm0 = vmmov %vm11118_vm12 }
0x19d7   : > { %v4638_v19 = vmul.f32 %v7754_v39, %v4637_v14 }
0x19d8   : > { %v4234_v48 = vpop.f32.mrf.mxu3 }
0x19d9   : > { %v4639_v34 = vadd.f32 %v7754_v39, %v4638_v19  ;;  %v9958_v20 = vpop.f32.mrf.mxu1 }
0x19db   : > { %v4643_v41 = vsel %vm4642_vm14, %v7754_v39, %v4639_v34  ;;  %vm11122_vm14 = vmmov %vm11120_vm3 }
0x19dc   : > { %v4648_v63 = vsel %vm4645_vm2, %v4647_v51, %v4643_v41  ;;  %vm11123_vm2 = vmmov %vm11121_vm0 }
0x19dd   : > { %7081 = vmatmul.msk.bf16.gmra.mxu1 %vm769_vm6, %v4427_v2  ;;  %v4649_v52 = vmul.f32 %v9810_v56, %v4648_v63 }
0x19df   : > { %v4652_v10 = vpack.c.bf16 %v4649_v52, %v4649_v52 }
0x19e0   : > { %v4236_v54 = vpop.f32.mrf.mxu3 }
0x19e1   : > { %v7406_v4 = vpack.i.bf16 %v4236_v54, %v4234_v48  ;;  %7088 = vmatmul.msk.bf16.gmra.mxu3 %vm769_vm6, %v4652_v10  ;;  %v9964_v17 = vpop.f32.mrf.mxu1 }
0x19e3   : > { %7407 = vrot.lane.b32.xlu1 %v7406_v4, %s11052_s17 }
0x19e9   : > { %v9967_v21 = vpop.f32.mrf.mxu1 }
0x19f1   : > { %v9969_v3 = vpop.f32.mrf.mxu1 }
0x19f9   : > { %v4022_v31 = vpop.f32.mrf.mxu1 }
0x1a15   : > { %v4350_v24 = vpop.xlane.xlu2 %4349 }
0x1a16   : > { %7755 = vrcp.f32 %v4350_v24  ;;  %v4239_v61 = vpop.f32.mrf.mxu3  ;;  %v4422_v27 = vand.u32 2147483648, %v4350_v24  ;;  %v4420_v30 = vand.u32 2147483647, %v4350_v24  ;;  %vm4416_vm8 = vweird.f32 %v4350_v24 }
0x1a18   : > { %v4423_v46 = vor.u32 1.1754944e-38, %v4422_v27  ;;  %vm4421_vm1 = vcmp.eq.f32.partialorder %v4420_v30, 8.507059e+37 }
0x1a1c   : > { %v7756_v28 = vpop.eup %7755 }
0x1a1d   : > { %v4412_v26 = vmul.f32 %v7756_v28, %v4350_v24  ;;  %vm4417_vm11 = vweird.f32 %v7756_v28 }
0x1a1e   : > { %v4241_v29 = vpop.f32.mrf.mxu3  ;;  %vm4418_vm10 = vmor %vm4416_vm8, %vm4417_vm11 }
0x1a1f   : > { %v4413_v56 = vsub.f32 1.0, %v4412_v26  ;;  %v7421_v23 = vpack.i.bf16 %v4241_v29, %v4239_v61  ;;  %vm11124_vm11 = vmmov %vm11121_vm0 }
0x1a20   : > { %vm11125_vm8 = vmmov %vm11121_vm0 }
0x1a21   : > { %v4414_v43 = vmul.f32 %v7756_v28, %v4413_v56 }
0x1a23   : > { %v4415_v5 = vadd.f32 %v7756_v28, %v4414_v43 }
0x1a25   : > { %v4419_v47 = vsel %vm4418_vm10, %v7756_v28, %v4415_v5  ;;  %vm11126_vm10 = vmmov %vm11121_vm0 }
0x1a26   : > { %v4424_v22 = vsel %vm4421_vm1, %v4423_v46, %v4419_v47  ;;  %v4244_v60 = vpop.f32.mrf.mxu3  ;;  %vm11127_vm1 = vmmov %vm11121_vm0 }
0x1a27   : > { %v4425_v8 = vmul.f32 %v9867_v50, %v4424_v22 }
0x1a29   : > { %v4428_v32 = vpack.c.bf16 %v4425_v8, %v4425_v8 }
0x1a2b   : > { %7082 = vmatmul.msk.bf16.gmra.mxu1 %vm769_vm6, %v4428_v32 }
0x1a2e   : > { %v4246_v33 = vpop.f32.mrf.mxu3 }
0x1a3a   : > { %v4682_v35 = vpop.f32.mrf.mxu3 }
0x1a42   : > { %v4684_v58 = vpop.f32.mrf.mxu3 }
0x1a43   : > { %v7416_v11 = vpack.i.bf16 %v4684_v58, %v4682_v35 }
0x1a45   : > { %7417 = vrot.lane.b32.xlu1 %v7416_v11, %s11054_s28 }
0x1a4a   : > { %v4458_v44 = vpop.f32.mrf.mxu1  ;;  %v4687_v15 = vpop.f32.mrf.mxu3 }
0x1a4d   : > { %7422 = vrot.lane.b32.xlu1 %v7421_v23, %s11052_s17 }
0x1a52   : > { %v4460_v50 = vpop.f32.mrf.mxu1  ;;  %v4689_v45 = vpop.f32.mrf.mxu3 }
0x1a53   : > { %v7411_v39 = vpack.i.bf16 %v4460_v50, %v4458_v44  ;;  %v7431_v53 = vpack.i.bf16 %v4689_v45, %v4687_v15  ;;  %v4779_v15 = vperm.slane %v10013_v12, 0 }
0x1a55   : > { %7412 = vrot.lane.b32.xlu2 %v7411_v39, %s11053_s25  ;;  %v7408_v40 = vpop.permute.xlu1 %7407 }
0x1a56   : > { %v7410_v34 = vunpack.i.h.bf16 %v7408_v40  ;;  %v7409_v18 = vunpack.i.l.bf16 %v7408_v40 }
0x1a58   : > { %v4757_v63 = vsel %vm722_vm5, %v9958_v20, %v7410_v34  ;;  %v4756_v52 = vsel %vm722_vm5, %v9955_v9, %v7409_v18 }
0x1a5a   : > { %v4463_v7 = vpop.f32.mrf.mxu1 }
0x1a5d   : > { %7432 = vrot.lane.b32.xlu2 %v7431_v53, %s11054_s28 }
0x1a62   : > { %v4465_v25 = vpop.f32.mrf.mxu1 }
0x1a63   : > { %v7426_v42 = vpack.i.bf16 %v4465_v25, %v4463_v7 }
0x1a64   : > { %v4692_v14 = vpop.f32.mrf.mxu3 }
0x1a65   : > { %4749 = vrot.lane.b32.xlu0 %v4692_v14, %s11054_s28  ;;  %7427 = vrot.lane.b32.xlu1 %v7426_v42, %s11053_s25 }
0x1a6c   : > { %v4694_v36 = vpop.f32.mrf.mxu3 }
0x1a6d   : > { %4709 = vrot.lane.b32.xlu1 %v4244_v60, %s11052_s17 }
0x1aa8   : > { %v4468_v19 = vpop.f32.mrf.mxu1 }
0x1aa9   : > { %4729 = vrot.lane.b32.xlu2 %v4468_v19, %s11053_s25 }
0x1aaf   : > { %v7413_v48 = vpop.permute.xlu2 %7412 }
0x1ab0   : > { %v4470_v49 = vpop.f32.mrf.mxu1  ;;  %v7415_v51 = vunpack.i.h.bf16 %v7413_v48  ;;  %v7414_v2 = vunpack.i.l.bf16 %v7413_v48 }
0x1ab2   : > { %v4762_v4 = vsel %vm1677_vm4, %v4757_v63, %v7415_v51  ;;  %v4761_v31 = vsel %vm1677_vm4, %v4756_v52, %v7414_v2 }
0x1ab7   : > { %v7418_v41 = vpop.permute.xlu1 %7417  ;;  %v7433_v20 = vpop.permute.xlu2 %7432 }
0x1ab8   : > { %v7420_v10 = vunpack.i.h.bf16 %v7418_v41  ;;  %v7419_v54 = vunpack.i.l.bf16 %v7418_v41  ;;  %v7435_v30 = vunpack.i.h.bf16 %v7433_v20  ;;  %v7434_v5 = vunpack.i.l.bf16 %v7433_v20 }
0x1aba   : > { %v4766_v24 = vsel %vm11116_vm15, %v4761_v31, %v7419_v54  ;;  %v4767_v61 = vsel %vm11117_vm9, %v4762_v4, %v7420_v10  ;;  %vm11128_vm15 = vmmov %vm11121_vm0 }
0x1abb   : > { %v4771_v28 = vpack.c.bf16 %v4767_v61, %v4766_v24  ;;  %vm11129_vm9 = vmmov %vm11121_vm0 }
0x1abd   : > { %7101 = vmatmul.msk.bf16.vlgmr.msrb.gmra.mxu2 %vm11118_vm12, %v4771_v28  ;;  %vm11130_vm12 = vcmask 253952  }
0x1abf   : > { %v7423_v26 = vpop.permute.xlu1 %7422 }
0x1ac0   : > { %v7425_v56 = vunpack.i.h.bf16 %v7423_v26  ;;  %v7424_v29 = vunpack.i.l.bf16 %v7423_v26 }
0x1ac2   : > { %v4759_v46 = vsel %vm722_vm5, %v9967_v21, %v7425_v56  ;;  %v4758_v47 = vsel %vm722_vm5, %v9964_v17, %v7424_v29 }
0x1ad7   : > { %v7428_v27 = vpop.permute.xlu1 %7427  ;;  %v4750_v21 = vpop.permute.xlu0 %4749 }
0x1ad8   : > { %v7430_v43 = vunpack.i.h.bf16 %v7428_v27  ;;  %v7429_v9 = vunpack.i.l.bf16 %v7428_v27 }
0x1ada   : > { %v4764_v22 = vsel %vm1677_vm4, %v4759_v46, %v7430_v43  ;;  %v4763_v60 = vsel %vm1677_vm4, %v4758_v47, %v7429_v9  ;;  %v7304_v47 = vld [vmem:[%s10958_s11 + $0x28] sm:$0xff] }
0x1adb   : > { %v4768_v8 = vsel %vm11119_vm13, %v4763_v60, %v7434_v5  ;;  %v4769_v32 = vsel %vm11120_vm3, %v4764_v22, %v7435_v30  ;;  %vm11131_vm13 = vmmov %vm11121_vm0  ;;  %4991 = vmatpush.bf16.msrb.mxu1 %v7304_v47  ;;  %v7303_v22 = vld [vmem:[%s10958_s11 + $0x20] sm:$0xff] }
0x1adc   : > { %v4772_v33 = vpack.c.bf16 %v4769_v32, %v4768_v8  ;;  %vm11132_vm3 = vmmov %vm11121_vm0 }
0x1ade   : > { %7102 = vmatmul.msk.bf16.gmra.mxu2 %vm11121_vm0, %v4772_v33  ;;  %vm11133_vm0 = vmmov %vm11130_vm12 }
0x1adf   : > { %v4710_v35 = vpop.permute.xlu1 %4709  ;;  %4992 = vmatpush.bf16.msrb.mxu1 %v7303_v22 }
0x1ae0   : > { %v4760_v58 = vsel %vm722_vm5, %v9969_v3, %v4710_v35 }
0x1b03   : > { %v4730_v11 = vpop.permute.xlu2 %4729 }
0x1b04   : > { %v4765_v44 = vsel %vm1677_vm4, %v4760_v58, %v4730_v11 }
0x1b05   : > { %v4770_v17 = vsel %vm11122_vm14, %v4765_v44, %v4750_v21 }
0x1b06   : > { %v4773_v23 = vpack.c.bf16 %v4770_v17, %v4770_v17 }
0x1b08   : > { %7103 = vmatmul.msk.bf16.gmra.mxu2 %vm11123_vm2, %v4773_v23 }
0x1b40   : > { %v4810_v50 = vpop.f32.mrf.mxu2 }
0x1b41   : > { %v4811_v39 = vadd.f32 %v4810_v50, %v4779_v15 }
0x1b43   : > { %v4824_v3 = vadd.f32 %v4811_v39, %v9394_v37 }
0x1b45   : > { %v4829_v45 = vsel %vm11124_vm11, %v4824_v3, 0.0 }
0x1b46   : > { %4830 = vadd.xlane.f32.xlu1 %v4829_v45 }
0x1b48   : > { %v4812_v7 = vpop.f32.mrf.mxu2 }
0x1b49   : > { %v4813_v53 = vadd.f32 %v4812_v7, %v4779_v15 }
0x1b4b   : > { %v4825_v25 = vadd.f32 %v4813_v53, %v9397_v1 }
0x1b4d   : > { %v4832_v42 = vsel %vm11125_vm8, %v4825_v25, 0.0 }
0x1b4e   : > { %4833 = vadd.xlane.f32.xlu2 %v4832_v42 }
0x1b61   : > { %v4815_v14 = vpop.f32.mrf.mxu2 }
0x1b62   : > { %v4816_v36 = vadd.f32 %v4815_v14, %v4779_v15  ;;  %v10057_v14 = vperm.slane %v10013_v12, 1 }
0x1b64   : > { %v4826_v59 = vadd.f32 %v4816_v36, %v9496_v62 }
0x1b66   : > { %v4835_v19 = vsel %vm11126_vm10, %v4826_v59, 0.0 }
0x1b67   : > { %4836 = vadd.xlane.f32.xlu0 %v4835_v19 }
0x1b69   : > { %v4817_v40 = vpop.f32.mrf.mxu2 }
0x1b6a   : > { %v4818_v49 = vadd.f32 %v4817_v40, %v4779_v15  ;;  %v10060_v40 = vperm.slane %v10013_v12, 2 }
0x1b6c   : > { %v4827_v37 = vadd.f32 %v4818_v49, %v9498_v57 }
0x1b6e   : > { %v4838_v48 = vsel %vm11127_vm1, %v4827_v37, 0.0 }
0x1b6f   : > { %4839 = vadd.xlane.f32.xlu1 %v4838_v48 }
0x1b8b   : > { %v4820_v34 = vpop.f32.mrf.mxu2 }
0x1b8c   : > { %v4821_v63 = vadd.f32 %v4820_v34, %v4779_v15 }
0x1b8e   : > { %v4828_v54 = vadd.f32 %v4821_v63, %v9506_v6 }
0x1b90   : > { %v4841_v24 = vsel %vm11130_vm12, %v4828_v54, 0.0 }
0x1b93   : > { %v4822_v18 = vpop.f32.mrf.mxu2 }
0x1bb9   : > { %v4831_v1 = vpop.xlane.xlu1 %4830 }
0x1bba   : > { %v4844_v51 = vmul.f32 %v4831_v1, %v8542_v13 }
0x1bbc   : > { %v4849_v2 = vsub.f32 %v4824_v3, %v4844_v51 }
0x1bbe   : > { %v4854_v41 = vmul.f32 %v4849_v2, %v4849_v2 }
0x1bc0   : > { %v4859_v62 = vsel %vm11128_vm15, %v4854_v41, 0.0  ;;  %vm11134_vm15 = vmmov %vm11132_vm3 }
0x1bc1   : > { %v4834_v52 = vpop.xlane.xlu2 %4833  ;;  %4860 = vadd.xlane.f32.xlu2 %v4859_v62 }
0x1bc2   : > { %v4845_v10 = vmul.f32 %v4834_v52, %v8542_v13 }
0x1bc4   : > { %v4850_v57 = vsub.f32 %v4825_v25, %v4845_v10 }
0x1bc6   : > { %v4855_v4 = vmul.f32 %v4850_v57, %v4850_v57 }
0x1bc8   : > { %v4862_v31 = vsel %vm11129_vm9, %v4855_v4, 0.0 }
0x1bc9   : > { %4863 = vadd.xlane.f32.xlu1 %v4862_v31  ;;  %4842 = vadd.xlane.f32.xlu2 %v4841_v24 }
0x1bda   : > { %v4837_v61 = vpop.xlane.xlu0 %4836 }
0x1bdb   : > { %v4846_v28 = vmul.f32 %v4837_v61, %v8542_v13 }
0x1bdd   : > { %v10031_v26 = vsub.f32 %v4826_v59, %v4846_v28 }
0x1bdf   : > { %v4856_v56 = vmul.f32 %v10031_v26, %v10031_v26 }
0x1be1   : > { %v4865_v29 = vsel %vm11131_vm13, %v4856_v56, 0.0 }
0x1be2   : > { %4866 = vadd.xlane.f32.xlu1 %v4865_v29  ;;  %v4840_v6 = vpop.xlane.xlu1 %4839 }
0x1be3   : > { %v4847_v20 = vmul.f32 %v4840_v6, %v8542_v13 }
0x1be5   : > { %v10037_v27 = vsub.f32 %v4827_v37, %v4847_v20 }
0x1be7   : > { %v4857_v43 = vmul.f32 %v10037_v27, %v10037_v27 }
0x1be9   : > { %v4868_v9 = vsel %vm11132_vm3, %v4857_v43, 0.0 }
0x1bea   : > { %4869 = vadd.xlane.f32.xlu0 %v4868_v9 }
0x1c34   : > { %v4861_v30 = vpop.xlane.xlu2 %4860 }
0x1c35   : > { %v4874_v5 = vmul.f32 %v4861_v30, %v8542_v13 }
0x1c37   : > { %v4879_v46 = vadd.f32 1e-05, %v4874_v5 }
0x1c39   : > { %7757 = vrsqrt.f32 %v4879_v46  ;;  %vm4890_vm2 = vweird.f32 %v4879_v46 }
0x1c3c   : > { %v4843_v60 = vpop.xlane.xlu2 %4842  ;;  %v4864_v8 = vpop.xlane.xlu1 %4863 }
0x1c3d   : > { %v4848_v32 = vmul.f32 %v4843_v60, %v8542_v13  ;;  %v4875_v33 = vmul.f32 %v4864_v8, %v8542_v13 }
0x1c3f   : > { %v7758_v35 = vpop.eup %7757  ;;  %v10051_v58 = vsub.f32 %v4828_v54, %v4848_v32  ;;  %v4880_v11 = vadd.f32 1e-05, %v4875_v33 }
0x1c40   : > { %v4885_v21 = vmul.f32 %v7758_v35, %v4879_v46  ;;  %vm4891_vm14 = vweird.f32 %v7758_v35 }
0x1c41   : > { %7759 = vrsqrt.f32 %v4880_v11  ;;  %v4858_v44 = vmul.f32 %v10051_v58, %v10051_v58  ;;  %vm4892_vm11 = vmor %vm4890_vm2, %vm4891_vm14  ;;  %vm4900_vm10 = vweird.f32 %v4880_v11 }
0x1c42   : > { %v4886_v17 = vmul.f32 %v7758_v35, %v4885_v21  ;;  %vm11135_vm2 = vmmov %vm11134_vm15 }
0x1c43   : > { %v4871_v23 = vsel %vm11133_vm0, %v4858_v44, 0.0  ;;  %v7306_v44 = vld [vmem:[%s10960_s13 + $0x48] sm:$0xff] }
0x1c44   : > { %v4887_v15 = vmul.f32 0.5, %v4886_v17  ;;  %4872 = vadd.xlane.f32.xlu2 %v4871_v23  ;;  %v7305_v23 = vld [vmem:[%s10960_s13 + $0x40] sm:$0xff] }
0x1c46   : > { %v4888_v50 = vsub.f32 1.5, %v4887_v15 }
0x1c47   : > { %v7760_v39 = vpop.eup %7759 }
0x1c48   : > { %v4889_v3 = vmul.f32 %v7758_v35, %v4888_v50  ;;  %v4895_v45 = vmul.f32 %v7760_v39, %v4880_v11  ;;  %vm4901_vm8 = vweird.f32 %v7760_v39 }
0x1c49   : > { %vm4902_vm1 = vmor %vm4900_vm10, %vm4901_vm8 }
0x1c4a   : > { %v4896_v7 = vmul.f32 %v7760_v39, %v4895_v45  ;;  %v4893_v53 = vsel %vm4892_vm11, %v7758_v35, %v4889_v3  ;;  %v7307_v35 = vld [vmem:[%s10960_s13 + $0x50] sm:$0xff] }
0x1c4b   : > { %v4934_v36 = vmul.f32 %v4893_v53, %v4849_v2 }
0x1c4c   : > { %v4897_v25 = vmul.f32 0.5, %v4896_v7 }
0x1c4d   : > { %v4940_v49 = vmul.f32 %v10057_v14, %v4934_v36  ;;  %v7472_v36 = vld [vmem:[%s10959_s12 + $0x2] ss:$0 sm:$0xff] }
0x1c4e   : > { %v4898_v42 = vsub.f32 1.5, %v4897_v25 }
0x1c4f   : > { %v10066_v1 = vadd.f32 %v10060_v40, %v4940_v49 }
0x1c50   : > { %v4899_v59 = vmul.f32 %v7760_v39, %v4898_v42 }
0x1c52   : > { %v4903_v19 = vsel %vm4902_vm1, %v7760_v39, %v4899_v59  ;;  %vm11136_vm1 = vmmov %vm11135_vm2 }
0x1c53   : > { %v4935_v37 = vmul.f32 %v4903_v19, %v4850_v57 }
0x1c55   : > { %v4941_v48 = vmul.f32 %v10057_v14, %v4935_v37  ;;  %v4867_v34 = vpop.xlane.xlu1 %4866 }
0x1c56   : > { %v4876_v18 = vmul.f32 %v4867_v34, %v8542_v13 }
0x1c57   : > { %v10069_v51 = vadd.f32 %v10060_v40, %v4941_v48 }
0x1c58   : > { %v4881_v2 = vadd.f32 1e-05, %v4876_v18 }
0x1c59   : > { %v4951_v41 = vpack.c.bf16 %v10069_v51, %v10066_v1 }
0x1c5a   : > { %7761 = vrsqrt.f32 %v4881_v2  ;;  %vm4910_vm12 = vweird.f32 %v4881_v2 }
0x1c5b   : > { %7117 = vmatmul.msk.bf16.vlgmr.msrb.gmra.mxu1 %vm11134_vm15, %v4951_v41  ;;  %vm11137_vm15 = vcmask 523264  }
0x1c5d   : > { %v4870_v63 = vpop.xlane.xlu0 %4869 }
0x1c5e   : > { %v4877_v62 = vmul.f32 %v4870_v63, %v8542_v13 }
0x1c60   : > { %v7762_v52 = vpop.eup %7761  ;;  %v4882_v10 = vadd.f32 1e-05, %v4877_v62 }
0x1c61   : > { %v4905_v54 = vmul.f32 %v7762_v52, %v4881_v2  ;;  %vm4911_vm9 = vweird.f32 %v7762_v52 }
0x1c62   : > { %7763 = vrsqrt.f32 %v4882_v10  ;;  %vm4912_vm13 = vmor %vm4910_vm12, %vm4911_vm9  ;;  %vm4920_vm0 = vweird.f32 %v4882_v10 }
0x1c63   : > { %v4906_v57 = vmul.f32 %v7762_v52, %v4905_v54  ;;  %vm11138_vm9 = vmmov %vm11137_vm15 }
0x1c64   : > { %vm11139_vm12 = vmmov %vm11138_vm9 }
0x1c65   : > { %v4907_v4 = vmul.f32 0.5, %v4906_v57 }
0x1c67   : > { %v4908_v31 = vsub.f32 1.5, %v4907_v4  ;;  %v5025_v4 = vperm.slane %v10013_v12, 3 }
0x1c68   : > { %v7764_v24 = vpop.eup %7763 }
0x1c69   : > { %v4909_v61 = vmul.f32 %v7762_v52, %v4908_v31  ;;  %v4915_v28 = vmul.f32 %v7764_v24, %v4882_v10  ;;  %vm4921_vm3 = vweird.f32 %v7764_v24 }
0x1c6a   : > { %vm4922_vm14 = vmor %vm4920_vm0, %vm4921_vm3 }
0x1c6b   : > { %v4916_v56 = vmul.f32 %v7764_v24, %v4915_v28  ;;  %v4913_v29 = vsel %vm4912_vm13, %v7762_v52, %v4909_v61  ;;  %vm11140_vm13 = vmmov %vm11136_vm1 }
0x1c6c   : > { %v4936_v43 = vmul.f32 %v4913_v29, %v10031_v26  ;;  %vm11141_vm3 = vmmov %vm11136_vm1 }
0x1c6d   : > { %v4917_v6 = vmul.f32 0.5, %v4916_v56  ;;  %vm11142_vm0 = vmmov %vm11136_vm1 }
0x1c6e   : > { %v4942_v46 = vmul.f32 %v10057_v14, %v4936_v43 }
0x1c6f   : > { %v4918_v20 = vsub.f32 1.5, %v4917_v6 }
0x1c70   : > { %v10080_v22 = vadd.f32 %v10060_v40, %v4942_v46 }
0x1c71   : > { %v4919_v9 = vmul.f32 %v7764_v24, %v4918_v20 }
0x1c73   : > { %v4923_v30 = vsel %vm4922_vm14, %v7764_v24, %v4919_v9  ;;  %vm11143_vm14 = vmmov %vm11142_vm0 }
0x1c74   : > { %v4937_v5 = vmul.f32 %v4923_v30, %v10037_v27  ;;  %v7308_v27 = vld [vmem:[%s10960_s13 + $0x58] sm:$0xff] }
0x1c75   : > { %5063 = vmatpush.bf16.msra.mxu0 %v7308_v27 }
0x1c76   : > { %v4943_v47 = vmul.f32 %v10057_v14, %v4937_v5 }
0x1c78   : > { %v10083_v60 = vadd.f32 %v10060_v40, %v4943_v47 }
0x1c79   : > { %5064 = vmatpush.bf16.msra.mxu0 %v7307_v35 }
0x1c7a   : > { %v4952_v8 = vpack.c.bf16 %v10083_v60, %v10080_v22 }
0x1c7c   : > { %7118 = vmatmul.msk.bf16.gmra.mxu1 %vm11135_vm2, %v4952_v8  ;;  %vm11144_vm2 = vcmask 253952  }
0x1c7d   : > { %5065 = vmatpush.bf16.msra.mxu0 %v7306_v44 }
0x1c81   : > { %5066 = vmatpush.bf16.msra.mxu0 %v7305_v23 }
0x1cb7   : > { %v4873_v26 = vpop.xlane.xlu2 %4872 }
0x1cb8   : > { %v4878_v32 = vmul.f32 %v4873_v26, %v8542_v13 }
0x1cba   : > { %v4883_v33 = vadd.f32 1e-05, %v4878_v32 }
0x1cbc   : > { %7765 = vrsqrt.f32 %v4883_v33  ;;  %vm4930_vm8 = vweird.f32 %v4883_v33 }
0x1cc2   : > { %v7766_v11 = vpop.eup %7765 }
0x1cc3   : > { %v4925_v21 = vmul.f32 %v7766_v11, %v4883_v33  ;;  %vm4931_vm11 = vweird.f32 %v7766_v11 }
0x1cc4   : > { %vm4932_vm10 = vmor %vm4930_vm8, %vm4931_vm11 }
0x1cc5   : > { %v4926_v17 = vmul.f32 %v7766_v11, %v4925_v21  ;;  %vm11145_vm11 = vmmov %vm11142_vm0 }
0x1cc6   : > { %vm11146_vm8 = vmmov %vm11142_vm0 }
0x1cc7   : > { %v4927_v15 = vmul.f32 0.5, %v4926_v17 }
0x1cc9   : > { %v4928_v50 = vsub.f32 1.5, %v4927_v15 }
0x1ccb   : > { %v4929_v39 = vmul.f32 %v7766_v11, %v4928_v50 }
0x1ccd   : > { %v4933_v3 = vsel %vm4932_vm10, %v7766_v11, %v4929_v39  ;;  %vm11147_vm10 = vmmov %vm11142_vm0 }
0x1cce   : > { %v4938_v45 = vmul.f32 %v4933_v3, %v10051_v58 }
0x1cd0   : > { %v4944_v7 = vmul.f32 %v10057_v14, %v4938_v45 }
0x1cd2   : > { %v4950_v53 = vadd.f32 %v10060_v40, %v4944_v7 }
0x1cd4   : > { %v4953_v25 = vpack.c.bf16 %v4950_v53, %v4950_v53 }
0x1cd6   : > { %7119 = vmatmul.msk.bf16.gmra.mxu1 %vm11136_vm1, %v4953_v25  ;;  %vm11148_vm1 = vmmov %vm11142_vm0 }
0x1cd8   : > { %v4994_v42 = vpop.f32.mrf.mxu1 }
0x1cd9   : > { %v4995_v59 = vadd.f32 %v7472_v36, %v4994_v42 }
0x1cdb   : > { %v5008_v37 = vmax.f32 %v4995_v59, 0.0 }
0x1ce0   : > { %v4996_v19 = vpop.f32.mrf.mxu1 }
0x1ce1   : > { %v4997_v49 = vadd.f32 %v7472_v36, %v4996_v19 }
0x1ce3   : > { %v5009_v48 = vmax.f32 %v4997_v49, 0.0 }
0x1ce5   : > { %v5013_v34 = vpack.c.bf16 %v5009_v48, %v5008_v37 }
0x1ce7   : > { %7144 = vmatmul.msk.bf16.vlgmr.msra.gmra.mxu0 %vm11137_vm15, %v5013_v34  ;;  %vm11149_vm15 = vmmov %vm11144_vm2 }
0x1cf9   : > { %v4999_v58 = vpop.f32.mrf.mxu1 }
0x1cfa   : > { %v5000_v14 = vadd.f32 %v7472_v36, %v4999_v58 }
0x1cfc   : > { %v5010_v2 = vmax.f32 %v5000_v14, 0.0 }
0x1d01   : > { %v5001_v18 = vpop.f32.mrf.mxu1 }
0x1d02   : > { %v5002_v40 = vadd.f32 %v7472_v36, %v5001_v18 }
0x1d04   : > { %v5011_v41 = vmax.f32 %v5002_v40, 0.0 }
0x1d06   : > { %v5014_v63 = vpack.c.bf16 %v5011_v41, %v5010_v2  ;;  %v7310_v2 = vld [vmem:[%s10954_s7 + $0x38] sm:$0xff]  ;;  %v7309_v41 = vld [vmem:[%s10954_s7 + $0x30] sm:$0xff] }
0x1d07   : > { %5251 = vmatpush.bf16.msrb.mxu3 %v7310_v2 }
0x1d08   : > { %7145 = vmatmul.msk.bf16.gmra.mxu0 %vm11138_vm9, %v5014_v63 }
0x1d0b   : > { %5252 = vmatpush.bf16.msrb.mxu3 %v7309_v41 }
0x1d53   : > { %v5004_v62 = vpop.f32.mrf.mxu1 }
0x1d54   : > { %v5005_v52 = vadd.f32 %v7472_v36, %v5004_v62 }
0x1d56   : > { %v5012_v10 = vmax.f32 %v5005_v52, 0.0 }
0x1d58   : > { %v5015_v54 = vpack.c.bf16 %v5012_v10, %v5012_v10 }
0x1d5a   : > { %7146 = vmatmul.msk.bf16.gmra.mxu0 %vm11139_vm12, %v5015_v54 }
0x1d5b   : > { %v5006_v57 = vpop.f32.mrf.mxu1 }
0x1d64   : > { %v5068_v31 = vpop.f32.mrf.mxu0 }
0x1d65   : > { %v5069_v24 = vadd.f32 %v5068_v31, %v5025_v4 }
0x1d67   : > { %v5082_v61 = vadd.f32 %v5069_v24, %v10066_v1 }
0x1d69   : > { %v5087_v28 = vsel %vm11140_vm13, %v5082_v61, 0.0 }
0x1d6a   : > { %5088 = vadd.xlane.f32.xlu1 %v5087_v28 }
0x1d6c   : > { %v5070_v56 = vpop.f32.mrf.mxu0 }
0x1d6d   : > { %v5071_v29 = vadd.f32 %v5070_v56, %v5025_v4 }
0x1d6f   : > { %v5083_v6 = vadd.f32 %v5071_v29, %v10069_v51 }
0x1d71   : > { %v5090_v20 = vsel %vm11141_vm3, %v5083_v6, 0.0 }
0x1d72   : > { %5091 = vadd.xlane.f32.xlu0 %v5090_v20 }
0x1d85   : > { %v5073_v43 = vpop.f32.mrf.mxu0 }
0x1d86   : > { %v5074_v9 = vadd.f32 %v5073_v43, %v5025_v4  ;;  %v10152_v43 = vperm.slane %v10013_v12, 4 }
0x1d88   : > { %v5084_v30 = vadd.f32 %v5074_v9, %v10080_v22 }
0x1d8a   : > { %v5093_v5 = vsel %vm11142_vm0, %v5084_v30, 0.0 }
0x1d8b   : > { %5094 = vadd.xlane.f32.xlu2 %v5093_v5 }
0x1d8d   : > { %v5075_v46 = vpop.f32.mrf.mxu0 }
0x1d8e   : > { %v5076_v47 = vadd.f32 %v5075_v46, %v5025_v4  ;;  %v5203_v46 = vperm.slane %v10013_v12, 5 }
0x1d90   : > { %v5085_v1 = vadd.f32 %v5076_v47, %v10083_v60 }
0x1d92   : > { %v5096_v8 = vsel %vm11143_vm14, %v5085_v1, 0.0 }
0x1d93   : > { %5097 = vadd.xlane.f32.xlu1 %v5096_v8 }
0x1dd7   : > { %v5078_v26 = vpop.f32.mrf.mxu0 }
0x1dd8   : > { %v5079_v32 = vadd.f32 %v5078_v26, %v5025_v4 }
0x1dda   : > { %v5086_v51 = vadd.f32 %v5079_v32, %v4950_v53 }
0x1ddc   : > { %v5099_v33 = vsel %vm11144_vm2, %v5086_v51, 0.0  ;;  %vm11150_vm2 = vmmov %vm11148_vm1 }
0x1ddd   : > { %5100 = vadd.xlane.f32.xlu0 %v5099_v33  ;;  %v5089_v27 = vpop.xlane.xlu1 %5088 }
0x1dde   : > { %v5102_v35 = vmul.f32 %v5089_v27, %v8542_v13 }
0x1ddf   : > { %v5080_v22 = vpop.f32.mrf.mxu0 }
0x1de0   : > { %v5107_v11 = vsub.f32 %v5082_v61, %v5102_v35 }
0x1de2   : > { %v5112_v21 = vmul.f32 %v5107_v11, %v5107_v11 }
0x1de4   : > { %v5117_v44 = vsel %vm11145_vm11, %v5112_v21, 0.0 }
0x1de5   : > { %v5092_v17 = vpop.xlane.xlu0 %5091  ;;  %5118 = vadd.xlane.f32.xlu2 %v5117_v44 }
0x1de6   : > { %v5103_v60 = vmul.f32 %v5092_v17, %v8542_v13 }
0x1de8   : > { %v5108_v23 = vsub.f32 %v5083_v6, %v5103_v60 }
0x1dea   : > { %v5113_v15 = vmul.f32 %v5108_v23, %v5108_v23 }
0x1dec   : > { %v5120_v50 = vsel %vm11146_vm8, %v5113_v15, 0.0 }
0x1ded   : > { %5121 = vadd.xlane.f32.xlu1 %v5120_v50 }
0x1dfe   : > { %v5095_v39 = vpop.xlane.xlu2 %5094 }
0x1dff   : > { %v5104_v3 = vmul.f32 %v5095_v39, %v8542_v13 }
0x1e01   : > { %v10126_v45 = vsub.f32 %v5084_v30, %v5104_v3 }
0x1e03   : > { %v5114_v7 = vmul.f32 %v10126_v45, %v10126_v45 }
0x1e05   : > { %v5123_v53 = vsel %vm11147_vm10, %v5114_v7, 0.0 }
0x1e06   : > { %5124 = vadd.xlane.f32.xlu0 %v5123_v53  ;;  %v5098_v25 = vpop.xlane.xlu1 %5097 }
0x1e07   : > { %v5105_v42 = vmul.f32 %v5098_v25, %v8542_v13 }
0x1e09   : > { %v10132_v36 = vsub.f32 %v5085_v1, %v5105_v42 }
0x1e0b   : > { %v5115_v59 = vmul.f32 %v10132_v36, %v10132_v36 }
0x1e0d   : > { %v5126_v19 = vsel %vm11148_vm1, %v5115_v59, 0.0 }
0x1e0e   : > { %5127 = vadd.xlane.f32.xlu2 %v5126_v19 }
0x1e50   : > { %v5101_v49 = vpop.xlane.xlu0 %5100 }
0x1e51   : > { %v5106_v37 = vmul.f32 %v5101_v49, %v8542_v13 }
0x1e53   : > { %v10138_v48 = vsub.f32 %v5086_v51, %v5106_v37 }
0x1e55   : > { %v5116_v34 = vmul.f32 %v10138_v48, %v10138_v48 }
0x1e57   : > { %v5129_v58 = vsel %vm11149_vm15, %v5116_v34, 0.0 }
0x1e58   : > { %5130 = vadd.xlane.f32.xlu1 %v5129_v58  ;;  %v5119_v14 = vpop.xlane.xlu2 %5118 }
0x1e59   : > { %v5132_v18 = vmul.f32 %v5119_v14, %v8542_v13 }
0x1e5b   : > { %v5137_v40 = vadd.f32 1e-05, %v5132_v18 }
0x1e5d   : > { %7767 = vrsqrt.f32 %v5137_v40  ;;  %vm5148_vm12 = vweird.f32 %v5137_v40 }
0x1e60   : > { %v5122_v63 = vpop.xlane.xlu1 %5121 }
0x1e61   : > { %v5133_v62 = vmul.f32 %v5122_v63, %v8542_v13 }
0x1e63   : > { %v7768_v52 = vpop.eup %7767  ;;  %v5138_v10 = vadd.f32 1e-05, %v5133_v62 }
0x1e64   : > { %v5143_v54 = vmul.f32 %v7768_v52, %v5137_v40  ;;  %vm5149_vm9 = vweird.f32 %v7768_v52 }
0x1e65   : > { %7769 = vrsqrt.f32 %v5138_v10  ;;  %vm5150_vm13 = vmor %vm5148_vm12, %vm5149_vm9  ;;  %vm5158_vm0 = vweird.f32 %v5138_v10 }
0x1e66   : > { %v5144_v57 = vmul.f32 %v7768_v52, %v5143_v54  ;;  %vm11151_vm12 = vmmov %vm11150_vm2 }
0x1e68   : > { %v5145_v4 = vmul.f32 0.5, %v5144_v57 }
0x1e6a   : > { %v5146_v31 = vsub.f32 1.5, %v5145_v4 }
0x1e6b   : > { %v7770_v24 = vpop.eup %7769 }
0x1e6c   : > { %v5147_v61 = vmul.f32 %v7768_v52, %v5146_v31  ;;  %v5153_v28 = vmul.f32 %v7770_v24, %v5138_v10  ;;  %vm5159_vm3 = vweird.f32 %v7770_v24 }
0x1e6d   : > { %vm5160_vm14 = vmor %vm5158_vm0, %vm5159_vm3 }
0x1e6e   : > { %v5154_v56 = vmul.f32 %v7770_v24, %v5153_v28  ;;  %v5151_v29 = vsel %vm5150_vm13, %v7768_v52, %v5147_v61 }
0x1e6f   : > { %v5192_v9 = vmul.f32 %v5151_v29, %v5107_v11  ;;  %v7473_v29 = vld [vmem:[%s10955_s8 + $0x3] ss:$0 sm:$0xff] }
0x1e70   : > { %v5155_v6 = vmul.f32 0.5, %v5154_v56 }
0x1e71   : > { %v5198_v47 = vmul.f32 %v10152_v43, %v5192_v9 }
0x1e72   : > { %v5156_v20 = vsub.f32 1.5, %v5155_v6 }
0x1e73   : > { %v10158_v51 = vadd.f32 %v5203_v46, %v5198_v47 }
0x1e74   : > { %v5157_v30 = vmul.f32 %v7770_v24, %v5156_v20 }
0x1e76   : > { %v5161_v5 = vsel %vm5160_vm14, %v7770_v24, %v5157_v30  ;;  %vm11152_vm14 = vmmov %vm11150_vm2 }
0x1e77   : > { %v5193_v1 = vmul.f32 %v5161_v5, %v5108_v23 }
0x1e79   : > { %v5199_v8 = vmul.f32 %v10152_v43, %v5193_v1  ;;  %v5125_v26 = vpop.xlane.xlu0 %5124 }
0x1e7a   : > { %v5134_v32 = vmul.f32 %v5125_v26, %v8542_v13 }
0x1e7b   : > { %v10160_v33 = vadd.f32 %v5203_v46, %v5199_v8 }
0x1e7c   : > { %v5139_v27 = vadd.f32 1e-05, %v5134_v32 }
0x1e7d   : > { %v5211_v35 = vpack.c.bf16 %v10160_v33, %v10158_v51 }
0x1e7e   : > { %7771 = vrsqrt.f32 %v5139_v27  ;;  %vm5168_vm8 = vweird.f32 %v5139_v27 }
0x1e7f   : > { %7161 = vmatmul.msk.bf16.vlgmr.msrb.gmra.mxu3 %vm11150_vm2, %v5211_v35 }
0x1e81   : > { %v5128_v12 = vpop.xlane.xlu2 %5127 }
0x1e82   : > { %v5135_v22 = vmul.f32 %v5128_v12, %v8542_v13 }
0x1e84   : > { %v7772_v11 = vpop.eup %7771  ;;  %v5140_v21 = vadd.f32 1e-05, %v5135_v22 }
0x1e85   : > { %v5163_v44 = vmul.f32 %v7772_v11, %v5139_v27  ;;  %vm5169_vm11 = vweird.f32 %v7772_v11 }
0x1e86   : > { %7773 = vrsqrt.f32 %v5140_v21  ;;  %vm5170_vm10 = vmor %vm5168_vm8, %vm5169_vm11  ;;  %vm5178_vm15 = vweird.f32 %v5140_v21 }
0x1e87   : > { %v5164_v17 = vmul.f32 %v7772_v11, %v5163_v44 }
0x1e89   : > { %v5165_v60 = vmul.f32 0.5, %v5164_v17 }
0x1e8b   : > { %v5166_v23 = vsub.f32 1.5, %v5165_v60 }
0x1e8c   : > { %v7774_v15 = vpop.eup %7773 }
0x1e8d   : > { %v5167_v50 = vmul.f32 %v7772_v11, %v5166_v23  ;;  %v5173_v39 = vmul.f32 %v7774_v15, %v5140_v21  ;;  %vm5179_vm1 = vweird.f32 %v7774_v15 }
0x1e8e   : > { %vm5180_vm9 = vmor %vm5178_vm15, %vm5179_vm1 }
0x1e8f   : > { %v5174_v3 = vmul.f32 %v7774_v15, %v5173_v39  ;;  %v5171_v7 = vsel %vm5170_vm10, %v7772_v11, %v5167_v50 }
0x1e90   : > { %v5194_v42 = vmul.f32 %v5171_v7, %v10126_v45 }
0x1e91   : > { %v5175_v53 = vmul.f32 0.5, %v5174_v3 }
0x1e92   : > { %v5200_v37 = vmul.f32 %v10152_v43, %v5194_v42 }
0x1e93   : > { %v5176_v25 = vsub.f32 1.5, %v5175_v53 }
0x1e94   : > { %v10170_v58 = vadd.f32 %v5203_v46, %v5200_v37 }
0x1e95   : > { %v5177_v59 = vmul.f32 %v7774_v15, %v5176_v25 }
0x1e97   : > { %v5181_v19 = vsel %vm5180_vm9, %v7774_v15, %v5177_v59 }
0x1e98   : > { %v5195_v49 = vmul.f32 %v5181_v19, %v10132_v36 }
0x1e9a   : > { %v5201_v34 = vmul.f32 %v10152_v43, %v5195_v49 }
0x1e9c   : > { %v10172_v14 = vadd.f32 %v5203_v46, %v5201_v34 }
0x1e9e   : > { %v5212_v18 = vpack.c.bf16 %v10172_v14, %v10170_v58 }
0x1ea0   : > { %7162 = vmatmul.msk.bf16.gmra.mxu3 %vm11151_vm12, %v5212_v18 }
0x1ecb   : > { %v5131_v45 = vpop.xlane.xlu1 %5130 }
0x1ecc   : > { %v5136_v40 = vmul.f32 %v5131_v45, %v8542_v13 }
0x1ece   : > { %v5141_v2 = vadd.f32 1e-05, %v5136_v40 }
0x1ed0   : > { %7775 = vrsqrt.f32 %v5141_v2  ;;  %vm5188_vm3 = vweird.f32 %v5141_v2 }
0x1ed6   : > { %v7776_v41 = vpop.eup %7775 }
0x1ed7   : > { %v5183_v36 = vmul.f32 %v7776_v41, %v5141_v2  ;;  %vm5189_vm13 = vweird.f32 %v7776_v41 }
0x1ed8   : > { %vm5190_vm0 = vmor %vm5188_vm3, %vm5189_vm13 }
0x1ed9   : > { %v5184_v63 = vmul.f32 %v7776_v41, %v5183_v36 }
0x1edb   : > { %v5185_v62 = vmul.f32 0.5, %v5184_v63 }
0x1edd   : > { %v5186_v52 = vsub.f32 1.5, %v5185_v62 }
0x1edf   : > { %v5187_v10 = vmul.f32 %v7776_v41, %v5186_v52 }
0x1ee1   : > { %v5191_v54 = vsel %vm5190_vm0, %v7776_v41, %v5187_v10 }
0x1ee2   : > { %v5196_v57 = vmul.f32 %v5191_v54, %v10138_v48 }
0x1ee4   : > { %v5202_v4 = vmul.f32 %v10152_v43, %v5196_v57 }
0x1ee6   : > { %v10180_v31 = vadd.f32 %v5203_v46, %v5202_v4 }
0x1ee8   : > { %v5213_v24 = vpack.c.bf16 %v10180_v31, %v10180_v31 }
0x1eea   : > { %7163 = vmatmul.msk.bf16.gmra.mxu3 %vm11152_vm14, %v5213_v24 }
0x1f02   : > { %v5254_v61 = vpop.f32.mrf.mxu3 }
0x1f03   : > { %v5255_v30 = vadd.f32 %v7473_v29, %v5254_v61 }
0x1f0a   : > { %v5256_v28 = vpop.f32.mrf.mxu3 }
0x1f0b   : > { %v5257_v43 = vadd.f32 %v7473_v29, %v5256_v28 }
0x1f0d   : > { %v10192_v5 = vpack.c.bf16 %v5257_v43, %v5255_v30 }
0x1f23   : > { %v5259_v56 = vpop.f32.mrf.mxu3 }
0x1f24   : > { %v5260_v20 = vadd.f32 %v7473_v29, %v5259_v56 }
0x1f2b   : > { %v5261_v6 = vpop.f32.mrf.mxu3 }
0x1f2c   : > { %v5262_v9 = vadd.f32 %v7473_v29, %v5261_v6 }
0x1f2e   : > { %v10188_v48 = vpack.c.bf16 %v5262_v9, %v5260_v20 }
0x1f30   : > { %5276 = vrot.lane.b32.xlu1 %v10188_v48, %s11088_s21 }
0x1f38   : > { %5492 = vrot.lane.b32.xlu1 %v10192_v5, %s11100_s1 }
0x1f6d   : > { %v5264_v46 = vpop.f32.mrf.mxu3 }
0x1f6e   : > { %v5265_v47 = vadd.f32 %v7473_v29, %v5264_v46 }
0x1f70   : > { %v10196_v1 = vpack.c.bf16 %v5265_v47, %v5265_v47 }
0x1f72   : > { %5950 = vrot.lane.b32.xlu1 %v10196_v1, %s11099_s27  ;;  %5502 = vrot.lane.b32.xlu2 %v10196_v1, %s11098_s24 }
0x1f73   : > { %5278 = vrot.lane.b32.xlu0 %v10196_v1, %s11088_s21 }
0x1f75   : > { %v5266_v8 = vpop.f32.mrf.mxu3 }
0x1f7a   : > { %5948 = vrot.lane.b32.xlu1 %v10188_v48, %s11099_s27  ;;  %5274 = vrot.lane.b32.xlu2 %v10192_v5, %s11088_s21 }
0x1f7b   : > { %5500 = vrot.lane.b32.xlu0 %v10188_v48, %s11098_s24 }
0x1f82   : > { %5716 = vrot.lane.b32.xlu1 %v10192_v5, %s11087_s16  ;;  %5494 = vrot.lane.b32.xlu2 %v10188_v48, %s11100_s1 }
0x1f83   : > { %5498 = vrot.lane.b32.xlu0 %v10192_v5, %s11098_s24 }
0x1f8a   : > { %5942 = vrot.lane.b32.xlu1 %v10188_v48, %s11101_s22  ;;  %5724 = vrot.lane.b32.xlu2 %v10188_v48, %s11025_s19 }
0x1f8b   : > { %5726 = vrot.lane.b32.xlu0 %v10196_v1, %s11025_s19 }
0x1f92   : > { %5675 = vrot.lane.b32.xlu1 %v10188_v48, %s11028_s29  ;;  %5722 = vrot.lane.b32.xlu2 %v10192_v5, %s11025_s19 }
0x1f93   : > { %5496 = vrot.lane.b32.xlu0 %v10196_v1, %s11100_s1 }
0x1f9a   : > { %5720 = vrot.lane.b32.xlu1 %v10196_v1, %s11087_s16  ;;  %5940 = vrot.lane.b32.xlu2 %v10192_v5, %s11101_s22 }
0x1f9b   : > { %5946 = vrot.lane.b32.xlu0 %v10192_v5, %s11099_s27 }
0x1fa2   : > { %5673 = vrot.lane.b32.xlu2 %v10192_v5, %s11028_s29  ;;  %v5277_v27 = vpop.permute.xlu1 %5276 }
0x1fa3   : > { %5718 = vrot.lane.b32.xlu0 %v10188_v48, %s11087_s16  ;;  %v5293_v50 = vsel %vm722_vm5, %v5277_v27, 0 }
0x1faa   : > { %5677 = vrot.lane.b32.xlu2 %v10196_v1, %s11028_s29  ;;  %v5493_v12 = vpop.permute.xlu1 %5492 }
0x1fab   : > { %5451 = vrot.lane.b32.xlu0 %v10188_v48, %s11026_s26 }
0x1fb2   : > { %5944 = vrot.lane.b32.xlu2 %v10196_v1, %s11101_s22 }
0x1fb3   : > { %5449 = vrot.lane.b32.xlu0 %v10192_v5, %s11026_s26 }
0x1fbb   : > { %5453 = vrot.lane.b32.xlu0 %v10196_v1, %s11026_s26 }
0x1fcc   : > { %v5503_v26 = vpop.permute.xlu2 %5502 }
0x1fcd   : > { %v5520_v32 = vsel %vm722_vm5, %v5503_v26, 0 }
0x1fce   : > { %5527 = vmatpush.bf16.xpose.msrb.mxu0 %v5520_v32 }
0x1fd4   : > { %v5275_v35 = vpop.permute.xlu2 %5274 }
0x1fd5   : > { %v5290_v53 = vsel %vm722_vm5, %v5275_v35, 0 }
0x1fdc   : > { %v5495_v22 = vpop.permute.xlu2 %5494 }
0x1fe4   : > { %v5725_v11 = vpop.permute.xlu2 %5724  ;;  %v5951_v21 = vpop.permute.xlu1 %5950 }
0x1fe5   : > { %v5279_v44 = vpop.permute.xlu0 %5278  ;;  %v5968_v59 = vsel %vm722_vm5, %v5951_v21, 0  ;;  %v5741_v41 = vsel %vm722_vm5, %v5725_v11, 0 }
0x1fe6   : > { %v5296_v17 = vsel %vm722_vm5, %v5279_v44, 0 }
0x1fe7   : > { %5303 = vmatpush.bf16.xpose.msra.mxu2 %v5296_v17 }
0x1fec   : > { %v5723_v60 = vpop.permute.xlu2 %5722  ;;  %v5949_v23 = vpop.permute.xlu1 %5948 }
0x1fed   : > { %v5501_v15 = vpop.permute.xlu0 %5500  ;;  %v5965_v34 = vsel %vm722_vm5, %v5949_v23, 0  ;;  %v5738_v62 = vsel %vm722_vm5, %v5723_v60, 0 }
0x1fee   : > { %v5517_v39 = vsel %vm722_vm5, %v5501_v15, 0 }
0x1fef   : > { %5304 = vmatpush.bf16.xpose.msra.mxu2 %v5293_v50  ;;  %5528 = vmatpush.bf16.xpose.msrb.mxu0 %v5517_v39 }
0x1ff4   : > { %v5941_v3 = vpop.permute.xlu2 %5940  ;;  %v5717_v42 = vpop.permute.xlu1 %5716 }
0x1ff5   : > { %v5499_v7 = vpop.permute.xlu0 %5498 }
0x1ff6   : > { %v5514_v25 = vsel %vm722_vm5, %v5499_v7, 0 }
0x1ff7   : > { %5305 = vmatpush.bf16.xpose.msra.mxu2 %v5290_v53  ;;  %5529 = vmatpush.bf16.xpose.msrb.mxu0 %v5514_v25 }
0x1ffc   : > { %v5674_v19 = vpop.permute.xlu2 %5673  ;;  %v5943_v18 = vpop.permute.xlu1 %5942 }
0x1ffd   : > { %v5727_v49 = vpop.permute.xlu0 %5726 }
0x1ffe   : > { %v5744_v37 = vsel %vm722_vm5, %v5727_v49, 0  ;;  %7164 = vmatmul.msk.bf16.vlgmr.msra.gmra.mxu2 %vm722_vm5, %v10192_v5  ;;  %7170 = vmatmul.msk.bf16.vlgmr.msrb.gmra.mxu0 %vm722_vm5, %v5493_v12 }
0x1fff   : > { %5975 = vmatpush.bf16.xpose.msra.mxu0 %v5968_v59  ;;  %5751 = vmatpush.bf16.xpose.msrb.mxu2 %v5744_v37 }
0x2004   : > { %v5678_v45 = vpop.permute.xlu2 %5677  ;;  %v5676_v36 = vpop.permute.xlu1 %5675 }
0x2005   : > { %v5691_v40 = vand.u32 %v5678_v45, %v8120_v0  ;;  %v5497_v2 = vpop.permute.xlu0 %5496 }
0x2007   : > { %5976 = vmatpush.bf16.xpose.msra.mxu0 %v5965_v34  ;;  %5752 = vmatpush.bf16.xpose.msrb.mxu2 %v5741_v41 }
0x2008   : > { %5698 = vmatpush.bf16.msra.mxu3 %v5691_v40 }
0x200c   : > { %5699 = vmatpush.bf16.msra.mxu3 %v5676_v36  ;;  %v5945_v61 = vpop.permute.xlu2 %5944  ;;  %v5721_v28 = vpop.permute.xlu1 %5720 }
0x200d   : > { %v5947_v63 = vpop.permute.xlu0 %5946 }
0x200e   : > { %v5962_v52 = vsel %vm722_vm5, %v5947_v63, 0  ;;  %7165 = vmatmul.msk.bf16.gmra.mxu2 %vm722_vm5, %v10188_v48  ;;  %7171 = vmatmul.msk.bf16.gmra.mxu0 %vm722_vm5, %v5495_v22 }
0x200f   : > { %5753 = vmatpush.bf16.xpose.msrb.mxu2 %v5738_v62  ;;  %5977 = vmatpush.bf16.xpose.msra.mxu0 %v5962_v52 }
0x2010   : > { %5700 = vmatpush.bf16.msra.mxu3 %v5674_v19 }
0x2015   : > { %v5719_v10 = vpop.permute.xlu0 %5718 }
0x201d   : > { %v5452_v54 = vpop.permute.xlu0 %5451 }
0x201e   : > { %7166 = vmatmul.msk.bf16.gmra.mxu2 %vm722_vm5, %v10196_v1  ;;  %7172 = vmatmul.msk.bf16.gmra.mxu0 %vm722_vm5, %v5497_v2 }
0x2025   : > { %v5450_v57 = vpop.permute.xlu0 %5449 }
0x202d   : > { %v5454_v4 = vpop.permute.xlu0 %5453 }
0x202e   : > { %v5467_v24 = vand.u32 %v5454_v4, %v8120_v0  ;;  %7176 = vmatmul.msk.bf16.vlgmr.msrb.gmra.mxu2 %vm722_vm5, %v5717_v42  ;;  %7182 = vmatmul.msk.bf16.vlgmr.msra.gmra.mxu0 %vm722_vm5, %v5941_v3 }
0x2030   : > { %5474 = vmatpush.bf16.msra.mxu1 %v5467_v24 }
0x2034   : > { %5475 = vmatpush.bf16.msra.mxu1 %v5452_v54 }
0x2038   : > { %5476 = vmatpush.bf16.msra.mxu1 %v5450_v57 }
0x203e   : > { %7177 = vmatmul.msk.bf16.gmra.mxu2 %vm722_vm5, %v5719_v10  ;;  %7183 = vmatmul.msk.bf16.gmra.mxu0 %vm722_vm5, %v5943_v18 }
0x204e   : > { %7178 = vmatmul.msk.bf16.gmra.mxu2 %vm722_vm5, %v5721_v28  ;;  %7184 = vmatmul.msk.bf16.gmra.mxu0 %vm722_vm5, %v5945_v61 }
0x207b   : > { %v5531_v56 = vpop.f32.mrf.mxu0 }
0x207c   : > { %v10277_v29 = vmul.f32 0.35355338, %v5531_v56 }
0x207e   : > { %v5550_v6 = vsel %vm769_vm6, %v10277_v29, -inf }
0x207f   : > { %5551 = vmax.xlane.f32.xlu2 %v5550_v6 }
0x2081   : > { %v5307_v20 = vpop.f32.mrf.mxu2 }
0x2082   : > { %v10281_v9 = vmul.f32 0.35355338, %v5307_v20 }
0x2083   : > { %v5533_v43 = vpop.f32.mrf.mxu0 }
0x2084   : > { %v10283_v30 = vmul.f32 0.35355338, %v5533_v43  ;;  %v5326_v46 = vsel %vm769_vm6, %v10281_v9, -inf }
0x2085   : > { %5327 = vmax.xlane.f32.xlu1 %v5326_v46 }
0x2086   : > { %v5553_v47 = vsel %vm769_vm6, %v10283_v30, -inf }
0x2087   : > { %5554 = vmax.xlane.f32.xlu0 %v5553_v47 }
0x2089   : > { %v5309_v8 = vpop.f32.mrf.mxu2 }
0x208a   : > { %v10289_v26 = vmul.f32 0.35355338, %v5309_v8 }
0x208b   : > { %v5536_v32 = vpop.f32.mrf.mxu0 }
0x208c   : > { %v10291_v27 = vmul.f32 0.35355338, %v5536_v32  ;;  %v5329_v35 = vsel %vm769_vm6, %v10289_v26, -inf }
0x208d   : > { %5330 = vmax.xlane.f32.xlu2 %v5329_v35 }
0x208e   : > { %v5556_v12 = vsel %vm769_vm6, %v10291_v27, -inf }
0x208f   : > { %5557 = vmax.xlane.f32.xlu0 %v5556_v12 }
0x2091   : > { %v5312_v22 = vpop.f32.mrf.mxu2 }
0x2092   : > { %v10297_v11 = vmul.f32 0.35355338, %v5312_v22 }
0x2093   : > { %v5538_v21 = vpop.f32.mrf.mxu0 }
0x2094   : > { %v10299_v44 = vmul.f32 0.35355338, %v5538_v21  ;;  %v5332_v17 = vsel %vm769_vm6, %v10297_v11, -inf }
0x2095   : > { %5333 = vmax.xlane.f32.xlu2 %v5332_v17 }
0x2096   : > { %v5559_v60 = vsel %vm769_vm6, %v10299_v44, -inf }
0x2097   : > { %5560 = vmax.xlane.f32.xlu1 %v5559_v60 }
0x2099   : > { %v5314_v23 = vpop.f32.mrf.mxu2 }
0x209a   : > { %v10305_v15 = vmul.f32 0.35355338, %v5314_v23 }
0x209b   : > { %v5541_v50 = vpop.f32.mrf.mxu0 }
0x209c   : > { %v10307_v39 = vmul.f32 0.35355338, %v5541_v50  ;;  %v5335_v3 = vsel %vm769_vm6, %v10305_v15, -inf }
0x209d   : > { %5336 = vmax.xlane.f32.xlu0 %v5335_v3 }
0x209e   : > { %v5562_v7 = vsel %vm782_vm7, %v10307_v39, -inf }
0x209f   : > { %5563 = vmax.xlane.f32.xlu1 %v5562_v7 }
0x20a1   : > { %v5317_v53 = vpop.f32.mrf.mxu2 }
0x20a2   : > { %v10313_v25 = vmul.f32 0.35355338, %v5317_v53 }
0x20a3   : > { %v5543_v42 = vpop.f32.mrf.mxu0 }
0x20a4   : > { %v5338_v59 = vsel %vm782_vm7, %v10313_v25, -inf }
0x20a5   : > { %5339 = vmax.xlane.f32.xlu2 %v5338_v59 }
0x20a9   : > { %v5319_v19 = vpop.f32.mrf.mxu2 }
0x20ab   : > { %v5979_v49 = vpop.f32.mrf.mxu0 }
0x20ac   : > { %v10317_v37 = vmul.f32 0.35355338, %v5979_v49 }
0x20ae   : > { %v5998_v34 = vsel %vm769_vm6, %v10317_v37, -inf }
0x20af   : > { %5999 = vmax.xlane.f32.xlu0 %v5998_v34 }
0x20b1   : > { %v5755_v18 = vpop.f32.mrf.mxu2 }
0x20b2   : > { %v10321_v45 = vmul.f32 0.35355338, %v5755_v18 }
0x20b3   : > { %v5981_v40 = vpop.f32.mrf.mxu0 }
0x20b4   : > { %v5774_v2 = vsel %vm769_vm6, %v10321_v45, -inf  ;;  %v10325_v41 = vmul.f32 0.35355338, %v5981_v40 }
0x20b5   : > { %5775 = vmax.xlane.f32.xlu1 %v5774_v2 }
0x20b6   : > { %v6001_v10 = vsel %vm769_vm6, %v10325_v41, -inf }
0x20b9   : > { %v5757_v36 = vpop.f32.mrf.mxu2 }
0x20ba   : > { %v10327_v63 = vmul.f32 0.35355338, %v5757_v36 }
0x20bb   : > { %v5984_v62 = vpop.f32.mrf.mxu0 }
0x20bc   : > { %v10329_v52 = vmul.f32 0.35355338, %v5984_v62  ;;  %v5777_v54 = vsel %vm769_vm6, %v10327_v63, -inf }
0x20bd   : > { %6002 = vmax.xlane.f32.xlu1 %v6001_v10  ;;  %5778 = vmax.xlane.f32.xlu2 %v5777_v54 }
0x20be   : > { %v6004_v57 = vsel %vm769_vm6, %v10329_v52, -inf }
0x20bf   : > { %6005 = vmax.xlane.f32.xlu0 %v6004_v57 }
0x20c1   : > { %v5760_v4 = vpop.f32.mrf.mxu2 }
0x20c2   : > { %v10337_v24 = vmul.f32 0.35355338, %v5760_v4 }
0x20c3   : > { %v5986_v61 = vpop.f32.mrf.mxu0 }
0x20c4   : > { %v5780_v28 = vsel %vm769_vm6, %v10337_v24, -inf  ;;  %v10341_v56 = vmul.f32 0.35355338, %v5986_v61 }
0x20c5   : > { %5781 = vmax.xlane.f32.xlu1 %v5780_v28 }
0x20c6   : > { %v6007_v47 = vsel %vm769_vm6, %v10341_v56, -inf }
0x20c9   : > { %v5762_v6 = vpop.f32.mrf.mxu2 }
0x20ca   : > { %v10343_v20 = vmul.f32 0.35355338, %v5762_v6 }
0x20cb   : > { %v10345_v43 = vpop.f32.mrf.mxu0 }
0x20cc   : > { %v5783_v46 = vsel %vm769_vm6, %v10343_v20, -inf }
0x20cd   : > { %5784 = vmax.xlane.f32.xlu2 %v5783_v46  ;;  %6008 = vmax.xlane.f32.xlu1 %v6007_v47 }
0x20d1   : > { %v10351_v8 = vpop.f32.mrf.mxu2 }
0x20d3   : > { %v5991_v32 = vpop.f32.mrf.mxu0 }
0x20d9   : > { %v5767_v35 = vpop.f32.mrf.mxu2 }
0x20f2   : > { %v5552_v12 = vpop.xlane.xlu2 %5551 }
0x20f3   : > { %v5565_v22 = vsub.f32 %v10277_v29, %v5552_v12 }
0x20f5   : > { %v5570_v21 = vmul.f32 1.442695, %v5565_v22 }
0x20f7   : > { %7777 = vpow2.f32 %v5570_v21 }
0x20f8   : > { %v5328_v17 = vpop.xlane.xlu1 %5327 }
0x20f9   : > { %v5341_v60 = vsub.f32 %v10281_v9, %v5328_v17 }
0x20fa   : > { %v5555_v23 = vpop.xlane.xlu0 %5554 }
0x20fb   : > { %v5346_v50 = vmul.f32 1.442695, %v5341_v60  ;;  %v5566_v3 = vsub.f32 %v10283_v30, %v5555_v23 }
0x20fd   : > { %v10356_v7 = vpop.eup %7777  ;;  %7779 = vpow2.f32 %v5346_v50  ;;  %v5572_v42 = vmul.f32 1.442695, %v5566_v3 }
0x20fe   : > { %v5580_v53 = vsel %vm769_vm6, %v10356_v7, 0.0 }
0x20ff   : > { %5581 = vadd.xlane.f32.xlu2 %v5580_v53  ;;  %7781 = vpow2.f32 %v5572_v42 }
0x2100   : > { %v5331_v59 = vpop.xlane.xlu2 %5330 }
0x2101   : > { %v5342_v29 = vsub.f32 %v10289_v26, %v5331_v59 }
0x2102   : > { %v5558_v19 = vpop.xlane.xlu0 %5557 }
0x2103   : > { %v10361_v49 = vpop.eup %7779  ;;  %v5348_v9 = vmul.f32 1.442695, %v5342_v29  ;;  %v5567_v34 = vsub.f32 %v10291_v27, %v5558_v19 }
0x2104   : > { %v5356_v30 = vsel %vm769_vm6, %v10361_v49, 0.0 }
0x2105   : > { %7783 = vpow2.f32 %v5348_v9  ;;  %v5574_v18 = vmul.f32 1.442695, %v5567_v34  ;;  %5357 = vadd.xlane.f32.xlu0 %v5356_v30  ;;  %v10366_v2 = vpop.eup %7781 }
0x2106   : > { %v5583_v57 = vsel %vm769_vm6, %v10366_v2, 0.0 }
0x2107   : > { %7785 = vpow2.f32 %v5574_v18 }
0x2108   : > { %v5334_v40 = vpop.xlane.xlu2 %5333 }
0x2109   : > { %v5343_v36 = vsub.f32 %v10297_v11, %v5334_v40 }
0x210a   : > { %v5561_v26 = vpop.xlane.xlu1 %5560 }
0x210b   : > { %v10369_v62 = vpop.eup %7783  ;;  %v5350_v10 = vmul.f32 1.442695, %v5343_v36  ;;  %v5568_v54 = vsub.f32 %v10299_v44, %v5561_v26 }
0x210c   : > { %v5359_v27 = vsel %vm769_vm6, %v10369_v62, 0.0 }
0x210d   : > { %v10376_v4 = vpop.eup %7785  ;;  %7787 = vpow2.f32 %v5350_v10  ;;  %v5576_v61 = vmul.f32 1.442695, %v5568_v54  ;;  %5360 = vadd.xlane.f32.xlu1 %v5359_v27  ;;  %5584 = vadd.xlane.f32.xlu0 %v5583_v57 }
0x210e   : > { %v5586_v11 = vsel %vm769_vm6, %v10376_v4, 0.0 }
0x210f   : > { %7789 = vpow2.f32 %v5576_v61  ;;  %5587 = vadd.xlane.f32.xlu2 %v5586_v11 }
0x2110   : > { %v5337_v28 = vpop.xlane.xlu0 %5336 }
0x2111   : > { %v5344_v44 = vsub.f32 %v10305_v15, %v5337_v28 }
0x2112   : > { %v5564_v6 = vpop.xlane.xlu1 %5563 }
0x2113   : > { %v10381_v46 = vpop.eup %7787  ;;  %v5352_v47 = vmul.f32 1.442695, %v5344_v44  ;;  %v5569_v32 = vsub.f32 %v10307_v39, %v5564_v6 }
0x2114   : > { %v5362_v35 = vsel %vm769_vm6, %v10381_v46, 0.0 }
0x2115   : > { %v10386_v12 = vpop.eup %7789  ;;  %7791 = vpow2.f32 %v5352_v47  ;;  %v5578_v22 = vmul.f32 1.442695, %v5569_v32  ;;  %5363 = vadd.xlane.f32.xlu1 %v5362_v35 }
0x2116   : > { %v5589_v21 = vsel %vm769_vm6, %v10386_v12, 0.0 }
0x2117   : > { %7793 = vpow2.f32 %v5578_v22  ;;  %5590 = vadd.xlane.f32.xlu0 %v5589_v21 }
0x2118   : > { %v5340_v15 = vpop.xlane.xlu2 %5339 }
0x2119   : > { %v5345_v17 = vsub.f32 %v10313_v25, %v5340_v15 }
0x211b   : > { %v10391_v60 = vpop.eup %7791  ;;  %v5354_v23 = vmul.f32 1.442695, %v5345_v17 }
0x211c   : > { %v5365_v39 = vsel %vm769_vm6, %v10391_v60, 0.0 }
0x211d   : > { %v10395_v50 = vpop.eup %7793  ;;  %7795 = vpow2.f32 %v5354_v23  ;;  %5366 = vadd.xlane.f32.xlu1 %v5365_v39 }
0x211e   : > { %v5592_v3 = vsel %vm782_vm7, %v10395_v50, 0.0 }
0x211f   : > { %5593 = vadd.xlane.f32.xlu0 %v5592_v3 }
0x2122   : > { %v6000_v30 = vpop.xlane.xlu0 %5999 }
0x2123   : > { %v10399_v53 = vpop.eup %7795  ;;  %v6013_v36 = vsub.f32 %v10317_v37, %v6000_v30 }
0x2124   : > { %v5368_v42 = vsel %vm782_vm7, %v10399_v53, 0.0 }
0x2125   : > { %5369 = vadd.xlane.f32.xlu2 %v5368_v42  ;;  %v6018_v57 = vmul.f32 1.442695, %v6013_v36  ;;  %v10462_v36 = vmul.f32 0.35355338, %v10351_v8 }
0x2128   : > { %v5776_v25 = vpop.xlane.xlu1 %5775 }
0x2129   : > { %v5789_v40 = vsub.f32 %v10321_v45, %v5776_v25  ;;  %v10451_v25 = vmul.f32 0.35355338, %v10345_v43 }
0x2130   : > { %v6003_v59 = vpop.xlane.xlu1 %6002  ;;  %v5779_v34 = vpop.xlane.xlu2 %5778 }
0x2131   : > { %v6014_v29 = vsub.f32 %v10325_v41, %v6003_v59  ;;  %v5790_v18 = vsub.f32 %v10327_v63, %v5779_v34 }
0x2132   : > { %v6006_v27 = vpop.xlane.xlu0 %6005 }
0x2133   : > { %5901 = vrot.lane.b32.xlu0 %v10196_v1, %s11027_s18  ;;  %v6020_v9 = vmul.f32 1.442695, %v6014_v29  ;;  %v5796_v26 = vmul.f32 1.442695, %v5790_v18  ;;  %v6015_v61 = vsub.f32 %v10329_v52, %v6006_v27  ;;  %v6010_v29 = vsel %vm782_vm7, %v10451_v25, -inf }
0x2135   : > { %7797 = vpow2.f32 %v6020_v9  ;;  %v6022_v37 = vmul.f32 1.442695, %v6015_v61 }
0x2136   : > { %6123 = vrot.lane.b32.xlu1 %v10188_v48, %s11029_s0  ;;  %7799 = vpow2.f32 %v5796_v26 }
0x2138   : > { %v10412_v19 = vpop.xlane.xlu1 %5781 }
0x2139   : > { %v5791_v61 = vsub.f32 %v10337_v24, %v10412_v19 }
0x213b   : > { %v10417_v54 = vpop.eup %7797 }
0x213c   : > { %v6031_v63 = vsel %vm769_vm6, %v10417_v54, 0.0  ;;  %v10423_v11 = vpop.eup %7799 }
0x213d   : > { %6125 = vrot.lane.b32.xlu2 %v10196_v1, %s11029_s0  ;;  %v5794_v1 = vmul.f32 1.442695, %v5789_v40  ;;  %v5807_v52 = vsel %vm769_vm6, %v10423_v11, 0.0 }
0x213e   : > { %6121 = vrot.lane.b32.xlu1 %v10192_v5, %s11029_s0 }
0x213f   : > { %7801 = vpow2.f32 %v5794_v1 }
0x2140   : > { %v6009_v10 = vpop.xlane.xlu1 %6008  ;;  %7803 = vpow2.f32 %v6018_v57  ;;  %v5785_v28 = vpop.xlane.xlu2 %5784  ;;  %v5786_v57 = vsel %vm782_vm7, %v10462_v36, -inf }
0x2141   : > { %v6016_v41 = vsub.f32 %v10341_v56, %v6009_v10  ;;  %v5792_v56 = vsub.f32 %v10343_v20, %v5785_v28 }
0x2143   : > { %v6024_v45 = vmul.f32 1.442695, %v6016_v41  ;;  %v5800_v35 = vmul.f32 1.442695, %v5792_v56 }
0x2145   : > { %v10425_v44 = vpop.eup %7801  ;;  %7805 = vpow2.f32 %v6024_v45 }
0x2146   : > { %v10427_v6 = vpop.eup %7803  ;;  %7807 = vpow2.f32 %v6022_v37  ;;  %v5804_v47 = vsel %vm769_vm6, %v10425_v44, 0.0 }
0x2147   : > { %v6028_v32 = vsel %vm769_vm6, %v10427_v6, 0.0  ;;  %7809 = vpow2.f32 %v5800_v35 }
0x214b   : > { %v10436_v22 = vpop.eup %7805 }
0x214c   : > { %v10438_v21 = vpop.eup %7807  ;;  %v6037_v20 = vsel %vm769_vm6, %v10436_v22, 0.0 }
0x214d   : > { %v6034_v15 = vsel %vm769_vm6, %v10438_v21, 0.0  ;;  %v10444_v17 = vpop.eup %7809 }
0x214e   : > { %v5813_v39 = vsel %vm769_vm6, %v10444_v17, 0.0 }
0x215d   : > { %6032 = vadd.xlane.f32.xlu0 %v6031_v63 }
0x2165   : > { %5808 = vadd.xlane.f32.xlu0 %v5807_v52 }
0x2166   : > { %5805 = vadd.xlane.f32.xlu2 %v5804_v47 }
0x2168   : > { %6029 = vadd.xlane.f32.xlu1 %v6028_v32 }
0x216d   : > { %6038 = vadd.xlane.f32.xlu0 %v6037_v20 }
0x216e   : > { %6035 = vadd.xlane.f32.xlu2 %v6034_v15 }
0x2172   : > { %v5582_v23 = vpop.xlane.xlu2 %5581 }
0x2173   : > { %7811 = vrcp.f32 %v5582_v23  ;;  %v5604_v10 = vand.u32 2147483647, %v5582_v23  ;;  %v5606_v27 = vand.u32 2147483648, %v5582_v23  ;;  %vm5600_vm2 = vweird.f32 %v5582_v23 }
0x2175   : > { %vm10480_vm8 = vcmp.eq.f32.partialorder %v5604_v10, 8.507059e+37  ;;  %v5607_v28 = vor.u32 1.1754944e-38, %v5606_v27 }
0x2176   : > { %5814 = vadd.xlane.f32.xlu2 %v5813_v39 }
0x2178   : > { %v5358_v3 = vpop.xlane.xlu0 %5357 }
0x2179   : > { %v10448_v42 = vpop.eup %7811  ;;  %7813 = vrcp.f32 %v5358_v3  ;;  %v5382_v41 = vand.u32 2147483648, %v5358_v3  ;;  %vm5376_vm10 = vweird.f32 %v5358_v3 }
0x217a   : > { %v5596_v59 = vmul.f32 %v10448_v42, %v5582_v23  ;;  %vm5601_vm11 = vweird.f32 %v10448_v42 }
0x217b   : > { %vm10492_vm15 = vmor %vm5600_vm2, %vm5601_vm11  ;;  %v5383_v23 = vor.u32 1.1754944e-38, %v5382_v41 }
0x217c   : > { %v5597_v34 = vsub.f32 1.0, %v5596_v59 }
0x217e   : > { %6011 = vmax.xlane.f32.xlu2 %v6010_v29  ;;  %v5598_v1 = vmul.f32 %v10448_v42, %v5597_v34 }
0x217f   : > { %v10456_v9 = vpop.eup %7813 }
0x2180   : > { %v5372_v30 = vmul.f32 %v10456_v9, %v5358_v3  ;;  %v5585_v18 = vpop.xlane.xlu0 %5584  ;;  %v10459_v40 = vpop.xlane.xlu1 %5360  ;;  %v5599_v63 = vadd.f32 %v10448_v42, %v5598_v1  ;;  %vm5377_vm1 = vweird.f32 %v10456_v9 }
0x2181   : > { %7815 = vrcp.f32 %v5585_v18  ;;  %5899 = vrot.lane.b32.xlu1 %v10188_v48, %s11027_s18  ;;  %5897 = vrot.lane.b32.xlu0 %v10192_v5, %s11027_s18  ;;  %v5380_v48 = vand.u32 2147483647, %v5358_v3  ;;  %v5619_v59 = vand.u32 2147483647, %v5585_v18  ;;  %vm10508_vm12 = vmor %vm5376_vm10, %vm5377_vm1  ;;  %vm5615_vm0 = vweird.f32 %v5585_v18 }
0x2182   : > { %v5373_v43 = vsub.f32 1.0, %v5372_v30  ;;  %7817 = vrcp.f32 %v10459_v40  ;;  %v10469_v26 = vpop.xlane.xlu2 %5587  ;;  %v5603_v34 = vsel %vm10492_vm15, %v10448_v42, %v5599_v63  ;;  %v5621_v30 = vand.u32 2147483648, %v5585_v18 }
0x2183   : > { %7819 = vrcp.f32 %v10469_v26  ;;  %vm10496_vm9 = vcmp.eq.f32.partialorder %v5380_v48, 8.507059e+37  ;;  %v5395_v48 = vand.u32 2147483647, %v10459_v40  ;;  %v5608_v3 = vsel %vm10480_vm8, %v5607_v28, %v5603_v34 }
0x2184   : > { %v5374_v8 = vmul.f32 %v10456_v9, %v5373_v43  ;;  %vm5391_vm14 = vweird.f32 %v10459_v40  ;;  %vm5620_vm11 = vcmp.eq.f32.partialorder %v5619_v59, 8.507059e+37  ;;  %v5609_v34 = vmul.f32 %v10356_v7, %v5608_v3 }
0x2185   : > { %vm5396_vm8 = vcmp.eq.f32.partialorder %v5395_v48, 8.507059e+37  ;;  %vm5630_vm1 = vweird.f32 %v10469_v26 }
0x2186   : > { %5787 = vmax.xlane.f32.xlu2 %v5786_v57  ;;  %v5375_v47 = vadd.f32 %v10456_v9, %v5374_v8  ;;  %v5397_v8 = vand.u32 2147483648, %v10459_v40 }
0x2187   : > { %v7816_v5 = vpop.eup %7815 }
0x2188   : > { %v7818_v45 = vpop.eup %7817  ;;  %v5611_v56 = vmul.f32 %v7816_v5, %v5585_v18  ;;  %v10484_v52 = vpop.xlane.xlu1 %5363  ;;  %vm5616_vm13 = vweird.f32 %v7816_v5  ;;  %v5379_v42 = vsel %vm10508_vm12, %v10456_v9, %v5375_v47 }
0x2189   : > { %v5387_v32 = vmul.f32 %v7818_v45, %v10459_v40  ;;  %7821 = vrcp.f32 %v10484_v52  ;;  %v10490_v35 = vpop.eup %7819  ;;  %vm5392_vm3 = vweird.f32 %v7818_v45  ;;  %vm5617_vm2 = vmor %vm5615_vm0, %vm5616_vm13  ;;  %v5384_v9 = vsel %vm10496_vm9, %v5383_v23, %v5379_v42 }
0x218a   : > { %v5612_v39 = vsub.f32 1.0, %v5611_v56  ;;  %v10500_v29 = vpop.xlane.xlu0 %5590  ;;  %v5626_v1 = vmul.f32 %v10490_v35, %v10469_v26  ;;  %v5622_v56 = vor.u32 1.1754944e-38, %v5621_v30  ;;  %vm5393_vm10 = vmor %vm5391_vm14, %vm5392_vm3  ;;  %vm5631_vm15 = vweird.f32 %v10490_v35 }
0x218b   : > { %v5388_v43 = vsub.f32 1.0, %v5387_v32  ;;  %7823 = vrcp.f32 %v10500_v29  ;;  %v5651_v24 = vand.u32 2147483648, %v10500_v29  ;;  %vm10555_vm13 = vmor %vm5630_vm1, %vm5631_vm15  ;;  %vm5406_vm3 = vweird.f32 %v10484_v52 }
0x218c   : > { %v5613_v27 = vmul.f32 %v7816_v5, %v5612_v39  ;;  %v5627_v20 = vsub.f32 1.0, %v5626_v1  ;;  %v5398_v39 = vor.u32 1.1754944e-38, %v5397_v8  ;;  %vm5645_vm14 = vweird.f32 %v10500_v29 }
0x218d   : > { %v5389_v57 = vmul.f32 %v7818_v45, %v5388_v43  ;;  %v5385_v43 = vmul.f32 %v10361_v49, %v5384_v9  ;;  %v5412_v49 = vand.u32 2147483648, %v10484_v52 }
0x218e   : > { %v5614_v41 = vadd.f32 %v7816_v5, %v5613_v27  ;;  %v5628_v10 = vmul.f32 %v10490_v35, %v5627_v20  ;;  %v5798_v27 = vmul.f32 1.442695, %v5791_v61 }
0x218f   : > { %v10521_v63 = vpop.eup %7821  ;;  %v5390_v32 = vadd.f32 %v7818_v45, %v5389_v57 }
0x2190   : > { %v5618_v47 = vsel %vm5617_vm2, %v7816_v5, %v5614_v41  ;;  %v5402_v37 = vmul.f32 %v10521_v63, %v10484_v52  ;;  %v10527_v28 = vpop.xlane.xlu1 %5366  ;;  %vm5407_vm9 = vweird.f32 %v10521_v63  ;;  %v5629_v61 = vadd.f32 %v10490_v35, %v5628_v10 }
0x2191   : > { %v5623_v18 = vsel %vm5620_vm11, %v5622_v56, %v5618_v47  ;;  %v5394_v40 = vsel %vm5393_vm10, %v7818_v45, %v5390_v32  ;;  %7825 = vrcp.f32 %v10527_v28  ;;  %v7824_v59 = vpop.eup %7823  ;;  %v5634_v41 = vand.u32 2147483647, %v10469_v26  ;;  %vm10567_vm0 = vmor %vm5406_vm3, %vm5407_vm9 }
0x2192   : > { %v5624_v30 = vmul.f32 %v10366_v2, %v5623_v18  ;;  %v5399_v15 = vsel %vm5396_vm8, %v5398_v39, %v5394_v40  ;;  %v5403_v23 = vsub.f32 1.0, %v5402_v37  ;;  %v10532_v5 = vpop.xlane.xlu0 %5593  ;;  %v5641_v45 = vmul.f32 %v7824_v59, %v10500_v29 }
0x2193   : > { %v5400_v1 = vmul.f32 %v10369_v62, %v5399_v15  ;;  %7827 = vrcp.f32 %v10532_v5  ;;  %v5649_v62 = vand.u32 2147483647, %v10500_v29  ;;  %vm5646_vm12 = vweird.f32 %v7824_v59 }
0x2194   : > { %v5670_v8 = vpack.c.bf16 %v5624_v30, %v5609_v34  ;;  %v5404_v7 = vmul.f32 %v10521_v63, %v5403_v23  ;;  %v5642_v42 = vsub.f32 1.0, %v5641_v45  ;;  %v5636_v56 = vand.u32 2147483648, %v10469_v26  ;;  %vm10574_vm2 = vmor %vm5645_vm14, %vm5646_vm12 }
0x2195   : > { %v5446_v2 = vpack.c.bf16 %v5400_v1, %v5385_v43  ;;  %v5410_v47 = vand.u32 2147483647, %v10484_v52  ;;  %v5413_v26 = vor.u32 1.1754944e-38, %v5412_v49  ;;  %vm5650_vm11 = vcmp.eq.f32.partialorder %v5649_v62, 8.507059e+37 }
0x2196   : > { %7173 = vmatmul.msk.bf16.vlgmr.msra.gmra.mxu3 %vm769_vm6, %v5670_v8  ;;  %v5405_v57 = vadd.f32 %v10521_v63, %v5404_v7  ;;  %v5643_v48 = vmul.f32 %v7824_v59, %v5642_v42  ;;  %v5652_v18 = vor.u32 1.1754944e-38, %v5651_v24  ;;  %v5633_v30 = vsel %vm10555_vm13, %v10490_v35, %v5629_v61 }
0x2197   : > { %v7826_v19 = vpop.eup %7825  ;;  %7167 = vmatmul.msk.bf16.vlgmr.msra.gmra.mxu1 %vm769_vm6, %v5446_v2  ;;  %v5427_v15 = vand.u32 2147483648, %v10527_v28  ;;  %v5425_v43 = vand.u32 2147483647, %v10527_v28  ;;  %vm5635_vm8 = vcmp.eq.f32.partialorder %v5634_v41, 8.507059e+37  ;;  %v5637_v10 = vor.u32 1.1754944e-38, %v5636_v56 }
0x2198   : > { %v5417_v32 = vmul.f32 %v7826_v19, %v10527_v28  ;;  %v10563_v20 = vpop.xlane.xlu2 %5369  ;;  %v5644_v39 = vadd.f32 %v7824_v59, %v5643_v48  ;;  %v5409_v52 = vsel %vm10567_vm0, %v10521_v63, %v5405_v57  ;;  %vm5422_vm10 = vweird.f32 %v7826_v19 }
0x2199   : > { %7829 = vrcp.f32 %v10563_v20  ;;  %v10578_v34 = vpop.eup %7827  ;;  %vm5411_vm1 = vcmp.eq.f32.partialorder %v5410_v47, 8.507059e+37  ;;  %vm5421_vm15 = vweird.f32 %v10527_v28  ;;  %v5638_v2 = vsel %vm5635_vm8, %v5637_v10, %v5633_v30 }
0x219a   : > { %v5418_v40 = vsub.f32 1.0, %v5417_v32  ;;  %v5648_v29 = vsel %vm10574_vm2, %v7824_v59, %v5644_v39  ;;  %v5656_v1 = vmul.f32 %v10578_v34, %v10532_v5  ;;  %v5414_v8 = vsel %vm5411_vm1, %v5413_v26, %v5409_v52  ;;  %vm5423_vm9 = vmor %vm5421_vm15, %vm5422_vm10 }
0x219b   : > { %v5653_v35 = vsel %vm5650_vm11, %v5652_v18, %v5648_v29  ;;  %v5428_v59 = vor.u32 1.1754944e-38, %v5427_v15  ;;  %vm5426_vm12 = vcmp.eq.f32.partialorder %v5425_v43, 8.507059e+37  ;;  %7831 = vpow2.f32 %v5798_v27 }
0x219c   : > { %v5419_v23 = vmul.f32 %v7826_v19, %v5418_v40  ;;  %v5657_v63 = vsub.f32 1.0, %v5656_v1  ;;  %v5654_v24 = vmul.f32 %v10386_v12, %v5653_v35  ;;  %v5415_v57 = vmul.f32 %v10381_v46, %v5414_v8 }
0x219d   : > { %v5639_v56 = vmul.f32 %v10376_v4, %v5638_v2  ;;  %vm5661_vm13 = vweird.f32 %v10578_v34  ;;  %v5666_v39 = vand.u32 2147483648, %v10532_v5  ;;  %vm5660_vm0 = vweird.f32 %v10532_v5 }
0x219e   : > { %v5420_v45 = vadd.f32 %v7826_v19, %v5419_v23  ;;  %v5658_v28 = vmul.f32 %v10578_v34, %v5657_v63  ;;  %v5664_v4 = vand.u32 2147483647, %v10532_v5  ;;  %v5442_v26 = vand.u32 2147483648, %v10563_v20  ;;  %vm5662_vm14 = vmor %vm5660_vm0, %vm5661_vm13 }
0x219f   : > { %v7830_v7 = vpop.eup %7829  ;;  %v5671_v9 = vpack.c.bf16 %v5654_v24, %v5639_v56  ;;  %vm5436_vm2 = vweird.f32 %v10563_v20  ;;  %v5667_v30 = vor.u32 1.1754944e-38, %v5666_v39 }
0x21a0   : > { %v5424_v42 = vsel %vm5423_vm9, %v7826_v19, %v5420_v45  ;;  %v5432_v49 = vmul.f32 %v7830_v7, %v10563_v20  ;;  %v6126_v62 = vpop.permute.xlu2 %6125  ;;  %v5659_v12 = vadd.f32 %v10578_v34, %v5658_v28  ;;  %vm5437_vm3 = vweird.f32 %v7830_v7 }
0x21a1   : > { %v6139_v61 = vand.u32 %v6126_v62, %v8120_v0  ;;  %v5429_v48 = vsel %vm5426_vm12, %v5428_v59, %v5424_v42  ;;  %v10604_v46 = vpop.eup %7831  ;;  %vm5438_vm11 = vmor %vm5436_vm2, %vm5437_vm3  ;;  %vm5665_vm10 = vcmp.eq.f32.partialorder %v5664_v4, 8.507059e+37  ;;  %v5443_v5 = vor.u32 1.1754944e-38, %v5442_v26 }
0x21a2   : > { %v5433_v3 = vsub.f32 1.0, %v5432_v49  ;;  %v5430_v41 = vmul.f32 %v10391_v60, %v5429_v48  ;;  %v5810_v18 = vsel %vm769_vm6, %v10604_v46, 0.0  ;;  %v5663_v40 = vsel %vm5662_vm14, %v10578_v34, %v5659_v12 }
0x21a3   : > { %6146 = vmatpush.bf16.msrb.mxu3 %v6139_v61  ;;  %v5668_v29 = vsel %vm5665_vm10, %v5667_v30, %v5663_v40 }
0x21a4   : > { %v5434_v19 = vmul.f32 %v7830_v7, %v5433_v3  ;;  %v5447_v32 = vpack.c.bf16 %v5430_v41, %v5415_v57  ;;  %v5669_v43 = vmul.f32 %v10395_v50, %v5668_v29 }
0x21a5   : > { %v5902_v47 = vpop.permute.xlu0 %5901 }
0x21a6   : > { %v5915_v27 = vand.u32 %v5902_v47, %v8120_v0  ;;  %7174 = vmatmul.msk.bf16.gmra.mxu3 %vm769_vm6, %v5671_v9  ;;  %v5435_v60 = vadd.f32 %v7830_v7, %v5434_v19  ;;  %v5440_v0 = vand.u32 2147483647, %v10563_v20  ;;  %v5672_v1 = vpack.c.bf16 %v5669_v43, %v5669_v43 }
0x21a7   : > { %7168 = vmatmul.msk.bf16.gmra.mxu1 %vm769_vm6, %v5447_v32 }
0x21a8   : > { %5922 = vmatpush.bf16.msrb.mxu1 %v5915_v27  ;;  %v6124_v37 = vpop.permute.xlu1 %6123  ;;  %v5439_v52 = vsel %vm5438_vm11, %v7830_v7, %v5435_v60  ;;  %vm5441_vm8 = vcmp.eq.f32.partialorder %v5440_v0, 8.507059e+37 }
0x21a9   : > { %6147 = vmatpush.bf16.msrb.mxu3 %v6124_v37  ;;  %v5444_v15 = vsel %vm5441_vm8, %v5443_v5, %v5439_v52 }
0x21aa   : > { %v5445_v20 = vmul.f32 %v10399_v53, %v5444_v15 }
0x21ab   : > { %5811 = vadd.xlane.f32.xlu1 %v5810_v18 }
0x21ac   : > { %v5448_v10 = vpack.c.bf16 %v5445_v20, %v5445_v20 }
0x21b0   : > { %v6122_v23 = vpop.permute.xlu1 %6121 }
0x21b1   : > { %6148 = vmatpush.bf16.msrb.mxu3 %v6122_v23 }
0x21b6   : > { %7175 = vmatmul.msk.bf16.gmra.mxu3 %vm769_vm6, %v5672_v1 }
0x21b7   : > { %7169 = vmatmul.msk.bf16.gmra.mxu1 %vm769_vm6, %v5448_v10 }
0x21d0   : > { %v6033_v34 = vpop.xlane.xlu0 %6032 }
0x21d1   : > { %7833 = vrcp.f32 %v6033_v34  ;;  %v6067_v48 = vand.u32 2147483647, %v6033_v34  ;;  %v6069_v28 = vand.u32 2147483648, %v6033_v34  ;;  %vm6063_vm15 = vweird.f32 %v6033_v34 }
0x21d3   : > { %vm10646_vm12 = vcmp.eq.f32.partialorder %v6067_v48, 8.507059e+37  ;;  %v6070_v39 = vor.u32 1.1754944e-38, %v6069_v28 }
0x21d7   : > { %v7834_v35 = vpop.eup %7833 }
0x21d8   : > { %v6059_v45 = vmul.f32 %v7834_v35, %v6033_v34  ;;  %v10620_v63 = vpop.xlane.xlu0 %5808  ;;  %vm6064_vm1 = vweird.f32 %v7834_v35 }
0x21d9   : > { %7835 = vrcp.f32 %v10620_v63  ;;  %v10623_v8 = vpop.xlane.xlu2 %5805  ;;  %vm10640_vm9 = vmor %vm6063_vm15, %vm6064_vm1  ;;  %vm5839_vm3 = vweird.f32 %v10620_v63  ;;  %v5843_v0 = vand.u32 2147483647, %v10620_v63  ;;  %v5845_v18 = vand.u32 2147483648, %v10620_v63 }
0x21da   : > { %v6060_v50 = vsub.f32 1.0, %v6059_v45  ;;  %7837 = vrcp.f32 %v10623_v8  ;;  %vm5824_vm8 = vweird.f32 %v10623_v8  ;;  %v5830_v45 = vand.u32 2147483648, %v10623_v8 }
0x21db   : > { %v6030_v53 = vpop.xlane.xlu1 %6029  ;;  %vm10686_vm15 = vcmp.eq.f32.partialorder %v5843_v0, 8.507059e+37 }
0x21dc   : > { %7839 = vrcp.f32 %v6030_v53  ;;  %v6061_v7 = vmul.f32 %v7834_v35, %v6060_v50  ;;  %v6052_v9 = vand.u32 2147483647, %v6030_v53  ;;  %v6054_v47 = vand.u32 2147483648, %v6030_v53 }
0x21dd   : > { %vm6048_vm0 = vweird.f32 %v6030_v53 }
0x21de   : > { %v6062_v57 = vadd.f32 %v7834_v35, %v6061_v7  ;;  %vm10659_vm14 = vcmp.eq.f32.partialorder %v6052_v9, 8.507059e+37  ;;  %v6055_v5 = vor.u32 1.1754944e-38, %v6054_v47 }
0x21df   : > { %v10626_v59 = vpop.eup %7835 }
0x21e0   : > { %v10628_v2 = vpop.eup %7837  ;;  %v5835_v42 = vmul.f32 %v10626_v59, %v10620_v63  ;;  %v10632_v49 = vpop.xlane.xlu0 %6038  ;;  %v6066_v12 = vsel %vm10640_vm9, %v7834_v35, %v6062_v57  ;;  %vm5840_vm2 = vweird.f32 %v10626_v59  ;;  %v5828_v35 = vand.u32 2147483647, %v10623_v8 }
0x21e1   : > { %v5820_v62 = vmul.f32 %v10628_v2, %v10623_v8  ;;  %7841 = vrcp.f32 %v10632_v49  ;;  %v10637_v24 = vpop.xlane.xlu2 %6035  ;;  %v6071_v23 = vsel %vm10646_vm12, %v6070_v39, %v6066_v12  ;;  %vm5825_vm11 = vweird.f32 %v10628_v2  ;;  %vm10680_vm1 = vmor %vm5839_vm3, %vm5840_vm2 }
0x21e2   : > { %v7840_v61 = vpop.eup %7839  ;;  %v5836_v3 = vsub.f32 1.0, %v5835_v42  ;;  %7843 = vrcp.f32 %v10637_v24  ;;  %v5846_v8 = vor.u32 1.1754944e-38, %v5845_v18  ;;  %vm10692_vm9 = vmor %vm5824_vm8, %vm5825_vm11  ;;  %vm5829_vm12 = vcmp.eq.f32.partialorder %v5828_v35, 8.507059e+37 }
0x21e3   : > { %v5821_v41 = vsub.f32 1.0, %v5820_v62  ;;  %v6044_v56 = vmul.f32 %v7840_v61, %v6030_v53  ;;  %vm6049_vm13 = vweird.f32 %v7840_v61  ;;  %v6072_v53 = vmul.f32 %v10417_v54, %v6071_v23 }
0x21e4   : > { %v5837_v4 = vmul.f32 %v10626_v59, %v5836_v3  ;;  %vm6050_vm10 = vmor %vm6048_vm0, %vm6049_vm13  ;;  %v5831_v3 = vor.u32 1.1754944e-38, %v5830_v45  ;;  %vm6093_vm13 = vweird.f32 %v10632_v49  ;;  %v6084_v9 = vand.u32 2147483648, %v10637_v24 }
0x21e5   : > { %v6045_v32 = vsub.f32 1.0, %v6044_v56  ;;  %v5822_v26 = vmul.f32 %v10628_v2, %v5821_v41  ;;  %v6099_v56 = vand.u32 2147483648, %v10632_v49  ;;  %v6097_v27 = vand.u32 2147483647, %v10632_v49 }
0x21e6   : > { %v5838_v20 = vadd.f32 %v10626_v59, %v5837_v4  ;;  %vm6078_vm2 = vweird.f32 %v10637_v24  ;;  %v6082_v39 = vand.u32 2147483647, %v10637_v24 }
0x21e7   : > { %v10650_v60 = vpop.eup %7841  ;;  %v6046_v37 = vmul.f32 %v7840_v61, %v6045_v32  ;;  %v5823_v1 = vadd.f32 %v10628_v2, %v5822_v26 }
0x21e8   : > { %v6089_v40 = vmul.f32 %v10650_v60, %v10632_v49  ;;  %v7844_v15 = vpop.eup %7843  ;;  %v5842_v63 = vsel %vm10680_vm1, %v10626_v59, %v5838_v20  ;;  %vm6094_vm3 = vweird.f32 %v10650_v60  ;;  %vm6083_vm8 = vcmp.eq.f32.partialorder %v6082_v39, 8.507059e+37 }
0x21e9   : > { %v6047_v30 = vadd.f32 %v7840_v61, %v6046_v37  ;;  %v10663_v29 = vpop.xlane.xlu2 %5814  ;;  %v6074_v34 = vmul.f32 %v7844_v15, %v10637_v24  ;;  %vm6079_vm0 = vweird.f32 %v7844_v15  ;;  %v5847_v59 = vsel %vm10686_vm15, %v5846_v8, %v5842_v63 }
0x21ea   : > { %v6090_v43 = vsub.f32 1.0, %v6089_v40  ;;  %vm6080_vm11 = vmor %vm6078_vm2, %vm6079_vm0  ;;  %v5848_v37 = vmul.f32 %v10423_v11, %v5847_v59  ;;  %v6100_v40 = vor.u32 1.1754944e-38, %v6099_v56  ;;  %v5875_v63 = vand.u32 2147483648, %v10663_v29 }
0x21eb   : > { %v6051_v10 = vsel %vm6050_vm10, %v7840_v61, %v6047_v30  ;;  %v6075_v61 = vsub.f32 1.0, %v6074_v34  ;;  %v6085_v30 = vor.u32 1.1754944e-38, %v6084_v9  ;;  %vm6098_vm10 = vcmp.eq.f32.partialorder %v6097_v27, 8.507059e+37 }
0x21ec   : > { %v6056_v50 = vsel %vm10659_vm14, %v6055_v5, %v6051_v10  ;;  %v6091_v62 = vmul.f32 %v10650_v60, %v6090_v43  ;;  %vm10711_vm14 = vmor %vm6093_vm13, %vm6094_vm3  ;;  %vm5869_vm1 = vweird.f32 %v10663_v29 }
0x21ed   : > { %v6057_v42 = vmul.f32 %v10427_v6, %v6056_v50  ;;  %v5827_v6 = vsel %vm10692_vm9, %v10628_v2, %v5823_v1  ;;  %v6076_v28 = vmul.f32 %v7844_v15, %v6075_v61 }
0x21ee   : > { %v6092_v41 = vadd.f32 %v10650_v60, %v6091_v62  ;;  %v5832_v2 = vsel %vm5829_vm12, %v5831_v3, %v5827_v6  ;;  %v5873_v6 = vand.u32 2147483647, %v10663_v29 }
0x21ef   : > { %v6118_v48 = vpack.c.bf16 %v6072_v53, %v6057_v42  ;;  %v6077_v19 = vadd.f32 %v7844_v15, %v6076_v28  ;;  %v5833_v0 = vmul.f32 %v10425_v44, %v5832_v2 }
0x21f0   : > { %vm5874_vm12 = vcmp.eq.f32.partialorder %v5873_v6, 8.507059e+37 }
0x21f1   : > { %v6012_v32 = vpop.xlane.xlu2 %6011  ;;  %7185 = vmatmul.msk.bf16.vlgmr.msrb.gmra.mxu3 %vm769_vm6, %v6118_v48  ;;  %v6081_v18 = vsel %vm6080_vm11, %v7844_v15, %v6077_v19  ;;  %v5894_v5 = vpack.c.bf16 %v5848_v37, %v5833_v0 }
0x21f2   : > { %v6017_v47 = vsub.f32 %v10451_v25, %v6012_v32  ;;  %v6096_v25 = vsel %vm10711_vm14, %v10650_v60, %v6092_v41  ;;  %v6086_v24 = vsel %vm6083_vm8, %v6085_v30, %v6081_v18  ;;  %v5876_v32 = vor.u32 1.1754944e-38, %v5875_v63 }
0x21f3   : > { %v5900_v4 = vpop.permute.xlu1 %5899  ;;  %v5898_v49 = vpop.permute.xlu0 %5897  ;;  %v6101_v52 = vsel %vm6098_vm10, %v6100_v40, %v6096_v25  ;;  %v6087_v44 = vmul.f32 %v10438_v21, %v6086_v24 }
0x21f4   : > { %v6026_v26 = vmul.f32 1.442695, %v6017_v47  ;;  %5923 = vmatpush.bf16.msrb.mxu1 %v5900_v4  ;;  %v6102_v60 = vmul.f32 %v10436_v22, %v6101_v52 }
0x21f6   : > { %7845 = vpow2.f32 %v6026_v26  ;;  %v6119_v1 = vpack.c.bf16 %v6102_v60, %v6087_v44 }
0x21f8   : > { %5924 = vmatpush.bf16.msrb.mxu1 %v5898_v49 }
0x21f9   : > { %v5788_v23 = vpop.xlane.xlu2 %5787 }
0x21fa   : > { %v5793_v11 = vsub.f32 %v10462_v36, %v5788_v23 }
0x21fb   : > { %7179 = vmatmul.msk.bf16.vlgmr.msrb.gmra.mxu1 %vm769_vm6, %v5894_v5 }
0x21fc   : > { %v10727_v15 = vpop.eup %7845  ;;  %v5802_v43 = vmul.f32 1.442695, %v5793_v11 }
0x21fd   : > { %v6040_v20 = vsel %vm782_vm7, %v10727_v15, 0.0 }
0x21fe   : > { %7847 = vpow2.f32 %v5802_v43  ;;  %6041 = vadd.xlane.f32.xlu2 %v6040_v20 }
0x21ff   : > { %7849 = vrcp.f32 %v10663_v29 }
0x2201   : > { %7186 = vmatmul.msk.bf16.gmra.mxu3 %vm769_vm6, %v6119_v1 }
0x2204   : > { %v10732_v10 = vpop.eup %7847 }
0x2205   : > { %v5816_v36 = vsel %vm782_vm7, %v10732_v10, 0.0  ;;  %v7850_v21 = vpop.eup %7849 }
0x2206   : > { %5817 = vadd.xlane.f32.xlu2 %v5816_v36  ;;  %v5865_v35 = vmul.f32 %v7850_v21, %v10663_v29  ;;  %vm5870_vm7 = vweird.f32 %v7850_v21 }
0x2207   : > { %vm5871_vm15 = vmor %vm5869_vm1, %vm5870_vm7 }
0x2208   : > { %v5866_v50 = vsub.f32 1.0, %v5865_v35 }
0x220a   : > { %v5867_v42 = vmul.f32 %v7850_v21, %v5866_v50 }
0x220c   : > { %v5868_v8 = vadd.f32 %v7850_v21, %v5867_v42 }
0x220e   : > { %v5872_v41 = vsel %vm5871_vm15, %v7850_v21, %v5868_v8 }
0x220f   : > { %v5877_v47 = vsel %vm5874_vm12, %v5876_v32, %v5872_v41  ;;  %vm11183_vm12 = vcmask 261120  }
0x2210   : > { %v5878_v39 = vmul.f32 %v10444_v17, %v5877_v47  ;;  %v7312_v47 = vld [vmem:[%s10956_s9 + $0x38] sm:$0xff] }
0x2211   : > { %6275 = vmatpush.bf16.msra.mxu2 %v7312_v47 }
0x2214   : > { %v10737_v22 = vpop.f32.mrf.mxu1 }
0x2219   : > { %v5702_v34 = vpop.f32.mrf.mxu3 }
0x221c   : > { %v10740_v45 = vpop.f32.mrf.mxu1 }
0x221e   : > { %v5812_v53 = vpop.xlane.xlu1 %5811 }
0x221f   : > { %7851 = vrcp.f32 %v5812_v53  ;;  %v5860_v28 = vand.u32 2147483648, %v5812_v53  ;;  %v5858_v19 = vand.u32 2147483647, %v5812_v53  ;;  %vm5854_vm13 = vweird.f32 %v5812_v53 }
0x2221   : > { %v5704_v7 = vpop.f32.mrf.mxu3  ;;  %v5861_v9 = vor.u32 1.1754944e-38, %v5860_v28  ;;  %vm5859_vm0 = vcmp.eq.f32.partialorder %v5858_v19, 8.507059e+37 }
0x2222   : > { %v7436_v62 = vpack.i.bf16 %v5704_v7, %v5702_v34 }
0x2224   : > { %v10742_v61 = vpop.f32.mrf.mxu1  ;;  %7437 = vrot.lane.b32.xlu0 %v7436_v62, %s11052_s17 }
0x2225   : > { %v7852_v57 = vpop.eup %7851 }
0x2226   : > { %v5850_v54 = vmul.f32 %v7852_v57, %v5812_v53  ;;  %vm5855_vm9 = vweird.f32 %v7852_v57 }
0x2227   : > { %vm5856_vm3 = vmor %vm5854_vm13, %vm5855_vm9 }
0x2228   : > { %v5851_v48 = vsub.f32 1.0, %v5850_v54 }
0x2229   : > { %v10748_v3 = vpop.f32.mrf.mxu3 }
0x222a   : > { %v5852_v56 = vmul.f32 %v7852_v57, %v5851_v48 }
0x222c   : > { %v5853_v59 = vadd.f32 %v7852_v57, %v5852_v56  ;;  %v10750_v2 = vpop.f32.mrf.mxu1 }
0x222e   : > { %v5857_v12 = vsel %vm5856_vm3, %v7852_v57, %v5853_v59 }
0x222f   : > { %v5862_v29 = vsel %vm5859_vm0, %v5861_v9, %v5857_v12  ;;  %vm11186_vm0 = vmmov %vm11183_vm12 }
0x2230   : > { %v5863_v27 = vmul.f32 %v10604_v46, %v5862_v29 }
0x2231   : > { %v5709_v4 = vpop.f32.mrf.mxu3 }
0x2232   : > { %v7451_v26 = vpack.i.bf16 %v5709_v4, %v10748_v3  ;;  %v5895_v37 = vpack.c.bf16 %v5878_v39, %v5863_v27 }
0x2234   : > { %v10755_v0 = vpop.f32.mrf.mxu1  ;;  %7180 = vmatmul.msk.bf16.gmra.mxu1 %vm769_vm6, %v5895_v37 }
0x2239   : > { %v5712_v25 = vpop.f32.mrf.mxu3 }
0x223c   : > { %v5490_v18 = vpop.f32.mrf.mxu1 }
0x2241   : > { %v5714_v40 = vpop.f32.mrf.mxu3 }
0x2271   : > { %v6042_v30 = vpop.xlane.xlu2 %6041 }
0x2272   : > { %7853 = vrcp.f32 %v6042_v30  ;;  %v6114_v23 = vand.u32 2147483648, %v6042_v30  ;;  %v6112_v60 = vand.u32 2147483647, %v6042_v30  ;;  %vm6108_vm2 = vweird.f32 %v6042_v30 }
0x2274   : > { %v6150_v49 = vpop.f32.mrf.mxu3  ;;  %v6115_v36 = vor.u32 1.1754944e-38, %v6114_v23  ;;  %vm6113_vm10 = vcmp.eq.f32.partialorder %v6112_v60, 8.507059e+37 }
0x2278   : > { %v7854_v24 = vpop.eup %7853  ;;  %v5926_v52 = vpop.f32.mrf.mxu1 }
0x2279   : > { %v6104_v5 = vmul.f32 %v7854_v24, %v6042_v30  ;;  %v5818_v46 = vpop.xlane.xlu2 %5817  ;;  %vm6109_vm14 = vweird.f32 %v7854_v24 }
0x227a   : > { %7855 = vrcp.f32 %v5818_v46  ;;  %vm6110_vm11 = vmor %vm6108_vm2, %vm6109_vm14  ;;  %v5890_v62 = vand.u32 2147483648, %v5818_v46  ;;  %v5888_v54 = vand.u32 2147483647, %v5818_v46  ;;  %vm5884_vm7 = vweird.f32 %v5818_v46 }
0x227b   : > { %v6105_v17 = vsub.f32 1.0, %v6104_v5  ;;  %vm11188_vm2 = vmmov %vm11186_vm0 }
0x227c   : > { %v6152_v11 = vpop.f32.mrf.mxu3  ;;  %v5891_v48 = vor.u32 1.1754944e-38, %v5890_v62  ;;  %vm5889_vm15 = vcmp.eq.f32.partialorder %v5888_v54, 8.507059e+37 }
0x227d   : > { %v6106_v44 = vmul.f32 %v7854_v24, %v6105_v17  ;;  %v7446_v43 = vpack.i.bf16 %v6152_v11, %v6150_v49 }
0x227f   : > { %v6107_v20 = vadd.f32 %v7854_v24, %v6106_v44  ;;  %7447 = vrot.lane.b32.xlu0 %v7446_v43, %s11054_s28 }
0x2280   : > { %v7856_v1 = vpop.eup %7855  ;;  %v5928_v21 = vpop.f32.mrf.mxu1 }
0x2281   : > { %v5880_v34 = vmul.f32 %v7856_v1, %v5818_v46  ;;  %v7441_v35 = vpack.i.bf16 %v5928_v21, %v5926_v52  ;;  %v6111_v50 = vsel %vm6110_vm11, %v7854_v24, %v6107_v20  ;;  %vm5885_vm8 = vweird.f32 %v7856_v1  ;;  %vm11189_vm11 = vmmov %vm11186_vm0 }
0x2282   : > { %v6116_v53 = vsel %vm6113_vm10, %v6115_v36, %v6111_v50  ;;  %vm5886_vm1 = vmor %vm5884_vm7, %vm5885_vm8 }
0x2283   : > { %v5881_v7 = vsub.f32 1.0, %v5880_v34  ;;  %7442 = vrot.lane.b32.xlu1 %v7441_v35, %s11053_s25  ;;  %v6117_v42 = vmul.f32 %v10727_v15, %v6116_v53  ;;  %vm11190_vm10 = vmmov %vm11186_vm0 }
0x2284   : > { %v6155_v57 = vpop.f32.mrf.mxu3  ;;  %vm11191_vm8 = vmmov %vm11186_vm0 }
0x2285   : > { %v5882_v8 = vmul.f32 %v7856_v1, %v5881_v7  ;;  %v6120_v63 = vpack.c.bf16 %v6117_v42, %v6117_v42  ;;  %vm11192_vm7 = vmmov %vm11186_vm0 }
0x2287   : > { %v5883_v6 = vadd.f32 %v7856_v1, %v5882_v8  ;;  %7187 = vmatmul.msk.bf16.gmra.mxu3 %vm769_vm6, %v6120_v63  ;;  %7452 = vrot.lane.b32.xlu0 %v7451_v26, %s11052_s17 }
0x2289   : > { %v5887_v28 = vsel %vm5886_vm1, %v7856_v1, %v5883_v6  ;;  %vm11193_vm1 = vmmov %vm11186_vm0 }
0x228a   : > { %v5892_v3 = vsel %vm5889_vm15, %v5891_v48, %v5887_v28  ;;  %v10802_v28 = vld [vmem:[%s10957_s10 + $0x18] sm:$0x3f]  ;;  %vm11194_vm15 = vmmov %vm11186_vm0 }
0x228b   : > { %v5893_v41 = vmul.f32 %v10732_v10, %v5892_v3  ;;  %v7311_v10 = vld [vmem:[%s10956_s9 + $0x30] sm:$0xff]  ;;  %v6247_v3 = vperm.slane %v10802_v28, 0 }
0x228c   : > { %v6157_v15 = vpop.f32.mrf.mxu3  ;;  %6276 = vmatpush.bf16.msra.mxu2 %v7311_v10 }
0x228d   : > { %v7461_v56 = vpack.i.bf16 %v6157_v15, %v6155_v57  ;;  %v5896_v19 = vpack.c.bf16 %v5893_v41, %v5893_v41 }
0x228f   : > { %7462 = vrot.lane.b32.xlu0 %v7461_v56, %s11054_s28  ;;  %7181 = vmatmul.msk.bf16.gmra.mxu1 %vm769_vm6, %v5896_v19  ;;  %vm11181_vm6 = vcmask 195584  }
0x2290   : > { %vm11182_vm9 = vmmov %vm11181_vm6 }
0x2291   : > { %vm11184_vm13 = vmmov %vm11181_vm6 }
0x2292   : > { %vm11185_vm3 = vmmov %vm11181_vm6 }
0x2293   : > { %vm11187_vm14 = vmmov %vm11185_vm3 }
0x2296   : > { %v7438_v12 = vpop.permute.xlu0 %7437 }
0x2297   : > { %v7440_v29 = vunpack.i.h.bf16 %v7438_v12  ;;  %v7439_v27 = vunpack.i.l.bf16 %v7438_v12 }
0x2299   : > { %v6225_v18 = vsel %vm722_vm5, %v10740_v45, %v7440_v29 }
0x22b1   : > { %v5931_v32 = vpop.f32.mrf.mxu1 }
0x22b9   : > { %v5933_v59 = vpop.f32.mrf.mxu1 }
0x22ba   : > { %v7456_v9 = vpack.i.bf16 %v5933_v59, %v5931_v32 }
0x22bc   : > { %7457 = vrot.lane.b32.xlu2 %v7456_v9, %s11053_s25 }
0x22c4   : > { %6177 = vrot.lane.b32.xlu2 %v5712_v25, %s11052_s17  ;;  %v6224_v25 = vsel %vm722_vm5, %v10737_v22, %v7439_v27 }
0x22f1   : > { %v7448_v39 = vpop.permute.xlu0 %7447 }
0x22f2   : > { %v7450_v40 = vunpack.i.h.bf16 %v7448_v39  ;;  %v7449_v30 = vunpack.i.l.bf16 %v7448_v39 }
0x22f5   : > { %v7443_v4 = vpop.permute.xlu1 %7442 }
0x22f6   : > { %v7445_v26 = vunpack.i.h.bf16 %v7443_v4  ;;  %v7444_v37 = vunpack.i.l.bf16 %v7443_v4 }
0x22f8   : > { %v6230_v49 = vsel %vm1677_vm4, %v6225_v18, %v7445_v26  ;;  %v6229_v24 = vsel %vm1677_vm4, %v6224_v25, %v7444_v37 }
0x22f9   : > { %v6235_v52 = vsel %vm11181_vm6, %v6230_v49, %v7450_v40  ;;  %v6234_v5 = vsel %vm11182_vm9, %v6229_v24, %v7449_v30  ;;  %v7453_v23 = vpop.permute.xlu0 %7452  ;;  %vm11195_vm6 = vmmov %vm11186_vm0  ;;  %vm11196_vm9 = vcmask 253952  }
0x22fa   : > { %v6239_v46 = vpack.c.bf16 %v6235_v52, %v6234_v5  ;;  %v7455_v45 = vunpack.i.h.bf16 %v7453_v23  ;;  %v7454_v44 = vunpack.i.l.bf16 %v7453_v23 }
0x22fc   : > { %7200 = vmatmul.msk.bf16.vlgmr.msra.gmra.mxu2 %vm11183_vm12, %v6239_v46  ;;  %v6227_v21 = vsel %vm722_vm5, %v10750_v2, %v7455_v45  ;;  %v6226_v34 = vsel %vm722_vm5, %v10742_v61, %v7454_v44  ;;  %vm11197_vm12 = vmmov %vm11186_vm0 }
0x2301   : > { %v7463_v43 = vpop.permute.xlu0 %7462 }
0x2302   : > { %v7465_v35 = vunpack.i.h.bf16 %v7463_v43  ;;  %v7464_v50 = vunpack.i.l.bf16 %v7463_v43 }
0x230a   : > { %v6160_v17 = vpop.f32.mrf.mxu3 }
0x230c   : > { %v5936_v11 = vpop.f32.mrf.mxu1 }
0x230d   : > { %6197 = vrot.lane.b32.xlu2 %v5936_v11, %s11053_s25 }
0x2312   : > { %v6162_v22 = vpop.f32.mrf.mxu3 }
0x2314   : > { %v5938_v60 = vpop.f32.mrf.mxu1 }
0x2315   : > { %6217 = vrot.lane.b32.xlu2 %v6160_v17, %s11054_s28 }
0x2316   : > { %v7458_v20 = vpop.permute.xlu2 %7457 }
0x2317   : > { %v7460_v1 = vunpack.i.h.bf16 %v7458_v20  ;;  %v7459_v36 = vunpack.i.l.bf16 %v7458_v20 }
0x2319   : > { %v6232_v53 = vsel %vm1677_vm4, %v6227_v21, %v7460_v1  ;;  %v6231_v7 = vsel %vm1677_vm4, %v6226_v34, %v7459_v36 }
0x231a   : > { %v6236_v42 = vsel %vm11184_vm13, %v6231_v7, %v7464_v50  ;;  %v6237_v62 = vsel %vm11185_vm3, %v6232_v53, %v7465_v35  ;;  %v7313_v7 = vld [vmem:[%s10958_s11 + $0x30] sm:$0xff] }
0x231b   : > { %v6240_v57 = vpack.c.bf16 %v6237_v62, %v6236_v42 }
0x231d   : > { %7201 = vmatmul.msk.bf16.gmra.mxu2 %vm11186_vm0, %v6240_v57 }
0x231e   : > { %v6178_v8 = vpop.permute.xlu2 %6177 }
0x231f   : > { %v6228_v2 = vsel %vm722_vm5, %v10755_v0, %v6178_v8 }
0x2367   : > { %v6198_v54 = vpop.permute.xlu2 %6197 }
0x2368   : > { %v6233_v61 = vsel %vm1677_vm4, %v6228_v2, %v6198_v54 }
0x236f   : > { %v6218_v63 = vpop.permute.xlu2 %6217 }
0x2370   : > { %v6238_v6 = vsel %vm11187_vm14, %v6233_v61, %v6218_v63 }
0x2371   : > { %v6241_v48 = vpack.c.bf16 %v6238_v6, %v6238_v6 }
0x2373   : > { %7202 = vmatmul.msk.bf16.gmra.mxu2 %vm11188_vm2, %v6241_v48 }
0x237f   : > { %v6278_v41 = vpop.f32.mrf.mxu2 }
0x2380   : > { %v6279_v15 = vadd.f32 %v6278_v41, %v6247_v3 }
0x2382   : > { %v6292_v56 = vadd.f32 %v6279_v15, %v10158_v51 }
0x2384   : > { %v6297_v0 = vsel %vm11189_vm11, %v6292_v56, 0.0 }
0x2385   : > { %6298 = vadd.xlane.f32.xlu1 %v6297_v0 }
0x2387   : > { %v6280_v19 = vpop.f32.mrf.mxu2 }
0x2388   : > { %v6281_v32 = vadd.f32 %v6280_v19, %v6247_v3 }
0x238a   : > { %v6293_v59 = vadd.f32 %v6281_v32, %v10160_v33 }
0x238c   : > { %v6300_v9 = vsel %vm11190_vm10, %v6293_v59, 0.0  ;;  %vm11198_vm10 = vmmov %vm11193_vm1 }
0x238d   : > { %6301 = vadd.xlane.f32.xlu0 %v6300_v9 }
0x23a0   : > { %v6283_v47 = vpop.f32.mrf.mxu2 }
0x23a1   : > { %v6284_v10 = vadd.f32 %v6283_v47, %v6247_v3 }
0x23a3   : > { %v6294_v12 = vadd.f32 %v6284_v10, %v10170_v58 }
0x23a5   : > { %v6303_v29 = vsel %vm11191_vm8, %v6294_v12, 0.0  ;;  %vm11199_vm8 = vmmov %vm11196_vm9 }
0x23a6   : > { %6304 = vadd.xlane.f32.xlu2 %v6303_v29 }
0x23a8   : > { %v6285_v27 = vpop.f32.mrf.mxu2 }
0x23a9   : > { %v6286_v39 = vadd.f32 %v6285_v27, %v6247_v3 }
0x23ab   : > { %v6295_v51 = vadd.f32 %v6286_v39, %v10172_v14 }
0x23ad   : > { %v6306_v4 = vsel %vm11192_vm7, %v6295_v51, 0.0 }
0x23ae   : > { %6307 = vadd.xlane.f32.xlu1 %v6306_v4 }
0x23f6   : > { %v6288_v26 = vpop.f32.mrf.mxu2 }
0x23f7   : > { %v6289_v11 = vadd.f32 %v6288_v26, %v6247_v3 }
0x23f8   : > { %v6299_v37 = vpop.xlane.xlu1 %6298 }
0x23f9   : > { %v6312_v33 = vmul.f32 %v6299_v37, %v8542_v13  ;;  %v6296_v60 = vadd.f32 %v6289_v11, %v10180_v31  ;;  %v7314_v31 = vld [vmem:[%s10958_s11 + $0x38] sm:$0xff] }
0x23fa   : > { %6459 = vmatpush.bf16.msra.mxu1 %v7314_v31 }
0x23fb   : > { %v6317_v25 = vsub.f32 %v6292_v56, %v6312_v33  ;;  %v6309_v1 = vsel %vm11196_vm9, %v6296_v60, 0.0  ;;  %v10840_v56 = vperm.slane %v10802_v28, 1 }
0x23fd   : > { %v6322_v18 = vmul.f32 %v6317_v25, %v6317_v25 }
0x23fe   : > { %v6290_v40 = vpop.f32.mrf.mxu2  ;;  %6460 = vmatpush.bf16.msra.mxu1 %v7313_v7  ;;  %v7316_v7 = vld [vmem:[%s10960_s13 + $0x68] sm:$0xff] }
0x23ff   : > { %v6327_v30 = vsel %vm11193_vm1, %v6322_v18, 0.0 }
0x2400   : > { %v6302_v58 = vpop.xlane.xlu0 %6301  ;;  %6328 = vadd.xlane.f32.xlu0 %v6327_v30 }
0x2401   : > { %v6313_v49 = vmul.f32 %v6302_v58, %v8542_v13 }
0x2403   : > { %v6318_v24 = vsub.f32 %v6293_v59, %v6313_v49  ;;  %v10843_v59 = vperm.slane %v10802_v28, 2 }
0x2405   : > { %v6323_v52 = vmul.f32 %v6318_v24, %v6318_v24 }
0x2407   : > { %v6330_v14 = vsel %vm11194_vm15, %v6323_v52, 0.0 }
0x2408   : > { %6331 = vadd.xlane.f32.xlu1 %v6330_v14 }
0x2419   : > { %v6305_v5 = vpop.xlane.xlu2 %6304 }
0x241a   : > { %v6314_v46 = vmul.f32 %v6305_v5, %v8542_v13 }
0x241c   : > { %v10818_v17 = vsub.f32 %v6294_v12, %v6314_v46 }
0x241e   : > { %v6324_v23 = vmul.f32 %v10818_v17, %v10818_v17 }
0x2420   : > { %v6333_v22 = vsel %vm11195_vm6, %v6324_v23, 0.0 }
0x2421   : > { %6334 = vadd.xlane.f32.xlu0 %v6333_v22  ;;  %v6308_v45 = vpop.xlane.xlu1 %6307 }
0x2422   : > { %v6315_v44 = vmul.f32 %v6308_v45, %v8542_v13 }
0x2424   : > { %v10825_v43 = vsub.f32 %v6295_v51, %v6315_v44 }
0x2426   : > { %v6325_v20 = vmul.f32 %v10825_v43, %v10825_v43 }
0x2428   : > { %v6336_v36 = vsel %vm11197_vm12, %v6325_v20, 0.0 }
0x2429   : > { %6310 = vadd.xlane.f32.xlu0 %v6309_v1  ;;  %6337 = vadd.xlane.f32.xlu1 %v6336_v36 }
0x2473   : > { %v6329_v21 = vpop.xlane.xlu0 %6328 }
0x2474   : > { %v6342_v34 = vmul.f32 %v6329_v21, %v8542_v13 }
0x2476   : > { %v6347_v35 = vadd.f32 1e-05, %v6342_v34 }
0x2478   : > { %7857 = vrsqrt.f32 %v6347_v35  ;;  %vm6358_vm3 = vweird.f32 %v6347_v35 }
0x247b   : > { %v6332_v50 = vpop.xlane.xlu1 %6331 }
0x247c   : > { %v6343_v53 = vmul.f32 %v6332_v50, %v8542_v13 }
0x247e   : > { %v7858_v42 = vpop.eup %7857  ;;  %v6348_v62 = vadd.f32 1e-05, %v6343_v53 }
0x247f   : > { %v6353_v57 = vmul.f32 %v7858_v42, %v6347_v35  ;;  %vm6359_vm13 = vweird.f32 %v7858_v42 }
0x2480   : > { %7859 = vrsqrt.f32 %v6348_v62  ;;  %vm6360_vm0 = vmor %vm6358_vm3, %vm6359_vm13  ;;  %vm6368_vm2 = vweird.f32 %v6348_v62  ;;  %vm11201_vm3 = vcmask 523264  }
0x2481   : > { %v6354_v8 = vmul.f32 %v7858_v42, %v6353_v57  ;;  %vm11200_vm13 = vmmov %vm11198_vm10 }
0x2483   : > { %v6355_v54 = vmul.f32 0.5, %v6354_v8 }
0x2485   : > { %v6356_v2 = vsub.f32 1.5, %v6355_v54  ;;  %v7474_v54 = vld [vmem:[%s10959_s12 + $0x3] ss:$0 sm:$0xff] }
0x2486   : > { %v7860_v61 = vpop.eup %7859 }
0x2487   : > { %v6357_v63 = vmul.f32 %v7858_v42, %v6356_v2  ;;  %v6363_v6 = vmul.f32 %v7860_v61, %v6348_v62  ;;  %vm6369_vm14 = vweird.f32 %v7860_v61 }
0x2488   : > { %vm6370_vm11 = vmor %vm6368_vm2, %vm6369_vm14 }
0x2489   : > { %v6364_v48 = vmul.f32 %v7860_v61, %v6363_v6  ;;  %v6361_v3 = vsel %vm6360_vm0, %v7858_v42, %v6357_v63  ;;  %v7315_v42 = vld [vmem:[%s10960_s13 + $0x60] sm:$0xff] }
0x248a   : > { %v6402_v0 = vmul.f32 %v6361_v3, %v6317_v25 }
0x248b   : > { %v6365_v41 = vmul.f32 0.5, %v6364_v48 }
0x248c   : > { %v6408_v9 = vmul.f32 %v10840_v56, %v6402_v0 }
0x248d   : > { %v6366_v15 = vsub.f32 1.5, %v6365_v41 }
0x248e   : > { %v6414_v27 = vadd.f32 %v10843_v59, %v6408_v9 }
0x248f   : > { %v6367_v19 = vmul.f32 %v7860_v61, %v6366_v15 }
0x2491   : > { %v6371_v32 = vsel %vm6370_vm11, %v7860_v61, %v6367_v19  ;;  %vm11202_vm11 = vmmov %vm11198_vm10 }
0x2492   : > { %v6403_v47 = vmul.f32 %v6371_v32, %v6318_v24 }
0x2494   : > { %v6409_v10 = vmul.f32 %v10840_v56, %v6403_v47  ;;  %v6335_v12 = vpop.xlane.xlu0 %6334 }
0x2495   : > { %v6344_v29 = vmul.f32 %v6335_v12, %v8542_v13 }
0x2496   : > { %v6415_v39 = vadd.f32 %v10843_v59, %v6409_v10 }
0x2497   : > { %v6349_v51 = vadd.f32 1e-05, %v6344_v29 }
0x2498   : > { %v6419_v4 = vpack.c.bf16 %v6415_v39, %v6414_v27 }
0x2499   : > { %7861 = vrsqrt.f32 %v6349_v51  ;;  %vm6378_vm1 = vweird.f32 %v6349_v51 }
0x249a   : > { %7216 = vmatmul.msk.bf16.vlgmr.msra.gmra.mxu1 %vm11198_vm10, %v6419_v4  ;;  %vm11203_vm10 = vmmov %vm11201_vm3 }
0x249c   : > { %v6311_v26 = vpop.xlane.xlu0 %6310  ;;  %v6338_v37 = vpop.xlane.xlu1 %6337 }
0x249d   : > { %v6316_v33 = vmul.f32 %v6311_v26, %v8542_v13  ;;  %v6345_v25 = vmul.f32 %v6338_v37, %v8542_v13 }
0x249f   : > { %v7862_v18 = vpop.eup %7861  ;;  %v10853_v40 = vsub.f32 %v6296_v60, %v6316_v33  ;;  %v6350_v30 = vadd.f32 1e-05, %v6345_v25 }
0x24a0   : > { %v6373_v58 = vmul.f32 %v7862_v18, %v6349_v51  ;;  %vm6379_vm7 = vweird.f32 %v7862_v18 }
0x24a1   : > { %7863 = vrsqrt.f32 %v6350_v30  ;;  %v6326_v49 = vmul.f32 %v10853_v40, %v10853_v40  ;;  %vm6380_vm15 = vmor %vm6378_vm1, %vm6379_vm7  ;;  %vm6388_vm9 = vweird.f32 %v6350_v30 }
0x24a2   : > { %v6374_v24 = vmul.f32 %v7862_v18, %v6373_v58  ;;  %vm11205_vm7 = vmmov %vm11202_vm11 }
0x24a3   : > { %v6339_v52 = vsel %vm11199_vm8, %v6326_v49, 0.0  ;;  %vm11204_vm8 = vmmov %vm11201_vm3 }
0x24a4   : > { %v6375_v14 = vmul.f32 0.5, %v6374_v24  ;;  %6340 = vadd.xlane.f32.xlu1 %v6339_v52  ;;  %v6493_v52 = vperm.slane %v10802_v28, 3  ;;  %vm11206_vm1 = vmmov %vm11205_vm7 }
0x24a6   : > { %v6376_v5 = vsub.f32 1.5, %v6375_v14 }
0x24a7   : > { %v7864_v46 = vpop.eup %7863 }
0x24a8   : > { %v6377_v23 = vmul.f32 %v7862_v18, %v6376_v5  ;;  %v6383_v11 = vmul.f32 %v7864_v46, %v6350_v30  ;;  %vm6389_vm6 = vweird.f32 %v7864_v46 }
0x24a9   : > { %vm6390_vm12 = vmor %vm6388_vm9, %vm6389_vm6 }
0x24aa   : > { %v6384_v22 = vmul.f32 %v7864_v46, %v6383_v11  ;;  %v6381_v45 = vsel %vm6380_vm15, %v7862_v18, %v6377_v23  ;;  %vm11207_vm15 = vcmask 253952   ;;  %vm11208_vm6 = vmmov %vm11206_vm1 }
0x24ab   : > { %v6404_v20 = vmul.f32 %v6381_v45, %v10818_v17  ;;  %v7318_v17 = vld [vmem:[%s10960_s13 + $0x78] sm:$0xff]  ;;  %vm11209_vm9 = vmmov %vm11206_vm1 }
0x24ac   : > { %v6385_v44 = vmul.f32 0.5, %v6384_v22  ;;  %6531 = vmatpush.bf16.msrb.mxu0 %v7318_v17 }
0x24ad   : > { %v6410_v34 = vmul.f32 %v10840_v56, %v6404_v20 }
0x24ae   : > { %v6386_v60 = vsub.f32 1.5, %v6385_v44 }
0x24af   : > { %v6416_v31 = vadd.f32 %v10843_v59, %v6410_v34 }
0x24b0   : > { %v6387_v1 = vmul.f32 %v7864_v46, %v6386_v60 }
0x24b2   : > { %v6391_v36 = vsel %vm6390_vm12, %v7864_v46, %v6387_v1  ;;  %vm11210_vm12 = vmmov %vm11207_vm15 }
0x24b3   : > { %v6405_v21 = vmul.f32 %v6391_v36, %v10825_v43  ;;  %v7317_v43 = vld [vmem:[%s10960_s13 + $0x70] sm:$0xff] }
0x24b4   : > { %6532 = vmatpush.bf16.msrb.mxu0 %v7317_v43 }
0x24b5   : > { %v6411_v35 = vmul.f32 %v10840_v56, %v6405_v21 }
0x24b7   : > { %v10864_v50 = vadd.f32 %v10843_v59, %v6411_v35 }
0x24b8   : > { %6533 = vmatpush.bf16.msrb.mxu0 %v7316_v7 }
0x24b9   : > { %v6420_v53 = vpack.c.bf16 %v10864_v50, %v6416_v31 }
0x24bb   : > { %7217 = vmatmul.msk.bf16.gmra.mxu1 %vm11200_vm13, %v6420_v53 }
0x24bc   : > { %6534 = vmatpush.bf16.msrb.mxu0 %v7315_v42 }
0x2517   : > { %v6462_v62 = vpop.f32.mrf.mxu1  ;;  %v6341_v57 = vpop.xlane.xlu1 %6340 }
0x2518   : > { %v6346_v8 = vmul.f32 %v6341_v57, %v8542_v13  ;;  %v6463_v61 = vadd.f32 %v7474_v54, %v6462_v62 }
0x251a   : > { %v6351_v2 = vadd.f32 1e-05, %v6346_v8  ;;  %v6476_v3 = vmax.f32 %v6463_v61, 0.0 }
0x251c   : > { %7865 = vrsqrt.f32 %v6351_v2  ;;  %vm6398_vm14 = vweird.f32 %v6351_v2 }
0x251f   : > { %v6464_v63 = vpop.f32.mrf.mxu1 }
0x2520   : > { %v6465_v6 = vadd.f32 %v7474_v54, %v6464_v63 }
0x2522   : > { %v7866_v48 = vpop.eup %7865  ;;  %v6477_v41 = vmax.f32 %v6465_v6, 0.0 }
0x2523   : > { %v6393_v15 = vmul.f32 %v7866_v48, %v6351_v2  ;;  %vm6399_vm0 = vweird.f32 %v7866_v48 }
0x2524   : > { %v6481_v0 = vpack.c.bf16 %v6477_v41, %v6476_v3  ;;  %vm6400_vm2 = vmor %vm6398_vm14, %vm6399_vm0  ;;  %v7320_v3 = vld [vmem:[%s10961_s14 + $0x18] sm:$0xff]  ;;  %v7319_v41 = vld [vmem:[%s10961_s14 + $0x10] sm:$0xff] }
0x2525   : > { %v6394_v19 = vmul.f32 %v7866_v48, %v6393_v15  ;;  %6660 = vmatpush.bf16.msra.mxu3 %v7320_v3 }
0x2526   : > { %7243 = vmatmul.msk.bf16.vlgmr.msrb.gmra.mxu0 %vm11201_vm3, %v6481_v0 }
0x2527   : > { %v6395_v32 = vmul.f32 0.5, %v6394_v19 }
0x2529   : > { %v6396_v9 = vsub.f32 1.5, %v6395_v32  ;;  %6661 = vmatpush.bf16.msra.mxu3 %v7319_v41 }
0x252b   : > { %v6397_v47 = vmul.f32 %v7866_v48, %v6396_v9 }
0x252d   : > { %v6401_v10 = vsel %vm6400_vm2, %v7866_v48, %v6397_v47 }
0x252e   : > { %v6406_v12 = vmul.f32 %v6401_v10, %v10853_v40 }
0x2530   : > { %v6412_v29 = vmul.f32 %v10840_v56, %v6406_v12 }
0x2532   : > { %v6418_v27 = vadd.f32 %v10843_v59, %v6412_v29 }
0x2534   : > { %v6421_v39 = vpack.c.bf16 %v6418_v27, %v6418_v27 }
0x2536   : > { %7218 = vmatmul.msk.bf16.gmra.mxu1 %vm11202_vm11, %v6421_v39 }
0x2538   : > { %v6467_v51 = vpop.f32.mrf.mxu1 }
0x2539   : > { %v6468_v4 = vadd.f32 %v7474_v54, %v6467_v51 }
0x253b   : > { %v6478_v33 = vmax.f32 %v6468_v4, 0.0 }
0x2540   : > { %v6469_v26 = vpop.f32.mrf.mxu1 }
0x2541   : > { %v6470_v37 = vadd.f32 %v7474_v54, %v6469_v26 }
0x2543   : > { %v6479_v25 = vmax.f32 %v6470_v37, 0.0 }
0x2545   : > { %v6482_v18 = vpack.c.bf16 %v6479_v25, %v6478_v33  ;;  %v6617_v33 = vperm.slane %v10802_v28, 4 }
0x2547   : > { %7244 = vmatmul.msk.bf16.gmra.mxu0 %vm11203_vm10, %v6482_v18  ;;  %vm11211_vm10 = vmmov %vm11206_vm1 }
0x25a3   : > { %v6536_v30 = vpop.f32.mrf.mxu0 }
0x25ab   : > { %v6537_v58 = vpop.f32.mrf.mxu0 }
0x25ac   : > { %v6621_v58 = vperm.slane %v10802_v28, 5 }
0x25b3   : > { %v6472_v49 = vpop.f32.mrf.mxu1 }
0x25b4   : > { %v6473_v40 = vadd.f32 %v7474_v54, %v6472_v49 }
0x25b6   : > { %v6480_v24 = vmax.f32 %v6473_v40, 0.0 }
0x25b8   : > { %v6483_v56 = vpack.c.bf16 %v6480_v24, %v6480_v24 }
0x25ba   : > { %7245 = vmatmul.msk.bf16.gmra.mxu0 %vm11204_vm8, %v6483_v56 }
0x25bb   : > { %v6474_v59 = vpop.f32.mrf.mxu1 }
0x25c4   : > { %v6539_v14 = vpop.f32.mrf.mxu0 }
0x25c5   : > { %v6540_v5 = vadd.f32 %v6539_v14, %v6493_v52 }
0x25c7   : > { %v6548_v46 = vadd.f32 %v6540_v5, %v6416_v31 }
0x25c9   : > { %v6551_v23 = vsel %vm11205_vm7, %v6548_v46, 0.0 }
0x25ca   : > { %6552 = vadd.xlane.f32.xlu0 %v6551_v23 }
0x25cc   : > { %v6541_v11 = vpop.f32.mrf.mxu0 }
0x25cd   : > { %v6542_v22 = vadd.f32 %v6541_v11, %v6493_v52 }
0x25cf   : > { %v6549_v45 = vadd.f32 %v6542_v22, %v10864_v50 }
0x25d1   : > { %v6554_v44 = vsel %vm11206_vm1, %v6549_v45, 0.0 }
0x25d2   : > { %6555 = vadd.xlane.f32.xlu1 %v6554_v44 }
0x2637   : > { %v6544_v60 = vpop.f32.mrf.mxu0 }
0x2638   : > { %v6545_v20 = vadd.f32 %v6544_v60, %v6493_v52 }
0x263a   : > { %v6550_v1 = vadd.f32 %v6545_v20, %v6418_v27 }
0x263c   : > { %v6557_v36 = vsel %vm11207_vm15, %v6550_v1, 0.0  ;;  %vm11212_vm15 = vmmov %vm11208_vm6 }
0x263d   : > { %v6553_v21 = vpop.xlane.xlu0 %6552  ;;  %6558 = vadd.xlane.f32.xlu1 %v6557_v36 }
0x263e   : > { %v6560_v34 = vmul.f32 %v6553_v21, %v8542_v13 }
0x263f   : > { %v6546_v35 = vpop.f32.mrf.mxu0 }
0x2640   : > { %v6563_v31 = vsub.f32 %v6548_v46, %v6560_v34 }
0x2642   : > { %v6566_v53 = vmul.f32 %v6563_v31, %v6563_v31 }
0x2644   : > { %v6569_v17 = vsel %vm11208_vm6, %v6566_v53, 0.0 }
0x2645   : > { %6570 = vadd.xlane.f32.xlu0 %v6569_v17  ;;  %v6556_v43 = vpop.xlane.xlu1 %6555  ;;  %v7251_v17 = vld [vmem:[%s10962_s15 + $0x20] sm:$0xff] }
0x2646   : > { %v6561_v50 = vmul.f32 %v6556_v43, %v8542_v13 }
0x2648   : > { %v6564_v7 = vsub.f32 %v6549_v45, %v6561_v50 }
0x264a   : > { %v6567_v42 = vmul.f32 %v6564_v7, %v6564_v7 }
0x264c   : > { %v6572_v62 = vsel %vm11209_vm9, %v6567_v42, 0.0 }
0x264d   : > { %6573 = vadd.xlane.f32.xlu2 %v6572_v62 }
0x26b0   : > { %v6559_v57 = vpop.xlane.xlu1 %6558 }
0x26b1   : > { %v6562_v8 = vmul.f32 %v6559_v57, %v8542_v13 }
0x26b3   : > { %v6565_v54 = vsub.f32 %v6550_v1, %v6562_v8 }
0x26b5   : > { %v6568_v2 = vmul.f32 %v6565_v54, %v6565_v54 }
0x26b7   : > { %v6575_v61 = vsel %vm11210_vm12, %v6568_v2, 0.0 }
0x26b8   : > { %v6571_v63 = vpop.xlane.xlu0 %6570  ;;  %6576 = vadd.xlane.f32.xlu0 %v6575_v61 }
0x26b9   : > { %v6578_v6 = vmul.f32 %v6571_v63, %v8542_v13 }
0x26bb   : > { %v6581_v48 = vadd.f32 1e-05, %v6578_v6 }
0x26bd   : > { %7867 = vrsqrt.f32 %v6581_v48  ;;  %vm6590_vm3 = vweird.f32 %v6581_v48 }
0x26c0   : > { %v6574_v15 = vpop.xlane.xlu2 %6573 }
0x26c1   : > { %v6579_v0 = vmul.f32 %v6574_v15, %v8542_v13 }
0x26c3   : > { %v7868_v19 = vpop.eup %7867  ;;  %v6582_v32 = vadd.f32 1e-05, %v6579_v0 }
0x26c4   : > { %v6585_v9 = vmul.f32 %v7868_v19, %v6581_v48  ;;  %vm6591_vm13 = vweird.f32 %v7868_v19 }
0x26c5   : > { %7869 = vrsqrt.f32 %v6582_v32  ;;  %vm6592_vm0 = vmor %vm6590_vm3, %vm6591_vm13  ;;  %vm6600_vm2 = vweird.f32 %v6582_v32  ;;  %vm6738_vm13 = vcmask 516096  }
0x26c6   : > { %v6586_v47 = vmul.f32 %v7868_v19, %v6585_v9 }
0x26c8   : > { %v6587_v10 = vmul.f32 0.5, %v6586_v47 }
0x26ca   : > { %v6588_v12 = vsub.f32 1.5, %v6587_v10 }
0x26cb   : > { %v7870_v29 = vpop.eup %7869 }
0x26cc   : > { %v6589_v27 = vmul.f32 %v7868_v19, %v6588_v12  ;;  %v6595_v39 = vmul.f32 %v7870_v29, %v6582_v32  ;;  %vm6601_vm14 = vweird.f32 %v7870_v29 }
0x26cd   : > { %vm6602_vm11 = vmor %vm6600_vm2, %vm6601_vm14  ;;  %vm11218_vm2 = vcmask 523264  }
0x26ce   : > { %v6596_v51 = vmul.f32 %v7870_v29, %v6595_v39  ;;  %v6593_v4 = vsel %vm6592_vm0, %v7868_v19, %v6589_v27 }
0x26cf   : > { %v6614_v25 = vmul.f32 %v6593_v4, %v6563_v31 }
0x26d0   : > { %v6597_v26 = vmul.f32 0.5, %v6596_v51 }
0x26d1   : > { %v6618_v49 = vmul.f32 %v6617_v33, %v6614_v25 }
0x26d2   : > { %v6598_v37 = vsub.f32 1.5, %v6597_v26 }
0x26d3   : > { %v6622_v56 = vadd.f32 %v6621_v58, %v6618_v49 }
0x26d4   : > { %v6599_v18 = vmul.f32 %v7870_v29, %v6598_v37 }
0x26d6   : > { %v6603_v30 = vsel %vm6602_vm11, %v7870_v29, %v6599_v18 }
0x26d7   : > { %v6615_v40 = vmul.f32 %v6603_v30, %v6564_v7 }
0x26d9   : > { %v6619_v24 = vmul.f32 %v6617_v33, %v6615_v40 }
0x26db   : > { %v6623_v59 = vadd.f32 %v6621_v58, %v6619_v24 }
0x26dd   : > { %v6625_v52 = vpack.c.bf16 %v6623_v59, %v6622_v56 }
0x26df   : > { %7261 = vmatmul.msk.bf16.vlgmr.msra.gmra.mxu3 %vm11211_vm10, %v6625_v52 }
0x272b   : > { %v6577_v14 = vpop.xlane.xlu0 %6576 }
0x272c   : > { %v6580_v5 = vmul.f32 %v6577_v14, %v8542_v13  ;;  %v7250_v13 = vld [vmem:[%s10962_s15 + $0x18] sm:$0xff] }
0x272e   : > { %v6583_v46 = vadd.f32 1e-05, %v6580_v5 }
0x2730   : > { %7871 = vrsqrt.f32 %v6583_v46  ;;  %vm6610_vm7 = vweird.f32 %v6583_v46 }
0x2736   : > { %v7872_v23 = vpop.eup %7871 }
0x2737   : > { %v6605_v11 = vmul.f32 %v7872_v23, %v6583_v46  ;;  %vm6611_vm8 = vweird.f32 %v7872_v23 }
0x2738   : > { %vm6612_vm1 = vmor %vm6610_vm7, %vm6611_vm8 }
0x2739   : > { %v6606_v22 = vmul.f32 %v7872_v23, %v6605_v11 }
0x273b   : > { %v6607_v45 = vmul.f32 0.5, %v6606_v22 }
0x273d   : > { %v6608_v44 = vsub.f32 1.5, %v6607_v45 }
0x273f   : > { %v6609_v28 = vmul.f32 %v7872_v23, %v6608_v44 }
0x2741   : > { %v6613_v60 = vsel %vm6612_vm1, %v7872_v23, %v6609_v28 }
0x2742   : > { %v6616_v20 = vmul.f32 %v6613_v60, %v6565_v54 }
0x2744   : > { %v6620_v1 = vmul.f32 %v6617_v33, %v6616_v20 }
0x2746   : > { %v6624_v36 = vadd.f32 %v6621_v58, %v6620_v1 }
0x2748   : > { %v6626_v21 = vpack.c.bf16 %v6624_v36, %v6624_v36 }
0x274a   : > { %7262 = vmatmul.msk.bf16.gmra.mxu3 %vm11212_vm15, %v6626_v21 }
0x2762   : > { %v6663_v34 = vpop.f32.mrf.mxu3 }
0x2763   : > { %v6664_v35 = vadd.f32 %v7250_v13, %v6663_v34 }
0x2765   : > { %v6672_v31 = vadd.f32 %v6664_v35, %v9481_v16  ;;  %v7252_v16 = vld [vmem:[%s10962_s15 + $0x28] sm:$0x1] }
0x2767   : > { %v6683_v53 = vmul.f32 %v6672_v31, %v6672_v31 }
0x2769   : > { %6685 = vrot.lane.b32.xlu0 %v6683_v53, %s11087_s16 }
0x276a   : > { %v6665_v43 = vpop.f32.mrf.mxu3 }
0x276b   : > { %v6666_v50 = vadd.f32 %v7251_v17, %v6665_v43 }
0x276d   : > { %6674 = vrot.lane.b32.xlu2 %v6666_v50, %s11088_s21  ;;  %s11213_s21 = sld [smem:[#allocation3_spill]] }
0x27c7   : > { %v6675_v7 = vpop.permute.xlu2 %6674 }
0x27c8   : > { %v6677_v42 = vadd.f32 %v6675_v7, %v9471_v38 }
0x27ca   : > { %v6700_v62 = vmul.f32 %v6677_v42, %v6677_v42 }
0x27cc   : > { %6702 = vrot.lane.b32.xlu1 %v6700_v62, %s11087_s16 }
0x27cd   : > { %v6668_v57 = vpop.f32.mrf.mxu3 }
0x27ce   : > { %v6669_v8 = vadd.f32 %v7252_v16, %v6668_v57 }
0x27d4   : > { %6679 = vrot.lane.b32.xlu1 %v6669_v8, %s11026_s26  ;;  %s11214_s26 = sshll.u32 %s11213_s21, 4 }
0x27d5   : > { %v6670_v54 = vpop.f32.mrf.mxu3  ;;  %s521_s2 = scalar_lea.vmem %s11215_s30, %s11214_s26 }
0x27db   : > { %v6686_v2 = vpop.permute.xlu0 %6685 }
0x27dc   : > { %v6688_v61 = vadd.f32 %v6686_v2, %v6683_v53 }
0x27de   : > { %v6689_v63 = vadd.f32 1e-08, %v6688_v61 }
0x27e0   : > { %7873 = vrsqrt.f32 %v6689_v63  ;;  %vm6696_vm9 = vweird.f32 %v6689_v63 }
0x27e6   : > { %v7874_v6 = vpop.eup %7873 }
0x27e7   : > { %v6691_v48 = vmul.f32 %v7874_v6, %v6689_v63  ;;  %vm6697_vm6 = vweird.f32 %v7874_v6 }
0x27e8   : > { %vm6698_vm12 = vmor %vm6696_vm9, %vm6697_vm6 }
0x27e9   : > { %v6692_v38 = vmul.f32 %v7874_v6, %v6691_v48 }
0x27eb   : > { %v6693_v3 = vmul.f32 0.5, %v6692_v38 }
0x27ed   : > { %v6694_v41 = vsub.f32 1.5, %v6693_v3 }
0x27ef   : > { %v6695_v15 = vmul.f32 %v7874_v6, %v6694_v41 }
0x27f1   : > { %v6699_v0 = vsel %vm6698_vm12, %v7874_v6, %v6695_v15 }
0x27f2   : > { %6719 = vrot.lane.b32.xlu0 %v6699_v0, %s11053_s25  ;;  %v6717_v49 = vmul.f32 %v6699_v0, %v6672_v31 }
0x283e   : > { %v6703_v19 = vpop.permute.xlu1 %6702 }
0x283f   : > { %v6705_v32 = vadd.f32 %v6703_v19, %v6700_v62 }
0x2841   : > { %v6706_v9 = vadd.f32 1e-08, %v6705_v32 }
0x2843   : > { %7875 = vrsqrt.f32 %v6706_v9  ;;  %vm6713_vm0 = vweird.f32 %v6706_v9 }
0x2846   : > { %v6680_v47 = vpop.permute.xlu1 %6679 }
0x2847   : > { %v6682_v10 = vadd.f32 %v6680_v47, %v9456_v55 }
0x2849   : > { %v7876_v12 = vpop.eup %7875  ;;  %v6731_v29 = vsel %vm722_vm5, %v6682_v10, 0.0  ;;  %vm11217_vm5 = vmmov %vm11211_vm10 }
0x284a   : > { %v6708_v27 = vmul.f32 %v7876_v12, %v6706_v9  ;;  %6739 = vst.msk [vmem:[%s521_s2 + $0x8] sm:$0x1] %vm6738_vm13, %v6731_v29  ;;  %vm6714_vm3 = vweird.f32 %v7876_v12 }
0x284b   : > { %vm6715_vm14 = vmor %vm6713_vm0, %vm6714_vm3 }
0x284c   : > { %v6709_v39 = vmul.f32 %v7876_v12, %v6708_v27 }
0x284e   : > { %v6710_v51 = vmul.f32 0.5, %v6709_v39 }
0x2850   : > { %v6711_v4 = vsub.f32 1.5, %v6710_v51 }
0x2852   : > { %v6712_v26 = vmul.f32 %v7876_v12, %v6711_v4 }
0x2854   : > { %v6716_v37 = vsel %vm6715_vm14, %v7876_v12, %v6712_v26 }
0x2855   : > { %6726 = vrot.lane.b32.xlu2 %v6716_v37, %s11053_s25  ;;  %v6724_v25 = vmul.f32 %v6716_v37, %v6677_v42 }
0x2864   : > { %v6720_v30 = vpop.permute.xlu0 %6719 }
0x2865   : > { %v6722_v58 = vmul.f32 %v6720_v30, %v6672_v31 }
0x2867   : > { %v6723_v40 = vsel %vm1677_vm4, %v6717_v49, %v6722_v58 }
0x28af   : > { %v6727_v33 = vpop.permute.xlu2 %6726 }
0x28b0   : > { %v6729_v18 = vmul.f32 %v6727_v33, %v6677_v42 }
0x28b2   : > { %v6730_v55 = vsel %vm1677_vm4, %v6724_v25, %v6729_v18 }
0x28b3   : > { %6733 = vrot.lane.b32.xlu2 %v6730_v55, %s11216_s3 }
0x290d   : > { %v6734_v24 = vpop.permute.xlu2 %6733 }
0x290e   : > { %v6736_v56 = vsel %vm11217_vm5, %v6723_v40, %v6734_v24 }
0x290f   : > { %6737 = vst.msk [vmem:[%s521_s2] sm:$0xff] %vm11218_vm2, %v6736_v56 }
0x2910 PF: > { %s11219_s20 = sld [smem:[#allocation2_spill]] }
0x2916   : > { %s26_s21 = sadd.s32 1, %s11219_s20  }
0x2917   : > { %p23_p4 = scmp.ge.s32.totalorder %s26_s21, 4  }
0x2919   :  { %25 = sbr.rel (!%p23_p4) target bundleno = 9 (0x9), region = 139 }

</bundles_post_ra>
